<compile_context>
chip_gen: v7x
topology: tpu7x:2x2x1
jax: 0.10.0
libtpu: 0.0.40
codegen_flags: <defaults>
</compile_context>

<pallas_src>
import functools

import jax
import jax.numpy as jnp
from jax.experimental import pallas as pl
from jax.experimental.pallas import tpu as pltpu


# ----------------------------------------------------------------------------
# Kernel 1: Y = leaky_relu_{0.2}( X @ W + b )  with K-tiled accumulation.
#   grid = (M tiles [parallel], K tiles [arbitrary])
#   X tile (tm, tk) bf16, W tile (tk, N) bf16, bias (1, N) f32, acc (tm, N) f32 scratch.
# ----------------------------------------------------------------------------
def _linear_kernel(x_ref, w_ref, b_ref, o_ref, acc_ref, *, act: bool):
    k = pl.program_id(1)

    @pl.when(k == 0)
    def _():
        acc_ref[...] = jnp.zeros_like(acc_ref)

    acc_ref[...] += jnp.dot(x_ref[...], w_ref[...],
                            preferred_element_type=jnp.float32)

    @pl.when(k == pl.num_programs(1) - 1)
    def _():
        y = acc_ref[...] + b_ref[...]
        if act:
            y = jnp.maximum(y, 0.2 * y)          # LeakyReLU(0.2)
        o_ref[...] = y.astype(o_ref.dtype)


def pallas_linear(x, w, b, *, act: bool = True, out_dtype=jnp.float32,
                  max_tm: int = 512, max_tk: int = 2048):
    """x: (M, K), w: (K, N), b: (N,)  ->  (M, N) in `out_dtype` (MXU runs in bf16)."""
    M, K = x.shape
    N = w.shape[1]

    xb = x.astype(jnp.bfloat16)
    wb = w.astype(jnp.bfloat16)
    b2 = b.reshape(1, N).astype(jnp.float32)

    # Row tiling: take the whole M when it fits, otherwise 512-row tiles (multiple of 8);
    # a ragged last tile is handled by Pallas edge masking (no jnp.pad of X).
    if M <= max_tm:
        tm = M
    else:
        tm = max_tm
    grid_m = pl.cdiv(M, tm)

    # K tiling: only needed for very large contractions (e.g. the real FC layer at big
    # img_size); pad K with zeros so every K block is exact.
    if K <= max_tk:
        tk = K
    else:
        tk = max_tk                                   # multiple of 128
        rem = K % tk
        if rem:
            pad = tk - rem
            xb = jnp.pad(xb, ((0, 0), (0, pad)))
            wb = jnp.pad(wb, ((0, pad), (0, 0)))
    nk = xb.shape[1] // tk

    return pl.pallas_call(
        functools.partial(_linear_kernel, act=act),
        out_shape=jax.ShapeDtypeStruct((M, N), out_dtype),
        grid_spec=pltpu.PrefetchScalarGridSpec(
            num_scalar_prefetch=0,
            grid=(grid_m, nk),
            in_specs=[
                pl.BlockSpec((tm, tk), lambda i, k: (i, k)),
                pl.BlockSpec((tk, N), lambda i, k: (k, 0)),
                pl.BlockSpec((1, N), lambda i, k: (0, 0)),
            ],
            out_specs=pl.BlockSpec((tm, N), lambda i, k: (i, 0)),
            scratch_shapes=[pltpu.VMEM((tm, N), jnp.float32)],
        ),
        compiler_params=pltpu.CompilerParams(
            dimension_semantics=("parallel", "arbitrary"),
            vmem_limit_bytes=32 * 1024 * 1024,
        ),
    )(xb, wb, b2)


# ----------------------------------------------------------------------------
# Kernel 2: fused MLP chain  y = L_n(...L_2(L_1(x)))  with all weights VMEM-resident.
# Used for the feature encoder (2 layers) and fusion+decoder (4 layers) so the
# lane-sparse hidden/N=1 intermediates never touch HBM.
# ----------------------------------------------------------------------------
def _fused_mlp_kernel(*refs, acts):
    x_ref, o_ref = refs[0], refs[-1]
    wb = refs[1:-1]
    n_layers = len(acts)
    y = x_ref[...]                                     # bf16
    for li in range(n_layers):
        w_ref = wb[2 * li]
        b_ref = wb[2 * li + 1]
        y = jnp.dot(y, w_ref[...], preferred_element_type=jnp.float32) + b_ref[...]
        if acts[li]:
            y = jnp.maximum(y, 0.2 * y)                # LeakyReLU(0.2)
        if li + 1 < n_layers:
            y = y.astype(jnp.bfloat16)
    o_ref[...] = y.astype(o_ref.dtype)


def pallas_fused_mlp(x, layers, acts, *, out_dtype=jnp.float32, max_tm: int = 512):
    """x: (M, K0); layers: list of (w (Ki, Ni), b (Ni,)); acts: per-layer bool."""
    M, K0 = x.shape
    xb = x.astype(jnp.bfloat16)

    tm = M if M <= max_tm else max_tm
    grid_m = pl.cdiv(M, tm)

    in_specs = [pl.BlockSpec((tm, K0), lambda i: (i, 0))]
    args = [xb]
    for (w, b) in layers:
        Ki, Ni = w.shape
        in_specs.append(pl.BlockSpec((Ki, Ni), lambda i: (0, 0)))
        in_specs.append(pl.BlockSpec((1, Ni), lambda i: (0, 0)))
        args.append(w.astype(jnp.bfloat16))
        args.append(b.reshape(1, Ni).astype(jnp.float32))
    n_last = layers[-1][0].shape[1]

    return pl.pallas_call(
        functools.partial(_fused_mlp_kernel, acts=tuple(acts)),
        out_shape=jax.ShapeDtypeStruct((M, n_last), out_dtype),
        grid_spec=pltpu.PrefetchScalarGridSpec(
            num_scalar_prefetch=0,
            grid=(grid_m,),
            in_specs=in_specs,
            out_specs=pl.BlockSpec((tm, n_last), lambda i: (i, 0)),
        ),
        compiler_params=pltpu.CompilerParams(
            dimension_semantics=("parallel",),
            vmem_limit_bytes=32 * 1024 * 1024,
        ),
    )(*args)


# ----------------------------------------------------------------------------
# NHWC im2col for Conv2d(k=3, stride=2, pad=1).  Patch columns ordered (KH, KW, C)
# to match the weight reshape transpose(w, (2,3,1,0)).reshape(9*C, O).
# ----------------------------------------------------------------------------
def im2col_nhwc_3x3_s2_p1(x):
    B, H, W, C = x.shape
    k, s, p = 3, 2, 1
    oh = (H + 2 * p - k) // s + 1
    ow = (W + 2 * p - k) // s + 1
    xp = jnp.pad(x, ((0, 0), (p, p), (p, p), (0, 0)))
    cols = []
    for kh in range(k):
        for kw in range(k):
            cols.append(xp[:, kh:kh + s * oh:s, kw:kw + s * ow:s, :])   # (B, oh, ow, C)
    patches = jnp.concatenate(cols, axis=-1)                            # (B, oh, ow, 9*C)
    return patches.reshape(B * oh * ow, k * k * C), oh, ow


def conv3x3_s2_lrelu_nhwc(x, w, b):
    """x: (B, H, W, C) bf16 NHWC; w: (O, C, 3, 3) PyTorch layout; b: (O,)."""
    B = x.shape[0]
    O = w.shape[0]
    patches, oh, ow = im2col_nhwc_3x3_s2_p1(x)
    wm = jnp.transpose(w, (2, 3, 1, 0)).reshape(-1, O)   # (9*C, O), rows in (kh, kw, c)
    y = pallas_linear(patches, wm, b, act=True, out_dtype=jnp.bfloat16)
    return y.reshape(B, oh, ow, O)                       # stay NHWC


# ----------------------------------------------------------------------------
# Parameter construction (deterministic, synthetic — PyTorch layouts).
# ----------------------------------------------------------------------------
def init_params(key, feature_dim, img_size, hidden_dim):
    ks = iter(jax.random.split(key, 64))

    def lin(in_d, out_d):
        return (0.08 * jax.random.normal(next(ks), (out_d, in_d), jnp.float32),
                0.02 * jax.random.normal(next(ks), (out_d,), jnp.float32))

    def conv(in_c, out_c):
        return (0.08 * jax.random.normal(next(ks), (out_c, in_c, 3, 3), jnp.float32),
                0.02 * jax.random.normal(next(ks), (out_c,), jnp.float32))

    def img_enc(in_c):
        chans = [in_c, 16, 32, 64, 128, 256]
        convs = [conv(chans[i], chans[i + 1]) for i in range(5)]
        fc = lin(256 * (img_size // 32) * (img_size // 32), hidden_dim)
        return {"convs": convs, "fc": fc}

    return {
        "feat1": lin(feature_dim, hidden_dim),
        "feat2": lin(hidden_dim, hidden_dim),
        "arrow": img_enc(3),
        "depth": img_enc(1),
        "normal": img_enc(3),
        "fus1": lin(hidden_dim * 4, hidden_dim * 2),
        "fus2": lin(hidden_dim * 2, hidden_dim),
        "dec1": lin(hidden_dim, hidden_dim),
        "dec2": lin(hidden_dim, 1),
    }


# ----------------------------------------------------------------------------
# Pallas forward (mirrors MultiImageFieldMLP.forward)
# ----------------------------------------------------------------------------
def img_encoder_forward(x_nchw, enc):
    x = jnp.transpose(x_nchw, (0, 2, 3, 1)).astype(jnp.bfloat16)   # NCHW -> NHWC once
    for (w, b) in enc["convs"]:
        x = conv3x3_s2_lrelu_nhwc(x, w, b)
    B, H, W, C = x.shape
    flat = x.reshape(B, H * W * C)                                  # NHWC flatten (h, w, c)
    fw, fb = enc["fc"]                                              # columns in (c, h, w)
    fwp = fw.reshape(-1, C, H, W).transpose(0, 2, 3, 1).reshape(fw.shape[0], -1)
    return pallas_linear(flat, fwp.T, fb, act=True, out_dtype=jnp.float32)


def multi_image_field_mlp_forward(params, feats, arrow, depth, normal):
    b, n, fd = feats.shape

    # feature encoder: Linear->LReLU->Linear->LReLU fused in one kernel
    w1, b1 = params["feat1"]
    w2, b2 = params["feat2"]
    feat_e = pallas_fused_mlp(feats.reshape(b * n, fd),
                              [(w1.T, b1), (w2.T, b2)],
                              acts=(True, True)).reshape(b, n, -1)

    # image encoders
    arr_e = img_encoder_forward(arrow, params["arrow"])
    dep_e = img_encoder_forward(depth, params["depth"])
    nor_e = img_encoder_forward(normal, params["normal"])

    arr_e = jnp.broadcast_to(arr_e[:, None, :], feat_e.shape)
    dep_e = jnp.broadcast_to(dep_e[:, None, :], feat_e.shape)
    nor_e = jnp.broadcast_to(nor_e[:, None, :], feat_e.shape)
    fused_in = jnp.concatenate([feat_e, arr_e, dep_e, nor_e], axis=-1)
    fused_in = fused_in.reshape(b * n, -1)

    # fusion (2 layers) + decoder (2 layers) fused in one kernel (final layer no act)
    fw1, fb1 = params["fus1"]
    fw2, fb2 = params["fus2"]
    dw1, db1 = params["dec1"]
    dw2, db2 = params["dec2"]
    y = pallas_fused_mlp(fused_in,
                         [(fw1.T, fb1), (fw2.T, fb2), (dw1.T, db1), (dw2.T, db2)],
                         acts=(True, True, True, False))
    return y.reshape(b, n)                                          # squeeze(-1)


# ----------------------------------------------------------------------------
# Pure-JAX reference with PyTorch semantics (NCHW conv via lax.conv_general_dilated,
# NCHW Flatten order, same bf16 matmul precision) — validates im2col, the NHWC layout
# switch and the FC-weight permutation against a trusted conv implementation.
# ----------------------------------------------------------------------------
def _ref_linear(x, w, b, act=True):
    y = jnp.dot(x.astype(jnp.bfloat16), w.astype(jnp.bfloat16),
                preferred_element_type=jnp.float32) + b.reshape(1, -1).astype(jnp.float32)
    if act:
        y = jnp.maximum(y, 0.2 * y)
    return y


def _ref_conv_lrelu(x, w, b):
    y = jax.lax.conv_general_dilated(
        x.astype(jnp.bfloat16), w.astype(jnp.bfloat16),
        window_strides=(2, 2), padding=((1, 1), (1, 1)),
        dimension_numbers=("NCHW", "OIHW", "NCHW"),
        preferred_element_type=jnp.float32)
    y = y + b.reshape(1, -1, 1, 1).astype(jnp.float32)
    return jnp.maximum(y, 0.2 * y)


def ref_img_encoder(x, enc):
    for (w, b) in enc["convs"]:
        x = _ref_conv_lrelu(x, w, b)
    B, C, H, W = x.shape
    flat = x.reshape(B, C * H * W)                # PyTorch Flatten: (C, H, W)
    fw, fb = enc["fc"]
    return _ref_linear(flat, fw.T, fb, act=True)


def ref_forward(params, feats, arrow, depth, normal):
    b, n, fd = feats.shape
    w1, b1 = params["feat1"]
    w2, b2 = params["feat2"]
    x = _ref_linear(feats.reshape(b * n, fd), w1.T, b1)
    feat_e = _ref_linear(x, w2.T, b2).reshape(b, n, -1)

    arr_e = ref_img_encoder(arrow, params["arrow"])
    dep_e = ref_img_encoder(depth, params["depth"])
    nor_e = ref_img_encoder(normal, params["normal"])

    arr_e = jnp.broadcast_to(arr_e[:, None, :], feat_e.shape)
    dep_e = jnp.broadcast_to(dep_e[:, None, :], feat_e.shape)
    nor_e = jnp.broadcast_to(nor_e[:, None, :], feat_e.shape)
    fused_in = jnp.concatenate([feat_e, arr_e, dep_e, nor_e], axis=-1).reshape(b * n, -1)

    fw1, fb1 = params["fus1"]
    fw2, fb2 = params["fus2"]
    dw1, db1 = params["dec1"]
    dw2, db2 = params["dec2"]
    y = _ref_linear(fused_in, fw1.T, fb1)
    y = _ref_linear(y, fw2.T, fb2)
    y = _ref_linear(y, dw1.T, db1)
    y = _ref_linear(y, dw2.T, db2, act=False)
    return y.reshape(b, n)


if __name__ == "__main__":
    # Small shapes consistent with the module (img_size must be a multiple of 32;
    # 64 exercises the multi-tile M grid and the non-trivial FC-weight permutation).
    B, N_PTS, FEATURE_DIM, IMG_SIZE, HIDDEN = 2, 8, 16, 64, 32

    key = jax.random.PRNGKey(0)
    kp, kf, ka, kd, kn = jax.random.split(key, 5)

    params = init_params(kp, FEATURE_DIM, IMG_SIZE, HIDDEN)
    feats = jax.random.normal(kf, (B, N_PTS, FEATURE_DIM), jnp.float32)
    arrow = jax.random.normal(ka, (B, 3, IMG_SIZE, IMG_SIZE), jnp.float32)
    depth = jax.random.normal(kd, (B, 1, IMG_SIZE, IMG_SIZE), jnp.float32)
    normal = jax.random.normal(kn, (B, 3, IMG_SIZE, IMG_SIZE), jnp.float32)

    out = jax.block_until_ready(
        jax.jit(multi_image_field_mlp_forward)(params, feats, arrow, depth, normal))
    ref = jax.block_until_ready(
        jax.jit(ref_forward)(params, feats, arrow, depth, normal))

    assert out.shape == (B, N_PTS)
    assert jnp.allclose(out, ref, atol=2e-2, rtol=2e-2), \
        f"max abs diff {float(jnp.max(jnp.abs(out - ref)))}"

    print("KERNEL_OK")
</pallas_src>

<mosaic_0001>
module attributes {stable_mosaic.version = 11 : i64} {
  func.func @_linear_kernel(%arg0: i32, %arg1: i32, %arg2: memref<512x27xbf16, #tpu.memory_space<vmem>>, %arg3: memref<27x16xbf16, #tpu.memory_space<vmem>>, %arg4: memref<1x16xf32, #tpu.memory_space<vmem>>, %arg5: memref<512x16xbf16, #tpu.memory_space<vmem>>, %arg6: memref<512x16xf32, #tpu.memory_space<vmem>>) attributes {dimension_semantics = [#tpu.dimension_semantics<parallel>, #tpu.dimension_semantics<arbitrary>], iteration_bounds = array<i64: 4, 1>, scalar_prefetch = 0 : i64, scratch_operands = 1 : i64, tpu.core_type = #tpu.core_type<tc>, window_params = [{transform_indices = @transform_0, window_bounds = array<i64: 512, 27>}, {transform_indices = @transform_1, window_bounds = array<i64: 27, 16>}, {pipeline_mode = #tpu.pipeline_mode<synchronous>, transform_indices = @transform_2, window_bounds = array<i64: 1, 16>}, {transform_indices = @transform_3, window_bounds = array<i64: 512, 16>}]} {
    %c0_i32 = arith.constant 0 : i32
    %0 = arith.cmpi eq, %arg1, %c0_i32 : i32
    %1 = arith.extui %0 : i1 to i32
    %c0_i32_0 = arith.constant 0 : i32
    %2 = arith.cmpi ne, %1, %c0_i32_0 : i32
    scf.if %2 {
      %cst_10 = arith.constant 0.000000e+00 : f32
      %12 = vector.broadcast %cst_10 : f32 to vector<512x16xf32>
      %c0_11 = arith.constant 0 : index
      %c0_12 = arith.constant 0 : index
      %13 = vector.load %arg6[%c0_11, %c0_12] : memref<512x16xf32, #tpu.memory_space<vmem>>, vector<512x16xf32>
      tpu.vector_store %arg6[%c0_11, %c0_12], %12 {strides = array<i32>} : memref<512x16xf32, #tpu.memory_space<vmem>>, vector<512x16xf32>,
    } else {
    }
    %c0 = arith.constant 0 : index
    %c0_1 = arith.constant 0 : index
    %3 = vector.load %arg6[%c0, %c0_1] : memref<512x16xf32, #tpu.memory_space<vmem>>, vector<512x16xf32>
    %c0_2 = arith.constant 0 : index
    %c0_3 = arith.constant 0 : index
    %4 = vector.load %arg2[%c0_2, %c0_3] : memref<512x27xbf16, #tpu.memory_space<vmem>>, vector<512x27xbf16>
    %c0_4 = arith.constant 0 : index
    %c0_5 = arith.constant 0 : index
    %5 = vector.load %arg3[%c0_4, %c0_5] : memref<27x16xbf16, #tpu.memory_space<vmem>>, vector<27x16xbf16>
    %cst = arith.constant dense<0.000000e+00> : vector<512x16xf32>
    %6 = tpu.matmul %4, %5, %cst {dimension_numbers = #tpu.dot_dimension_numbers<[1], [0], [0], [1], [0, 0, 1, 1], [], []>} : vector<512x27xbf16>, vector<27x16xbf16>, vector<512x16xf32> -> vector<512x16xf32>
    %7 = arith.addf %3, %6 : vector<512x16xf32>
    %c0_6 = arith.constant 0 : index
    %c0_7 = arith.constant 0 : index
    %8 = vector.load %arg6[%c0_6, %c0_7] : memref<512x16xf32, #tpu.memory_space<vmem>>, vector<512x16xf32>
    tpu.vector_store %arg6[%c0_6, %c0_7], %7 {strides = array<i32>} : memref<512x16xf32, #tpu.memory_space<vmem>>, vector<512x16xf32>,
    %c0_i32_8 = arith.constant 0 : i32
    %9 = arith.cmpi eq, %arg1, %c0_i32_8 : i32
    %10 = arith.extui %9 : i1 to i32
    %c0_i32_9 = arith.constant 0 : i32
    %11 = arith.cmpi ne, %10, %c0_i32_9 : i32
    scf.if %11 {
      %c0_10 = arith.constant 0 : index
      %c0_11 = arith.constant 0 : index
      %12 = vector.load %arg6[%c0_10, %c0_11] : memref<512x16xf32, #tpu.memory_space<vmem>>, vector<512x16xf32>
      %c0_12 = arith.constant 0 : index
      %c0_13 = arith.constant 0 : index
      %13 = vector.load %arg4[%c0_12, %c0_13] : memref<1x16xf32, #tpu.memory_space<vmem>>, vector<1x16xf32>
      %14 = vector.broadcast %13 : vector<1x16xf32> to vector<512x16xf32>
      %15 = arith.addf %12, %14 : vector<512x16xf32>
      %cst_14 = arith.constant 2.000000e-01 : f32
      %16 = vector.broadcast %cst_14 : f32 to vector<512x16xf32>
      %17 = arith.mulf %16, %15 : vector<512x16xf32>
      %18 = arith.maximumf %15, %17 : vector<512x16xf32>
      %19 = arith.truncf %18 : vector<512x16xf32> to vector<512x16xbf16>
      %c0_15 = arith.constant 0 : index
      %c0_16 = arith.constant 0 : index
      %20 = vector.load %arg5[%c0_15, %c0_16] : memref<512x16xbf16, #tpu.memory_space<vmem>>, vector<512x16xbf16>
      tpu.vector_store %arg5[%c0_15, %c0_16], %19 {strides = array<i32>} : memref<512x16xbf16, #tpu.memory_space<vmem>>, vector<512x16xbf16>,
    } else {
    }
    return
  }
  func.func @transform_0(%arg0: i32, %arg1: i32) -> (i32, i32) {
    %c0_i32 = arith.constant 0 : i32
    return %arg0, %arg1 : i32, i32
  }
  func.func @transform_1(%arg0: i32, %arg1: i32) -> (i32, i32) {
    %c0_i32 = arith.constant 0 : i32
    %c0_i32_0 = arith.constant 0 : i32
    return %arg1, %c0_i32 : i32, i32
  }
  func.func @transform_2(%arg0: i32, %arg1: i32) -> (i32, i32) {
    %c0_i32 = arith.constant 0 : i32
    %c0_i32_0 = arith.constant 0 : i32
    %c0_i32_1 = arith.constant 0 : i32
    return %c0_i32, %c0_i32_0 : i32, i32
  }
  func.func @transform_3(%arg0: i32, %arg1: i32) -> (i32, i32) {
    %c0_i32 = arith.constant 0 : i32
    %c0_i32_0 = arith.constant 0 : i32
    return %arg0, %c0_i32 : i32, i32
  }
}

module attributes {stable_mosaic.version = 11 : i64} {
  func.func @_linear_kernel(%arg0: i32, %arg1: i32, %arg2: memref<512x144xbf16, #tpu.memory_space<vmem>>, %arg3: memref<144x32xbf16, #tpu.memory_space<vmem>>, %arg4: memref<1x32xf32, #tpu.memory_space<vmem>>, %arg5: memref<512x32xbf16, #tpu.memory_space<vmem>>, %arg6: memref<512x32xf32, #tpu.memory_space<vmem>>) attributes {dimension_semantics = [#tpu.dimension_semantics<parallel>, #tpu.dimension_semantics<arbitrary>], iteration_bounds = array<i64: 1, 1>, scalar_prefetch = 0 : i64, scratch_operands = 1 : i64, tpu.core_type = #tpu.core_type<tc>, window_params = [{transform_indices = @transform_0, window_bounds = array<i64: 512, 144>}, {transform_indices = @transform_1, window_bounds = array<i64: 144, 32>}, {pipeline_mode = #tpu.pipeline_mode<synchronous>, transform_indices = @transform_2, window_bounds = array<i64: 1, 32>}, {transform_indices = @transform_3, window_bounds = array<i64: 512, 32>}]} {
    %c0_i32 = arith.constant 0 : i32
    %0 = arith.cmpi eq, %arg1, %c0_i32 : i32
    %1 = arith.extui %0 : i1 to i32
    %c0_i32_0 = arith.constant 0 : i32
    %2 = arith.cmpi ne, %1, %c0_i32_0 : i32
    scf.if %2 {
      %cst_10 = arith.constant 0.000000e+00 : f32
      %12 = vector.broadcast %cst_10 : f32 to vector<512x32xf32>
      %c0_11 = arith.constant 0 : index
      %c0_12 = arith.constant 0 : index
      %13 = vector.load %arg6[%c0_11, %c0_12] : memref<512x32xf32, #tpu.memory_space<vmem>>, vector<512x32xf32>
      tpu.vector_store %arg6[%c0_11, %c0_12], %12 {strides = array<i32>} : memref<512x32xf32, #tpu.memory_space<vmem>>, vector<512x32xf32>,
    } else {
    }
    %c0 = arith.constant 0 : index
    %c0_1 = arith.constant 0 : index
    %3 = vector.load %arg6[%c0, %c0_1] : memref<512x32xf32, #tpu.memory_space<vmem>>, vector<512x32xf32>
    %c0_2 = arith.constant 0 : index
    %c0_3 = arith.constant 0 : index
    %4 = vector.load %arg2[%c0_2, %c0_3] : memref<512x144xbf16, #tpu.memory_space<vmem>>, vector<512x144xbf16>
    %c0_4 = arith.constant 0 : index
    %c0_5 = arith.constant 0 : index
    %5 = vector.load %arg3[%c0_4, %c0_5] : memref<144x32xbf16, #tpu.memory_space<vmem>>, vector<144x32xbf16>
    %cst = arith.constant dense<0.000000e+00> : vector<512x32xf32>
    %6 = tpu.matmul %4, %5, %cst {dimension_numbers = #tpu.dot_dimension_numbers<[1], [0], [0], [1], [0, 0, 1, 1], [], []>} : vector<512x144xbf16>, vector<144x32xbf16>, vector<512x32xf32> -> vector<512x32xf32>
    %7 = arith.addf %3, %6 : vector<512x32xf32>
    %c0_6 = arith.constant 0 : index
    %c0_7 = arith.constant 0 : index
    %8 = vector.load %arg6[%c0_6, %c0_7] : memref<512x32xf32, #tpu.memory_space<vmem>>, vector<512x32xf32>
    tpu.vector_store %arg6[%c0_6, %c0_7], %7 {strides = array<i32>} : memref<512x32xf32, #tpu.memory_space<vmem>>, vector<512x32xf32>,
    %c0_i32_8 = arith.constant 0 : i32
    %9 = arith.cmpi eq, %arg1, %c0_i32_8 : i32
    %10 = arith.extui %9 : i1 to i32
    %c0_i32_9 = arith.constant 0 : i32
    %11 = arith.cmpi ne, %10, %c0_i32_9 : i32
    scf.if %11 {
      %c0_10 = arith.constant 0 : index
      %c0_11 = arith.constant 0 : index
      %12 = vector.load %arg6[%c0_10, %c0_11] : memref<512x32xf32, #tpu.memory_space<vmem>>, vector<512x32xf32>
      %c0_12 = arith.constant 0 : index
      %c0_13 = arith.constant 0 : index
      %13 = vector.load %arg4[%c0_12, %c0_13] : memref<1x32xf32, #tpu.memory_space<vmem>>, vector<1x32xf32>
      %14 = vector.broadcast %13 : vector<1x32xf32> to vector<512x32xf32>
      %15 = arith.addf %12, %14 : vector<512x32xf32>
      %cst_14 = arith.constant 2.000000e-01 : f32
      %16 = vector.broadcast %cst_14 : f32 to vector<512x32xf32>
      %17 = arith.mulf %16, %15 : vector<512x32xf32>
      %18 = arith.maximumf %15, %17 : vector<512x32xf32>
      %19 = arith.truncf %18 : vector<512x32xf32> to vector<512x32xbf16>
      %c0_15 = arith.constant 0 : index
      %c0_16 = arith.constant 0 : index
      %20 = vector.load %arg5[%c0_15, %c0_16] : memref<512x32xbf16, #tpu.memory_space<vmem>>, vector<512x32xbf16>
      tpu.vector_store %arg5[%c0_15, %c0_16], %19 {strides = array<i32>} : memref<512x32xbf16, #tpu.memory_space<vmem>>, vector<512x32xbf16>,
    } else {
    }
    return
  }
  func.func @transform_0(%arg0: i32, %arg1: i32) -> (i32, i32) {
    %c0_i32 = arith.constant 0 : i32
    return %arg0, %arg1 : i32, i32
  }
  func.func @transform_1(%arg0: i32, %arg1: i32) -> (i32, i32) {
    %c0_i32 = arith.constant 0 : i32
    %c0_i32_0 = arith.constant 0 : i32
    return %arg1, %c0_i32 : i32, i32
  }
  func.func @transform_2(%arg0: i32, %arg1: i32) -> (i32, i32) {
    %c0_i32 = arith.constant 0 : i32
    %c0_i32_0 = arith.constant 0 : i32
    %c0_i32_1 = arith.constant 0 : i32
    return %c0_i32, %c0_i32_0 : i32, i32
  }
  func.func @transform_3(%arg0: i32, %arg1: i32) -> (i32, i32) {
    %c0_i32 = arith.constant 0 : i32
    %c0_i32_0 = arith.constant 0 : i32
    return %arg0, %c0_i32 : i32, i32
  }
}

module attributes {stable_mosaic.version = 11 : i64} {
  func.func @_linear_kernel(%arg0: i32, %arg1: i32, %arg2: memref<128x288xbf16, #tpu.memory_space<vmem>>, %arg3: memref<288x64xbf16, #tpu.memory_space<vmem>>, %arg4: memref<1x64xf32, #tpu.memory_space<vmem>>, %arg5: memref<128x64xbf16, #tpu.memory_space<vmem>>, %arg6: memref<128x64xf32, #tpu.memory_space<vmem>>) attributes {dimension_semantics = [#tpu.dimension_semantics<parallel>, #tpu.dimension_semantics<arbitrary>], iteration_bounds = array<i64: 1, 1>, scalar_prefetch = 0 : i64, scratch_operands = 1 : i64, tpu.core_type = #tpu.core_type<tc>, window_params = [{transform_indices = @transform_0, window_bounds = array<i64: 128, 288>}, {transform_indices = @transform_1, window_bounds = array<i64: 288, 64>}, {pipeline_mode = #tpu.pipeline_mode<synchronous>, transform_indices = @transform_2, window_bounds = array<i64: 1, 64>}, {transform_indices = @transform_3, window_bounds = array<i64: 128, 64>}]} {
    %c0_i32 = arith.constant 0 : i32
    %0 = arith.cmpi eq, %arg1, %c0_i32 : i32
    %1 = arith.extui %0 : i1 to i32
    %c0_i32_0 = arith.constant 0 : i32
    %2 = arith.cmpi ne, %1, %c0_i32_0 : i32
    scf.if %2 {
      %cst_10 = arith.constant 0.000000e+00 : f32
      %12 = vector.broadcast %cst_10 : f32 to vector<128x64xf32>
      %c0_11 = arith.constant 0 : index
      %c0_12 = arith.constant 0 : index
      %13 = vector.load %arg6[%c0_11, %c0_12] : memref<128x64xf32, #tpu.memory_space<vmem>>, vector<128x64xf32>
      tpu.vector_store %arg6[%c0_11, %c0_12], %12 {strides = array<i32>} : memref<128x64xf32, #tpu.memory_space<vmem>>, vector<128x64xf32>,
    } else {
    }
    %c0 = arith.constant 0 : index
    %c0_1 = arith.constant 0 : index
    %3 = vector.load %arg6[%c0, %c0_1] : memref<128x64xf32, #tpu.memory_space<vmem>>, vector<128x64xf32>
    %c0_2 = arith.constant 0 : index
    %c0_3 = arith.constant 0 : index
    %4 = vector.load %arg2[%c0_2, %c0_3] : memref<128x288xbf16, #tpu.memory_space<vmem>>, vector<128x288xbf16>
    %c0_4 = arith.constant 0 : index
    %c0_5 = arith.constant 0 : index
    %5 = vector.load %arg3[%c0_4, %c0_5] : memref<288x64xbf16, #tpu.memory_space<vmem>>, vector<288x64xbf16>
    %cst = arith.constant dense<0.000000e+00> : vector<128x64xf32>
    %6 = tpu.matmul %4, %5, %cst {dimension_numbers = #tpu.dot_dimension_numbers<[1], [0], [0], [1], [0, 0, 1, 1], [], []>} : vector<128x288xbf16>, vector<288x64xbf16>, vector<128x64xf32> -> vector<128x64xf32>
    %7 = arith.addf %3, %6 : vector<128x64xf32>
    %c0_6 = arith.constant 0 : index
    %c0_7 = arith.constant 0 : index
    %8 = vector.load %arg6[%c0_6, %c0_7] : memref<128x64xf32, #tpu.memory_space<vmem>>, vector<128x64xf32>
    tpu.vector_store %arg6[%c0_6, %c0_7], %7 {strides = array<i32>} : memref<128x64xf32, #tpu.memory_space<vmem>>, vector<128x64xf32>,
    %c0_i32_8 = arith.constant 0 : i32
    %9 = arith.cmpi eq, %arg1, %c0_i32_8 : i32
    %10 = arith.extui %9 : i1 to i32
    %c0_i32_9 = arith.constant 0 : i32
    %11 = arith.cmpi ne, %10, %c0_i32_9 : i32
    scf.if %11 {
      %c0_10 = arith.constant 0 : index
      %c0_11 = arith.constant 0 : index
      %12 = vector.load %arg6[%c0_10, %c0_11] : memref<128x64xf32, #tpu.memory_space<vmem>>, vector<128x64xf32>
      %c0_12 = arith.constant 0 : index
      %c0_13 = arith.constant 0 : index
      %13 = vector.load %arg4[%c0_12, %c0_13] : memref<1x64xf32, #tpu.memory_space<vmem>>, vector<1x64xf32>
      %14 = vector.broadcast %13 : vector<1x64xf32> to vector<128x64xf32>
      %15 = arith.addf %12, %14 : vector<128x64xf32>
      %cst_14 = arith.constant 2.000000e-01 : f32
      %16 = vector.broadcast %cst_14 : f32 to vector<128x64xf32>
      %17 = arith.mulf %16, %15 : vector<128x64xf32>
      %18 = arith.maximumf %15, %17 : vector<128x64xf32>
      %19 = arith.truncf %18 : vector<128x64xf32> to vector<128x64xbf16>
      %c0_15 = arith.constant 0 : index
      %c0_16 = arith.constant 0 : index
      %20 = vector.load %arg5[%c0_15, %c0_16] : memref<128x64xbf16, #tpu.memory_space<vmem>>, vector<128x64xbf16>
      tpu.vector_store %arg5[%c0_15, %c0_16], %19 {strides = array<i32>} : memref<128x64xbf16, #tpu.memory_space<vmem>>, vector<128x64xbf16>,
    } else {
    }
    return
  }
  func.func @transform_0(%arg0: i32, %arg1: i32) -> (i32, i32) {
    %c0_i32 = arith.constant 0 : i32
    return %arg0, %arg1 : i32, i32
  }
  func.func @transform_1(%arg0: i32, %arg1: i32) -> (i32, i32) {
    %c0_i32 = arith.constant 0 : i32
    %c0_i32_0 = arith.constant 0 : i32
    return %arg1, %c0_i32 : i32, i32
  }
  func.func @transform_2(%arg0: i32, %arg1: i32) -> (i32, i32) {
    %c0_i32 = arith.constant 0 : i32
    %c0_i32_0 = arith.constant 0 : i32
    %c0_i32_1 = arith.constant 0 : i32
    return %c0_i32, %c0_i32_0 : i32, i32
  }
  func.func @transform_3(%arg0: i32, %arg1: i32) -> (i32, i32) {
    %c0_i32 = arith.constant 0 : i32
    %c0_i32_0 = arith.constant 0 : i32
    return %arg0, %c0_i32 : i32, i32
  }
}

module attributes {stable_mosaic.version = 11 : i64} {
  func.func @_linear_kernel(%arg0: i32, %arg1: i32, %arg2: memref<32x576xbf16, #tpu.memory_space<vmem>>, %arg3: memref<576x128xbf16, #tpu.memory_space<vmem>>, %arg4: memref<1x128xf32, #tpu.memory_space<vmem>>, %arg5: memref<32x128xbf16, #tpu.memory_space<vmem>>, %arg6: memref<32x128xf32, #tpu.memory_space<vmem>>) attributes {dimension_semantics = [#tpu.dimension_semantics<parallel>, #tpu.dimension_semantics<arbitrary>], iteration_bounds = array<i64: 1, 1>, scalar_prefetch = 0 : i64, scratch_operands = 1 : i64, tpu.core_type = #tpu.core_type<tc>, window_params = [{transform_indices = @transform_0, window_bounds = array<i64: 32, 576>}, {transform_indices = @transform_1, window_bounds = array<i64: 576, 128>}, {pipeline_mode = #tpu.pipeline_mode<synchronous>, transform_indices = @transform_2, window_bounds = array<i64: 1, 128>}, {transform_indices = @transform_3, window_bounds = array<i64: 32, 128>}]} {
    %c0_i32 = arith.constant 0 : i32
    %0 = arith.cmpi eq, %arg1, %c0_i32 : i32
    %1 = arith.extui %0 : i1 to i32
    %c0_i32_0 = arith.constant 0 : i32
    %2 = arith.cmpi ne, %1, %c0_i32_0 : i32
    scf.if %2 {
      %cst_10 = arith.constant 0.000000e+00 : f32
      %12 = vector.broadcast %cst_10 : f32 to vector<32x128xf32>
      %c0_11 = arith.constant 0 : index
      %c0_12 = arith.constant 0 : index
      %13 = vector.load %arg6[%c0_11, %c0_12] : memref<32x128xf32, #tpu.memory_space<vmem>>, vector<32x128xf32>
      tpu.vector_store %arg6[%c0_11, %c0_12], %12 {strides = array<i32>} : memref<32x128xf32, #tpu.memory_space<vmem>>, vector<32x128xf32>,
    } else {
    }
    %c0 = arith.constant 0 : index
    %c0_1 = arith.constant 0 : index
    %3 = vector.load %arg6[%c0, %c0_1] : memref<32x128xf32, #tpu.memory_space<vmem>>, vector<32x128xf32>
    %c0_2 = arith.constant 0 : index
    %c0_3 = arith.constant 0 : index
    %4 = vector.load %arg2[%c0_2, %c0_3] : memref<32x576xbf16, #tpu.memory_space<vmem>>, vector<32x576xbf16>
    %c0_4 = arith.constant 0 : index
    %c0_5 = arith.constant 0 : index
    %5 = vector.load %arg3[%c0_4, %c0_5] : memref<576x128xbf16, #tpu.memory_space<vmem>>, vector<576x128xbf16>
    %cst = arith.constant dense<0.000000e+00> : vector<32x128xf32>
    %6 = tpu.matmul %4, %5, %cst {dimension_numbers = #tpu.dot_dimension_numbers<[1], [0], [0], [1], [0, 0, 1, 1], [], []>} : vector<32x576xbf16>, vector<576x128xbf16>, vector<32x128xf32> -> vector<32x128xf32>
    %7 = arith.addf %3, %6 : vector<32x128xf32>
    %c0_6 = arith.constant 0 : index
    %c0_7 = arith.constant 0 : index
    %8 = vector.load %arg6[%c0_6, %c0_7] : memref<32x128xf32, #tpu.memory_space<vmem>>, vector<32x128xf32>
    tpu.vector_store %arg6[%c0_6, %c0_7], %7 {strides = array<i32>} : memref<32x128xf32, #tpu.memory_space<vmem>>, vector<32x128xf32>,
    %c0_i32_8 = arith.constant 0 : i32
    %9 = arith.cmpi eq, %arg1, %c0_i32_8 : i32
    %10 = arith.extui %9 : i1 to i32
    %c0_i32_9 = arith.constant 0 : i32
    %11 = arith.cmpi ne, %10, %c0_i32_9 : i32
    scf.if %11 {
      %c0_10 = arith.constant 0 : index
      %c0_11 = arith.constant 0 : index
      %12 = vector.load %arg6[%c0_10, %c0_11] : memref<32x128xf32, #tpu.memory_space<vmem>>, vector<32x128xf32>
      %c0_12 = arith.constant 0 : index
      %c0_13 = arith.constant 0 : index
      %13 = vector.load %arg4[%c0_12, %c0_13] : memref<1x128xf32, #tpu.memory_space<vmem>>, vector<1x128xf32>
      %14 = vector.broadcast %13 : vector<1x128xf32> to vector<32x128xf32>
      %15 = arith.addf %12, %14 : vector<32x128xf32>
      %cst_14 = arith.constant 2.000000e-01 : f32
      %16 = vector.broadcast %cst_14 : f32 to vector<32x128xf32>
      %17 = arith.mulf %16, %15 : vector<32x128xf32>
      %18 = arith.maximumf %15, %17 : vector<32x128xf32>
      %19 = arith.truncf %18 : vector<32x128xf32> to vector<32x128xbf16>
      %c0_15 = arith.constant 0 : index
      %c0_16 = arith.constant 0 : index
      %20 = vector.load %arg5[%c0_15, %c0_16] : memref<32x128xbf16, #tpu.memory_space<vmem>>, vector<32x128xbf16>
      tpu.vector_store %arg5[%c0_15, %c0_16], %19 {strides = array<i32>} : memref<32x128xbf16, #tpu.memory_space<vmem>>, vector<32x128xbf16>,
    } else {
    }
    return
  }
  func.func @transform_0(%arg0: i32, %arg1: i32) -> (i32, i32) {
    %c0_i32 = arith.constant 0 : i32
    return %arg0, %arg1 : i32, i32
  }
  func.func @transform_1(%arg0: i32, %arg1: i32) -> (i32, i32) {
    %c0_i32 = arith.constant 0 : i32
    %c0_i32_0 = arith.constant 0 : i32
    return %arg1, %c0_i32 : i32, i32
  }
  func.func @transform_2(%arg0: i32, %arg1: i32) -> (i32, i32) {
    %c0_i32 = arith.constant 0 : i32
    %c0_i32_0 = arith.constant 0 : i32
    %c0_i32_1 = arith.constant 0 : i32
    return %c0_i32, %c0_i32_0 : i32, i32
  }
  func.func @transform_3(%arg0: i32, %arg1: i32) -> (i32, i32) {
    %c0_i32 = arith.constant 0 : i32
    %c0_i32_0 = arith.constant 0 : i32
    return %arg0, %c0_i32 : i32, i32
  }
}

module attributes {stable_mosaic.version = 11 : i64} {
  func.func @_linear_kernel(%arg0: i32, %arg1: i32, %arg2: memref<8x1152xbf16, #tpu.memory_space<vmem>>, %arg3: memref<1152x256xbf16, #tpu.memory_space<vmem>>, %arg4: memref<1x256xf32, #tpu.memory_space<vmem>>, %arg5: memref<8x256xbf16, #tpu.memory_space<vmem>>, %arg6: memref<8x256xf32, #tpu.memory_space<vmem>>) attributes {dimension_semantics = [#tpu.dimension_semantics<parallel>, #tpu.dimension_semantics<arbitrary>], iteration_bounds = array<i64: 1, 1>, scalar_prefetch = 0 : i64, scratch_operands = 1 : i64, tpu.core_type = #tpu.core_type<tc>, window_params = [{transform_indices = @transform_0, window_bounds = array<i64: 8, 1152>}, {transform_indices = @transform_1, window_bounds = array<i64: 1152, 256>}, {pipeline_mode = #tpu.pipeline_mode<synchronous>, transform_indices = @transform_2, window_bounds = array<i64: 1, 256>}, {transform_indices = @transform_3, window_bounds = array<i64: 8, 256>}]} {
    %c0_i32 = arith.constant 0 : i32
    %0 = arith.cmpi eq, %arg1, %c0_i32 : i32
    %1 = arith.extui %0 : i1 to i32
    %c0_i32_0 = arith.constant 0 : i32
    %2 = arith.cmpi ne, %1, %c0_i32_0 : i32
    scf.if %2 {
      %cst_10 = arith.constant 0.000000e+00 : f32
      %12 = vector.broadcast %cst_10 : f32 to vector<8x256xf32>
      %c0_11 = arith.constant 0 : index
      %c0_12 = arith.constant 0 : index
      %13 = vector.load %arg6[%c0_11, %c0_12] : memref<8x256xf32, #tpu.memory_space<vmem>>, vector<8x256xf32>
      tpu.vector_store %arg6[%c0_11, %c0_12], %12 {strides = array<i32>} : memref<8x256xf32, #tpu.memory_space<vmem>>, vector<8x256xf32>,
    } else {
    }
    %c0 = arith.constant 0 : index
    %c0_1 = arith.constant 0 : index
    %3 = vector.load %arg6[%c0, %c0_1] : memref<8x256xf32, #tpu.memory_space<vmem>>, vector<8x256xf32>
    %c0_2 = arith.constant 0 : index
    %c0_3 = arith.constant 0 : index
    %4 = vector.load %arg2[%c0_2, %c0_3] : memref<8x1152xbf16, #tpu.memory_space<vmem>>, vector<8x1152xbf16>
    %c0_4 = arith.constant 0 : index
    %c0_5 = arith.constant 0 : index
    %5 = vector.load %arg3[%c0_4, %c0_5] : memref<1152x256xbf16, #tpu.memory_space<vmem>>, vector<1152x256xbf16>
    %cst = arith.constant dense<0.000000e+00> : vector<8x256xf32>
    %6 = tpu.matmul %4, %5, %cst {dimension_numbers = #tpu.dot_dimension_numbers<[1], [0], [0], [1], [0, 0, 1, 1], [], []>} : vector<8x1152xbf16>, vector<1152x256xbf16>, vector<8x256xf32> -> vector<8x256xf32>
    %7 = arith.addf %3, %6 : vector<8x256xf32>
    %c0_6 = arith.constant 0 : index
    %c0_7 = arith.constant 0 : index
    %8 = vector.load %arg6[%c0_6, %c0_7] : memref<8x256xf32, #tpu.memory_space<vmem>>, vector<8x256xf32>
    tpu.vector_store %arg6[%c0_6, %c0_7], %7 {strides = array<i32>} : memref<8x256xf32, #tpu.memory_space<vmem>>, vector<8x256xf32>,
    %c0_i32_8 = arith.constant 0 : i32
    %9 = arith.cmpi eq, %arg1, %c0_i32_8 : i32
    %10 = arith.extui %9 : i1 to i32
    %c0_i32_9 = arith.constant 0 : i32
    %11 = arith.cmpi ne, %10, %c0_i32_9 : i32
    scf.if %11 {
      %c0_10 = arith.constant 0 : index
      %c0_11 = arith.constant 0 : index
      %12 = vector.load %arg6[%c0_10, %c0_11] : memref<8x256xf32, #tpu.memory_space<vmem>>, vector<8x256xf32>
      %c0_12 = arith.constant 0 : index
      %c0_13 = arith.constant 0 : index
      %13 = vector.load %arg4[%c0_12, %c0_13] : memref<1x256xf32, #tpu.memory_space<vmem>>, vector<1x256xf32>
      %14 = vector.broadcast %13 : vector<1x256xf32> to vector<8x256xf32>
      %15 = arith.addf %12, %14 : vector<8x256xf32>
      %cst_14 = arith.constant 2.000000e-01 : f32
      %16 = vector.broadcast %cst_14 : f32 to vector<8x256xf32>
      %17 = arith.mulf %16, %15 : vector<8x256xf32>
      %18 = arith.maximumf %15, %17 : vector<8x256xf32>
      %19 = arith.truncf %18 : vector<8x256xf32> to vector<8x256xbf16>
      %c0_15 = arith.constant 0 : index
      %c0_16 = arith.constant 0 : index
      %20 = vector.load %arg5[%c0_15, %c0_16] : memref<8x256xbf16, #tpu.memory_space<vmem>>, vector<8x256xbf16>
      tpu.vector_store %arg5[%c0_15, %c0_16], %19 {strides = array<i32>} : memref<8x256xbf16, #tpu.memory_space<vmem>>, vector<8x256xbf16>,
    } else {
    }
    return
  }
  func.func @transform_0(%arg0: i32, %arg1: i32) -> (i32, i32) {
    %c0_i32 = arith.constant 0 : i32
    return %arg0, %arg1 : i32, i32
  }
  func.func @transform_1(%arg0: i32, %arg1: i32) -> (i32, i32) {
    %c0_i32 = arith.constant 0 : i32
    %c0_i32_0 = arith.constant 0 : i32
    return %arg1, %c0_i32 : i32, i32
  }
  func.func @transform_2(%arg0: i32, %arg1: i32) -> (i32, i32) {
    %c0_i32 = arith.constant 0 : i32
    %c0_i32_0 = arith.constant 0 : i32
    %c0_i32_1 = arith.constant 0 : i32
    return %c0_i32, %c0_i32_0 : i32, i32
  }
  func.func @transform_3(%arg0: i32, %arg1: i32) -> (i32, i32) {
    %c0_i32 = arith.constant 0 : i32
    %c0_i32_0 = arith.constant 0 : i32
    return %arg0, %c0_i32 : i32, i32
  }
}

module attributes {stable_mosaic.version = 11 : i64} {
  func.func @_linear_kernel(%arg0: i32, %arg1: i32, %arg2: memref<2x1024xbf16, #tpu.memory_space<vmem>>, %arg3: memref<1024x32xbf16, #tpu.memory_space<vmem>>, %arg4: memref<1x32xf32, #tpu.memory_space<vmem>>, %arg5: memref<2x32xf32, #tpu.memory_space<vmem>>, %arg6: memref<2x32xf32, #tpu.memory_space<vmem>>) attributes {dimension_semantics = [#tpu.dimension_semantics<parallel>, #tpu.dimension_semantics<arbitrary>], iteration_bounds = array<i64: 1, 1>, scalar_prefetch = 0 : i64, scratch_operands = 1 : i64, tpu.core_type = #tpu.core_type<tc>, window_params = [{transform_indices = @transform_0, window_bounds = array<i64: 2, 1024>}, {transform_indices = @transform_1, window_bounds = array<i64: 1024, 32>}, {pipeline_mode = #tpu.pipeline_mode<synchronous>, transform_indices = @transform_2, window_bounds = array<i64: 1, 32>}, {transform_indices = @transform_3, window_bounds = array<i64: 2, 32>}]} {
    %c0_i32 = arith.constant 0 : i32
    %0 = arith.cmpi eq, %arg1, %c0_i32 : i32
    %1 = arith.extui %0 : i1 to i32
    %c0_i32_0 = arith.constant 0 : i32
    %2 = arith.cmpi ne, %1, %c0_i32_0 : i32
    scf.if %2 {
      %cst_10 = arith.constant 0.000000e+00 : f32
      %12 = vector.broadcast %cst_10 : f32 to vector<2x32xf32>
      %c0_11 = arith.constant 0 : index
      %c0_12 = arith.constant 0 : index
      %13 = vector.load %arg6[%c0_11, %c0_12] : memref<2x32xf32, #tpu.memory_space<vmem>>, vector<2x32xf32>
      tpu.vector_store %arg6[%c0_11, %c0_12], %12 {strides = array<i32>} : memref<2x32xf32, #tpu.memory_space<vmem>>, vector<2x32xf32>,
    } else {
    }
    %c0 = arith.constant 0 : index
    %c0_1 = arith.constant 0 : index
    %3 = vector.load %arg6[%c0, %c0_1] : memref<2x32xf32, #tpu.memory_space<vmem>>, vector<2x32xf32>
    %c0_2 = arith.constant 0 : index
    %c0_3 = arith.constant 0 : index
    %4 = vector.load %arg2[%c0_2, %c0_3] : memref<2x1024xbf16, #tpu.memory_space<vmem>>, vector<2x1024xbf16>
    %c0_4 = arith.constant 0 : index
    %c0_5 = arith.constant 0 : index
    %5 = vector.load %arg3[%c0_4, %c0_5] : memref<1024x32xbf16, #tpu.memory_space<vmem>>, vector<1024x32xbf16>
    %cst = arith.constant dense<0.000000e+00> : vector<2x32xf32>
    %6 = tpu.matmul %4, %5, %cst {dimension_numbers = #tpu.dot_dimension_numbers<[1], [0], [0], [1], [0, 0, 1, 1], [], []>} : vector<2x1024xbf16>, vector<1024x32xbf16>, vector<2x32xf32> -> vector<2x32xf32>
    %7 = arith.addf %3, %6 : vector<2x32xf32>
    %c0_6 = arith.constant 0 : index
    %c0_7 = arith.constant 0 : index
    %8 = vector.load %arg6[%c0_6, %c0_7] : memref<2x32xf32, #tpu.memory_space<vmem>>, vector<2x32xf32>
    tpu.vector_store %arg6[%c0_6, %c0_7], %7 {strides = array<i32>} : memref<2x32xf32, #tpu.memory_space<vmem>>, vector<2x32xf32>,
    %c0_i32_8 = arith.constant 0 : i32
    %9 = arith.cmpi eq, %arg1, %c0_i32_8 : i32
    %10 = arith.extui %9 : i1 to i32
    %c0_i32_9 = arith.constant 0 : i32
    %11 = arith.cmpi ne, %10, %c0_i32_9 : i32
    scf.if %11 {
      %c0_10 = arith.constant 0 : index
      %c0_11 = arith.constant 0 : index
      %12 = vector.load %arg6[%c0_10, %c0_11] : memref<2x32xf32, #tpu.memory_space<vmem>>, vector<2x32xf32>
      %c0_12 = arith.constant 0 : index
      %c0_13 = arith.constant 0 : index
      %13 = vector.load %arg4[%c0_12, %c0_13] : memref<1x32xf32, #tpu.memory_space<vmem>>, vector<1x32xf32>
      %14 = vector.broadcast %13 : vector<1x32xf32> to vector<2x32xf32>
      %15 = arith.addf %12, %14 : vector<2x32xf32>
      %cst_14 = arith.constant 2.000000e-01 : f32
      %16 = vector.broadcast %cst_14 : f32 to vector<2x32xf32>
      %17 = arith.mulf %16, %15 : vector<2x32xf32>
      %18 = arith.maximumf %15, %17 : vector<2x32xf32>
      %c0_15 = arith.constant 0 : index
      %c0_16 = arith.constant 0 : index
      %19 = vector.load %arg5[%c0_15, %c0_16] : memref<2x32xf32, #tpu.memory_space<vmem>>, vector<2x32xf32>
      tpu.vector_store %arg5[%c0_15, %c0_16], %18 {strides = array<i32>} : memref<2x32xf32, #tpu.memory_space<vmem>>, vector<2x32xf32>,
    } else {
    }
    return
  }
  func.func @transform_0(%arg0: i32, %arg1: i32) -> (i32, i32) {
    %c0_i32 = arith.constant 0 : i32
    return %arg0, %arg1 : i32, i32
  }
  func.func @transform_1(%arg0: i32, %arg1: i32) -> (i32, i32) {
    %c0_i32 = arith.constant 0 : i32
    %c0_i32_0 = arith.constant 0 : i32
    return %arg1, %c0_i32 : i32, i32
  }
  func.func @transform_2(%arg0: i32, %arg1: i32) -> (i32, i32) {
    %c0_i32 = arith.constant 0 : i32
    %c0_i32_0 = arith.constant 0 : i32
    %c0_i32_1 = arith.constant 0 : i32
    return %c0_i32, %c0_i32_0 : i32, i32
  }
  func.func @transform_3(%arg0: i32, %arg1: i32) -> (i32, i32) {
    %c0_i32 = arith.constant 0 : i32
    %c0_i32_0 = arith.constant 0 : i32
    return %arg0, %c0_i32 : i32, i32
  }
}

module attributes {stable_mosaic.version = 11 : i64} {
  func.func @_linear_kernel(%arg0: i32, %arg1: i32, %arg2: memref<512x9xbf16, #tpu.memory_space<vmem>>, %arg3: memref<9x16xbf16, #tpu.memory_space<vmem>>, %arg4: memref<1x16xf32, #tpu.memory_space<vmem>>, %arg5: memref<512x16xbf16, #tpu.memory_space<vmem>>, %arg6: memref<512x16xf32, #tpu.memory_space<vmem>>) attributes {dimension_semantics = [#tpu.dimension_semantics<parallel>, #tpu.dimension_semantics<arbitrary>], iteration_bounds = array<i64: 4, 1>, scalar_prefetch = 0 : i64, scratch_operands = 1 : i64, tpu.core_type = #tpu.core_type<tc>, window_params = [{transform_indices = @transform_0, window_bounds = array<i64: 512, 9>}, {transform_indices = @transform_1, window_bounds = array<i64: 9, 16>}, {pipeline_mode = #tpu.pipeline_mode<synchronous>, transform_indices = @transform_2, window_bounds = array<i64: 1, 16>}, {transform_indices = @transform_3, window_bounds = array<i64: 512, 16>}]} {
    %c0_i32 = arith.constant 0 : i32
    %0 = arith.cmpi eq, %arg1, %c0_i32 : i32
    %1 = arith.extui %0 : i1 to i32
    %c0_i32_0 = arith.constant 0 : i32
    %2 = arith.cmpi ne, %1, %c0_i32_0 : i32
    scf.if %2 {
      %cst_10 = arith.constant 0.000000e+00 : f32
      %12 = vector.broadcast %cst_10 : f32 to vector<512x16xf32>
      %c0_11 = arith.constant 0 : index
      %c0_12 = arith.constant 0 : index
      %13 = vector.load %arg6[%c0_11, %c0_12] : memref<512x16xf32, #tpu.memory_space<vmem>>, vector<512x16xf32>
      tpu.vector_store %arg6[%c0_11, %c0_12], %12 {strides = array<i32>} : memref<512x16xf32, #tpu.memory_space<vmem>>, vector<512x16xf32>,
    } else {
    }
    %c0 = arith.constant 0 : index
    %c0_1 = arith.constant 0 : index
    %3 = vector.load %arg6[%c0, %c0_1] : memref<512x16xf32, #tpu.memory_space<vmem>>, vector<512x16xf32>
    %c0_2 = arith.constant 0 : index
    %c0_3 = arith.constant 0 : index
    %4 = vector.load %arg2[%c0_2, %c0_3] : memref<512x9xbf16, #tpu.memory_space<vmem>>, vector<512x9xbf16>
    %c0_4 = arith.constant 0 : index
    %c0_5 = arith.constant 0 : index
    %5 = vector.load %arg3[%c0_4, %c0_5] : memref<9x16xbf16, #tpu.memory_space<vmem>>, vector<9x16xbf16>
    %cst = arith.constant dense<0.000000e+00> : vector<512x16xf32>
    %6 = tpu.matmul %4, %5, %cst {dimension_numbers = #tpu.dot_dimension_numbers<[1], [0], [0], [1], [0, 0, 1, 1], [], []>} : vector<512x9xbf16>, vector<9x16xbf16>, vector<512x16xf32> -> vector<512x16xf32>
    %7 = arith.addf %3, %6 : vector<512x16xf32>
    %c0_6 = arith.constant 0 : index
    %c0_7 = arith.constant 0 : index
    %8 = vector.load %arg6[%c0_6, %c0_7] : memref<512x16xf32, #tpu.memory_space<vmem>>, vector<512x16xf32>
    tpu.vector_store %arg6[%c0_6, %c0_7], %7 {strides = array<i32>} : memref<512x16xf32, #tpu.memory_space<vmem>>, vector<512x16xf32>,
    %c0_i32_8 = arith.constant 0 : i32
    %9 = arith.cmpi eq, %arg1, %c0_i32_8 : i32
    %10 = arith.extui %9 : i1 to i32
    %c0_i32_9 = arith.constant 0 : i32
    %11 = arith.cmpi ne, %10, %c0_i32_9 : i32
    scf.if %11 {
      %c0_10 = arith.constant 0 : index
      %c0_11 = arith.constant 0 : index
      %12 = vector.load %arg6[%c0_10, %c0_11] : memref<512x16xf32, #tpu.memory_space<vmem>>, vector<512x16xf32>
      %c0_12 = arith.constant 0 : index
      %c0_13 = arith.constant 0 : index
      %13 = vector.load %arg4[%c0_12, %c0_13] : memref<1x16xf32, #tpu.memory_space<vmem>>, vector<1x16xf32>
      %14 = vector.broadcast %13 : vector<1x16xf32> to vector<512x16xf32>
      %15 = arith.addf %12, %14 : vector<512x16xf32>
      %cst_14 = arith.constant 2.000000e-01 : f32
      %16 = vector.broadcast %cst_14 : f32 to vector<512x16xf32>
      %17 = arith.mulf %16, %15 : vector<512x16xf32>
      %18 = arith.maximumf %15, %17 : vector<512x16xf32>
      %19 = arith.truncf %18 : vector<512x16xf32> to vector<512x16xbf16>
      %c0_15 = arith.constant 0 : index
      %c0_16 = arith.constant 0 : index
      %20 = vector.load %arg5[%c0_15, %c0_16] : memref<512x16xbf16, #tpu.memory_space<vmem>>, vector<512x16xbf16>
      tpu.vector_store %arg5[%c0_15, %c0_16], %19 {strides = array<i32>} : memref<512x16xbf16, #tpu.memory_space<vmem>>, vector<512x16xbf16>,
    } else {
    }
    return
  }
  func.func @transform_0(%arg0: i32, %arg1: i32) -> (i32, i32) {
    %c0_i32 = arith.constant 0 : i32
    return %arg0, %arg1 : i32, i32
  }
  func.func @transform_1(%arg0: i32, %arg1: i32) -> (i32, i32) {
    %c0_i32 = arith.constant 0 : i32
    %c0_i32_0 = arith.constant 0 : i32
    return %arg1, %c0_i32 : i32, i32
  }
  func.func @transform_2(%arg0: i32, %arg1: i32) -> (i32, i32) {
    %c0_i32 = arith.constant 0 : i32
    %c0_i32_0 = arith.constant 0 : i32
    %c0_i32_1 = arith.constant 0 : i32
    return %c0_i32, %c0_i32_0 : i32, i32
  }
  func.func @transform_3(%arg0: i32, %arg1: i32) -> (i32, i32) {
    %c0_i32 = arith.constant 0 : i32
    %c0_i32_0 = arith.constant 0 : i32
    return %arg0, %c0_i32 : i32, i32
  }
}

module attributes {stable_mosaic.version = 11 : i64} {
  func.func @_fused_mlp_kernel(%arg0: i32, %arg1: memref<16x16xbf16, #tpu.memory_space<vmem>>, %arg2: memref<16x32xbf16, #tpu.memory_space<vmem>>, %arg3: memref<1x32xf32, #tpu.memory_space<vmem>>, %arg4: memref<32x32xbf16, #tpu.memory_space<vmem>>, %arg5: memref<1x32xf32, #tpu.memory_space<vmem>>, %arg6: memref<16x32xf32, #tpu.memory_space<vmem>>) attributes {dimension_semantics = [#tpu.dimension_semantics<parallel>], iteration_bounds = array<i64: 1>, scalar_prefetch = 0 : i64, scratch_operands = 0 : i64, tpu.core_type = #tpu.core_type<tc>, window_params = [{transform_indices = @transform_0, window_bounds = array<i64: 16, 16>}, {pipeline_mode = #tpu.pipeline_mode<synchronous>, transform_indices = @transform_1, window_bounds = array<i64: 16, 32>}, {pipeline_mode = #tpu.pipeline_mode<synchronous>, transform_indices = @transform_2, window_bounds = array<i64: 1, 32>}, {pipeline_mode = #tpu.pipeline_mode<synchronous>, transform_indices = @transform_3, window_bounds = array<i64: 32, 32>}, {pipeline_mode = #tpu.pipeline_mode<synchronous>, transform_indices = @transform_4, window_bounds = array<i64: 1, 32>}, {transform_indices = @transform_5, window_bounds = array<i64: 16, 32>}]} {
    %c0 = arith.constant 0 : index
    %c0_0 = arith.constant 0 : index
    %0 = vector.load %arg1[%c0, %c0_0] : memref<16x16xbf16, #tpu.memory_space<vmem>>, vector<16x16xbf16>
    %c0_1 = arith.constant 0 : index
    %c0_2 = arith.constant 0 : index
    %1 = vector.load %arg2[%c0_1, %c0_2] : memref<16x32xbf16, #tpu.memory_space<vmem>>, vector<16x32xbf16>
    %cst = arith.constant dense<0.000000e+00> : vector<16x32xf32>
    %2 = tpu.matmul %0, %1, %cst {dimension_numbers = #tpu.dot_dimension_numbers<[1], [0], [0], [1], [0, 0, 1, 1], [], []>} : vector<16x16xbf16>, vector<16x32xbf16>, vector<16x32xf32> -> vector<16x32xf32>
    %c0_3 = arith.constant 0 : index
    %c0_4 = arith.constant 0 : index
    %3 = vector.load %arg3[%c0_3, %c0_4] : memref<1x32xf32, #tpu.memory_space<vmem>>, vector<1x32xf32>
    %4 = vector.broadcast %3 : vector<1x32xf32> to vector<16x32xf32>
    %5 = arith.addf %2, %4 : vector<16x32xf32>
    %cst_5 = arith.constant 2.000000e-01 : f32
    %6 = vector.broadcast %cst_5 : f32 to vector<16x32xf32>
    %7 = arith.mulf %6, %5 : vector<16x32xf32>
    %8 = arith.maximumf %5, %7 : vector<16x32xf32>
    %9 = arith.truncf %8 : vector<16x32xf32> to vector<16x32xbf16>
    %c0_6 = arith.constant 0 : index
    %c0_7 = arith.constant 0 : index
    %10 = vector.load %arg4[%c0_6, %c0_7] : memref<32x32xbf16, #tpu.memory_space<vmem>>, vector<32x32xbf16>
    %cst_8 = arith.constant dense<0.000000e+00> : vector<16x32xf32>
    %11 = tpu.matmul %9, %10, %cst_8 {dimension_numbers = #tpu.dot_dimension_numbers<[1], [0], [0], [1], [0, 0, 1, 1], [], []>} : vector<16x32xbf16>, vector<32x32xbf16>, vector<16x32xf32> -> vector<16x32xf32>
    %c0_9 = arith.constant 0 : index
    %c0_10 = arith.constant 0 : index
    %12 = vector.load %arg5[%c0_9, %c0_10] : memref<1x32xf32, #tpu.memory_space<vmem>>, vector<1x32xf32>
    %13 = vector.broadcast %12 : vector<1x32xf32> to vector<16x32xf32>
    %14 = arith.addf %11, %13 : vector<16x32xf32>
    %cst_11 = arith.constant 2.000000e-01 : f32
    %15 = vector.broadcast %cst_11 : f32 to vector<16x32xf32>
    %16 = arith.mulf %15, %14 : vector<16x32xf32>
    %17 = arith.maximumf %14, %16 : vector<16x32xf32>
    %c0_12 = arith.constant 0 : index
    %c0_13 = arith.constant 0 : index
    %18 = vector.load %arg6[%c0_12, %c0_13] : memref<16x32xf32, #tpu.memory_space<vmem>>, vector<16x32xf32>
    tpu.vector_store %arg6[%c0_12, %c0_13], %17 {strides = array<i32>} : memref<16x32xf32, #tpu.memory_space<vmem>>, vector<16x32xf32>,
    return
  }
  func.func @transform_0(%arg0: i32) -> (i32, i32) {
    %c0_i32 = arith.constant 0 : i32
    %c0_i32_0 = arith.constant 0 : i32
    return %arg0, %c0_i32 : i32, i32
  }
  func.func @transform_1(%arg0: i32) -> (i32, i32) {
    %c0_i32 = arith.constant 0 : i32
    %c0_i32_0 = arith.constant 0 : i32
    %c0_i32_1 = arith.constant 0 : i32
    return %c0_i32, %c0_i32_0 : i32, i32
  }
  func.func @transform_2(%arg0: i32) -> (i32, i32) {
    %c0_i32 = arith.constant 0 : i32
    %c0_i32_0 = arith.constant 0 : i32
    %c0_i32_1 = arith.constant 0 : i32
    return %c0_i32, %c0_i32_0 : i32, i32
  }
  func.func @transform_3(%arg0: i32) -> (i32, i32) {
    %c0_i32 = arith.constant 0 : i32
    %c0_i32_0 = arith.constant 0 : i32
    %c0_i32_1 = arith.constant 0 : i32
    return %c0_i32, %c0_i32_0 : i32, i32
  }
  func.func @transform_4(%arg0: i32) -> (i32, i32) {
    %c0_i32 = arith.constant 0 : i32
    %c0_i32_0 = arith.constant 0 : i32
    %c0_i32_1 = arith.constant 0 : i32
    return %c0_i32, %c0_i32_0 : i32, i32
  }
  func.func @transform_5(%arg0: i32) -> (i32, i32) {
    %c0_i32 = arith.constant 0 : i32
    %c0_i32_0 = arith.constant 0 : i32
    return %arg0, %c0_i32 : i32, i32
  }
}

module attributes {stable_mosaic.version = 11 : i64} {
  func.func @_fused_mlp_kernel(%arg0: i32, %arg1: memref<16x128xbf16, #tpu.memory_space<vmem>>, %arg2: memref<128x64xbf16, #tpu.memory_space<vmem>>, %arg3: memref<1x64xf32, #tpu.memory_space<vmem>>, %arg4: memref<64x32xbf16, #tpu.memory_space<vmem>>, %arg5: memref<1x32xf32, #tpu.memory_space<vmem>>, %arg6: memref<32x32xbf16, #tpu.memory_space<vmem>>, %arg7: memref<1x32xf32, #tpu.memory_space<vmem>>, %arg8: memref<32x1xbf16, #tpu.memory_space<vmem>>, %arg9: memref<1x1xf32, #tpu.memory_space<vmem>>, %arg10: memref<16x1xf32, #tpu.memory_space<vmem>>) attributes {dimension_semantics = [#tpu.dimension_semantics<parallel>], iteration_bounds = array<i64: 1>, scalar_prefetch = 0 : i64, scratch_operands = 0 : i64, tpu.core_type = #tpu.core_type<tc>, window_params = [{transform_indices = @transform_0, window_bounds = array<i64: 16, 128>}, {pipeline_mode = #tpu.pipeline_mode<synchronous>, transform_indices = @transform_1, window_bounds = array<i64: 128, 64>}, {pipeline_mode = #tpu.pipeline_mode<synchronous>, transform_indices = @transform_2, window_bounds = array<i64: 1, 64>}, {pipeline_mode = #tpu.pipeline_mode<synchronous>, transform_indices = @transform_3, window_bounds = array<i64: 64, 32>}, {pipeline_mode = #tpu.pipeline_mode<synchronous>, transform_indices = @transform_4, window_bounds = array<i64: 1, 32>}, {pipeline_mode = #tpu.pipeline_mode<synchronous>, transform_indices = @transform_5, window_bounds = array<i64: 32, 32>}, {pipeline_mode = #tpu.pipeline_mode<synchronous>, transform_indices = @transform_6, window_bounds = array<i64: 1, 32>}, {pipeline_mode = #tpu.pipeline_mode<synchronous>, transform_indices = @transform_7, window_bounds = array<i64: 32, 1>}, {pipeline_mode = #tpu.pipeline_mode<synchronous>, transform_indices = @transform_8, window_bounds = array<i64: 1, 1>}, {transform_indices = @transform_9, window_bounds = array<i64: 16, 1>}]} {
    %c0 = arith.constant 0 : index
    %c0_0 = arith.constant 0 : index
    %0 = vector.load %arg1[%c0, %c0_0] : memref<16x128xbf16, #tpu.memory_space<vmem>>, vector<16x128xbf16>
    %c0_1 = arith.constant 0 : index
    %c0_2 = arith.constant 0 : index
    %1 = vector.load %arg2[%c0_1, %c0_2] : memref<128x64xbf16, #tpu.memory_space<vmem>>, vector<128x64xbf16>
    %cst = arith.constant dense<0.000000e+00> : vector<16x64xf32>
    %2 = tpu.matmul %0, %1, %cst {dimension_numbers = #tpu.dot_dimension_numbers<[1], [0], [0], [1], [0, 0, 1, 1], [], []>} : vector<16x128xbf16>, vector<128x64xbf16>, vector<16x64xf32> -> vector<16x64xf32>
    %c0_3 = arith.constant 0 : index
    %c0_4 = arith.constant 0 : index
    %3 = vector.load %arg3[%c0_3, %c0_4] : memref<1x64xf32, #tpu.memory_space<vmem>>, vector<1x64xf32>
    %4 = vector.broadcast %3 : vector<1x64xf32> to vector<16x64xf32>
    %5 = arith.addf %2, %4 : vector<16x64xf32>
    %cst_5 = arith.constant 2.000000e-01 : f32
    %6 = vector.broadcast %cst_5 : f32 to vector<16x64xf32>
    %7 = arith.mulf %6, %5 : vector<16x64xf32>
    %8 = arith.maximumf %5, %7 : vector<16x64xf32>
    %9 = arith.truncf %8 : vector<16x64xf32> to vector<16x64xbf16>
    %c0_6 = arith.constant 0 : index
    %c0_7 = arith.constant 0 : index
    %10 = vector.load %arg4[%c0_6, %c0_7] : memref<64x32xbf16, #tpu.memory_space<vmem>>, vector<64x32xbf16>
    %cst_8 = arith.constant dense<0.000000e+00> : vector<16x32xf32>
    %11 = tpu.matmul %9, %10, %cst_8 {dimension_numbers = #tpu.dot_dimension_numbers<[1], [0], [0], [1], [0, 0, 1, 1], [], []>} : vector<16x64xbf16>, vector<64x32xbf16>, vector<16x32xf32> -> vector<16x32xf32>
    %c0_9 = arith.constant 0 : index
    %c0_10 = arith.constant 0 : index
    %12 = vector.load %arg5[%c0_9, %c0_10] : memref<1x32xf32, #tpu.memory_space<vmem>>, vector<1x32xf32>
    %13 = vector.broadcast %12 : vector<1x32xf32> to vector<16x32xf32>
    %14 = arith.addf %11, %13 : vector<16x32xf32>
    %cst_11 = arith.constant 2.000000e-01 : f32
    %15 = vector.broadcast %cst_11 : f32 to vector<16x32xf32>
    %16 = arith.mulf %15, %14 : vector<16x32xf32>
    %17 = arith.maximumf %14, %16 : vector<16x32xf32>
    %18 = arith.truncf %17 : vector<16x32xf32> to vector<16x32xbf16>
    %c0_12 = arith.constant 0 : index
    %c0_13 = arith.constant 0 : index
    %19 = vector.load %arg6[%c0_12, %c0_13] : memref<32x32xbf16, #tpu.memory_space<vmem>>, vector<32x32xbf16>
    %cst_14 = arith.constant dense<0.000000e+00> : vector<16x32xf32>
    %20 = tpu.matmul %18, %19, %cst_14 {dimension_numbers = #tpu.dot_dimension_numbers<[1], [0], [0], [1], [0, 0, 1, 1], [], []>} : vector<16x32xbf16>, vector<32x32xbf16>, vector<16x32xf32> -> vector<16x32xf32>
    %c0_15 = arith.constant 0 : index
    %c0_16 = arith.constant 0 : index
    %21 = vector.load %arg7[%c0_15, %c0_16] : memref<1x32xf32, #tpu.memory_space<vmem>>, vector<1x32xf32>
    %22 = vector.broadcast %21 : vector<1x32xf32> to vector<16x32xf32>
    %23 = arith.addf %20, %22 : vector<16x32xf32>
    %cst_17 = arith.constant 2.000000e-01 : f32
    %24 = vector.broadcast %cst_17 : f32 to vector<16x32xf32>
    %25 = arith.mulf %24, %23 : vector<16x32xf32>
    %26 = arith.maximumf %23, %25 : vector<16x32xf32>
    %27 = arith.truncf %26 : vector<16x32xf32> to vector<16x32xbf16>
    %c0_18 = arith.constant 0 : index
    %c0_19 = arith.constant 0 : index
    %28 = vector.load %arg8[%c0_18, %c0_19] : memref<32x1xbf16, #tpu.memory_space<vmem>>, vector<32x1xbf16>
    %cst_20 = arith.constant dense<0.000000e+00> : vector<16x1xf32>
    %29 = tpu.matmul %27, %28, %cst_20 {dimension_numbers = #tpu.dot_dimension_numbers<[1], [0], [0], [1], [0, 0, 1, 1], [], []>} : vector<16x32xbf16>, vector<32x1xbf16>, vector<16x1xf32> -> vector<16x1xf32>
    %c0_21 = arith.constant 0 : index
    %c0_22 = arith.constant 0 : index
    %30 = vector.load %arg9[%c0_21, %c0_22] : memref<1x1xf32, #tpu.memory_space<vmem>>, vector<1x1xf32>
    %31 = vector.broadcast %30 : vector<1x1xf32> to vector<16x1xf32>
    %32 = arith.addf %29, %31 : vector<16x1xf32>
    %c0_23 = arith.constant 0 : index
    %c0_24 = arith.constant 0 : index
    %33 = vector.load %arg10[%c0_23, %c0_24] : memref<16x1xf32, #tpu.memory_space<vmem>>, vector<16x1xf32>
    tpu.vector_store %arg10[%c0_23, %c0_24], %32 {strides = array<i32>} : memref<16x1xf32, #tpu.memory_space<vmem>>, vector<16x1xf32>,
    return
  }
  func.func @transform_0(%arg0: i32) -> (i32, i32) {
    %c0_i32 = arith.constant 0 : i32
    %c0_i32_0 = arith.constant 0 : i32
    return %arg0, %c0_i32 : i32, i32
  }
  func.func @transform_1(%arg0: i32) -> (i32, i32) {
    %c0_i32 = arith.constant 0 : i32
    %c0_i32_0 = arith.constant 0 : i32
    %c0_i32_1 = arith.constant 0 : i32
    return %c0_i32, %c0_i32_0 : i32, i32
  }
  func.func @transform_2(%arg0: i32) -> (i32, i32) {
    %c0_i32 = arith.constant 0 : i32
    %c0_i32_0 = arith.constant 0 : i32
    %c0_i32_1 = arith.constant 0 : i32
    return %c0_i32, %c0_i32_0 : i32, i32
  }
  func.func @transform_3(%arg0: i32) -> (i32, i32) {
    %c0_i32 = arith.constant 0 : i32
    %c0_i32_0 = arith.constant 0 : i32
    %c0_i32_1 = arith.constant 0 : i32
    return %c0_i32, %c0_i32_0 : i32, i32
  }
  func.func @transform_4(%arg0: i32) -> (i32, i32) {
    %c0_i32 = arith.constant 0 : i32
    %c0_i32_0 = arith.constant 0 : i32
    %c0_i32_1 = arith.constant 0 : i32
    return %c0_i32, %c0_i32_0 : i32, i32
  }
  func.func @transform_5(%arg0: i32) -> (i32, i32) {
    %c0_i32 = arith.constant 0 : i32
    %c0_i32_0 = arith.constant 0 : i32
    %c0_i32_1 = arith.constant 0 : i32
    return %c0_i32, %c0_i32_0 : i32, i32
  }
  func.func @transform_6(%arg0: i32) -> (i32, i32) {
    %c0_i32 = arith.constant 0 : i32
    %c0_i32_0 = arith.constant 0 : i32
    %c0_i32_1 = arith.constant 0 : i32
    return %c0_i32, %c0_i32_0 : i32, i32
  }
  func.func @transform_7(%arg0: i32) -> (i32, i32) {
    %c0_i32 = arith.constant 0 : i32
    %c0_i32_0 = arith.constant 0 : i32
    %c0_i32_1 = arith.constant 0 : i32
    return %c0_i32, %c0_i32_0 : i32, i32
  }
  func.func @transform_8(%arg0: i32) -> (i32, i32) {
    %c0_i32 = arith.constant 0 : i32
    %c0_i32_0 = arith.constant 0 : i32
    %c0_i32_1 = arith.constant 0 : i32
    return %c0_i32, %c0_i32_0 : i32, i32
  }
  func.func @transform_9(%arg0: i32) -> (i32, i32) {
    %c0_i32 = arith.constant 0 : i32
    %c0_i32_0 = arith.constant 0 : i32
    return %arg0, %c0_i32 : i32, i32
  }
}

</mosaic_0001>

<bundles_post_ra>
// kernel: multi_image_field_mlp_forward.21
= control target key start
LH: loop header
LB: loop body
LE: loop exit
PB: predicated region body
PF: predicated region fallthrough
CT: control target
= control target key end

     0   :  { %s2204_s12 = smov 0   ;;  %s2206_s13 = smov 0   ;;  %s2824_s0 = inlined_call_operand.vmem [shape: bf16[2048,27], index: 0, kind: input, shape index: {}]   ;;  %s2825_s1 = inlined_call_operand.vmem [shape: bf16[27,16], index: 1, kind: input, shape index: {}]   ;;  %s2826_s2 = inlined_call_operand.vmem [shape: f32[1,16], index: 2, kind: input, shape index: {}]   ;;  %s2827_s3 = inlined_call_operand.vmem [shape: bf16[2048,16], index: 3, kind: output, shape index: {}]  }
   0x1   :  { %s2208_s14 = smov 0  }
   0x2 LB: > { %s25_s15 = sadd.s32 1, %s2176_s13  ;;  %p1789_p0 = scmp.ge.s32.totalorder %s2180_s14, 1  ;;  %s2180_s14 = sphi %s2208_s14, %s13_s14   ;;  %s2176_s13 = sphi %s2206_s13, %s2830_s13   ;;  %s2172_s12 = sphi %s2204_s12, %s2829_s12  }
   0x3   : > { %p27_p1 = scmp.ge.s32.totalorder %s25_s15, 4  ;;  %p166_p2 = scmp.lt.s32.totalorder %s2180_s14, 5 }
   0x5   : > { %s2832_s15 = smov (%p27_p1, %s25_s15), 0  ;;  %p167_p3 = pnand %p1789_p0, %p166_p2 }
   0x6   : > { %v2123_v0 = vld [vmem:[%s2825_s1] sm:$0xff] (!%p167_p3)   ;;  %vm689_vm0 = vcmask (!%p167_p3), 1044480   ;;  %v2230_v1 = vld [vmem:[%s2825_s1 + $0x8] sm:$0x3f] (!%p167_p3)   ;;  %vm690_vm1 = vcmask (!%p167_p3), 1045504   ;;  %s1790_s20 = sshll.u32 (!%p167_p3), %s2172_s12, 6 }
   0x7   : > { %170 = sbr.rel (%p167_p3) target bundleno = 338 (0x152), region = 32  ;;  %2025 = vmatprep.subr.bf16.mxu0 (!%p167_p3), %v2123_v0  ;;  %2093 = vmatprep.subr.bf16.mxu1 (!%p167_p3), %v2123_v0  ;;  %vm224_vm2 = vcmask (!%p167_p3), 130048   ;;  %v2182_v2 = vmov (!%p167_p3), 65535   ;;  %p2235_p4 = scmp.lt.s32.totalorder (!%p167_p3), %s1790_s20, 255  ;;  %v2183_v5 = vmov (!%p167_p3), 0.0   ;;  %vm592_vm3 = vcmask (!%p167_p3), 220160  }
   0x8   : > { %2026 = vmatpush3.bf16.msra.mxu0 (!%p167_p3), %v2123_v0  ;;  %2095 = vmatpush3.bf16.msra.mxu1 (!%p167_p3), %v2123_v0  ;;  %v691_v3 = vsel (!%p167_p3), %vm689_vm0, 4294967295, %v2182_v2  ;;  %227 = vst.msk [vmem:[#allocation2 + $0x10] sm:$0xff] (!%p167_p3), %vm224_vm2, %v2183_v5  ;;  %225 = vst.msk [vmem:[#allocation2] sm:$0xff] (!%p167_p3), %vm224_vm2, %v2183_v5  ;;  %v2460_v2 = vld [vmem:[%s2826_s2] ss:$0 sm:$0xff] (!%p167_p3)  ;;  %vm1636_vm4 = vcmask (!%p167_p3), 125952  }
   0x9   : > { %v2239_v4 = vsel (!%p167_p3), %vm690_vm1, %v691_v3, 0  ;;  %226 = vst.msk [vmem:[#allocation2 + $0x8] sm:$0xff] (!%p167_p3), %vm224_vm2, %v2183_v5  ;;  %228 = vst.msk [vmem:[#allocation2 + $0x18] sm:$0xff] (!%p167_p3), %vm224_vm2, %v2183_v5 }
   0xa   : > { %229 = vst.msk [vmem:[#allocation2 + $0x20] sm:$0xff] (!%p167_p3), %vm224_vm2, %v2183_v5  ;;  %230 = vst.msk [vmem:[#allocation2 + $0x28] sm:$0xff] (!%p167_p3), %vm224_vm2, %v2183_v5  ;;  %v694_v6 = vand.u32 (!%p167_p3), %v2230_v1, %v2239_v4 }
   0xb   : > { %231 = vst.msk [vmem:[#allocation2 + $0x30] sm:$0xff] (!%p167_p3), %vm224_vm2, %v2183_v5  ;;  %232 = vst.msk [vmem:[#allocation2 + $0x38] sm:$0xff] (!%p167_p3), %vm224_vm2, %v2183_v5 }
   0xc   : > { %233 = vst.msk [vmem:[#allocation2 + $0x40] sm:$0xff] (!%p167_p3), %vm224_vm2, %v2183_v5  ;;  %234 = vst.msk [vmem:[#allocation2 + $0x48] sm:$0xff] (!%p167_p3), %vm224_vm2, %v2183_v5  ;;  %2027 = vmatprep.subr.bf16.mxu0 (!%p167_p3), %v694_v6  ;;  %2094 = vmatprep.subr.bf16.mxu1 (!%p167_p3), %v694_v6 }
   0xd   : > { %235 = vst.msk [vmem:[#allocation2 + $0x50] sm:$0xff] (!%p167_p3), %vm224_vm2, %v2183_v5  ;;  %236 = vst.msk [vmem:[#allocation2 + $0x58] sm:$0xff] (!%p167_p3), %vm224_vm2, %v2183_v5  ;;  %2028 = vmatpush3.bf16.msra.mxu0 (!%p167_p3), %v694_v6  ;;  %2096 = vmatpush3.bf16.msra.mxu1 (!%p167_p3), %v694_v6 }
   0xe   : > { %237 = vst.msk [vmem:[#allocation2 + $0x60] sm:$0xff] %vm224_vm2, %v2183_v5  ;;  %238 = vst.msk [vmem:[#allocation2 + $0x68] sm:$0xff] %vm224_vm2, %v2183_v5  ;;  %s2834_s20 = smov (!%p2235_p4, %s1790_s20), 255 }
   0xf   : > { %239 = vst.msk [vmem:[#allocation2 + $0x70] sm:$0xff] %vm224_vm2, %v2183_v5  ;;  %240 = vst.msk [vmem:[#allocation2 + $0x78] sm:$0xff] %vm224_vm2, %v2183_v5  ;;  %s1791_s22 = sshll.u32 %s2834_s20, 2  ;;  %v291_v39 = vld [vmem:[#allocation2 + $0x10] sm:$0xff]  ;;  %v289_v41 = vld [vmem:[#allocation2] sm:$0xff] }
  0x10   : > { %241 = vst.msk [vmem:[#allocation2 + $0x80] sm:$0xff] %vm224_vm2, %v2183_v5  ;;  %242 = vst.msk [vmem:[#allocation2 + $0x88] sm:$0xff] %vm224_vm2, %v2183_v5  ;;  %s2383_s25 = scalar_lea.vmem %s2824_s0, %s1791_s22  ;;  %v292_v44 = vld [vmem:[#allocation2 + $0x18] sm:$0xff]  ;;  %v290_v49 = vld [vmem:[#allocation2 + $0x8] sm:$0xff]  ;;  %s2483_s30 = scalar_lea.vmem %s2827_s3, %s1791_s22 }
  0x11   : > { %243 = vst.msk [vmem:[#allocation2 + $0x90] sm:$0xff] %vm224_vm2, %v2183_v5  ;;  %244 = vst.msk [vmem:[#allocation2 + $0x98] sm:$0xff] %vm224_vm2, %v2183_v5  ;;  %v2125_v7 = vld [vmem:[%s2383_s25] sm:$0xff]   ;;  %v2127_v9 = vld [vmem:[%s2383_s25 + $0x8] sm:$0xff]  }
  0x12   : > { %245 = vst.msk [vmem:[#allocation2 + $0xa0] sm:$0xff] %vm224_vm2, %v2183_v5  ;;  %246 = vst.msk [vmem:[#allocation2 + $0xa8] sm:$0xff] %vm224_vm2, %v2183_v5  ;;  %v2126_v8 = vld [vmem:[%s2383_s25 + $0x80] sm:$0xff]   ;;  %2029 = vmatprep.mubr.msk.bf16.mxu0 %vm592_vm3, %v2125_v7  ;;  %v2128_v10 = vld [vmem:[%s2383_s25 + $0x88] sm:$0xff]  }
  0x13   : > { %247 = vst.msk [vmem:[#allocation2 + $0xb0] sm:$0xff] %vm224_vm2, %v2183_v5  ;;  %248 = vst.msk [vmem:[#allocation2 + $0xb8] sm:$0xff] %vm224_vm2, %v2183_v5  ;;  %2061 = vmatprep.mubr.msk.bf16.mxu1 %vm592_vm3, %v2126_v8  ;;  %2030 = vmatmul.mubr.msk.bf16.vlgmr.msra.gmra.mrb[0].mxu0 %vm592_vm3, %v2127_v9  ;;  %v2129_v11 = vld [vmem:[%s2383_s25 + $0x10] sm:$0xff]   ;;  %v2131_v13 = vld [vmem:[%s2383_s25 + $0x18] sm:$0xff]  }
  0x14   : > { %249 = vst.msk [vmem:[#allocation2 + $0xc0] sm:$0xff] %vm224_vm2, %v2183_v5  ;;  %250 = vst.msk [vmem:[#allocation2 + $0xc8] sm:$0xff] %vm224_vm2, %v2183_v5  ;;  %2062 = vmatmul.mubr.msk.bf16.vlgmr.msra.gmra.mrb[0].mxu1 %vm592_vm3, %v2128_v10  ;;  %v2130_v12 = vld [vmem:[%s2383_s25 + $0x90] sm:$0xff]   ;;  %2033 = vmatprep.mubr.msk.bf16.mxu0 %vm592_vm3, %v2129_v11  ;;  %v2132_v14 = vld [vmem:[%s2383_s25 + $0x98] sm:$0xff]  }
  0x15   : > { %251 = vst.msk [vmem:[#allocation2 + $0xd0] sm:$0xff] %vm224_vm2, %v2183_v5  ;;  %252 = vst.msk [vmem:[#allocation2 + $0xd8] sm:$0xff] %vm224_vm2, %v2183_v5  ;;  %2065 = vmatprep.mubr.msk.bf16.mxu1 %vm592_vm3, %v2130_v12  ;;  %v2133_v15 = vld [vmem:[%s2383_s25 + $0x20] sm:$0xff]   ;;  %v2135_v17 = vld [vmem:[%s2383_s25 + $0x28] sm:$0xff]  }
  0x16   : > { %253 = vst.msk [vmem:[#allocation2 + $0xe0] sm:$0xff] %vm224_vm2, %v2183_v5  ;;  %254 = vst.msk [vmem:[#allocation2 + $0xe8] sm:$0xff] %vm224_vm2, %v2183_v5  ;;  %v2134_v16 = vld [vmem:[%s2383_s25 + $0xa0] sm:$0xff]   ;;  %v2136_v18 = vld [vmem:[%s2383_s25 + $0xa8] sm:$0xff]  }
  0x17   : > { %255 = vst.msk [vmem:[#allocation2 + $0xf0] sm:$0xff] %vm224_vm2, %v2183_v5  ;;  %256 = vst.msk [vmem:[#allocation2 + $0xf8] sm:$0xff] %vm224_vm2, %v2183_v5  ;;  %v2137_v19 = vld [vmem:[%s2383_s25 + $0x30] sm:$0xff]   ;;  %v2139_v21 = vld [vmem:[%s2383_s25 + $0x38] sm:$0xff]  }
  0x18   : > { %257 = vst.msk [vmem:[#allocation2 + $0x100] sm:$0xff] %vm224_vm2, %v2183_v5  ;;  %258 = vst.msk [vmem:[#allocation2 + $0x108] sm:$0xff] %vm224_vm2, %v2183_v5  ;;  %v2138_v20 = vld [vmem:[%s2383_s25 + $0xb0] sm:$0xff]   ;;  %v2140_v22 = vld [vmem:[%s2383_s25 + $0xb8] sm:$0xff]  }
  0x19   : > { %259 = vst.msk [vmem:[#allocation2 + $0x110] sm:$0xff] %vm224_vm2, %v2183_v5  ;;  %260 = vst.msk [vmem:[#allocation2 + $0x118] sm:$0xff] %vm224_vm2, %v2183_v5  ;;  %v2141_v23 = vld [vmem:[%s2383_s25 + $0x40] sm:$0xff]   ;;  %v2143_v25 = vld [vmem:[%s2383_s25 + $0x48] sm:$0xff]  }
  0x1a   : > { %261 = vst.msk [vmem:[#allocation2 + $0x120] sm:$0xff] %vm224_vm2, %v2183_v5  ;;  %262 = vst.msk [vmem:[#allocation2 + $0x128] sm:$0xff] %vm224_vm2, %v2183_v5  ;;  %v2142_v24 = vld [vmem:[%s2383_s25 + $0xc0] sm:$0xff]   ;;  %v2144_v26 = vld [vmem:[%s2383_s25 + $0xc8] sm:$0xff]  }
  0x1b   : > { %263 = vst.msk [vmem:[#allocation2 + $0x130] sm:$0xff] %vm224_vm2, %v2183_v5  ;;  %264 = vst.msk [vmem:[#allocation2 + $0x138] sm:$0xff] %vm224_vm2, %v2183_v5  ;;  %2034 = vmatmul.mubr.msk.bf16.gmra.mrb[4].mxu0 %vm592_vm3, %v2131_v13  ;;  %v2145_v27 = vld [vmem:[%s2383_s25 + $0x50] sm:$0xff]   ;;  %v2147_v29 = vld [vmem:[%s2383_s25 + $0x58] sm:$0xff]  }
  0x1c   : > { %265 = vst.msk [vmem:[#allocation2 + $0x140] sm:$0xff] %vm224_vm2, %v2183_v5  ;;  %266 = vst.msk [vmem:[#allocation2 + $0x148] sm:$0xff] %vm224_vm2, %v2183_v5  ;;  %2066 = vmatmul.mubr.msk.bf16.gmra.mrb[4].mxu1 %vm592_vm3, %v2132_v14  ;;  %2037 = vmatprep.mubr.msk.bf16.mxu0 %vm592_vm3, %v2133_v15  ;;  %v2146_v28 = vld [vmem:[%s2383_s25 + $0xd0] sm:$0xff]   ;;  %v2148_v30 = vld [vmem:[%s2383_s25 + $0xd8] sm:$0xff]  }
  0x1d   : > { %267 = vst.msk [vmem:[#allocation2 + $0x150] sm:$0xff] %vm224_vm2, %v2183_v5  ;;  %268 = vst.msk [vmem:[#allocation2 + $0x158] sm:$0xff] %vm224_vm2, %v2183_v5  ;;  %2069 = vmatprep.mubr.msk.bf16.mxu1 %vm592_vm3, %v2134_v16  ;;  %v2149_v31 = vld [vmem:[%s2383_s25 + $0x60] sm:$0xff]   ;;  %v2151_v33 = vld [vmem:[%s2383_s25 + $0x68] sm:$0xff]  }
  0x1e   : > { %269 = vst.msk [vmem:[#allocation2 + $0x160] sm:$0xff] %vm224_vm2, %v2183_v5  ;;  %270 = vst.msk [vmem:[#allocation2 + $0x168] sm:$0xff] %vm224_vm2, %v2183_v5  ;;  %v2150_v32 = vld [vmem:[%s2383_s25 + $0xe0] sm:$0xff]   ;;  %v2152_v34 = vld [vmem:[%s2383_s25 + $0xe8] sm:$0xff]  }
  0x1f   : > { %271 = vst.msk [vmem:[#allocation2 + $0x170] sm:$0xff] %vm224_vm2, %v2183_v5  ;;  %272 = vst.msk [vmem:[#allocation2 + $0x178] sm:$0xff] %vm224_vm2, %v2183_v5  ;;  %v2153_v35 = vld [vmem:[%s2383_s25 + $0x70] sm:$0xff]   ;;  %v2155_v37 = vld [vmem:[%s2383_s25 + $0x78] sm:$0xff]  }
  0x20   : > { %273 = vst.msk [vmem:[#allocation2 + $0x180] sm:$0xff] %vm224_vm2, %v2183_v5  ;;  %274 = vst.msk [vmem:[#allocation2 + $0x188] sm:$0xff] %vm224_vm2, %v2183_v5  ;;  %v2154_v36 = vld [vmem:[%s2383_s25 + $0xf0] sm:$0xff]   ;;  %v2156_v38 = vld [vmem:[%s2383_s25 + $0xf8] sm:$0xff]  }
  0x21   : > { %275 = vst.msk [vmem:[#allocation2 + $0x190] sm:$0xff] %vm224_vm2, %v2183_v5  ;;  %276 = vst.msk [vmem:[#allocation2 + $0x198] sm:$0xff] %vm224_vm2, %v2183_v5  ;;  %v323_v40 = vld [vmem:[#allocation2 + $0x110] sm:$0xff]  ;;  %v321_v43 = vld [vmem:[#allocation2 + $0x100] sm:$0xff] }
  0x22   : > { %277 = vst.msk [vmem:[#allocation2 + $0x1a0] sm:$0xff] %vm224_vm2, %v2183_v5  ;;  %278 = vst.msk [vmem:[#allocation2 + $0x1a8] sm:$0xff] %vm224_vm2, %v2183_v5  ;;  %v324_v48 = vld [vmem:[#allocation2 + $0x118] sm:$0xff]  ;;  %v322_v54 = vld [vmem:[#allocation2 + $0x108] sm:$0xff] }
  0x23   : > { %279 = vst.msk [vmem:[#allocation2 + $0x1b0] sm:$0xff] %vm224_vm2, %v2183_v5  ;;  %280 = vst.msk [vmem:[#allocation2 + $0x1b8] sm:$0xff] %vm224_vm2, %v2183_v5  ;;  %2038 = vmatmul.mubr.msk.bf16.gmra.mrb[8].mxu0 %vm592_vm3, %v2135_v17  ;;  %v295_v63 = vld [vmem:[#allocation2 + $0x30] sm:$0xff]  ;;  %v293_v1 = vld [vmem:[#allocation2 + $0x20] sm:$0xff] }
  0x24   : > { %281 = vst.msk [vmem:[#allocation2 + $0x1c0] sm:$0xff] %vm224_vm2, %v2183_v5  ;;  %282 = vst.msk [vmem:[#allocation2 + $0x1c8] sm:$0xff] %vm224_vm2, %v2183_v5  ;;  %2070 = vmatmul.mubr.msk.bf16.gmra.mrb[8].mxu1 %vm592_vm3, %v2136_v18  ;;  %2041 = vmatprep.mubr.msk.bf16.mxu0 %vm592_vm3, %v2137_v19  ;;  %v327_v0 = vld [vmem:[#allocation2 + $0x130] sm:$0xff]  ;;  %v325_v4 = vld [vmem:[#allocation2 + $0x120] sm:$0xff] }
  0x25   : > { %283 = vst.msk [vmem:[#allocation2 + $0x1d0] sm:$0xff] %vm224_vm2, %v2183_v5  ;;  %284 = vst.msk [vmem:[#allocation2 + $0x1d8] sm:$0xff] %vm224_vm2, %v2183_v5  ;;  %2073 = vmatprep.mubr.msk.bf16.mxu1 %vm592_vm3, %v2138_v20  ;;  %v328_v9 = vld [vmem:[#allocation2 + $0x138] sm:$0xff]  ;;  %v294_v10 = vld [vmem:[#allocation2 + $0x28] sm:$0xff] }
  0x26   : > { %285 = vst.msk [vmem:[#allocation2 + $0x1e0] sm:$0xff] %vm224_vm2, %v2183_v5  ;;  %286 = vst.msk [vmem:[#allocation2 + $0x1e8] sm:$0xff] %vm224_vm2, %v2183_v5  ;;  %v326_v16 = vld [vmem:[#allocation2 + $0x128] sm:$0xff] }
  0x27   : > { %287 = vst.msk [vmem:[#allocation2 + $0x1f0] sm:$0xff] %vm224_vm2, %v2183_v5  ;;  %288 = vst.msk [vmem:[#allocation2 + $0x1f8] sm:$0xff] %vm224_vm2, %v2183_v5  ;;  %v296_v5 = vld [vmem:[#allocation2 + $0x38] sm:$0xff] }
  0x2b   : > { %2042 = vmatmul.mubr.msk.bf16.gmra.mrb[12].mxu0 %vm592_vm3, %v2139_v21 }
  0x2c   : > { %2074 = vmatmul.mubr.msk.bf16.gmra.mrb[12].mxu1 %vm592_vm3, %v2140_v22  ;;  %2045 = vmatprep.mubr.msk.bf16.mxu0 %vm592_vm3, %v2141_v23 }
  0x2d   : > { %2077 = vmatprep.mubr.msk.bf16.mxu1 %vm592_vm3, %v2142_v24 }
  0x33   : > { %2046 = vmatmul.mubr.msk.bf16.gmra.mrb[16].mxu0 %vm592_vm3, %v2143_v25 }
  0x34   : > { %2078 = vmatmul.mubr.msk.bf16.gmra.mrb[16].mxu1 %vm592_vm3, %v2144_v26  ;;  %2049 = vmatprep.mubr.msk.bf16.mxu0 %vm592_vm3, %v2145_v27 }
  0x35   : > { %2081 = vmatprep.mubr.msk.bf16.mxu1 %vm592_vm3, %v2146_v28 }
  0x3b   : > { %2050 = vmatmul.mubr.msk.bf16.gmra.mrb[20].mxu0 %vm592_vm3, %v2147_v29 }
  0x3c   : > { %2082 = vmatmul.mubr.msk.bf16.gmra.mrb[20].mxu1 %vm592_vm3, %v2148_v30  ;;  %2053 = vmatprep.mubr.msk.bf16.mxu0 %vm592_vm3, %v2149_v31 }
  0x3d   : > { %2085 = vmatprep.mubr.msk.bf16.mxu1 %vm592_vm3, %v2150_v32 }
  0x43   : > { %2054 = vmatmul.mubr.msk.bf16.gmra.mrb[24].mxu0 %vm592_vm3, %v2151_v33 }
  0x44   : > { %2086 = vmatmul.mubr.msk.bf16.gmra.mrb[24].mxu1 %vm592_vm3, %v2152_v34  ;;  %2057 = vmatprep.mubr.msk.bf16.mxu0 %vm592_vm3, %v2153_v35 }
  0x45   : > { %2089 = vmatprep.mubr.msk.bf16.mxu1 %vm592_vm3, %v2154_v36 }
  0x4b   : > { %2058 = vmatmul.mubr.msk.bf16.gmra.mrb[28].mxu0 %vm592_vm3, %v2155_v37 }
  0x4c   : > { %2090 = vmatmul.mubr.msk.bf16.gmra.mrb[28].mxu1 %vm592_vm3, %v2156_v38 }
  0xe6   : > { %v2031_v42 = vpop.f32.mrb[0].mxu0 }
  0xe7   : > { %v987_v45 = vadd.f32 %v2031_v42, %v291_v39  ;;  %v2063_v46 = vpop.f32.mrb[0].mxu1  ;;  %v730_v47 = vpop.f32.mrb[1].mxu0 }
  0xe8   : > { %v1019_v50 = vadd.f32 %v2063_v46, %v323_v40  ;;  %v985_v51 = vadd.f32 %v730_v47, %v289_v41  ;;  %v858_v52 = vpop.f32.mrb[1].mxu1  ;;  %v2032_v53 = vpop.f32.mrb[2].mxu0 }
  0xe9   : > { %1052 = vst.msk [vmem:[#allocation2 + $0x10] sm:$0xff] %vm224_vm2, %v987_v45  ;;  %v1017_v55 = vadd.f32 %v858_v52, %v321_v43  ;;  %v988_v56 = vadd.f32 %v2032_v53, %v292_v44  ;;  %v2064_v57 = vpop.f32.mrb[2].mxu1  ;;  %v733_v58 = vpop.f32.mrb[3].mxu0 }
  0xea   : > { %1084 = vst.msk [vmem:[#allocation2 + $0x110] sm:$0xff] %vm224_vm2, %v1019_v50  ;;  %1050 = vst.msk [vmem:[#allocation2] sm:$0xff] %vm224_vm2, %v985_v51  ;;  %v1020_v59 = vadd.f32 %v2064_v57, %v324_v48  ;;  %v986_v60 = vadd.f32 %v733_v58, %v290_v49  ;;  %v861_v61 = vpop.f32.mrb[3].mxu1 }
  0xeb   : > { %1082 = vst.msk [vmem:[#allocation2 + $0x100] sm:$0xff] %vm224_vm2, %v1017_v55  ;;  %1053 = vst.msk [vmem:[#allocation2 + $0x18] sm:$0xff] %vm224_vm2, %v988_v56  ;;  %v1018_v62 = vadd.f32 %v861_v61, %v322_v54 }
  0xec   : > { %1085 = vst.msk [vmem:[#allocation2 + $0x118] sm:$0xff] %vm224_vm2, %v1020_v59  ;;  %1051 = vst.msk [vmem:[#allocation2 + $0x8] sm:$0xff] %vm224_vm2, %v986_v60 }
  0xed   : > { %1083 = vst.msk [vmem:[#allocation2 + $0x108] sm:$0xff] %vm224_vm2, %v1018_v62 }
  0xee   : > { %v2035_v3 = vpop.f32.mrb[4].mxu0 }
  0xef   : > { %v991_v6 = vadd.f32 %v2035_v3, %v295_v63  ;;  %v2067_v7 = vpop.f32.mrb[4].mxu1  ;;  %v746_v8 = vpop.f32.mrb[5].mxu0 }
  0xf0   : > { %v1119_v11 = vld [vmem:[#allocation2 + $0x10] sm:$0xff]  ;;  %v1023_v12 = vadd.f32 %v2067_v7, %v327_v0  ;;  %v989_v13 = vadd.f32 %v746_v8, %v293_v1  ;;  %v874_v14 = vpop.f32.mrb[5].mxu1  ;;  %v2036_v15 = vpop.f32.mrb[6].mxu0 }
  0xf1   : > { %v1190_v17 = vadd.f32 %v2460_v2, %v1119_v11  ;;  %v1151_v18 = vld [vmem:[#allocation2 + $0x110] sm:$0xff]  ;;  %v1117_v19 = vld [vmem:[#allocation2] sm:$0xff]  ;;  %1056 = vst.msk [vmem:[#allocation2 + $0x30] sm:$0xff] %vm224_vm2, %v991_v6  ;;  %v1021_v20 = vadd.f32 %v874_v14, %v325_v4  ;;  %v992_v21 = vadd.f32 %v2036_v15, %v296_v5  ;;  %v2068_v22 = vpop.f32.mrb[6].mxu1  ;;  %v749_v23 = vpop.f32.mrb[7].mxu0 }
  0xf2   : > { %v1222_v24 = vadd.f32 %v2460_v2, %v1151_v18  ;;  %v1188_v25 = vadd.f32 %v2460_v2, %v1117_v19  ;;  %v1149_v26 = vld [vmem:[#allocation2 + $0x100] sm:$0xff]  ;;  %v1120_v27 = vld [vmem:[#allocation2 + $0x18] sm:$0xff]  ;;  %1088 = vst.msk [vmem:[#allocation2 + $0x130] sm:$0xff] %vm224_vm2, %v1023_v12  ;;  %1054 = vst.msk [vmem:[#allocation2 + $0x20] sm:$0xff] %vm224_vm2, %v989_v13  ;;  %v1024_v28 = vadd.f32 %v2068_v22, %v328_v9  ;;  %v877_v30 = vpop.f32.mrb[7].mxu1 }
  0xf3   : > { %v990_v29 = vadd.f32 %v749_v23, %v294_v10  ;;  %v1254_v31 = vmul.f32 0.2, %v1190_v17  ;;  %v1220_v32 = vadd.f32 %v2460_v2, %v1149_v26  ;;  %v1191_v33 = vadd.f32 %v2460_v2, %v1120_v27  ;;  %v1152_v34 = vld [vmem:[#allocation2 + $0x118] sm:$0xff]  ;;  %v1118_v35 = vld [vmem:[#allocation2 + $0x8] sm:$0xff]  ;;  %1086 = vst.msk [vmem:[#allocation2 + $0x120] sm:$0xff] %vm224_vm2, %v1021_v20  ;;  %1057 = vst.msk [vmem:[#allocation2 + $0x38] sm:$0xff] %vm224_vm2, %v992_v21 }
  0xf4   : > { %v1022_v36 = vadd.f32 %v877_v30, %v326_v16  ;;  %v1286_v37 = vmul.f32 0.2, %v1222_v24  ;;  %v1252_v38 = vmul.f32 0.2, %v1188_v25  ;;  %v1223_v39 = vadd.f32 %v2460_v2, %v1152_v34  ;;  %v1150_v41 = vld [vmem:[#allocation2 + $0x108] sm:$0xff]  ;;  %1089 = vst.msk [vmem:[#allocation2 + $0x138] sm:$0xff] %vm224_vm2, %v1024_v28 }
  0xf5   : > { %v1189_v40 = vadd.f32 %v2460_v2, %v1118_v35  ;;  %1055 = vst.msk [vmem:[#allocation2 + $0x28] sm:$0xff] %vm224_vm2, %v990_v29  ;;  %v1318_v42 = vmax.f32 %v1190_v17, %v1254_v31  ;;  %v1284_v43 = vmul.f32 0.2, %v1220_v32  ;;  %v1255_v44 = vmul.f32 0.2, %v1191_v33  ;;  %v299_v31 = vld [vmem:[#allocation2 + $0x50] sm:$0xff] }
  0xf6   : > { %v1221_v45 = vadd.f32 %v2460_v2, %v1150_v41  ;;  %1087 = vst.msk [vmem:[#allocation2 + $0x128] sm:$0xff] %vm224_vm2, %v1022_v36  ;;  %v1350_v46 = vmax.f32 %v1222_v24, %v1286_v37  ;;  %v1316_v47 = vmax.f32 %v1188_v25, %v1252_v38  ;;  %v1287_v48 = vmul.f32 0.2, %v1223_v39  ;;  %v2485_v50 = vpop.f32.mrb[8].mxu0  ;;  %v297_v37 = vld [vmem:[#allocation2 + $0x40] sm:$0xff] }
  0xf7   : > { %v1253_v49 = vmul.f32 0.2, %v1189_v40  ;;  %v1929_v51 = vpack.c.bf16 %v1318_v42, %v1318_v42  ;;  %v1348_v52 = vmax.f32 %v1220_v32, %v1284_v43  ;;  %v1319_v53 = vmax.f32 %v1191_v33, %v1255_v44  ;;  %v2487_v55 = vpop.f32.mrb[8].mxu1  ;;  %v2489_v56 = vpop.f32.mrb[9].mxu0  ;;  %v331_v32 = vld [vmem:[#allocation2 + $0x150] sm:$0xff]  ;;  %v329_v43 = vld [vmem:[#allocation2 + $0x140] sm:$0xff] }
  0xf8   : > { %v1285_v54 = vmul.f32 0.2, %v1221_v45  ;;  %v1961_v57 = vpack.c.bf16 %v1350_v46, %v1350_v46  ;;  %v1927_v58 = vpack.c.bf16 %v1316_v47, %v1316_v47  ;;  %v1351_v59 = vmax.f32 %v1223_v39, %v1287_v48  ;;  %v1123_v61 = vld [vmem:[#allocation2 + $0x30] sm:$0xff]  ;;  %v2491_v62 = vpop.f32.mrb[9].mxu1  ;;  %v2493_v63 = vpop.f32.mrb[10].mxu0  ;;  %v300_v44 = vld [vmem:[#allocation2 + $0x58] sm:$0xff] }
  0xf9   : > { %v1317_v60 = vmax.f32 %v1189_v40, %v1253_v49  ;;  %1639 = vst.msk [vmem:[%s2483_s30 + $0x8] sm:$0xf] %vm1636_vm4, %v1929_v51  ;;  %v1959_v0 = vpack.c.bf16 %v1348_v52, %v1348_v52  ;;  %v1930_v1 = vpack.c.bf16 %v1319_v53, %v1319_v53  ;;  %v1194_v4 = vadd.f32 %v2460_v2, %v1123_v61  ;;  %v1155_v5 = vld [vmem:[#allocation2 + $0x130] sm:$0xff]  ;;  %v1121_v6 = vld [vmem:[#allocation2 + $0x20] sm:$0xff]  ;;  %v2498_v7 = vpop.f32.mrb[10].mxu1  ;;  %v2500_v8 = vpop.f32.mrb[11].mxu0 }
  0xfa   : > { %v1349_v3 = vmax.f32 %v1221_v45, %v1285_v54  ;;  %1671 = vst.msk [vmem:[%s2483_s30 + $0x88] sm:$0xf] %vm1636_vm4, %v1961_v57  ;;  %1637 = vst.msk [vmem:[%s2483_s30] sm:$0xf] %vm1636_vm4, %v1927_v58  ;;  %v1962_v9 = vpack.c.bf16 %v1351_v59, %v1351_v59  ;;  %v1226_v11 = vadd.f32 %v2460_v2, %v1155_v5  ;;  %v1153_v13 = vld [vmem:[#allocation2 + $0x120] sm:$0xff]  ;;  %v1124_v14 = vld [vmem:[#allocation2 + $0x38] sm:$0xff] }
  0xfb   : > { %v1928_v10 = vpack.c.bf16 %v1317_v60, %v1317_v60  ;;  %v1192_v12 = vadd.f32 %v2460_v2, %v1121_v6  ;;  %v2508_v15 = vpop.f32.mrb[11].mxu1  ;;  %1669 = vst.msk [vmem:[%s2483_s30 + $0x80] sm:$0xf] %vm1636_vm4, %v1959_v0  ;;  %1640 = vst.msk [vmem:[%s2483_s30 + $0xc] sm:$0xf] %vm1636_vm4, %v1930_v1  ;;  %v1224_v18 = vadd.f32 %v2460_v2, %v1153_v13  ;;  %v1156_v20 = vld [vmem:[#allocation2 + $0x138] sm:$0xff] }
  0xfc   : > { %v1960_v16 = vpack.c.bf16 %v1349_v3, %v1349_v3  ;;  %v1258_v17 = vmul.f32 0.2, %v1194_v4  ;;  %v1195_v19 = vadd.f32 %v2460_v2, %v1124_v14  ;;  %v1122_v21 = vld [vmem:[#allocation2 + $0x28] sm:$0xff]  ;;  %1672 = vst.msk [vmem:[%s2483_s30 + $0x8c] sm:$0xf] %vm1636_vm4, %v1962_v9  ;;  %v1227_v24 = vadd.f32 %v2460_v2, %v1156_v20  ;;  %v332_v52 = vld [vmem:[#allocation2 + $0x158] sm:$0xff] }
  0xfd   : > { %1638 = vst.msk [vmem:[%s2483_s30 + $0x4] sm:$0xf] %vm1636_vm4, %v1928_v10  ;;  %v1290_v22 = vmul.f32 0.2, %v1226_v11  ;;  %v1256_v23 = vmul.f32 0.2, %v1192_v12  ;;  %v1193_v25 = vadd.f32 %v2460_v2, %v1122_v21  ;;  %v995_v0 = vadd.f32 %v2485_v50, %v299_v31 }
  0xfe   : > { %v1154_v26 = vld [vmem:[#allocation2 + $0x128] sm:$0xff]  ;;  %1670 = vst.msk [vmem:[%s2483_s30 + $0x84] sm:$0xf] %vm1636_vm4, %v1960_v16  ;;  %v1322_v27 = vmax.f32 %v1194_v4, %v1258_v17  ;;  %v1288_v28 = vmul.f32 0.2, %v1224_v18  ;;  %v2043_v38 = vpop.f32.mrb[12].mxu0 }
  0xff   : > { %v1259_v29 = vmul.f32 0.2, %v1195_v19  ;;  %v1225_v30 = vadd.f32 %v2460_v2, %v1154_v26  ;;  %v1354_v33 = vmax.f32 %v1226_v11, %v1290_v22  ;;  %v1320_v34 = vmax.f32 %v1192_v12, %v1256_v23  ;;  %v2075_v45 = vpop.f32.mrb[12].mxu1  ;;  %v778_v46 = vpop.f32.mrb[13].mxu0  ;;  %v298_v53 = vld [vmem:[#allocation2 + $0x48] sm:$0xff]  ;;  %v303_v1 = vld [vmem:[#allocation2 + $0x70] sm:$0xff] }
 0x100   : > { %v1291_v35 = vmul.f32 0.2, %v1227_v24  ;;  %v1257_v36 = vmul.f32 0.2, %v1193_v25  ;;  %v1933_v39 = vpack.c.bf16 %v1322_v27, %v1322_v27  ;;  %v1352_v40 = vmax.f32 %v1224_v18, %v1288_v28  ;;  %v330_v54 = vld [vmem:[#allocation2 + $0x148] sm:$0xff]  ;;  %v906_v57 = vpop.f32.mrb[13].mxu1 }
 0x101   : > { %v1323_v41 = vmax.f32 %v1195_v19, %v1259_v29  ;;  %v1289_v42 = vmul.f32 0.2, %v1225_v30  ;;  %v1965_v47 = vpack.c.bf16 %v1354_v33, %v1354_v33  ;;  %v1931_v48 = vpack.c.bf16 %v1320_v34, %v1320_v34  ;;  %v2044_v58 = vpop.f32.mrb[14].mxu0  ;;  %v335_v3 = vld [vmem:[#allocation2 + $0x170] sm:$0xff]  ;;  %v301_v4 = vld [vmem:[#allocation2 + $0x60] sm:$0xff]  ;;  %v2076_v5 = vpop.f32.mrb[14].mxu1 }
 0x102   : > { %v1355_v49 = vmax.f32 %v1227_v24, %v1291_v35  ;;  %v1321_v51 = vmax.f32 %v1193_v25, %v1257_v36  ;;  %1643 = vst.msk [vmem:[%s2483_s30 + $0x18] sm:$0xf] %vm1636_vm4, %v1933_v39  ;;  %v1963_v59 = vpack.c.bf16 %v1352_v40, %v1352_v40  ;;  %v781_v6 = vpop.f32.mrb[15].mxu0  ;;  %v1027_v11 = vadd.f32 %v2487_v55, %v331_v32  ;;  %v333_v50 = vld [vmem:[#allocation2 + $0x160] sm:$0xff]  ;;  %v304_v13 = vld [vmem:[#allocation2 + $0x78] sm:$0xff]  ;;  %v909_v16 = vpop.f32.mrb[15].mxu1 }
 0x103   : > { %v1934_v60 = vpack.c.bf16 %v1323_v41, %v1323_v41  ;;  %v1353_v61 = vmax.f32 %v1225_v30, %v1289_v42  ;;  %1675 = vst.msk [vmem:[%s2483_s30 + $0x98] sm:$0xf] %vm1636_vm4, %v1965_v47  ;;  %1641 = vst.msk [vmem:[%s2483_s30 + $0x10] sm:$0xf] %vm1636_vm4, %v1931_v48  ;;  %v993_v12 = vadd.f32 %v2489_v56, %v297_v37  ;;  %v336_v14 = vld [vmem:[#allocation2 + $0x178] sm:$0xff]  ;;  %v302_v20 = vld [vmem:[#allocation2 + $0x68] sm:$0xff] }
 0x104   : > { %v1966_v9 = vpack.c.bf16 %v1355_v49, %v1355_v49  ;;  %v1932_v10 = vpack.c.bf16 %v1321_v51, %v1321_v51  ;;  %1673 = vst.msk [vmem:[%s2483_s30 + $0x90] sm:$0xf] %vm1636_vm4, %v1963_v59  ;;  %v1025_v18 = vadd.f32 %v2491_v62, %v329_v43  ;;  %v996_v19 = vadd.f32 %v2493_v63, %v300_v44  ;;  %v334_v56 = vld [vmem:[#allocation2 + $0x168] sm:$0xff]  ;;  %v307_v24 = vld [vmem:[#allocation2 + $0x90] sm:$0xff]  ;;  %v305_v28 = vld [vmem:[#allocation2 + $0x80] sm:$0xff] }
 0x105   : > { %1644 = vst.msk [vmem:[%s2483_s30 + $0x1c] sm:$0xf] %vm1636_vm4, %v1934_v60  ;;  %v1964_v17 = vpack.c.bf16 %v1353_v61, %v1353_v61  ;;  %v1028_v55 = vadd.f32 %v2498_v7, %v332_v52  ;;  %v994_v21 = vadd.f32 %v2500_v8, %v298_v53  ;;  %v1026_v22 = vadd.f32 %v2508_v15, %v330_v54  ;;  %v339_v27 = vld [vmem:[#allocation2 + $0x190] sm:$0xff]  ;;  %v337_v30 = vld [vmem:[#allocation2 + $0x180] sm:$0xff]  ;;  %v308_v31 = vld [vmem:[#allocation2 + $0x98] sm:$0xff] }
 0x106   : > { %1060 = vst.msk [vmem:[#allocation2 + $0x50] sm:$0xff] %vm224_vm2, %v995_v0  ;;  %1092 = vst.msk [vmem:[#allocation2 + $0x150] sm:$0xff] %vm224_vm2, %v1027_v11  ;;  %v999_v23 = vadd.f32 %v2043_v38, %v303_v1  ;;  %v1031_v62 = vadd.f32 %v2075_v45, %v335_v3  ;;  %v997_v63 = vadd.f32 %v778_v46, %v301_v4  ;;  %v2047_v29 = vpop.f32.mrb[16].mxu0  ;;  %v340_v35 = vld [vmem:[#allocation2 + $0x198] sm:$0xff]  ;;  %v306_v36 = vld [vmem:[#allocation2 + $0x88] sm:$0xff] }
 0x107   : > { %1676 = vst.msk [vmem:[%s2483_s30 + $0x9c] sm:$0xf] %vm1636_vm4, %v1966_v9  ;;  %1642 = vst.msk [vmem:[%s2483_s30 + $0x14] sm:$0xf] %vm1636_vm4, %v1932_v10  ;;  %v1029_v7 = vadd.f32 %v906_v57, %v333_v50  ;;  %v1000_v25 = vadd.f32 %v2044_v58, %v304_v13  ;;  %v1032_v26 = vadd.f32 %v2076_v5, %v336_v14  ;;  %v2079_v33 = vpop.f32.mrb[16].mxu1  ;;  %v794_v34 = vpop.f32.mrb[17].mxu0 }
 0x108   : > { %1058 = vst.msk [vmem:[#allocation2 + $0x40] sm:$0xff] %vm224_vm2, %v993_v12  ;;  %1090 = vst.msk [vmem:[#allocation2 + $0x140] sm:$0xff] %vm224_vm2, %v1025_v18  ;;  %v998_v8 = vadd.f32 %v781_v6, %v302_v20  ;;  %v1030_v15 = vadd.f32 %v909_v16, %v334_v56  ;;  %v1003_v32 = vadd.f32 %v2047_v29, %v307_v24  ;;  %v922_v39 = vpop.f32.mrb[17].mxu1  ;;  %v2048_v40 = vpop.f32.mrb[18].mxu0  ;;  %v338_v41 = vld [vmem:[#allocation2 + $0x188] sm:$0xff] }
 0x109   : > { %1674 = vst.msk [vmem:[%s2483_s30 + $0x94] sm:$0xf] %vm1636_vm4, %v1964_v17  ;;  %v1035_v37 = vadd.f32 %v2079_v33, %v339_v27  ;;  %v1001_v38 = vadd.f32 %v794_v34, %v305_v28  ;;  %v1033_v42 = vadd.f32 %v922_v39, %v337_v30  ;;  %v1004_v43 = vadd.f32 %v2048_v40, %v308_v31  ;;  %v2080_v44 = vpop.f32.mrb[18].mxu1  ;;  %v797_v45 = vpop.f32.mrb[19].mxu0 }
 0x10a   : > { %1061 = vst.msk [vmem:[#allocation2 + $0x58] sm:$0xff] %vm224_vm2, %v996_v19  ;;  %1093 = vst.msk [vmem:[#allocation2 + $0x158] sm:$0xff] %vm224_vm2, %v1028_v55  ;;  %v1036_v47 = vadd.f32 %v2080_v44, %v340_v35  ;;  %v1002_v48 = vadd.f32 %v797_v45, %v306_v36  ;;  %v925_v49 = vpop.f32.mrb[19].mxu1 }
 0x10b   : > { %1059 = vst.msk [vmem:[#allocation2 + $0x48] sm:$0xff] %vm224_vm2, %v994_v21  ;;  %1091 = vst.msk [vmem:[#allocation2 + $0x148] sm:$0xff] %vm224_vm2, %v1026_v22  ;;  %v1034_v54 = vadd.f32 %v925_v49, %v338_v41 }
 0x10c   : > { %1064 = vst.msk [vmem:[#allocation2 + $0x70] sm:$0xff] %vm224_vm2, %v999_v23  ;;  %1096 = vst.msk [vmem:[#allocation2 + $0x170] sm:$0xff] %vm224_vm2, %v1031_v62 }
 0x10d   : > { %1062 = vst.msk [vmem:[#allocation2 + $0x60] sm:$0xff] %vm224_vm2, %v997_v63  ;;  %1094 = vst.msk [vmem:[#allocation2 + $0x160] sm:$0xff] %vm224_vm2, %v1029_v7  ;;  %v1127_v46 = vld [vmem:[#allocation2 + $0x50] sm:$0xff] }
 0x10e   : > { %1065 = vst.msk [vmem:[#allocation2 + $0x78] sm:$0xff] %vm224_vm2, %v1000_v25  ;;  %1097 = vst.msk [vmem:[#allocation2 + $0x178] sm:$0xff] %vm224_vm2, %v1032_v26  ;;  %v1198_v51 = vadd.f32 %v2460_v2, %v1127_v46  ;;  %v1159_v52 = vld [vmem:[#allocation2 + $0x150] sm:$0xff]  ;;  %v2581_v63 = vpop.f32.mrb[20].mxu0 }
 0x10f   : > { %1063 = vst.msk [vmem:[#allocation2 + $0x68] sm:$0xff] %vm224_vm2, %v998_v8  ;;  %1095 = vst.msk [vmem:[#allocation2 + $0x168] sm:$0xff] %vm224_vm2, %v1030_v15  ;;  %v1125_v53 = vld [vmem:[#allocation2 + $0x40] sm:$0xff]  ;;  %v1230_v57 = vadd.f32 %v2460_v2, %v1159_v52  ;;  %v2583_v7 = vpop.f32.mrb[20].mxu1  ;;  %v2585_v30 = vpop.f32.mrb[21].mxu0 }
 0x110   : > { %1068 = vst.msk [vmem:[#allocation2 + $0x90] sm:$0xff] %vm224_vm2, %v1003_v32  ;;  %1100 = vst.msk [vmem:[#allocation2 + $0x190] sm:$0xff] %vm224_vm2, %v1035_v37  ;;  %v1196_v58 = vadd.f32 %v2460_v2, %v1125_v53  ;;  %v1157_v59 = vld [vmem:[#allocation2 + $0x140] sm:$0xff]  ;;  %v1262_v0 = vmul.f32 0.2, %v1198_v51  ;;  %v2587_v31 = vpop.f32.mrb[21].mxu1 }
 0x111   : > { %1066 = vst.msk [vmem:[#allocation2 + $0x80] sm:$0xff] %vm224_vm2, %v1001_v38  ;;  %1098 = vst.msk [vmem:[#allocation2 + $0x180] sm:$0xff] %vm224_vm2, %v1033_v42  ;;  %v1128_v60 = vld [vmem:[#allocation2 + $0x58] sm:$0xff]  ;;  %v1228_v1 = vadd.f32 %v2460_v2, %v1157_v59  ;;  %v1294_v9 = vmul.f32 0.2, %v1230_v57  ;;  %v2592_v38 = vpop.f32.mrb[22].mxu0 }
 0x112   : > { %1069 = vst.msk [vmem:[#allocation2 + $0x98] sm:$0xff] %vm224_vm2, %v1004_v43  ;;  %v1160_v61 = vld [vmem:[#allocation2 + $0x158] sm:$0xff]  ;;  %1101 = vst.msk [vmem:[#allocation2 + $0x198] sm:$0xff] %vm224_vm2, %v1036_v47  ;;  %v1199_v3 = vadd.f32 %v2460_v2, %v1128_v60  ;;  %v1126_v5 = vld [vmem:[#allocation2 + $0x48] sm:$0xff]  ;;  %v1260_v10 = vmul.f32 0.2, %v1196_v58  ;;  %v1326_v50 = vmax.f32 %v1198_v51, %v1262_v0 }
 0x113   : > { %1067 = vst.msk [vmem:[#allocation2 + $0x88] sm:$0xff] %vm224_vm2, %v1002_v48  ;;  %v1231_v4 = vadd.f32 %v2460_v2, %v1160_v61  ;;  %v1158_v6 = vld [vmem:[#allocation2 + $0x148] sm:$0xff]  ;;  %1099 = vst.msk [vmem:[#allocation2 + $0x188] sm:$0xff] %vm224_vm2, %v1034_v54  ;;  %v1197_v11 = vadd.f32 %v2460_v2, %v1126_v5  ;;  %v1292_v13 = vmul.f32 0.2, %v1228_v1  ;;  %v1358_v17 = vmax.f32 %v1230_v57, %v1294_v9  ;;  %v1131_v20 = vld [vmem:[#allocation2 + $0x70] sm:$0xff] }
 0x114   : > { %v1229_v12 = vadd.f32 %v2460_v2, %v1158_v6  ;;  %v1263_v14 = vmul.f32 0.2, %v1199_v3  ;;  %v1324_v18 = vmax.f32 %v1196_v58, %v1260_v10  ;;  %v1937_v56 = vpack.c.bf16 %v1326_v50, %v1326_v50  ;;  %v1163_v62 = vld [vmem:[#allocation2 + $0x170] sm:$0xff]  ;;  %v1129_v24 = vld [vmem:[#allocation2 + $0x60] sm:$0xff]  ;;  %v2594_v39 = vpop.f32.mrb[22].mxu1  ;;  %v2602_v44 = vpop.f32.mrb[23].mxu0 }
 0x115   : > { %v1295_v16 = vmul.f32 0.2, %v1231_v4  ;;  %v1261_v19 = vmul.f32 0.2, %v1197_v11  ;;  %v1356_v21 = vmax.f32 %v1228_v1, %v1292_v13  ;;  %v1969_v25 = vpack.c.bf16 %v1358_v17, %v1358_v17  ;;  %v1161_v8 = vld [vmem:[#allocation2 + $0x160] sm:$0xff]  ;;  %v1132_v15 = vld [vmem:[#allocation2 + $0x78] sm:$0xff] }
 0x116   : > { %v1293_v55 = vmul.f32 0.2, %v1229_v12  ;;  %v1327_v22 = vmax.f32 %v1199_v3, %v1263_v14  ;;  %v1935_v26 = vpack.c.bf16 %v1324_v18, %v1324_v18  ;;  %v1164_v29 = vld [vmem:[#allocation2 + $0x178] sm:$0xff]  ;;  %1647 = vst.msk [vmem:[%s2483_s30 + $0x28] sm:$0xf] %vm1636_vm4, %v1937_v56  ;;  %v1202_v35 = vadd.f32 %v2460_v2, %v1131_v20  ;;  %v1130_v36 = vld [vmem:[#allocation2 + $0x68] sm:$0xff] }
 0x117   : > { %v1359_v23 = vmax.f32 %v1231_v4, %v1295_v16  ;;  %v1325_v27 = vmax.f32 %v1197_v11, %v1261_v19  ;;  %v1967_v32 = vpack.c.bf16 %v1356_v21, %v1356_v21  ;;  %v1162_v37 = vld [vmem:[#allocation2 + $0x168] sm:$0xff]  ;;  %1679 = vst.msk [vmem:[%s2483_s30 + $0xa8] sm:$0xf] %vm1636_vm4, %v1969_v25  ;;  %v1234_v42 = vadd.f32 %v2460_v2, %v1163_v62  ;;  %v2604_v45 = vpop.f32.mrb[23].mxu1  ;;  %v1135_v57 = vld [vmem:[#allocation2 + $0x90] sm:$0xff]  ;;  %v2621_v58 = vpop.f32.mrb[24].mxu0 }
 0x118   : > { %v1357_v28 = vmax.f32 %v1229_v12, %v1293_v55  ;;  %v1938_v33 = vpack.c.bf16 %v1327_v22, %v1327_v22  ;;  %1645 = vst.msk [vmem:[%s2483_s30 + $0x20] sm:$0xf] %vm1636_vm4, %v1935_v26  ;;  %v1200_v43 = vadd.f32 %v2460_v2, %v1129_v24  ;;  %v1266_v46 = vmul.f32 0.2, %v1202_v35  ;;  %v2623_v6 = vpop.f32.mrb[24].mxu1  ;;  %v2625_v9 = vpop.f32.mrb[25].mxu0 }
 0x119   : > { %v1970_v34 = vpack.c.bf16 %v1359_v23, %v1359_v23  ;;  %v1936_v40 = vpack.c.bf16 %v1325_v27, %v1325_v27  ;;  %1677 = vst.msk [vmem:[%s2483_s30 + $0xa0] sm:$0xf] %vm1636_vm4, %v1967_v32  ;;  %v1232_v47 = vadd.f32 %v2460_v2, %v1161_v8  ;;  %v1203_v48 = vadd.f32 %v2460_v2, %v1132_v15  ;;  %v1167_v13 = vld [vmem:[#allocation2 + $0x190] sm:$0xff]  ;;  %v1133_v14 = vld [vmem:[#allocation2 + $0x80] sm:$0xff]  ;;  %v2627_v16 = vpop.f32.mrb[25].mxu1  ;;  %v2629_v17 = vpop.f32.mrb[26].mxu0 }
 0x11a   : > { %v1968_v41 = vpack.c.bf16 %v1357_v28, %v1357_v28  ;;  %1648 = vst.msk [vmem:[%s2483_s30 + $0x2c] sm:$0xf] %vm1636_vm4, %v1938_v33  ;;  %v1235_v49 = vadd.f32 %v2460_v2, %v1164_v29  ;;  %v1298_v51 = vmul.f32 0.2, %v1234_v42  ;;  %v1264_v52 = vmul.f32 0.2, %v1200_v43 }
 0x11b   : > { %1680 = vst.msk [vmem:[%s2483_s30 + $0xac] sm:$0xf] %vm1636_vm4, %v1970_v34  ;;  %1646 = vst.msk [vmem:[%s2483_s30 + $0x24] sm:$0xf] %vm1636_vm4, %v1936_v40  ;;  %v1201_v53 = vadd.f32 %v2460_v2, %v1130_v36  ;;  %v1233_v54 = vadd.f32 %v2460_v2, %v1162_v37  ;;  %v1330_v59 = vmax.f32 %v1202_v35, %v1266_v46  ;;  %v1296_v60 = vmul.f32 0.2, %v1232_v47 }
 0x11c   : > { %1678 = vst.msk [vmem:[%s2483_s30 + $0xa4] sm:$0xf] %vm1636_vm4, %v1968_v41  ;;  %v1267_v61 = vmul.f32 0.2, %v1203_v48  ;;  %v1299_v0 = vmul.f32 0.2, %v1235_v49  ;;  %v1362_v1 = vmax.f32 %v1234_v42, %v1298_v51  ;;  %v1328_v3 = vmax.f32 %v1200_v43, %v1264_v52 }
 0x11d   : > { %v1265_v4 = vmul.f32 0.2, %v1201_v53  ;;  %v1297_v5 = vmul.f32 0.2, %v1233_v54  ;;  %v1941_v10 = vpack.c.bf16 %v1330_v59, %v1330_v59  ;;  %v1360_v11 = vmax.f32 %v1232_v47, %v1296_v60  ;;  %v1165_v56 = vld [vmem:[#allocation2 + $0x180] sm:$0xff]  ;;  %v1136_v21 = vld [vmem:[#allocation2 + $0x98] sm:$0xff] }
 0x11e   : > { %v1331_v12 = vmax.f32 %v1203_v48, %v1267_v61  ;;  %v1363_v50 = vmax.f32 %v1235_v49, %v1299_v0  ;;  %v1973_v18 = vpack.c.bf16 %v1362_v1, %v1362_v1  ;;  %v1939_v19 = vpack.c.bf16 %v1328_v3, %v1328_v3  ;;  %v1168_v22 = vld [vmem:[#allocation2 + $0x198] sm:$0xff]  ;;  %v2631_v23 = vpop.f32.mrb[26].mxu1  ;;  %v2633_v62 = vpop.f32.mrb[27].mxu0  ;;  %v1134_v28 = vld [vmem:[#allocation2 + $0x88] sm:$0xff]  ;;  %v311_v47 = vld [vmem:[#allocation2 + $0xb0] sm:$0xff] }
 0x11f   : > { %v1329_v55 = vmax.f32 %v1201_v53, %v1265_v4  ;;  %v1361_v20 = vmax.f32 %v1233_v54, %v1297_v5  ;;  %1651 = vst.msk [vmem:[%s2483_s30 + $0x38] sm:$0xf] %vm1636_vm4, %v1941_v10  ;;  %v1971_v24 = vpack.c.bf16 %v1360_v11, %v1360_v11  ;;  %v1206_v27 = vadd.f32 %v2460_v2, %v1135_v57  ;;  %v1166_v8 = vld [vmem:[#allocation2 + $0x188] sm:$0xff]  ;;  %v2638_v15 = vpop.f32.mrb[27].mxu1  ;;  %v2661_v48 = vpop.f32.mrb[28].mxu0  ;;  %v343_v54 = vld [vmem:[#allocation2 + $0x1b0] sm:$0xff] }
 0x120   : > { %v1942_v25 = vpack.c.bf16 %v1331_v12, %v1331_v12  ;;  %v1974_v26 = vpack.c.bf16 %v1363_v50, %v1363_v50  ;;  %1683 = vst.msk [vmem:[%s2483_s30 + $0xb8] sm:$0xf] %vm1636_vm4, %v1973_v18  ;;  %1649 = vst.msk [vmem:[%s2483_s30 + $0x30] sm:$0xf] %vm1636_vm4, %v1939_v19  ;;  %v1238_v33 = vadd.f32 %v2460_v2, %v1167_v13  ;;  %v309_v57 = vld [vmem:[#allocation2 + $0xa0] sm:$0xff]  ;;  %v312_v3 = vld [vmem:[#allocation2 + $0xb8] sm:$0xff] }
 0x121   : > { %v1940_v29 = vpack.c.bf16 %v1329_v55, %v1329_v55  ;;  %v1972_v32 = vpack.c.bf16 %v1361_v20, %v1361_v20  ;;  %v1204_v34 = vadd.f32 %v2460_v2, %v1133_v14  ;;  %1681 = vst.msk [vmem:[%s2483_s30 + $0xb0] sm:$0xf] %vm1636_vm4, %v1971_v24  ;;  %v1270_v35 = vmul.f32 0.2, %v1206_v27  ;;  %v341_v1 = vld [vmem:[#allocation2 + $0x1a0] sm:$0xff]  ;;  %v2663_v4 = vpop.f32.mrb[28].mxu1 }
 0x122   : > { %1652 = vst.msk [vmem:[%s2483_s30 + $0x3c] sm:$0xf] %vm1636_vm4, %v1942_v25  ;;  %1684 = vst.msk [vmem:[%s2483_s30 + $0xbc] sm:$0xf] %vm1636_vm4, %v1974_v26  ;;  %v1236_v36 = vadd.f32 %v2460_v2, %v1165_v56  ;;  %v1207_v37 = vadd.f32 %v2460_v2, %v1136_v21  ;;  %v1239_v40 = vadd.f32 %v2460_v2, %v1168_v22  ;;  %v1302_v41 = vmul.f32 0.2, %v1238_v33 }
 0x123   : > { %1650 = vst.msk [vmem:[%s2483_s30 + $0x34] sm:$0xf] %vm1636_vm4, %v1940_v29  ;;  %1682 = vst.msk [vmem:[%s2483_s30 + $0xb4] sm:$0xf] %vm1636_vm4, %v1972_v32  ;;  %v1268_v42 = vmul.f32 0.2, %v1204_v34  ;;  %v1205_v43 = vadd.f32 %v2460_v2, %v1134_v28  ;;  %v1237_v46 = vadd.f32 %v2460_v2, %v1166_v8  ;;  %v1334_v49 = vmax.f32 %v1206_v27, %v1270_v35 }
 0x124   : > { %v1300_v51 = vmul.f32 0.2, %v1236_v36  ;;  %v1271_v52 = vmul.f32 0.2, %v1207_v37  ;;  %v1303_v53 = vmul.f32 0.2, %v1239_v40  ;;  %v1366_v59 = vmax.f32 %v1238_v33, %v1302_v41 }
 0x125   : > { %v1332_v60 = vmax.f32 %v1204_v34, %v1268_v42  ;;  %v1269_v61 = vmul.f32 0.2, %v1205_v43  ;;  %v1301_v0 = vmul.f32 0.2, %v1237_v46  ;;  %v2665_v5 = vpop.f32.mrb[29].mxu0  ;;  %v1945_v10 = vpack.c.bf16 %v1334_v49, %v1334_v49  ;;  %v344_v13 = vld [vmem:[#allocation2 + $0x1b8] sm:$0xff] }
 0x126   : > { %v1364_v11 = vmax.f32 %v1236_v36, %v1300_v51  ;;  %v1335_v12 = vmax.f32 %v1207_v37, %v1271_v52  ;;  %v1367_v50 = vmax.f32 %v1239_v40, %v1303_v53  ;;  %v310_v14 = vld [vmem:[#allocation2 + $0xa8] sm:$0xff]  ;;  %v2667_v19 = vpop.f32.mrb[29].mxu1  ;;  %v2669_v55 = vpop.f32.mrb[30].mxu0  ;;  %v1977_v20 = vpack.c.bf16 %v1366_v59, %v1366_v59  ;;  %v315_v24 = vld [vmem:[#allocation2 + $0xd0] sm:$0xff]  ;;  %v313_v26 = vld [vmem:[#allocation2 + $0xc0] sm:$0xff] }
 0x127   : > { %v342_v18 = vld [vmem:[#allocation2 + $0x1a8] sm:$0xff]  ;;  %v1943_v56 = vpack.c.bf16 %v1332_v60, %v1332_v60  ;;  %v1333_v21 = vmax.f32 %v1205_v43, %v1269_v61  ;;  %v1365_v22 = vmax.f32 %v1237_v46, %v1301_v0  ;;  %v347_v25 = vld [vmem:[#allocation2 + $0x1d0] sm:$0xff]  ;;  %v2671_v27 = vpop.f32.mrb[30].mxu1  ;;  %v2673_v28 = vpop.f32.mrb[31].mxu0  ;;  %1655 = vst.msk [vmem:[%s2483_s30 + $0x48] sm:$0xf] %vm1636_vm4, %v1945_v10  ;;  %v1007_v33 = vadd.f32 %v2581_v63, %v311_v47 }
 0x128   : > { %v1975_v8 = vpack.c.bf16 %v1364_v11, %v1364_v11  ;;  %v1946_v29 = vpack.c.bf16 %v1335_v12, %v1335_v12  ;;  %v1978_v32 = vpack.c.bf16 %v1367_v50, %v1367_v50  ;;  %v345_v34 = vld [vmem:[#allocation2 + $0x1c0] sm:$0xff]  ;;  %v316_v35 = vld [vmem:[#allocation2 + $0xd8] sm:$0xff]  ;;  %v973_v37 = vpop.f32.mrb[31].mxu1  ;;  %1687 = vst.msk [vmem:[%s2483_s30 + $0xc8] sm:$0xf] %vm1636_vm4, %v1977_v20  ;;  %v1039_v42 = vadd.f32 %v2583_v7, %v343_v54  ;;  %v314_v46 = vld [vmem:[#allocation2 + $0xc8] sm:$0xff] }
 0x129   : > { %v348_v36 = vld [vmem:[#allocation2 + $0x1d8] sm:$0xff]  ;;  %1653 = vst.msk [vmem:[%s2483_s30 + $0x40] sm:$0xf] %vm1636_vm4, %v1943_v56  ;;  %v1944_v40 = vpack.c.bf16 %v1333_v21, %v1333_v21  ;;  %v1976_v41 = vpack.c.bf16 %v1365_v22, %v1365_v22  ;;  %v1005_v43 = vadd.f32 %v2585_v30, %v309_v57  ;;  %v346_v49 = vld [vmem:[#allocation2 + $0x1c8] sm:$0xff]  ;;  %v319_v63 = vld [vmem:[#allocation2 + $0xf0] sm:$0xff]  ;;  %v1037_v47 = vadd.f32 %v2587_v31, %v341_v1 }
 0x12a   : > { %1685 = vst.msk [vmem:[%s2483_s30 + $0xc0] sm:$0xf] %vm1636_vm4, %v1975_v8  ;;  %1656 = vst.msk [vmem:[%s2483_s30 + $0x4c] sm:$0xf] %vm1636_vm4, %v1946_v29  ;;  %v1008_v51 = vadd.f32 %v2592_v38, %v312_v3  ;;  %v1040_v7 = vadd.f32 %v2594_v39, %v344_v13  ;;  %v1006_v30 = vadd.f32 %v2602_v44, %v310_v14  ;;  %v351_v52 = vld [vmem:[#allocation2 + $0x1f0] sm:$0xff]  ;;  %v317_v53 = vld [vmem:[#allocation2 + $0xe0] sm:$0xff] }
 0x12b   : > { %1688 = vst.msk [vmem:[%s2483_s30 + $0xcc] sm:$0xf] %vm1636_vm4, %v1978_v32  ;;  %v349_v54 = vld [vmem:[#allocation2 + $0x1e0] sm:$0xff]  ;;  %1654 = vst.msk [vmem:[%s2483_s30 + $0x44] sm:$0xf] %vm1636_vm4, %v1944_v40  ;;  %v1038_v57 = vadd.f32 %v2604_v45, %v342_v18  ;;  %v1011_v31 = vadd.f32 %v2621_v58, %v315_v24  ;;  %v1043_v38 = vadd.f32 %v2623_v6, %v347_v25  ;;  %v320_v44 = vld [vmem:[#allocation2 + $0xf8] sm:$0xff] }
 0x12c   : > { %1072 = vst.msk [vmem:[#allocation2 + $0xb0] sm:$0xff] %vm224_vm2, %v1007_v33  ;;  %1104 = vst.msk [vmem:[#allocation2 + $0x1b0] sm:$0xff] %vm224_vm2, %v1039_v42  ;;  %v1009_v39 = vadd.f32 %v2625_v9, %v313_v26  ;;  %v352_v59 = vld [vmem:[#allocation2 + $0x1f8] sm:$0xff]  ;;  %v318_v60 = vld [vmem:[#allocation2 + $0xe8] sm:$0xff]  ;;  %v1041_v61 = vadd.f32 %v2627_v16, %v345_v34  ;;  %v1012_v45 = vadd.f32 %v2629_v17, %v316_v35 }
 0x12d   : > { %1686 = vst.msk [vmem:[%s2483_s30 + $0xc4] sm:$0xf] %vm1636_vm4, %v1976_v41  ;;  %v1044_v58 = vadd.f32 %v2631_v23, %v348_v36  ;;  %v1010_v6 = vadd.f32 %v2633_v62, %v314_v46  ;;  %v350_v9 = vld [vmem:[#allocation2 + $0x1e8] sm:$0xff]  ;;  %v1042_v0 = vadd.f32 %v2638_v15, %v346_v49  ;;  %v1015_v1 = vadd.f32 %v2661_v48, %v319_v63 }
 0x12e   : > { %1070 = vst.msk [vmem:[#allocation2 + $0xa0] sm:$0xff] %vm224_vm2, %v1005_v43  ;;  %1102 = vst.msk [vmem:[#allocation2 + $0x1a0] sm:$0xff] %vm224_vm2, %v1037_v47  ;;  %v1047_v16 = vadd.f32 %v2663_v4, %v351_v52  ;;  %v1013_v17 = vadd.f32 %v2665_v5, %v317_v53  ;;  %v1045_v23 = vadd.f32 %v2667_v19, %v349_v54 }
 0x12f   : > { %1073 = vst.msk [vmem:[#allocation2 + $0xb8] sm:$0xff] %vm224_vm2, %v1008_v51  ;;  %1105 = vst.msk [vmem:[#allocation2 + $0x1b8] sm:$0xff] %vm224_vm2, %v1040_v7  ;;  %v1016_v62 = vadd.f32 %v2669_v55, %v320_v44  ;;  %v1048_v15 = vadd.f32 %v2671_v27, %v352_v59  ;;  %v1014_v48 = vadd.f32 %v2673_v28, %v318_v60 }
 0x130   : > { %1071 = vst.msk [vmem:[#allocation2 + $0xa8] sm:$0xff] %vm224_vm2, %v1006_v30  ;;  %1103 = vst.msk [vmem:[#allocation2 + $0x1a8] sm:$0xff] %vm224_vm2, %v1038_v57  ;;  %v1046_v3 = vadd.f32 %v973_v37, %v350_v9 }
 0x131   : > { %1076 = vst.msk [vmem:[#allocation2 + $0xd0] sm:$0xff] %vm224_vm2, %v1011_v31  ;;  %1108 = vst.msk [vmem:[#allocation2 + $0x1d0] sm:$0xff] %vm224_vm2, %v1043_v38 }
 0x132   : > { %1074 = vst.msk [vmem:[#allocation2 + $0xc0] sm:$0xff] %vm224_vm2, %v1009_v39  ;;  %1106 = vst.msk [vmem:[#allocation2 + $0x1c0] sm:$0xff] %vm224_vm2, %v1041_v61  ;;  %v2756_v61 = vld [vmem:[%s2826_s2] ss:$0 sm:$0xff] }
 0x133   : > { %1077 = vst.msk [vmem:[#allocation2 + $0xd8] sm:$0xff] %vm224_vm2, %v1012_v45  ;;  %1109 = vst.msk [vmem:[#allocation2 + $0x1d8] sm:$0xff] %vm224_vm2, %v1044_v58  ;;  %v1139_v4 = vld [vmem:[#allocation2 + $0xb0] sm:$0xff] }
 0x134   : > { %1075 = vst.msk [vmem:[#allocation2 + $0xc8] sm:$0xff] %vm224_vm2, %v1010_v6  ;;  %1107 = vst.msk [vmem:[#allocation2 + $0x1c8] sm:$0xff] %vm224_vm2, %v1042_v0  ;;  %v1210_v5 = vadd.f32 %v2460_v2, %v1139_v4  ;;  %v1171_v10 = vld [vmem:[#allocation2 + $0x1b0] sm:$0xff] }
 0x135   : > { %1080 = vst.msk [vmem:[#allocation2 + $0xf0] sm:$0xff] %vm224_vm2, %v1015_v1  ;;  %1112 = vst.msk [vmem:[#allocation2 + $0x1f0] sm:$0xff] %vm224_vm2, %v1047_v16  ;;  %v1137_v11 = vld [vmem:[#allocation2 + $0xa0] sm:$0xff]  ;;  %v1242_v12 = vadd.f32 %v2460_v2, %v1171_v10 }
 0x136   : > { %1078 = vst.msk [vmem:[#allocation2 + $0xe0] sm:$0xff] %vm224_vm2, %v1013_v17  ;;  %1110 = vst.msk [vmem:[#allocation2 + $0x1e0] sm:$0xff] %vm224_vm2, %v1045_v23  ;;  %v1208_v50 = vadd.f32 %v2460_v2, %v1137_v11  ;;  %v1169_v13 = vld [vmem:[#allocation2 + $0x1a0] sm:$0xff]  ;;  %v1140_v14 = vld [vmem:[#allocation2 + $0xb8] sm:$0xff]  ;;  %v1274_v19 = vmul.f32 0.2, %v1210_v5 }
 0x137   : > { %1081 = vst.msk [vmem:[#allocation2 + $0xf8] sm:$0xff] %vm224_vm2, %v1016_v62  ;;  %1113 = vst.msk [vmem:[#allocation2 + $0x1f8] sm:$0xff] %vm224_vm2, %v1048_v15  ;;  %v1172_v18 = vld [vmem:[#allocation2 + $0x1b8] sm:$0xff]  ;;  %v1240_v55 = vadd.f32 %v2460_v2, %v1169_v13  ;;  %v1211_v20 = vadd.f32 %v2460_v2, %v1140_v14  ;;  %v1138_v21 = vld [vmem:[#allocation2 + $0xa8] sm:$0xff]  ;;  %v1306_v24 = vmul.f32 0.2, %v1242_v12 }
 0x138   : > { %1079 = vst.msk [vmem:[#allocation2 + $0xe8] sm:$0xff] %vm224_vm2, %v1014_v48  ;;  %1111 = vst.msk [vmem:[#allocation2 + $0x1e8] sm:$0xff] %vm224_vm2, %v1046_v3  ;;  %v1243_v56 = vadd.f32 %v2460_v2, %v1172_v18  ;;  %v1170_v22 = vld [vmem:[#allocation2 + $0x1a8] sm:$0xff]  ;;  %v1272_v25 = vmul.f32 0.2, %v1208_v50  ;;  %v1209_v26 = vadd.f32 %v2460_v2, %v1138_v21  ;;  %v1338_v28 = vmax.f32 %v1210_v5, %v1274_v19  ;;  %v1143_v37 = vld [vmem:[#allocation2 + $0xd0] sm:$0xff] }
 0x139   : > { %v1241_v27 = vadd.f32 %v2460_v2, %v1170_v22  ;;  %v1304_v8 = vmul.f32 0.2, %v1240_v55  ;;  %v1275_v29 = vmul.f32 0.2, %v1211_v20  ;;  %v1370_v33 = vmax.f32 %v1242_v12, %v1306_v24  ;;  %v1175_v46 = vld [vmem:[#allocation2 + $0x1d0] sm:$0xff]  ;;  %v1141_v49 = vld [vmem:[#allocation2 + $0xc0] sm:$0xff] }
 0x13a   : > { %v1307_v32 = vmul.f32 0.2, %v1243_v56  ;;  %v1336_v34 = vmax.f32 %v1208_v50, %v1272_v25  ;;  %v1273_v35 = vmul.f32 0.2, %v1209_v26  ;;  %v1949_v40 = vpack.c.bf16 %v1338_v28, %v1338_v28  ;;  %v1173_v30 = vld [vmem:[#allocation2 + $0x1c0] sm:$0xff]  ;;  %v1144_v52 = vld [vmem:[#allocation2 + $0xd8] sm:$0xff] }
 0x13b   : > { %v1305_v36 = vmul.f32 0.2, %v1241_v27  ;;  %v1368_v41 = vmax.f32 %v1240_v55, %v1304_v8  ;;  %v1339_v42 = vmax.f32 %v1211_v20, %v1275_v29  ;;  %v1981_v63 = vpack.c.bf16 %v1370_v33, %v1370_v33  ;;  %v1176_v53 = vld [vmem:[#allocation2 + $0x1d8] sm:$0xff]  ;;  %v1142_v39 = vld [vmem:[#allocation2 + $0xc8] sm:$0xff] }
 0x13c   : > { %v1371_v43 = vmax.f32 %v1243_v56, %v1307_v32  ;;  %v1947_v47 = vpack.c.bf16 %v1336_v34, %v1336_v34  ;;  %v1337_v51 = vmax.f32 %v1209_v26, %v1273_v35  ;;  %1659 = vst.msk [vmem:[%s2483_s30 + $0x58] sm:$0xf] %vm1636_vm4, %v1949_v40  ;;  %v1214_v38 = vadd.f32 %v2460_v2, %v1143_v37  ;;  %v1174_v44 = vld [vmem:[#allocation2 + $0x1c8] sm:$0xff]  ;;  %v1147_v12 = vld [vmem:[#allocation2 + $0xf0] sm:$0xff] }
 0x13d   : > { %v1369_v7 = vmax.f32 %v1241_v27, %v1305_v36  ;;  %v1979_v54 = vpack.c.bf16 %v1368_v41, %v1368_v41  ;;  %v1950_v57 = vpack.c.bf16 %v1339_v42, %v1339_v42  ;;  %1691 = vst.msk [vmem:[%s2483_s30 + $0xd8] sm:$0xf] %vm1636_vm4, %v1981_v63  ;;  %v1246_v45 = vadd.f32 %v2756_v61, %v1175_v46  ;;  %v1179_v19 = vld [vmem:[#allocation2 + $0x1f0] sm:$0xff]  ;;  %v1145_v55 = vld [vmem:[#allocation2 + $0xe0] sm:$0xff] }
 0x13e   : > { %v1982_v31 = vpack.c.bf16 %v1371_v43, %v1371_v43  ;;  %1657 = vst.msk [vmem:[%s2483_s30 + $0x50] sm:$0xf] %vm1636_vm4, %v1947_v47  ;;  %v1948_v59 = vpack.c.bf16 %v1337_v51, %v1337_v51  ;;  %v1212_v58 = vadd.f32 %v2756_v61, %v1141_v49  ;;  %v1278_v2 = vmul.f32 0.2, %v1214_v38  ;;  %v1177_v24 = vld [vmem:[#allocation2 + $0x1e0] sm:$0xff]  ;;  %v1148_v25 = vld [vmem:[#allocation2 + $0xf8] sm:$0xff] }
 0x13f   : > { %v1980_v60 = vpack.c.bf16 %v1369_v7, %v1369_v7  ;;  %1689 = vst.msk [vmem:[%s2483_s30 + $0xd0] sm:$0xf] %vm1636_vm4, %v1979_v54  ;;  %1660 = vst.msk [vmem:[%s2483_s30 + $0x5c] sm:$0xf] %vm1636_vm4, %v1950_v57  ;;  %v1244_v6 = vadd.f32 %v2756_v61, %v1173_v30  ;;  %v1215_v9 = vadd.f32 %v2756_v61, %v1144_v52  ;;  %v1310_v1 = vmul.f32 0.2, %v1246_v45 }
 0x140   : > { %1692 = vst.msk [vmem:[%s2483_s30 + $0xdc] sm:$0xf] %vm1636_vm4, %v1982_v31  ;;  %v1247_v0 = vadd.f32 %v2756_v61, %v1176_v53  ;;  %1658 = vst.msk [vmem:[%s2483_s30 + $0x54] sm:$0xf] %vm1636_vm4, %v1948_v59  ;;  %v1276_v16 = vmul.f32 0.2, %v1212_v58  ;;  %v1213_v17 = vadd.f32 %v2756_v61, %v1142_v39  ;;  %v1245_v23 = vadd.f32 %v2756_v61, %v1174_v44 }
 0x141   : > { %1690 = vst.msk [vmem:[%s2483_s30 + $0xd4] sm:$0xf] %vm1636_vm4, %v1980_v60  ;;  %v1342_v62 = vmax.f32 %v1214_v38, %v1278_v2  ;;  %v1308_v15 = vmul.f32 0.2, %v1244_v6  ;;  %v1279_v48 = vmul.f32 0.2, %v1215_v9  ;;  %v1374_v4 = vmax.f32 %v1246_v45, %v1310_v1 }
 0x142   : > { %v1311_v3 = vmul.f32 0.2, %v1247_v0  ;;  %v1340_v5 = vmax.f32 %v1212_v58, %v1276_v16  ;;  %v1277_v10 = vmul.f32 0.2, %v1213_v17  ;;  %v1309_v11 = vmul.f32 0.2, %v1245_v23 }
 0x143   : > { %v1953_v50 = vpack.c.bf16 %v1342_v62, %v1342_v62  ;;  %v1372_v13 = vmax.f32 %v1244_v6, %v1308_v15  ;;  %v1343_v14 = vmax.f32 %v1215_v9, %v1279_v48  ;;  %v1985_v20 = vpack.c.bf16 %v1374_v4, %v1374_v4  ;;  %v1180_v26 = vld [vmem:[#allocation2 + $0x1f8] sm:$0xff]  ;;  %v1146_v32 = vld [vmem:[#allocation2 + $0xe8] sm:$0xff] }
 0x144   : > { %v1375_v18 = vmax.f32 %v1247_v0, %v1311_v3  ;;  %v1951_v56 = vpack.c.bf16 %v1340_v5, %v1340_v5  ;;  %v1341_v21 = vmax.f32 %v1213_v17, %v1277_v10  ;;  %v1373_v22 = vmax.f32 %v1245_v23, %v1309_v11  ;;  %v1178_v33 = vld [vmem:[#allocation2 + $0x1e8] sm:$0xff] }
 0x145   : > { %1663 = vst.msk [vmem:[%s2483_s30 + $0x68] sm:$0xf] %vm1636_vm4, %v1953_v50  ;;  %v1983_v27 = vpack.c.bf16 %v1372_v13, %v1372_v13  ;;  %v1954_v28 = vpack.c.bf16 %v1343_v14, %v1343_v14  ;;  %v1218_v29 = vadd.f32 %v2756_v61, %v1147_v12  ;;  %1695 = vst.msk [vmem:[%s2483_s30 + $0xe8] sm:$0xf] %vm1636_vm4, %v1985_v20 }
 0x146   : > { %v1986_v8 = vpack.c.bf16 %v1375_v18, %v1375_v18  ;;  %1661 = vst.msk [vmem:[%s2483_s30 + $0x60] sm:$0xf] %vm1636_vm4, %v1951_v56  ;;  %v1952_v34 = vpack.c.bf16 %v1341_v21, %v1341_v21  ;;  %v1984_v35 = vpack.c.bf16 %v1373_v22, %v1373_v22  ;;  %v1250_v36 = vadd.f32 %v2756_v61, %v1179_v19 }
 0x147   : > { %v1216_v37 = vadd.f32 %v2756_v61, %v1145_v55  ;;  %1693 = vst.msk [vmem:[%s2483_s30 + $0xe0] sm:$0xf] %vm1636_vm4, %v1983_v27  ;;  %1664 = vst.msk [vmem:[%s2483_s30 + $0x6c] sm:$0xf] %vm1636_vm4, %v1954_v28  ;;  %v1282_v40 = vmul.f32 0.2, %v1218_v29  ;;  %v1248_v41 = vadd.f32 %v2756_v61, %v1177_v24  ;;  %v1219_v42 = vadd.f32 %v2756_v61, %v1148_v25 }
 0x148   : > { %1696 = vst.msk [vmem:[%s2483_s30 + $0xec] sm:$0xf] %vm1636_vm4, %v1986_v8  ;;  %v1251_v43 = vadd.f32 %v2756_v61, %v1180_v26  ;;  %1662 = vst.msk [vmem:[%s2483_s30 + $0x64] sm:$0xf] %vm1636_vm4, %v1952_v34  ;;  %v1314_v46 = vmul.f32 0.2, %v1250_v36  ;;  %v1217_v63 = vadd.f32 %v2756_v61, %v1146_v32  ;;  %v1249_v47 = vadd.f32 %v2756_v61, %v1178_v33 }
 0x149   : > { %1694 = vst.msk [vmem:[%s2483_s30 + $0xe4] sm:$0xf] %vm1636_vm4, %v1984_v35  ;;  %v1280_v49 = vmul.f32 0.2, %v1216_v37  ;;  %v1346_v51 = vmax.f32 %v1218_v29, %v1282_v40  ;;  %v1312_v7 = vmul.f32 0.2, %v1248_v41 }
 0x14a   : > { %v1283_v30 = vmul.f32 0.2, %v1219_v42  ;;  %v1315_v52 = vmul.f32 0.2, %v1251_v43  ;;  %v1378_v53 = vmax.f32 %v1250_v36, %v1314_v46  ;;  %v1281_v57 = vmul.f32 0.2, %v1217_v63 }
 0x14b   : > { %v1344_v54 = vmax.f32 %v1216_v37, %v1280_v49  ;;  %v1313_v31 = vmul.f32 0.2, %v1249_v47  ;;  %v1957_v38 = vpack.c.bf16 %v1346_v51, %v1346_v51  ;;  %v1376_v39 = vmax.f32 %v1248_v41, %v1312_v7 }
 0x14c   : > { %v1347_v44 = vmax.f32 %v1219_v42, %v1283_v30  ;;  %v1379_v59 = vmax.f32 %v1251_v43, %v1315_v52  ;;  %v1989_v60 = vpack.c.bf16 %v1378_v53, %v1378_v53  ;;  %v1345_v45 = vmax.f32 %v1217_v63, %v1281_v57 }
 0x14d   : > { %v1955_v61 = vpack.c.bf16 %v1344_v54, %v1344_v54  ;;  %v1377_v58 = vmax.f32 %v1249_v47, %v1313_v31  ;;  %1667 = vst.msk [vmem:[%s2483_s30 + $0x78] sm:$0xf] %vm1636_vm4, %v1957_v38  ;;  %v1987_v2 = vpack.c.bf16 %v1376_v39, %v1376_v39 }
 0x14e   : > { %v1958_v6 = vpack.c.bf16 %v1347_v44, %v1347_v44  ;;  %v1990_v9 = vpack.c.bf16 %v1379_v59, %v1379_v59  ;;  %1699 = vst.msk [vmem:[%s2483_s30 + $0xf8] sm:$0xf] %vm1636_vm4, %v1989_v60  ;;  %v1956_v0 = vpack.c.bf16 %v1345_v45, %v1345_v45 }
 0x14f   : > { %1665 = vst.msk [vmem:[%s2483_s30 + $0x70] sm:$0xf] %vm1636_vm4, %v1955_v61  ;;  %v1988_v1 = vpack.c.bf16 %v1377_v58, %v1377_v58  ;;  %1697 = vst.msk [vmem:[%s2483_s30 + $0xf0] sm:$0xf] %vm1636_vm4, %v1987_v2 }
 0x150   : > { %1668 = vst.msk [vmem:[%s2483_s30 + $0x7c] sm:$0xf] %vm1636_vm4, %v1958_v6  ;;  %1700 = vst.msk [vmem:[%s2483_s30 + $0xfc] sm:$0xf] %vm1636_vm4, %v1990_v9 }
 0x151   : > { %1666 = vst.msk [vmem:[%s2483_s30 + $0x74] sm:$0xf] %vm1636_vm4, %v1956_v0  ;;  %1698 = vst.msk [vmem:[%s2483_s30 + $0xf4] sm:$0xf] %vm1636_vm4, %v1988_v1 }
 0x152 PF: > { %s13_s14 = sadd.s32 1, %s2180_s14   ;;  %s2829_s12 = smov %s2176_s13 }
 0x153   : > { %p10_p5 = scmp.ge.s32.totalorder %s13_s14, 6   ;;  %s2830_s13 = smov %s2832_s15 }
 0x155   :  { %12 = sbr.rel (!%p10_p5) target bundleno = 2 (0x2), region = 73 }

// kernel: multi_image_field_mlp_forward.22
= control target key start
LH: loop header
LB: loop body
LE: loop exit
PB: predicated region body
PF: predicated region fallthrough
CT: control target
= control target key end

     0   :  { %v2038_v0 = vmov 0   ;;  %vm572_vm0 = vcmask 130048   ;;  %vm19_vm1 = vcmask 261120   ;;  %v2039_v12 = vmov 0.0   ;;  %s2837_s1 = inlined_call_operand.vmem [shape: bf16[144,32], index: 1, kind: input, shape index: {}]   ;;  %s2838_s0 = inlined_call_operand.vmem [shape: bf16[512,144], index: 0, kind: input, shape index: {}]   ;;  %s2839_s2 = inlined_call_operand.vmem [shape: f32[1,32], index: 2, kind: input, shape index: {}]   ;;  %s2840_s3 = inlined_call_operand.vmem [shape: bf16[512,32], index: 3, kind: output, shape index: {}]  }
   0x1   :  { %669 = vmatprep.subr.bf16.mxu0 %v2038_v0  ;;  %1912 = vmatprep.subr.bf16.mxu1 %v2038_v0  ;;  %v1932_v1 = vld [vmem:[%s2837_s1] sm:$0xff]   ;;  %v1933_v2 = vld [vmem:[%s2837_s1 + $0x8] sm:$0xff]   ;;  %v1934_v3 = vld [vmem:[%s2837_s1 + $0x10] sm:$0xff]   ;;  %20 = vst.msk [vmem:[#allocation2] sm:$0xff] %vm19_vm1, %v2039_v12  ;;  %vm1609_vm2 = vcmask 257024  }
   0x2   :  { %670 = vmatpush1.bf16.msra.mxu0 %v1932_v1  ;;  %1921 = vmatpush1.bf16.msra.mxu1 %v1932_v1  ;;  %v1935_v4 = vld [vmem:[%s2837_s1 + $0x18] sm:$0xff]   ;;  %v1943_v5 = vld [vmem:[%s2838_s0 + $0x4] ss:$8 sps:$4 sm:$0xff]   ;;  %v1938_v9 = vld [vmem:[%s2837_s1 + $0x30] sm:$0xff]   ;;  %21 = vst.msk [vmem:[#allocation2 + $0x8] sm:$0xff] %vm19_vm1, %v2039_v12 }
   0x3   :  { %671 = vmatprep.subr.bf16.mxu0 %v2038_v0  ;;  %1913 = vmatprep.subr.bf16.mxu1 %v2038_v0  ;;  %v1946_v6 = vld [vmem:[%s2838_s0 + $0x104] ss:$8 sps:$4 sm:$0xff]   ;;  %v1939_v10 = vld [vmem:[%s2837_s1 + $0x38] sm:$0xff]   ;;  %22 = vst.msk [vmem:[#allocation2 + $0x10] sm:$0xff] %vm19_vm1, %v2039_v12  ;;  %23 = vst.msk [vmem:[#allocation2 + $0x18] sm:$0xff] %vm19_vm1, %v2039_v12 }
   0x4   :  { %1751 = vmatprep.mubr.msk.bf16.mxu0 %vm572_vm0, %v1943_v5  ;;  %1767 = vmatprep.mubr.msk.bf16.mxu1 %vm572_vm0, %v1946_v6  ;;  %v1936_v7 = vld [vmem:[%s2837_s1 + $0x20] sm:$0xff]   ;;  %v1937_v8 = vld [vmem:[%s2837_s1 + $0x28] sm:$0xff]   ;;  %24 = vst.msk [vmem:[#allocation2 + $0x20] sm:$0xff] %vm19_vm1, %v2039_v12  ;;  %25 = vst.msk [vmem:[#allocation2 + $0x28] sm:$0xff] %vm19_vm1, %v2039_v12 }
   0x5   :  { %v2095_v11 = vld [vmem:[%s2837_s1 + $0x40] sm:$0xff]   ;;  %26 = vst.msk [vmem:[#allocation2 + $0x30] sm:$0xff] %vm19_vm1, %v2039_v12  ;;  %27 = vst.msk [vmem:[#allocation2 + $0x38] sm:$0xff] %vm19_vm1, %v2039_v12  ;;  %v1947_v15 = vld [vmem:[%s2838_s0 + $0x14] ss:$8 sps:$4 sm:$0xff]  }
   0x6   :  { %672 = vmatpush1.bf16.msra.mxu0 %v1933_v2  ;;  %1922 = vmatpush1.bf16.msra.mxu1 %v1933_v2  ;;  %28 = vst.msk [vmem:[#allocation2 + $0x40] sm:$0xff] %vm19_vm1, %v2039_v12  ;;  %29 = vst.msk [vmem:[#allocation2 + $0x48] sm:$0xff] %vm19_vm1, %v2039_v12  ;;  %v1941_v13 = vld [vmem:[%s2838_s0] ss:$8 sps:$4 sm:$0xff]   ;;  %v1949_v16 = vld [vmem:[%s2838_s0 + $0x114] ss:$8 sps:$4 sm:$0xff]  }
   0x7   :  { %673 = vmatprep.subr.bf16.mxu0 %v2038_v0  ;;  %1914 = vmatprep.subr.bf16.mxu1 %v2038_v0  ;;  %30 = vst.msk [vmem:[#allocation2 + $0x50] sm:$0xff] %vm19_vm1, %v2039_v12  ;;  %31 = vst.msk [vmem:[#allocation2 + $0x58] sm:$0xff] %vm19_vm1, %v2039_v12  ;;  %v1944_v14 = vld [vmem:[%s2838_s0 + $0x100] ss:$8 sps:$4 sm:$0xff]   ;;  %v1951_v17 = vld [vmem:[%s2838_s0 + $0x10] ss:$8 sps:$4 sm:$0xff]  }
   0x8   :  { %32 = vst.msk [vmem:[#allocation2 + $0x60] sm:$0xff] %vm19_vm1, %v2039_v12  ;;  %33 = vst.msk [vmem:[#allocation2 + $0x68] sm:$0xff] %vm19_vm1, %v2039_v12  ;;  %v1952_v18 = vld [vmem:[%s2838_s0 + $0x110] ss:$8 sps:$4 sm:$0xff]   ;;  %v1953_v19 = vld [vmem:[%s2838_s0 + $0x24] ss:$8 sps:$4 sm:$0xff]  }
   0x9   :  { %34 = vst.msk [vmem:[#allocation2 + $0x70] sm:$0xff] %vm19_vm1, %v2039_v12  ;;  %35 = vst.msk [vmem:[#allocation2 + $0x78] sm:$0xff] %vm19_vm1, %v2039_v12  ;;  %v1955_v20 = vld [vmem:[%s2838_s0 + $0x124] ss:$8 sps:$4 sm:$0xff]   ;;  %v1957_v21 = vld [vmem:[%s2838_s0 + $0x20] ss:$8 sps:$4 sm:$0xff]  }
   0xa   :  { %674 = vmatpush1.bf16.msra.mxu0 %v1934_v3  ;;  %1923 = vmatpush1.bf16.msra.mxu1 %v1934_v3  ;;  %36 = vst.msk [vmem:[#allocation2 + $0x80] sm:$0xff] %vm19_vm1, %v2039_v12  ;;  %37 = vst.msk [vmem:[#allocation2 + $0x88] sm:$0xff] %vm19_vm1, %v2039_v12  ;;  %v1958_v22 = vld [vmem:[%s2838_s0 + $0x120] ss:$8 sps:$4 sm:$0xff]   ;;  %v1959_v23 = vld [vmem:[%s2838_s0 + $0x34] ss:$8 sps:$4 sm:$0xff]  }
   0xb   :  { %675 = vmatprep.subr.bf16.mxu0 %v2038_v0  ;;  %1915 = vmatprep.subr.bf16.mxu1 %v2038_v0  ;;  %38 = vst.msk [vmem:[#allocation2 + $0x90] sm:$0xff] %vm19_vm1, %v2039_v12  ;;  %39 = vst.msk [vmem:[#allocation2 + $0x98] sm:$0xff] %vm19_vm1, %v2039_v12  ;;  %v1961_v24 = vld [vmem:[%s2838_s0 + $0x134] ss:$8 sps:$4 sm:$0xff]   ;;  %v1963_v25 = vld [vmem:[%s2838_s0 + $0x30] ss:$8 sps:$4 sm:$0xff]  }
   0xc   :  { %40 = vst.msk [vmem:[#allocation2 + $0xa0] sm:$0xff] %vm19_vm1, %v2039_v12  ;;  %41 = vst.msk [vmem:[#allocation2 + $0xa8] sm:$0xff] %vm19_vm1, %v2039_v12  ;;  %v1964_v26 = vld [vmem:[%s2838_s0 + $0x130] ss:$8 sps:$4 sm:$0xff]   ;;  %v1965_v27 = vld [vmem:[%s2838_s0 + $0x44] ss:$8 sps:$4 sm:$0xff]  }
   0xd   :  { %42 = vst.msk [vmem:[#allocation2 + $0xb0] sm:$0xff] %vm19_vm1, %v2039_v12  ;;  %43 = vst.msk [vmem:[#allocation2 + $0xb8] sm:$0xff] %vm19_vm1, %v2039_v12  ;;  %v1967_v28 = vld [vmem:[%s2838_s0 + $0x144] ss:$8 sps:$4 sm:$0xff]   ;;  %v1969_v29 = vld [vmem:[%s2838_s0 + $0x40] ss:$8 sps:$4 sm:$0xff]  }
   0xe   :  { %676 = vmatpush1.bf16.msra.mxu0 %v1935_v4  ;;  %1924 = vmatpush1.bf16.msra.mxu1 %v1935_v4  ;;  %44 = vst.msk [vmem:[#allocation2 + $0xc0] sm:$0xff] %vm19_vm1, %v2039_v12  ;;  %45 = vst.msk [vmem:[#allocation2 + $0xc8] sm:$0xff] %vm19_vm1, %v2039_v12  ;;  %v1970_v30 = vld [vmem:[%s2838_s0 + $0x140] ss:$8 sps:$4 sm:$0xff]   ;;  %v1971_v31 = vld [vmem:[%s2838_s0 + $0x54] ss:$8 sps:$4 sm:$0xff]  }
   0xf   :  { %677 = vmatprep.subr.bf16.mxu0 %v2038_v0  ;;  %1916 = vmatprep.subr.bf16.mxu1 %v2038_v0  ;;  %46 = vst.msk [vmem:[#allocation2 + $0xd0] sm:$0xff] %vm19_vm1, %v2039_v12  ;;  %47 = vst.msk [vmem:[#allocation2 + $0xd8] sm:$0xff] %vm19_vm1, %v2039_v12  ;;  %v1973_v32 = vld [vmem:[%s2838_s0 + $0x154] ss:$8 sps:$4 sm:$0xff]   ;;  %v1975_v33 = vld [vmem:[%s2838_s0 + $0x50] ss:$8 sps:$4 sm:$0xff]  }
  0x10   :  { %48 = vst.msk [vmem:[#allocation2 + $0xe0] sm:$0xff] %vm19_vm1, %v2039_v12  ;;  %49 = vst.msk [vmem:[#allocation2 + $0xe8] sm:$0xff] %vm19_vm1, %v2039_v12  ;;  %v1976_v34 = vld [vmem:[%s2838_s0 + $0x150] ss:$8 sps:$4 sm:$0xff]   ;;  %v1977_v35 = vld [vmem:[%s2838_s0 + $0x64] ss:$8 sps:$4 sm:$0xff]  }
  0x11   :  { %50 = vst.msk [vmem:[#allocation2 + $0xf0] sm:$0xff] %vm19_vm1, %v2039_v12  ;;  %51 = vst.msk [vmem:[#allocation2 + $0xf8] sm:$0xff] %vm19_vm1, %v2039_v12  ;;  %v1979_v36 = vld [vmem:[%s2838_s0 + $0x164] ss:$8 sps:$4 sm:$0xff]   ;;  %v1981_v37 = vld [vmem:[%s2838_s0 + $0x60] ss:$8 sps:$4 sm:$0xff]  }
  0x12   :  { %678 = vmatpush1.bf16.msra.mxu0 %v1936_v7  ;;  %1925 = vmatpush1.bf16.msra.mxu1 %v1936_v7  ;;  %52 = vst.msk [vmem:[#allocation2 + $0x100] sm:$0xff] %vm19_vm1, %v2039_v12  ;;  %53 = vst.msk [vmem:[#allocation2 + $0x108] sm:$0xff] %vm19_vm1, %v2039_v12  ;;  %v1982_v38 = vld [vmem:[%s2838_s0 + $0x160] ss:$8 sps:$4 sm:$0xff]   ;;  %v1983_v39 = vld [vmem:[%s2838_s0 + $0x74] ss:$8 sps:$4 sm:$0xff]  }
  0x13   :  { %679 = vmatprep.subr.bf16.mxu0 %v2038_v0  ;;  %1917 = vmatprep.subr.bf16.mxu1 %v2038_v0  ;;  %54 = vst.msk [vmem:[#allocation2 + $0x110] sm:$0xff] %vm19_vm1, %v2039_v12  ;;  %55 = vst.msk [vmem:[#allocation2 + $0x118] sm:$0xff] %vm19_vm1, %v2039_v12  ;;  %v1985_v40 = vld [vmem:[%s2838_s0 + $0x174] ss:$8 sps:$4 sm:$0xff]   ;;  %v1987_v41 = vld [vmem:[%s2838_s0 + $0x70] ss:$8 sps:$4 sm:$0xff]  }
  0x14   :  { %56 = vst.msk [vmem:[#allocation2 + $0x120] sm:$0xff] %vm19_vm1, %v2039_v12  ;;  %57 = vst.msk [vmem:[#allocation2 + $0x128] sm:$0xff] %vm19_vm1, %v2039_v12  ;;  %v1988_v42 = vld [vmem:[%s2838_s0 + $0x170] ss:$8 sps:$4 sm:$0xff]   ;;  %v1989_v43 = vld [vmem:[%s2838_s0 + $0x84] ss:$8 sps:$4 sm:$0xff]  }
  0x15   :  { %58 = vst.msk [vmem:[#allocation2 + $0x130] sm:$0xff] %vm19_vm1, %v2039_v12  ;;  %59 = vst.msk [vmem:[#allocation2 + $0x138] sm:$0xff] %vm19_vm1, %v2039_v12  ;;  %v1991_v44 = vld [vmem:[%s2838_s0 + $0x184] ss:$8 sps:$4 sm:$0xff]   ;;  %v1993_v45 = vld [vmem:[%s2838_s0 + $0x80] ss:$8 sps:$4 sm:$0xff]  }
  0x16   :  { %680 = vmatpush1.bf16.msra.mxu0 %v1937_v8  ;;  %1926 = vmatpush1.bf16.msra.mxu1 %v1937_v8  ;;  %60 = vst.msk [vmem:[#allocation2 + $0x140] sm:$0xff] %vm19_vm1, %v2039_v12  ;;  %61 = vst.msk [vmem:[#allocation2 + $0x148] sm:$0xff] %vm19_vm1, %v2039_v12  ;;  %v1994_v46 = vld [vmem:[%s2838_s0 + $0x180] ss:$8 sps:$4 sm:$0xff]   ;;  %v1995_v47 = vld [vmem:[%s2838_s0 + $0x94] ss:$8 sps:$4 sm:$0xff]  }
  0x17   :  { %681 = vmatprep.subr.bf16.mxu0 %v2038_v0  ;;  %1918 = vmatprep.subr.bf16.mxu1 %v2038_v0  ;;  %62 = vst.msk [vmem:[#allocation2 + $0x150] sm:$0xff] %vm19_vm1, %v2039_v12  ;;  %63 = vst.msk [vmem:[#allocation2 + $0x158] sm:$0xff] %vm19_vm1, %v2039_v12  ;;  %v1997_v48 = vld [vmem:[%s2838_s0 + $0x194] ss:$8 sps:$4 sm:$0xff]   ;;  %v1999_v49 = vld [vmem:[%s2838_s0 + $0x90] ss:$8 sps:$4 sm:$0xff]  }
  0x18   :  { %64 = vst.msk [vmem:[#allocation2 + $0x160] sm:$0xff] %vm19_vm1, %v2039_v12  ;;  %65 = vst.msk [vmem:[#allocation2 + $0x168] sm:$0xff] %vm19_vm1, %v2039_v12  ;;  %v2000_v50 = vld [vmem:[%s2838_s0 + $0x190] ss:$8 sps:$4 sm:$0xff]   ;;  %v2001_v51 = vld [vmem:[%s2838_s0 + $0xa4] ss:$8 sps:$4 sm:$0xff]  }
  0x19   :  { %66 = vst.msk [vmem:[#allocation2 + $0x170] sm:$0xff] %vm19_vm1, %v2039_v12  ;;  %67 = vst.msk [vmem:[#allocation2 + $0x178] sm:$0xff] %vm19_vm1, %v2039_v12  ;;  %v2003_v52 = vld [vmem:[%s2838_s0 + $0x1a4] ss:$8 sps:$4 sm:$0xff]   ;;  %v2005_v53 = vld [vmem:[%s2838_s0 + $0xa0] ss:$8 sps:$4 sm:$0xff]  }
  0x1a   :  { %682 = vmatpush1.bf16.msra.mxu0 %v1938_v9  ;;  %1927 = vmatpush1.bf16.msra.mxu1 %v1938_v9  ;;  %68 = vst.msk [vmem:[#allocation2 + $0x180] sm:$0xff] %vm19_vm1, %v2039_v12  ;;  %69 = vst.msk [vmem:[#allocation2 + $0x188] sm:$0xff] %vm19_vm1, %v2039_v12  ;;  %v2006_v54 = vld [vmem:[%s2838_s0 + $0x1a0] ss:$8 sps:$4 sm:$0xff]   ;;  %v2007_v55 = vld [vmem:[%s2838_s0 + $0xb4] ss:$8 sps:$4 sm:$0xff]  }
  0x1b   :  { %683 = vmatprep.subr.bf16.mxu0 %v2038_v0  ;;  %1919 = vmatprep.subr.bf16.mxu1 %v2038_v0  ;;  %70 = vst.msk [vmem:[#allocation2 + $0x190] sm:$0xff] %vm19_vm1, %v2039_v12  ;;  %71 = vst.msk [vmem:[#allocation2 + $0x198] sm:$0xff] %vm19_vm1, %v2039_v12  ;;  %v2009_v56 = vld [vmem:[%s2838_s0 + $0x1b4] ss:$8 sps:$4 sm:$0xff]   ;;  %v2011_v57 = vld [vmem:[%s2838_s0 + $0xb0] ss:$8 sps:$4 sm:$0xff]  }
  0x1c   :  { %72 = vst.msk [vmem:[#allocation2 + $0x1a0] sm:$0xff] %vm19_vm1, %v2039_v12  ;;  %73 = vst.msk [vmem:[#allocation2 + $0x1a8] sm:$0xff] %vm19_vm1, %v2039_v12  ;;  %v2012_v58 = vld [vmem:[%s2838_s0 + $0x1b0] ss:$8 sps:$4 sm:$0xff]   ;;  %v2013_v59 = vld [vmem:[%s2838_s0 + $0xc4] ss:$8 sps:$4 sm:$0xff]  }
  0x1d   :  { %74 = vst.msk [vmem:[#allocation2 + $0x1b0] sm:$0xff] %vm19_vm1, %v2039_v12  ;;  %75 = vst.msk [vmem:[#allocation2 + $0x1b8] sm:$0xff] %vm19_vm1, %v2039_v12  ;;  %v2015_v60 = vld [vmem:[%s2838_s0 + $0x1c4] ss:$8 sps:$4 sm:$0xff]   ;;  %v2017_v61 = vld [vmem:[%s2838_s0 + $0xc0] ss:$8 sps:$4 sm:$0xff]  }
  0x1e   :  { %684 = vmatpush1.bf16.msra.mxu0 %v1939_v10  ;;  %1928 = vmatpush1.bf16.msra.mxu1 %v1939_v10  ;;  %76 = vst.msk [vmem:[#allocation2 + $0x1c0] sm:$0xff] %vm19_vm1, %v2039_v12  ;;  %77 = vst.msk [vmem:[#allocation2 + $0x1c8] sm:$0xff] %vm19_vm1, %v2039_v12  ;;  %v2018_v62 = vld [vmem:[%s2838_s0 + $0x1c0] ss:$8 sps:$4 sm:$0xff]   ;;  %v2019_v63 = vld [vmem:[%s2838_s0 + $0xd4] ss:$8 sps:$4 sm:$0xff]  }
  0x1f   :  { %685 = vmatprep.subr.bf16.mxu0 %v2038_v0  ;;  %1920 = vmatprep.subr.bf16.mxu1 %v2038_v0  ;;  %78 = vst.msk [vmem:[#allocation2 + $0x1d0] sm:$0xff] %vm19_vm1, %v2039_v12  ;;  %79 = vst.msk [vmem:[#allocation2 + $0x1d8] sm:$0xff] %vm19_vm1, %v2039_v12  ;;  %v2021_v0 = vld [vmem:[%s2838_s0 + $0x1d4] ss:$8 sps:$4 sm:$0xff]   ;;  %v2023_v1 = vld [vmem:[%s2838_s0 + $0xd0] ss:$8 sps:$4 sm:$0xff]  }
  0x20   :  { %80 = vst.msk [vmem:[#allocation2 + $0x1e0] sm:$0xff] %vm19_vm1, %v2039_v12  ;;  %81 = vst.msk [vmem:[#allocation2 + $0x1e8] sm:$0xff] %vm19_vm1, %v2039_v12  ;;  %v2024_v2 = vld [vmem:[%s2838_s0 + $0x1d0] ss:$8 sps:$4 sm:$0xff]   ;;  %v2025_v3 = vld [vmem:[%s2838_s0 + $0xe4] ss:$8 sps:$4 sm:$0xff]  }
  0x21   :  { %82 = vst.msk [vmem:[#allocation2 + $0x1f0] sm:$0xff] %vm19_vm1, %v2039_v12  ;;  %83 = vst.msk [vmem:[#allocation2 + $0x1f8] sm:$0xff] %vm19_vm1, %v2039_v12  ;;  %v2027_v4 = vld [vmem:[%s2838_s0 + $0x1e4] ss:$8 sps:$4 sm:$0xff]   ;;  %v2029_v5 = vld [vmem:[%s2838_s0 + $0xe0] ss:$8 sps:$4 sm:$0xff]  }
  0x22   :  { %686 = vmatpush1.bf16.msra.mxu0 %v2095_v11  ;;  %1929 = vmatpush1.bf16.msra.mxu1 %v2095_v11  ;;  %v2030_v6 = vld [vmem:[%s2838_s0 + $0x1e0] ss:$8 sps:$4 sm:$0xff]   ;;  %v2031_v7 = vld [vmem:[%s2838_s0 + $0xf4] ss:$8 sps:$4 sm:$0xff]   ;;  %v2035_v9 = vld [vmem:[%s2838_s0 + $0xf0] ss:$8 sps:$4 sm:$0xff]  }
  0x23   :  { %v2033_v8 = vld [vmem:[%s2838_s0 + $0x1f4] ss:$8 sps:$4 sm:$0xff]   ;;  %v2036_v10 = vld [vmem:[%s2838_s0 + $0x1f0] ss:$8 sps:$4 sm:$0xff]   ;;  %v84_v11 = vld [vmem:[#allocation2] sm:$0xff] }
  0x24   :  { %v116_v12 = vld [vmem:[#allocation2 + $0x100] sm:$0xff] }
  0x25   :  { %702 = vmatmul.mubr.bf16.vlgmr.msra.gmra.mrb[0].mxu0 %v1941_v13  ;;  %830 = vmatmul.mubr.bf16.vlgmr.msra.gmra.mrb[0].mxu1 %v1944_v14 }
  0x26   :  { %1752 = vmatprep.mubr.msk.bf16.mxu0 %vm572_vm0, %v1947_v15  ;;  %1768 = vmatprep.mubr.msk.bf16.mxu1 %vm572_vm0, %v1949_v16  ;;  %v85_v15 = vld [vmem:[#allocation2 + $0x8] sm:$0xff] }
  0x27   :  { %v117_v16 = vld [vmem:[#allocation2 + $0x108] sm:$0xff] }
  0x2d   :  { %710 = vmatmul.mubr.bf16.gmra.mrb[4].mxu0 %v1951_v17  ;;  %838 = vmatmul.mubr.bf16.gmra.mrb[4].mxu1 %v1952_v18 }
  0x2e   :  { %1753 = vmatprep.mubr.msk.bf16.mxu0 %vm572_vm0, %v1953_v19  ;;  %1769 = vmatprep.mubr.msk.bf16.mxu1 %vm572_vm0, %v1955_v20 }
  0x35   :  { %718 = vmatmul.mubr.bf16.gmra.mrb[8].mxu0 %v1957_v21  ;;  %846 = vmatmul.mubr.bf16.gmra.mrb[8].mxu1 %v1958_v22 }
  0x36   :  { %1754 = vmatprep.mubr.msk.bf16.mxu0 %vm572_vm0, %v1959_v23  ;;  %1770 = vmatprep.mubr.msk.bf16.mxu1 %vm572_vm0, %v1961_v24 }
  0x3d   :  { %726 = vmatmul.mubr.bf16.gmra.mrb[12].mxu0 %v1963_v25  ;;  %854 = vmatmul.mubr.bf16.gmra.mrb[12].mxu1 %v1964_v26 }
  0x3e   :  { %1755 = vmatprep.mubr.msk.bf16.mxu0 %vm572_vm0, %v1965_v27  ;;  %1771 = vmatprep.mubr.msk.bf16.mxu1 %vm572_vm0, %v1967_v28  ;;  %v86_v27 = vld [vmem:[#allocation2 + $0x10] sm:$0xff] }
  0x3f   :  { %v118_v28 = vld [vmem:[#allocation2 + $0x110] sm:$0xff] }
  0x45   :  { %734 = vmatmul.mubr.bf16.gmra.mrb[16].mxu0 %v1969_v29  ;;  %862 = vmatmul.mubr.bf16.gmra.mrb[16].mxu1 %v1970_v30  ;;  %v2450_v29 = vld [vmem:[%s2839_s2] ss:$0 sm:$0xff] }
  0x46   :  { %1756 = vmatprep.mubr.msk.bf16.mxu0 %vm572_vm0, %v1971_v31  ;;  %1772 = vmatprep.mubr.msk.bf16.mxu1 %vm572_vm0, %v1973_v32  ;;  %v87_v32 = vld [vmem:[#allocation2 + $0x18] sm:$0xff] }
  0x4d   :  { %742 = vmatmul.mubr.bf16.gmra.mrb[20].mxu0 %v1975_v33  ;;  %870 = vmatmul.mubr.bf16.gmra.mrb[20].mxu1 %v1976_v34  ;;  %v119_v33 = vld [vmem:[#allocation2 + $0x118] sm:$0xff] }
  0x4e   :  { %1757 = vmatprep.mubr.msk.bf16.mxu0 %vm572_vm0, %v1977_v35  ;;  %1773 = vmatprep.mubr.msk.bf16.mxu1 %vm572_vm0, %v1979_v36 }
  0x55   :  { %750 = vmatmul.mubr.bf16.gmra.mrb[24].mxu0 %v1981_v37  ;;  %878 = vmatmul.mubr.bf16.gmra.mrb[24].mxu1 %v1982_v38 }
  0x56   :  { %1758 = vmatprep.mubr.msk.bf16.mxu0 %vm572_vm0, %v1983_v39  ;;  %1774 = vmatprep.mubr.msk.bf16.mxu1 %vm572_vm0, %v1985_v40 }
  0x5d   :  { %758 = vmatmul.mubr.bf16.gmra.mrb[28].mxu0 %v1987_v41  ;;  %886 = vmatmul.mubr.bf16.gmra.mrb[28].mxu1 %v1988_v42 }
  0x5e   :  { %1759 = vmatprep.mubr.msk.bf16.mxu0 %vm572_vm0, %v1989_v43  ;;  %1775 = vmatprep.mubr.msk.bf16.mxu1 %vm572_vm0, %v1991_v44 }
  0x65   :  { %766 = vmatmul.mubr.bf16.gmra.mrb[32].mxu0 %v1993_v45  ;;  %894 = vmatmul.mubr.bf16.gmra.mrb[32].mxu1 %v1994_v46 }
  0x66   :  { %1760 = vmatprep.mubr.msk.bf16.mxu0 %vm572_vm0, %v1995_v47  ;;  %1776 = vmatprep.mubr.msk.bf16.mxu1 %vm572_vm0, %v1997_v48 }
  0x6d   :  { %774 = vmatmul.mubr.bf16.gmra.mrb[36].mxu0 %v1999_v49  ;;  %902 = vmatmul.mubr.bf16.gmra.mrb[36].mxu1 %v2000_v50 }
  0x6e   :  { %1761 = vmatprep.mubr.msk.bf16.mxu0 %vm572_vm0, %v2001_v51  ;;  %1777 = vmatprep.mubr.msk.bf16.mxu1 %vm572_vm0, %v2003_v52 }
  0x75   :  { %782 = vmatmul.mubr.bf16.gmra.mrb[40].mxu0 %v2005_v53  ;;  %910 = vmatmul.mubr.bf16.gmra.mrb[40].mxu1 %v2006_v54 }
  0x76   :  { %1762 = vmatprep.mubr.msk.bf16.mxu0 %vm572_vm0, %v2007_v55  ;;  %1778 = vmatprep.mubr.msk.bf16.mxu1 %vm572_vm0, %v2009_v56 }
  0x7d   :  { %790 = vmatmul.mubr.bf16.gmra.mrb[44].mxu0 %v2011_v57  ;;  %918 = vmatmul.mubr.bf16.gmra.mrb[44].mxu1 %v2012_v58  ;;  %v88_v58 = vld [vmem:[#allocation2 + $0x20] sm:$0xff] }
  0x7e   :  { %1763 = vmatprep.mubr.msk.bf16.mxu0 %vm572_vm0, %v2013_v59  ;;  %1779 = vmatprep.mubr.msk.bf16.mxu1 %vm572_vm0, %v2015_v60  ;;  %v120_v59 = vld [vmem:[#allocation2 + $0x120] sm:$0xff] }
  0x85   :  { %798 = vmatmul.mubr.bf16.gmra.mrb[48].mxu0 %v2017_v61  ;;  %926 = vmatmul.mubr.bf16.gmra.mrb[48].mxu1 %v2018_v62 }
  0x86   :  { %1764 = vmatprep.mubr.msk.bf16.mxu0 %vm572_vm0, %v2019_v63  ;;  %1780 = vmatprep.mubr.msk.bf16.mxu1 %vm572_vm0, %v2021_v0 }
  0x8d   :  { %806 = vmatmul.mubr.bf16.gmra.mrb[52].mxu0 %v2023_v1  ;;  %934 = vmatmul.mubr.bf16.gmra.mrb[52].mxu1 %v2024_v2 }
  0x8e   :  { %1765 = vmatprep.mubr.msk.bf16.mxu0 %vm572_vm0, %v2025_v3  ;;  %1781 = vmatprep.mubr.msk.bf16.mxu1 %vm572_vm0, %v2027_v4  ;;  %v89_v4 = vld [vmem:[#allocation2 + $0x28] sm:$0xff] }
  0x95   :  { %814 = vmatmul.mubr.bf16.gmra.mrb[56].mxu0 %v2029_v5  ;;  %942 = vmatmul.mubr.bf16.gmra.mrb[56].mxu1 %v2030_v6  ;;  %v121_v5 = vld [vmem:[#allocation2 + $0x128] sm:$0xff] }
  0x96   :  { %1766 = vmatprep.mubr.msk.bf16.mxu0 %vm572_vm0, %v2031_v7  ;;  %1782 = vmatprep.mubr.msk.bf16.mxu1 %vm572_vm0, %v2033_v8 }
  0x9d   :  { %822 = vmatmul.mubr.bf16.gmra.mrb[60].mxu0 %v2035_v9  ;;  %950 = vmatmul.mubr.bf16.gmra.mrb[60].mxu1 %v2036_v10 }
  0xf8   :  { %v703_v13 = vpop.f32.mrb[0].mxu0  ;;  %v831_v14 = vpop.f32.mrb[0].mxu1 }
  0xf9   :  { %v958_v17 = vadd.f32 %v703_v13, %v84_v11  ;;  %v990_v18 = vadd.f32 %v831_v14, %v116_v12  ;;  %v705_v19 = vpop.f32.mrb[1].mxu0  ;;  %v833_v20 = vpop.f32.mrb[1].mxu1 }
  0xfa   :  { %v706_v21 = vpop.f32.mrb[2].mxu0  ;;  %v834_v22 = vpop.f32.mrb[2].mxu1 }
  0xfb   :  { %1023 = vst.msk [vmem:[#allocation2] sm:$0xff] %vm19_vm1, %v958_v17  ;;  %1055 = vst.msk [vmem:[#allocation2 + $0x100] sm:$0xff] %vm19_vm1, %v990_v18  ;;  %v959_v23 = vadd.f32 %v706_v21, %v85_v15  ;;  %v991_v24 = vadd.f32 %v834_v22, %v117_v16  ;;  %v708_v25 = vpop.f32.mrb[3].mxu0  ;;  %v836_v26 = vpop.f32.mrb[3].mxu1 }
  0xfd   :  { %1024 = vst.msk [vmem:[#allocation2 + $0x8] sm:$0xff] %vm19_vm1, %v959_v23  ;;  %1056 = vst.msk [vmem:[#allocation2 + $0x108] sm:$0xff] %vm19_vm1, %v991_v24 }
 0x100   :  { %v711_v30 = vpop.f32.mrb[4].mxu0  ;;  %v839_v31 = vpop.f32.mrb[4].mxu1 }
 0x101   :  { %v960_v34 = vadd.f32 %v711_v30, %v86_v27  ;;  %v992_v35 = vadd.f32 %v839_v31, %v118_v28  ;;  %v713_v36 = vpop.f32.mrb[5].mxu0  ;;  %v841_v37 = vpop.f32.mrb[5].mxu1  ;;  %v90_v31 = vld [vmem:[#allocation2 + $0x30] sm:$0xff] }
 0x102   :  { %v1090_v38 = vld [vmem:[#allocation2] sm:$0xff]  ;;  %v714_v40 = vpop.f32.mrb[6].mxu0  ;;  %v842_v41 = vpop.f32.mrb[6].mxu1  ;;  %v123_v36 = vld [vmem:[#allocation2 + $0x138] sm:$0xff] }
 0x103   :  { %v1122_v39 = vld [vmem:[#allocation2 + $0x100] sm:$0xff]  ;;  %v1161_v42 = vadd.f32 %v2450_v29, %v1090_v38  ;;  %1025 = vst.msk [vmem:[#allocation2 + $0x10] sm:$0xff] %vm19_vm1, %v960_v34  ;;  %1057 = vst.msk [vmem:[#allocation2 + $0x110] sm:$0xff] %vm19_vm1, %v992_v35  ;;  %v961_v44 = vadd.f32 %v714_v40, %v87_v32  ;;  %v993_v45 = vadd.f32 %v842_v41, %v119_v33  ;;  %v716_v46 = vpop.f32.mrb[7].mxu0  ;;  %v844_v47 = vpop.f32.mrb[7].mxu1  ;;  %v122_v32 = vld [vmem:[#allocation2 + $0x130] sm:$0xff] }
 0x104   :  { %v1193_v43 = vadd.f32 %v2450_v29, %v1122_v39  ;;  %v1091_v48 = vld [vmem:[#allocation2 + $0x8] sm:$0xff]  ;;  %v91_v35 = vld [vmem:[#allocation2 + $0x38] sm:$0xff] }
 0x105   :  { %v1123_v49 = vld [vmem:[#allocation2 + $0x108] sm:$0xff]  ;;  %v1225_v50 = vmul.f32 0.2, %v1161_v42  ;;  %v1162_v52 = vadd.f32 %v2450_v29, %v1091_v48  ;;  %1026 = vst.msk [vmem:[#allocation2 + $0x18] sm:$0xff] %vm19_vm1, %v961_v44  ;;  %1058 = vst.msk [vmem:[#allocation2 + $0x118] sm:$0xff] %vm19_vm1, %v993_v45 }
 0x106   :  { %v1257_v51 = vmul.f32 0.2, %v1193_v43  ;;  %v1194_v53 = vadd.f32 %v2450_v29, %v1123_v49 }
 0x107   :  { %v1289_v54 = vmax.f32 %v1161_v42, %v1225_v50  ;;  %v1226_v56 = vmul.f32 0.2, %v1162_v52 }
 0x108   :  { %v1321_v55 = vmax.f32 %v1193_v43, %v1257_v51  ;;  %v1258_v57 = vmul.f32 0.2, %v1194_v53  ;;  %v719_v60 = vpop.f32.mrb[8].mxu0  ;;  %v847_v61 = vpop.f32.mrb[8].mxu1 }
 0x109   :  { %v1848_v62 = vpack.c.bf16 %v1289_v54, %v1289_v54  ;;  %v1290_v0 = vmax.f32 %v1162_v52, %v1226_v56  ;;  %v721_v2 = vpop.f32.mrb[9].mxu0  ;;  %v849_v3 = vpop.f32.mrb[9].mxu1  ;;  %v962_v8 = vadd.f32 %v719_v60, %v88_v58  ;;  %v994_v9 = vadd.f32 %v847_v61, %v120_v59 }
 0x10a   :  { %v1880_v63 = vpack.c.bf16 %v1321_v55, %v1321_v55  ;;  %v1322_v1 = vmax.f32 %v1194_v53, %v1258_v57  ;;  %v1092_v6 = vld [vmem:[#allocation2 + $0x10] sm:$0xff]  ;;  %v722_v10 = vpop.f32.mrb[10].mxu0  ;;  %v850_v11 = vpop.f32.mrb[10].mxu1  ;;  %v125_v2 = vld [vmem:[#allocation2 + $0x148] sm:$0xff] }
 0x10b   :  { %v1124_v7 = vld [vmem:[#allocation2 + $0x110] sm:$0xff]  ;;  %1610 = vst.msk [vmem:[%s2840_s3] sm:$0xf] %vm1609_vm2, %v1848_v62  ;;  %v1849_v12 = vpack.c.bf16 %v1290_v0, %v1290_v0  ;;  %v1163_v14 = vadd.f32 %v2450_v29, %v1092_v6  ;;  %v724_v16 = vpop.f32.mrb[11].mxu0  ;;  %v852_v17 = vpop.f32.mrb[11].mxu1  ;;  %v963_v20 = vadd.f32 %v722_v10, %v89_v4  ;;  %v995_v21 = vadd.f32 %v850_v11, %v121_v5  ;;  %v124_v0 = vld [vmem:[#allocation2 + $0x140] sm:$0xff] }
 0x10c   :  { %1642 = vst.msk [vmem:[%s2840_s3 + $0x80] sm:$0xf] %vm1609_vm2, %v1880_v63  ;;  %v1881_v13 = vpack.c.bf16 %v1322_v1, %v1322_v1  ;;  %v1195_v15 = vadd.f32 %v2450_v29, %v1124_v7  ;;  %v1093_v18 = vld [vmem:[#allocation2 + $0x18] sm:$0xff]  ;;  %v92_v63 = vld [vmem:[#allocation2 + $0x40] sm:$0xff]  ;;  %v93_v1 = vld [vmem:[#allocation2 + $0x48] sm:$0xff] }
 0x10d   :  { %v1125_v19 = vld [vmem:[#allocation2 + $0x118] sm:$0xff]  ;;  %1027 = vst.msk [vmem:[#allocation2 + $0x20] sm:$0xff] %vm19_vm1, %v962_v8  ;;  %1059 = vst.msk [vmem:[#allocation2 + $0x120] sm:$0xff] %vm19_vm1, %v994_v9  ;;  %v1227_v22 = vmul.f32 0.2, %v1163_v14  ;;  %v1164_v24 = vadd.f32 %v2450_v29, %v1093_v18 }
 0x10e   :  { %1611 = vst.msk [vmem:[%s2840_s3 + $0x4] sm:$0xf] %vm1609_vm2, %v1849_v12  ;;  %1643 = vst.msk [vmem:[%s2840_s3 + $0x84] sm:$0xf] %vm1609_vm2, %v1881_v13  ;;  %v1259_v23 = vmul.f32 0.2, %v1195_v15  ;;  %v1196_v25 = vadd.f32 %v2450_v29, %v1125_v19 }
 0x10f   :  { %1028 = vst.msk [vmem:[#allocation2 + $0x28] sm:$0xff] %vm19_vm1, %v963_v20  ;;  %1060 = vst.msk [vmem:[#allocation2 + $0x128] sm:$0xff] %vm19_vm1, %v995_v21  ;;  %v1291_v26 = vmax.f32 %v1163_v14, %v1227_v22  ;;  %v1228_v28 = vmul.f32 0.2, %v1164_v24 }
 0x110   :  { %v1323_v27 = vmax.f32 %v1195_v15, %v1259_v23  ;;  %v1260_v30 = vmul.f32 0.2, %v1196_v25  ;;  %v727_v33 = vpop.f32.mrb[12].mxu0  ;;  %v855_v34 = vpop.f32.mrb[12].mxu1 }
 0x111   :  { %v1850_v37 = vpack.c.bf16 %v1291_v26, %v1291_v26  ;;  %v1292_v39 = vmax.f32 %v1164_v24, %v1228_v28  ;;  %v729_v41 = vpop.f32.mrb[13].mxu0  ;;  %v857_v42 = vpop.f32.mrb[13].mxu1  ;;  %v964_v43 = vadd.f32 %v727_v33, %v90_v31  ;;  %v996_v44 = vadd.f32 %v855_v34, %v122_v32 }
 0x112   :  { %v1882_v38 = vpack.c.bf16 %v1323_v27, %v1323_v27  ;;  %v1324_v40 = vmax.f32 %v1196_v25, %v1260_v30  ;;  %v730_v45 = vpop.f32.mrb[14].mxu0  ;;  %v858_v46 = vpop.f32.mrb[14].mxu1 }
 0x113   :  { %1612 = vst.msk [vmem:[%s2840_s3 + $0x8] sm:$0xf] %vm1609_vm2, %v1850_v37  ;;  %v1851_v47 = vpack.c.bf16 %v1292_v39, %v1292_v39  ;;  %v965_v51 = vadd.f32 %v730_v45, %v91_v35  ;;  %v997_v52 = vadd.f32 %v858_v46, %v123_v36  ;;  %v732_v53 = vpop.f32.mrb[15].mxu0  ;;  %v860_v54 = vpop.f32.mrb[15].mxu1  ;;  %v94_v36 = vld [vmem:[#allocation2 + $0x50] sm:$0xff] }
 0x114   :  { %1644 = vst.msk [vmem:[%s2840_s3 + $0x88] sm:$0xf] %vm1609_vm2, %v1882_v38  ;;  %v1883_v48 = vpack.c.bf16 %v1324_v40, %v1324_v40  ;;  %v1094_v49 = vld [vmem:[#allocation2 + $0x20] sm:$0xff]  ;;  %v126_v37 = vld [vmem:[#allocation2 + $0x150] sm:$0xff] }
 0x115   :  { %v1126_v50 = vld [vmem:[#allocation2 + $0x120] sm:$0xff]  ;;  %v1165_v55 = vadd.f32 %v2450_v29, %v1094_v49  ;;  %1029 = vst.msk [vmem:[#allocation2 + $0x30] sm:$0xff] %vm19_vm1, %v964_v43  ;;  %1061 = vst.msk [vmem:[#allocation2 + $0x130] sm:$0xff] %vm19_vm1, %v996_v44 }
 0x116   :  { %v1197_v56 = vadd.f32 %v2450_v29, %v1126_v50  ;;  %1613 = vst.msk [vmem:[%s2840_s3 + $0xc] sm:$0xf] %vm1609_vm2, %v1851_v47  ;;  %1645 = vst.msk [vmem:[%s2840_s3 + $0x8c] sm:$0xf] %vm1609_vm2, %v1883_v48  ;;  %v1095_v57 = vld [vmem:[#allocation2 + $0x28] sm:$0xff]  ;;  %v95_v50 = vld [vmem:[#allocation2 + $0x58] sm:$0xff] }
 0x117   :  { %v1127_v58 = vld [vmem:[#allocation2 + $0x128] sm:$0xff]  ;;  %1030 = vst.msk [vmem:[#allocation2 + $0x38] sm:$0xff] %vm19_vm1, %v965_v51  ;;  %1062 = vst.msk [vmem:[#allocation2 + $0x138] sm:$0xff] %vm19_vm1, %v997_v52  ;;  %v1229_v59 = vmul.f32 0.2, %v1165_v55  ;;  %v1166_v61 = vadd.f32 %v2450_v29, %v1095_v57  ;;  %v127_v51 = vld [vmem:[#allocation2 + $0x158] sm:$0xff] }
 0x118   :  { %v1261_v60 = vmul.f32 0.2, %v1197_v56  ;;  %v1198_v62 = vadd.f32 %v2450_v29, %v1127_v58  ;;  %v735_v7 = vpop.f32.mrb[16].mxu0  ;;  %v863_v8 = vpop.f32.mrb[16].mxu1 }
 0x119   :  { %v1293_v3 = vmax.f32 %v1165_v55, %v1229_v59  ;;  %v1230_v5 = vmul.f32 0.2, %v1166_v61  ;;  %v966_v9 = vadd.f32 %v735_v7, %v92_v63  ;;  %v998_v10 = vadd.f32 %v863_v8, %v124_v0  ;;  %v737_v11 = vpop.f32.mrb[17].mxu0  ;;  %v865_v12 = vpop.f32.mrb[17].mxu1 }
 0x11a   :  { %v1325_v4 = vmax.f32 %v1197_v56, %v1261_v60  ;;  %v1262_v6 = vmul.f32 0.2, %v1198_v62  ;;  %v738_v17 = vpop.f32.mrb[18].mxu0  ;;  %v866_v18 = vpop.f32.mrb[18].mxu1  ;;  %v96_v12 = vld [vmem:[#allocation2 + $0x60] sm:$0xff] }
 0x11b   :  { %v1852_v13 = vpack.c.bf16 %v1293_v3, %v1293_v3  ;;  %v1294_v15 = vmax.f32 %v1166_v61, %v1230_v5  ;;  %1031 = vst.msk [vmem:[#allocation2 + $0x40] sm:$0xff] %vm19_vm1, %v966_v9  ;;  %1063 = vst.msk [vmem:[#allocation2 + $0x140] sm:$0xff] %vm19_vm1, %v998_v10  ;;  %v967_v21 = vadd.f32 %v738_v17, %v93_v1  ;;  %v740_v23 = vpop.f32.mrb[19].mxu0  ;;  %v868_v24 = vpop.f32.mrb[19].mxu1 }
 0x11c   :  { %v1884_v14 = vpack.c.bf16 %v1325_v4, %v1325_v4  ;;  %v1326_v16 = vmax.f32 %v1198_v62, %v1262_v6  ;;  %v1096_v19 = vld [vmem:[#allocation2 + $0x30] sm:$0xff]  ;;  %v999_v22 = vadd.f32 %v866_v18, %v125_v2  ;;  %v129_v23 = vld [vmem:[#allocation2 + $0x168] sm:$0xff] }
 0x11d   :  { %v1128_v20 = vld [vmem:[#allocation2 + $0x130] sm:$0xff]  ;;  %1614 = vst.msk [vmem:[%s2840_s3 + $0x10] sm:$0xf] %vm1609_vm2, %v1852_v13  ;;  %v1853_v25 = vpack.c.bf16 %v1294_v15, %v1294_v15  ;;  %v1167_v27 = vadd.f32 %v2450_v29, %v1096_v19  ;;  %v128_v13 = vld [vmem:[#allocation2 + $0x160] sm:$0xff] }
 0x11e   :  { %1646 = vst.msk [vmem:[%s2840_s3 + $0x90] sm:$0xf] %vm1609_vm2, %v1884_v14  ;;  %v1885_v26 = vpack.c.bf16 %v1326_v16, %v1326_v16  ;;  %v1199_v28 = vadd.f32 %v2450_v29, %v1128_v20  ;;  %v1097_v30 = vld [vmem:[#allocation2 + $0x38] sm:$0xff] }
 0x11f   :  { %v1129_v31 = vld [vmem:[#allocation2 + $0x138] sm:$0xff]  ;;  %v1168_v32 = vadd.f32 %v2450_v29, %v1097_v30  ;;  %1032 = vst.msk [vmem:[#allocation2 + $0x48] sm:$0xff] %vm19_vm1, %v967_v21  ;;  %1064 = vst.msk [vmem:[#allocation2 + $0x148] sm:$0xff] %vm19_vm1, %v999_v22  ;;  %v1231_v34 = vmul.f32 0.2, %v1167_v27  ;;  %v97_v22 = vld [vmem:[#allocation2 + $0x68] sm:$0xff] }
 0x120   :  { %v1200_v33 = vadd.f32 %v2450_v29, %v1129_v31  ;;  %1615 = vst.msk [vmem:[%s2840_s3 + $0x14] sm:$0xf] %vm1609_vm2, %v1853_v25  ;;  %1647 = vst.msk [vmem:[%s2840_s3 + $0x94] sm:$0xf] %vm1609_vm2, %v1885_v26  ;;  %v1263_v35 = vmul.f32 0.2, %v1199_v28 }
 0x121   :  { %v1232_v38 = vmul.f32 0.2, %v1168_v32  ;;  %v1295_v40 = vmax.f32 %v1167_v27, %v1231_v34  ;;  %v743_v42 = vpop.f32.mrb[20].mxu0  ;;  %v871_v43 = vpop.f32.mrb[20].mxu1 }
 0x122   :  { %v1264_v39 = vmul.f32 0.2, %v1200_v33  ;;  %v1327_v41 = vmax.f32 %v1199_v28, %v1263_v35  ;;  %v968_v46 = vadd.f32 %v743_v42, %v94_v36  ;;  %v1000_v47 = vadd.f32 %v871_v43, %v126_v37  ;;  %v745_v48 = vpop.f32.mrb[21].mxu0  ;;  %v873_v49 = vpop.f32.mrb[21].mxu1  ;;  %v1098_v54 = vld [vmem:[#allocation2 + $0x40] sm:$0xff] }
 0x123   :  { %v1296_v44 = vmax.f32 %v1168_v32, %v1232_v38  ;;  %v1854_v52 = vpack.c.bf16 %v1295_v40, %v1295_v40  ;;  %v1130_v55 = vld [vmem:[#allocation2 + $0x140] sm:$0xff]  ;;  %v746_v56 = vpop.f32.mrb[22].mxu0  ;;  %v874_v57 = vpop.f32.mrb[22].mxu1  ;;  %v1169_v60 = vadd.f32 %v2450_v29, %v1098_v54  ;;  %v99_v49 = vld [vmem:[#allocation2 + $0x78] sm:$0xff] }
 0x124   :  { %v1328_v45 = vmax.f32 %v1200_v33, %v1264_v39  ;;  %v1886_v53 = vpack.c.bf16 %v1327_v41, %v1327_v41  ;;  %v1201_v61 = vadd.f32 %v2450_v29, %v1130_v55  ;;  %1033 = vst.msk [vmem:[#allocation2 + $0x50] sm:$0xff] %vm19_vm1, %v968_v46  ;;  %1065 = vst.msk [vmem:[#allocation2 + $0x150] sm:$0xff] %vm19_vm1, %v1000_v47  ;;  %v748_v62 = vpop.f32.mrb[23].mxu0  ;;  %v876_v63 = vpop.f32.mrb[23].mxu1  ;;  %v130_v46 = vld [vmem:[#allocation2 + $0x170] sm:$0xff] }
 0x125   :  { %v1855_v58 = vpack.c.bf16 %v1296_v44, %v1296_v44  ;;  %1616 = vst.msk [vmem:[%s2840_s3 + $0x18] sm:$0xf] %vm1609_vm2, %v1854_v52  ;;  %v969_v2 = vadd.f32 %v746_v56, %v95_v50  ;;  %v1001_v3 = vadd.f32 %v874_v57, %v127_v51  ;;  %v1233_v4 = vmul.f32 0.2, %v1169_v60  ;;  %v131_v50 = vld [vmem:[#allocation2 + $0x178] sm:$0xff] }
 0x126   :  { %v1887_v59 = vpack.c.bf16 %v1328_v45, %v1328_v45  ;;  %1648 = vst.msk [vmem:[%s2840_s3 + $0x98] sm:$0xf] %vm1609_vm2, %v1886_v53  ;;  %v1099_v0 = vld [vmem:[#allocation2 + $0x48] sm:$0xff]  ;;  %v1265_v5 = vmul.f32 0.2, %v1201_v61  ;;  %v98_v45 = vld [vmem:[#allocation2 + $0x70] sm:$0xff] }
 0x127   :  { %v1131_v1 = vld [vmem:[#allocation2 + $0x148] sm:$0xff]  ;;  %1617 = vst.msk [vmem:[%s2840_s3 + $0x1c] sm:$0xf] %vm1609_vm2, %v1855_v58  ;;  %v1170_v6 = vadd.f32 %v2450_v29, %v1099_v0  ;;  %v1297_v8 = vmax.f32 %v1169_v60, %v1233_v4 }
 0x128   :  { %1649 = vst.msk [vmem:[%s2840_s3 + $0x9c] sm:$0xf] %vm1609_vm2, %v1887_v59  ;;  %v1202_v7 = vadd.f32 %v2450_v29, %v1131_v1  ;;  %v1329_v9 = vmax.f32 %v1201_v61, %v1265_v5  ;;  %v751_v14 = vpop.f32.mrb[24].mxu0  ;;  %v879_v15 = vpop.f32.mrb[24].mxu1 }
 0x129   :  { %1034 = vst.msk [vmem:[#allocation2 + $0x58] sm:$0xff] %vm19_vm1, %v969_v2  ;;  %1066 = vst.msk [vmem:[#allocation2 + $0x158] sm:$0xff] %vm19_vm1, %v1001_v3  ;;  %v1234_v10 = vmul.f32 0.2, %v1170_v6  ;;  %v1856_v16 = vpack.c.bf16 %v1297_v8, %v1297_v8  ;;  %v753_v20 = vpop.f32.mrb[25].mxu0  ;;  %v881_v21 = vpop.f32.mrb[25].mxu1  ;;  %v970_v26 = vadd.f32 %v751_v14, %v96_v12  ;;  %v1002_v27 = vadd.f32 %v879_v15, %v128_v13 }
 0x12a   :  { %v1266_v11 = vmul.f32 0.2, %v1202_v7  ;;  %v1888_v17 = vpack.c.bf16 %v1329_v9, %v1329_v9  ;;  %v754_v28 = vpop.f32.mrb[26].mxu0  ;;  %v882_v30 = vpop.f32.mrb[26].mxu1  ;;  %v133_v20 = vld [vmem:[#allocation2 + $0x188] sm:$0xff] }
 0x12b   :  { %v1298_v18 = vmax.f32 %v1170_v6, %v1234_v10  ;;  %v1100_v24 = vld [vmem:[#allocation2 + $0x50] sm:$0xff]  ;;  %1618 = vst.msk [vmem:[%s2840_s3 + $0x20] sm:$0xf] %vm1609_vm2, %v1856_v16  ;;  %v756_v35 = vpop.f32.mrb[27].mxu0  ;;  %v884_v36 = vpop.f32.mrb[27].mxu1  ;;  %v971_v37 = vadd.f32 %v754_v28, %v97_v22  ;;  %v1003_v38 = vadd.f32 %v882_v30, %v129_v23 }
 0x12c   :  { %v1330_v19 = vmax.f32 %v1202_v7, %v1266_v11  ;;  %v1132_v25 = vld [vmem:[#allocation2 + $0x150] sm:$0xff]  ;;  %1650 = vst.msk [vmem:[%s2840_s3 + $0xa0] sm:$0xf] %vm1609_vm2, %v1888_v17  ;;  %v1171_v33 = vadd.f32 %v2450_v29, %v1100_v24  ;;  %v100_v17 = vld [vmem:[#allocation2 + $0x80] sm:$0xff] }
 0x12d   :  { %v1857_v31 = vpack.c.bf16 %v1298_v18, %v1298_v18  ;;  %v1203_v34 = vadd.f32 %v2450_v29, %v1132_v25  ;;  %1035 = vst.msk [vmem:[#allocation2 + $0x60] sm:$0xff] %vm19_vm1, %v970_v26  ;;  %1067 = vst.msk [vmem:[#allocation2 + $0x160] sm:$0xff] %vm19_vm1, %v1002_v27  ;;  %v132_v18 = vld [vmem:[#allocation2 + $0x180] sm:$0xff] }
 0x12e   :  { %v1889_v32 = vpack.c.bf16 %v1330_v19, %v1330_v19  ;;  %v1235_v39 = vmul.f32 0.2, %v1171_v33  ;;  %1036 = vst.msk [vmem:[#allocation2 + $0x68] sm:$0xff] %vm19_vm1, %v971_v37  ;;  %1068 = vst.msk [vmem:[#allocation2 + $0x168] sm:$0xff] %vm19_vm1, %v1003_v38  ;;  %v101_v19 = vld [vmem:[#allocation2 + $0x88] sm:$0xff] }
 0x12f   :  { %1619 = vst.msk [vmem:[%s2840_s3 + $0x24] sm:$0xf] %vm1609_vm2, %v1857_v31  ;;  %v1267_v40 = vmul.f32 0.2, %v1203_v34 }
 0x130   :  { %1651 = vst.msk [vmem:[%s2840_s3 + $0xa4] sm:$0xf] %vm1609_vm2, %v1889_v32  ;;  %v1101_v41 = vld [vmem:[#allocation2 + $0x58] sm:$0xff]  ;;  %v1299_v47 = vmax.f32 %v1171_v33, %v1235_v39  ;;  %v759_v53 = vpop.f32.mrb[28].mxu0  ;;  %v887_v54 = vpop.f32.mrb[28].mxu1 }
 0x131   :  { %v1133_v42 = vld [vmem:[#allocation2 + $0x158] sm:$0xff]  ;;  %v1172_v43 = vadd.f32 %v2450_v29, %v1101_v41  ;;  %v1331_v48 = vmax.f32 %v1203_v34, %v1267_v40  ;;  %v972_v57 = vadd.f32 %v759_v53, %v98_v45  ;;  %v1004_v58 = vadd.f32 %v887_v54, %v130_v46  ;;  %v761_v59 = vpop.f32.mrb[29].mxu0  ;;  %v889_v60 = vpop.f32.mrb[29].mxu1 }
 0x132   :  { %v1204_v44 = vadd.f32 %v2450_v29, %v1133_v42  ;;  %v1858_v55 = vpack.c.bf16 %v1299_v47, %v1299_v47  ;;  %v762_v63 = vpop.f32.mrb[30].mxu0  ;;  %v890_v0 = vpop.f32.mrb[30].mxu1  ;;  %v134_v59 = vld [vmem:[#allocation2 + $0x190] sm:$0xff] }
 0x133   :  { %v1236_v51 = vmul.f32 0.2, %v1172_v43  ;;  %v1890_v56 = vpack.c.bf16 %v1331_v48, %v1331_v48  ;;  %1037 = vst.msk [vmem:[#allocation2 + $0x70] sm:$0xff] %vm19_vm1, %v972_v57  ;;  %1069 = vst.msk [vmem:[#allocation2 + $0x170] sm:$0xff] %vm19_vm1, %v1004_v58  ;;  %v973_v3 = vadd.f32 %v762_v63, %v99_v49  ;;  %v1005_v4 = vadd.f32 %v890_v0, %v131_v50  ;;  %v764_v5 = vpop.f32.mrb[31].mxu0  ;;  %v892_v6 = vpop.f32.mrb[31].mxu1 }
 0x134   :  { %v1268_v52 = vmul.f32 0.2, %v1204_v44  ;;  %1620 = vst.msk [vmem:[%s2840_s3 + $0x28] sm:$0xf] %vm1609_vm2, %v1858_v55  ;;  %v1102_v1 = vld [vmem:[#allocation2 + $0x60] sm:$0xff]  ;;  %v102_v58 = vld [vmem:[#allocation2 + $0x90] sm:$0xff] }
 0x135   :  { %v1300_v61 = vmax.f32 %v1172_v43, %v1236_v51  ;;  %1652 = vst.msk [vmem:[%s2840_s3 + $0xa8] sm:$0xf] %vm1609_vm2, %v1890_v56  ;;  %v1134_v2 = vld [vmem:[#allocation2 + $0x160] sm:$0xff]  ;;  %v1173_v9 = vadd.f32 %v2450_v29, %v1102_v1  ;;  %v1103_v11 = vld [vmem:[#allocation2 + $0x68] sm:$0xff]  ;;  %v135_v5 = vld [vmem:[#allocation2 + $0x198] sm:$0xff] }
 0x136   :  { %v1332_v62 = vmax.f32 %v1204_v44, %v1268_v52  ;;  %v1205_v10 = vadd.f32 %v2450_v29, %v1134_v2  ;;  %v1135_v12 = vld [vmem:[#allocation2 + $0x168] sm:$0xff]  ;;  %1038 = vst.msk [vmem:[#allocation2 + $0x78] sm:$0xff] %vm19_vm1, %v973_v3  ;;  %1070 = vst.msk [vmem:[#allocation2 + $0x178] sm:$0xff] %vm19_vm1, %v1005_v4  ;;  %v1174_v15 = vadd.f32 %v2450_v29, %v1103_v11  ;;  %v103_v4 = vld [vmem:[#allocation2 + $0x98] sm:$0xff] }
 0x137   :  { %v1859_v7 = vpack.c.bf16 %v1300_v61, %v1300_v61  ;;  %v1237_v13 = vmul.f32 0.2, %v1173_v9  ;;  %v1206_v16 = vadd.f32 %v2450_v29, %v1135_v12 }
 0x138   :  { %v1891_v8 = vpack.c.bf16 %v1332_v62, %v1332_v62  ;;  %v1269_v14 = vmul.f32 0.2, %v1205_v10  ;;  %v1238_v23 = vmul.f32 0.2, %v1174_v15  ;;  %v767_v25 = vpop.f32.mrb[32].mxu0  ;;  %v895_v26 = vpop.f32.mrb[32].mxu1 }
 0x139   :  { %1621 = vst.msk [vmem:[%s2840_s3 + $0x2c] sm:$0xf] %vm1609_vm2, %v1859_v7  ;;  %v1301_v21 = vmax.f32 %v1173_v9, %v1237_v13  ;;  %v1270_v24 = vmul.f32 0.2, %v1206_v16  ;;  %v974_v27 = vadd.f32 %v767_v25, %v100_v17  ;;  %v1006_v28 = vadd.f32 %v895_v26, %v132_v18  ;;  %v769_v30 = vpop.f32.mrb[33].mxu0  ;;  %v897_v31 = vpop.f32.mrb[33].mxu1 }
 0x13a   :  { %1653 = vst.msk [vmem:[%s2840_s3 + $0xac] sm:$0xf] %vm1609_vm2, %v1891_v8  ;;  %v1333_v22 = vmax.f32 %v1205_v10, %v1269_v14  ;;  %v1302_v34 = vmax.f32 %v1174_v15, %v1238_v23  ;;  %v1104_v36 = vld [vmem:[#allocation2 + $0x70] sm:$0xff]  ;;  %v770_v38 = vpop.f32.mrb[34].mxu0  ;;  %v898_v39 = vpop.f32.mrb[34].mxu1  ;;  %v104_v31 = vld [vmem:[#allocation2 + $0xa0] sm:$0xff] }
 0x13b   :  { %v1860_v32 = vpack.c.bf16 %v1301_v21, %v1301_v21  ;;  %v1334_v35 = vmax.f32 %v1206_v16, %v1270_v24  ;;  %v1136_v37 = vld [vmem:[#allocation2 + $0x170] sm:$0xff]  ;;  %v1175_v40 = vadd.f32 %v2450_v29, %v1104_v36  ;;  %1039 = vst.msk [vmem:[#allocation2 + $0x80] sm:$0xff] %vm19_vm1, %v974_v27  ;;  %1071 = vst.msk [vmem:[#allocation2 + $0x180] sm:$0xff] %vm19_vm1, %v1006_v28  ;;  %v772_v44 = vpop.f32.mrb[35].mxu0  ;;  %v900_v45 = vpop.f32.mrb[35].mxu1  ;;  %v137_v36 = vld [vmem:[#allocation2 + $0x1a8] sm:$0xff] }
 0x13c   :  { %v1892_v33 = vpack.c.bf16 %v1333_v22, %v1333_v22  ;;  %v1207_v41 = vadd.f32 %v2450_v29, %v1136_v37  ;;  %v975_v42 = vadd.f32 %v770_v38, %v101_v19  ;;  %v1007_v43 = vadd.f32 %v898_v39, %v133_v20 }
 0x13d   :  { %1622 = vst.msk [vmem:[%s2840_s3 + $0x30] sm:$0xf] %vm1609_vm2, %v1860_v32  ;;  %v1861_v46 = vpack.c.bf16 %v1302_v34, %v1302_v34  ;;  %v1893_v47 = vpack.c.bf16 %v1334_v35, %v1334_v35  ;;  %v1105_v48 = vld [vmem:[#allocation2 + $0x78] sm:$0xff]  ;;  %v1239_v50 = vmul.f32 0.2, %v1175_v40  ;;  %v136_v32 = vld [vmem:[#allocation2 + $0x1a0] sm:$0xff] }
 0x13e   :  { %1654 = vst.msk [vmem:[%s2840_s3 + $0xb0] sm:$0xf] %vm1609_vm2, %v1892_v33  ;;  %v1137_v49 = vld [vmem:[#allocation2 + $0x178] sm:$0xff]  ;;  %v1271_v51 = vmul.f32 0.2, %v1207_v41  ;;  %v1176_v52 = vadd.f32 %v2450_v29, %v1105_v48  ;;  %v105_v35 = vld [vmem:[#allocation2 + $0xa8] sm:$0xff] }
 0x13f   :  { %v1208_v53 = vadd.f32 %v2450_v29, %v1137_v49  ;;  %1040 = vst.msk [vmem:[#allocation2 + $0x88] sm:$0xff] %vm19_vm1, %v975_v42  ;;  %1072 = vst.msk [vmem:[#allocation2 + $0x188] sm:$0xff] %vm19_vm1, %v1007_v43  ;;  %v1303_v54 = vmax.f32 %v1175_v40, %v1239_v50 }
 0x140   :  { %1623 = vst.msk [vmem:[%s2840_s3 + $0x34] sm:$0xf] %vm1609_vm2, %v1861_v46  ;;  %1655 = vst.msk [vmem:[%s2840_s3 + $0xb4] sm:$0xf] %vm1609_vm2, %v1893_v47  ;;  %v1335_v55 = vmax.f32 %v1207_v41, %v1271_v51  ;;  %v1240_v56 = vmul.f32 0.2, %v1176_v52 }
 0x141   :  { %v1272_v57 = vmul.f32 0.2, %v1208_v53  ;;  %v775_v60 = vpop.f32.mrb[36].mxu0  ;;  %v903_v61 = vpop.f32.mrb[36].mxu1  ;;  %v1862_v62 = vpack.c.bf16 %v1303_v54, %v1303_v54 }
 0x142   :  { %v1894_v63 = vpack.c.bf16 %v1335_v55, %v1335_v55  ;;  %v1304_v0 = vmax.f32 %v1176_v52, %v1240_v56  ;;  %v777_v2 = vpop.f32.mrb[37].mxu0  ;;  %v905_v3 = vpop.f32.mrb[37].mxu1  ;;  %v1106_v6 = vld [vmem:[#allocation2 + $0x80] sm:$0xff]  ;;  %v976_v8 = vadd.f32 %v775_v60, %v102_v58  ;;  %v1008_v9 = vadd.f32 %v903_v61, %v134_v59 }
 0x143   :  { %v1336_v1 = vmax.f32 %v1208_v53, %v1272_v57  ;;  %v1138_v7 = vld [vmem:[#allocation2 + $0x180] sm:$0xff]  ;;  %v778_v10 = vpop.f32.mrb[38].mxu0  ;;  %v906_v11 = vpop.f32.mrb[38].mxu1  ;;  %1624 = vst.msk [vmem:[%s2840_s3 + $0x38] sm:$0xf] %vm1609_vm2, %v1862_v62  ;;  %v1177_v14 = vadd.f32 %v2450_v29, %v1106_v6  ;;  %v139_v2 = vld [vmem:[#allocation2 + $0x1b8] sm:$0xff] }
 0x144   :  { %1656 = vst.msk [vmem:[%s2840_s3 + $0xb8] sm:$0xf] %vm1609_vm2, %v1894_v63  ;;  %v1863_v12 = vpack.c.bf16 %v1304_v0, %v1304_v0  ;;  %v1209_v15 = vadd.f32 %v2450_v29, %v1138_v7  ;;  %v780_v16 = vpop.f32.mrb[39].mxu0  ;;  %v908_v17 = vpop.f32.mrb[39].mxu1  ;;  %v977_v20 = vadd.f32 %v778_v10, %v103_v4  ;;  %v1009_v21 = vadd.f32 %v906_v11, %v135_v5  ;;  %v106_v63 = vld [vmem:[#allocation2 + $0xb0] sm:$0xff] }
 0x145   :  { %v1895_v13 = vpack.c.bf16 %v1336_v1, %v1336_v1  ;;  %1041 = vst.msk [vmem:[#allocation2 + $0x90] sm:$0xff] %vm19_vm1, %v976_v8  ;;  %1073 = vst.msk [vmem:[#allocation2 + $0x190] sm:$0xff] %vm19_vm1, %v1008_v9  ;;  %v1241_v22 = vmul.f32 0.2, %v1177_v14  ;;  %v138_v0 = vld [vmem:[#allocation2 + $0x1b0] sm:$0xff]  ;;  %v107_v1 = vld [vmem:[#allocation2 + $0xb8] sm:$0xff] }
 0x146   :  { %v1107_v18 = vld [vmem:[#allocation2 + $0x88] sm:$0xff]  ;;  %1625 = vst.msk [vmem:[%s2840_s3 + $0x3c] sm:$0xf] %vm1609_vm2, %v1863_v12  ;;  %v1273_v23 = vmul.f32 0.2, %v1209_v15 }
 0x147   :  { %v1139_v19 = vld [vmem:[#allocation2 + $0x188] sm:$0xff]  ;;  %1657 = vst.msk [vmem:[%s2840_s3 + $0xbc] sm:$0xf] %vm1609_vm2, %v1895_v13  ;;  %v1178_v24 = vadd.f32 %v2450_v29, %v1107_v18  ;;  %v1305_v26 = vmax.f32 %v1177_v14, %v1241_v22 }
 0x148   :  { %v1210_v25 = vadd.f32 %v2450_v29, %v1139_v19  ;;  %1042 = vst.msk [vmem:[#allocation2 + $0x98] sm:$0xff] %vm19_vm1, %v977_v20  ;;  %1074 = vst.msk [vmem:[#allocation2 + $0x198] sm:$0xff] %vm19_vm1, %v1009_v21  ;;  %v1337_v27 = vmax.f32 %v1209_v15, %v1273_v23  ;;  %v783_v33 = vpop.f32.mrb[40].mxu0  ;;  %v911_v34 = vpop.f32.mrb[40].mxu1 }
 0x149   :  { %v1242_v28 = vmul.f32 0.2, %v1178_v24  ;;  %v1864_v37 = vpack.c.bf16 %v1305_v26, %v1305_v26  ;;  %v785_v41 = vpop.f32.mrb[41].mxu0  ;;  %v913_v42 = vpop.f32.mrb[41].mxu1  ;;  %v978_v43 = vadd.f32 %v783_v33, %v104_v31  ;;  %v1010_v44 = vadd.f32 %v911_v34, %v136_v32 }
 0x14a   :  { %v1274_v30 = vmul.f32 0.2, %v1210_v25  ;;  %v1896_v38 = vpack.c.bf16 %v1337_v27, %v1337_v27  ;;  %v786_v45 = vpop.f32.mrb[42].mxu0  ;;  %v914_v46 = vpop.f32.mrb[42].mxu1 }
 0x14b   :  { %v1306_v39 = vmax.f32 %v1178_v24, %v1242_v28  ;;  %1626 = vst.msk [vmem:[%s2840_s3 + $0x40] sm:$0xf] %vm1609_vm2, %v1864_v37  ;;  %v979_v51 = vadd.f32 %v786_v45, %v105_v35  ;;  %v1011_v52 = vadd.f32 %v914_v46, %v137_v36  ;;  %v788_v53 = vpop.f32.mrb[43].mxu0  ;;  %v916_v54 = vpop.f32.mrb[43].mxu1  ;;  %v108_v36 = vld [vmem:[#allocation2 + $0xc0] sm:$0xff] }
 0x14c   :  { %v1338_v40 = vmax.f32 %v1210_v25, %v1274_v30  ;;  %1658 = vst.msk [vmem:[%s2840_s3 + $0xc0] sm:$0xf] %vm1609_vm2, %v1896_v38  ;;  %v1108_v49 = vld [vmem:[#allocation2 + $0x90] sm:$0xff]  ;;  %v140_v37 = vld [vmem:[#allocation2 + $0x1c0] sm:$0xff] }
 0x14d   :  { %v1865_v47 = vpack.c.bf16 %v1306_v39, %v1306_v39  ;;  %v1140_v50 = vld [vmem:[#allocation2 + $0x190] sm:$0xff]  ;;  %v1179_v55 = vadd.f32 %v2450_v29, %v1108_v49  ;;  %1043 = vst.msk [vmem:[#allocation2 + $0xa0] sm:$0xff] %vm19_vm1, %v978_v43  ;;  %1075 = vst.msk [vmem:[#allocation2 + $0x1a0] sm:$0xff] %vm19_vm1, %v1010_v44 }
 0x14e   :  { %v1897_v48 = vpack.c.bf16 %v1338_v40, %v1338_v40  ;;  %v1211_v56 = vadd.f32 %v2450_v29, %v1140_v50  ;;  %1044 = vst.msk [vmem:[#allocation2 + $0xa8] sm:$0xff] %vm19_vm1, %v979_v51  ;;  %1076 = vst.msk [vmem:[#allocation2 + $0x1a8] sm:$0xff] %vm19_vm1, %v1011_v52  ;;  %v109_v50 = vld [vmem:[#allocation2 + $0xc8] sm:$0xff] }
 0x14f   :  { %1627 = vst.msk [vmem:[%s2840_s3 + $0x44] sm:$0xf] %vm1609_vm2, %v1865_v47  ;;  %v1109_v57 = vld [vmem:[#allocation2 + $0x98] sm:$0xff]  ;;  %v1243_v59 = vmul.f32 0.2, %v1179_v55  ;;  %v141_v51 = vld [vmem:[#allocation2 + $0x1c8] sm:$0xff] }
 0x150   :  { %1659 = vst.msk [vmem:[%s2840_s3 + $0xc4] sm:$0xf] %vm1609_vm2, %v1897_v48  ;;  %v1141_v58 = vld [vmem:[#allocation2 + $0x198] sm:$0xff]  ;;  %v1275_v60 = vmul.f32 0.2, %v1211_v56  ;;  %v1180_v61 = vadd.f32 %v2450_v29, %v1109_v57  ;;  %v791_v7 = vpop.f32.mrb[44].mxu0 }
 0x151   :  { %v1212_v62 = vadd.f32 %v2450_v29, %v1141_v58  ;;  %v1307_v3 = vmax.f32 %v1179_v55, %v1243_v59  ;;  %v919_v8 = vpop.f32.mrb[44].mxu1  ;;  %v980_v9 = vadd.f32 %v791_v7, %v106_v63  ;;  %v793_v11 = vpop.f32.mrb[45].mxu0  ;;  %v2724_v7 = vld [vmem:[%s2839_s2] ss:$0 sm:$0xff] }
 0x152   :  { %v1339_v4 = vmax.f32 %v1211_v56, %v1275_v60  ;;  %v1244_v5 = vmul.f32 0.2, %v1180_v61  ;;  %v1012_v10 = vadd.f32 %v919_v8, %v138_v0  ;;  %v921_v12 = vpop.f32.mrb[45].mxu1  ;;  %v794_v17 = vpop.f32.mrb[46].mxu0 }
 0x153   :  { %v1276_v6 = vmul.f32 0.2, %v1212_v62  ;;  %v1866_v13 = vpack.c.bf16 %v1307_v3, %v1307_v3  ;;  %v922_v18 = vpop.f32.mrb[46].mxu1  ;;  %1045 = vst.msk [vmem:[#allocation2 + $0xb0] sm:$0xff] %vm19_vm1, %v980_v9  ;;  %v981_v21 = vadd.f32 %v794_v17, %v107_v1  ;;  %v796_v23 = vpop.f32.mrb[47].mxu0 }
 0x154   :  { %v1898_v14 = vpack.c.bf16 %v1339_v4, %v1339_v4  ;;  %v1308_v15 = vmax.f32 %v1180_v61, %v1244_v5  ;;  %v1110_v19 = vld [vmem:[#allocation2 + $0xa0] sm:$0xff]  ;;  %1077 = vst.msk [vmem:[#allocation2 + $0x1b0] sm:$0xff] %vm19_vm1, %v1012_v10  ;;  %v1013_v22 = vadd.f32 %v922_v18, %v139_v2  ;;  %v924_v24 = vpop.f32.mrb[47].mxu1  ;;  %v143_v23 = vld [vmem:[#allocation2 + $0x1d8] sm:$0xff] }
 0x155   :  { %v1340_v16 = vmax.f32 %v1212_v62, %v1276_v6  ;;  %v1142_v20 = vld [vmem:[#allocation2 + $0x1a0] sm:$0xff]  ;;  %1628 = vst.msk [vmem:[%s2840_s3 + $0x48] sm:$0xf] %vm1609_vm2, %v1866_v13  ;;  %v1181_v27 = vadd.f32 %v2450_v29, %v1110_v19  ;;  %v1111_v30 = vld [vmem:[#allocation2 + $0xa8] sm:$0xff]  ;;  %v110_v13 = vld [vmem:[#allocation2 + $0xd0] sm:$0xff] }
 0x156   :  { %1660 = vst.msk [vmem:[%s2840_s3 + $0xc8] sm:$0xf] %vm1609_vm2, %v1898_v14  ;;  %v1867_v25 = vpack.c.bf16 %v1308_v15, %v1308_v15  ;;  %v1213_v28 = vadd.f32 %v2450_v29, %v1142_v20  ;;  %v1143_v31 = vld [vmem:[#allocation2 + $0x1a8] sm:$0xff]  ;;  %v1182_v32 = vadd.f32 %v2450_v29, %v1111_v30  ;;  %v142_v14 = vld [vmem:[#allocation2 + $0x1d0] sm:$0xff] }
 0x157   :  { %v1899_v26 = vpack.c.bf16 %v1340_v16, %v1340_v16  ;;  %v1214_v33 = vadd.f32 %v2450_v29, %v1143_v31  ;;  %1046 = vst.msk [vmem:[#allocation2 + $0xb8] sm:$0xff] %vm19_vm1, %v981_v21  ;;  %1078 = vst.msk [vmem:[#allocation2 + $0x1b8] sm:$0xff] %vm19_vm1, %v1013_v22  ;;  %v1245_v34 = vmul.f32 0.2, %v1181_v27  ;;  %v111_v22 = vld [vmem:[#allocation2 + $0xd8] sm:$0xff] }
 0x158   :  { %1629 = vst.msk [vmem:[%s2840_s3 + $0x4c] sm:$0xf] %vm1609_vm2, %v1867_v25  ;;  %v1277_v35 = vmul.f32 0.2, %v1213_v28  ;;  %v1246_v38 = vmul.f32 0.2, %v1182_v32 }
 0x159   :  { %1661 = vst.msk [vmem:[%s2840_s3 + $0xcc] sm:$0xf] %vm1609_vm2, %v1899_v26  ;;  %v1278_v39 = vmul.f32 0.2, %v1214_v33  ;;  %v1309_v40 = vmax.f32 %v1181_v27, %v1245_v34  ;;  %v799_v42 = vpop.f32.mrb[48].mxu0  ;;  %v927_v43 = vpop.f32.mrb[48].mxu1 }
 0x15a   :  { %v1341_v41 = vmax.f32 %v1213_v28, %v1277_v35  ;;  %v1310_v44 = vmax.f32 %v1182_v32, %v1246_v38  ;;  %v982_v46 = vadd.f32 %v799_v42, %v108_v36  ;;  %v1014_v47 = vadd.f32 %v927_v43, %v140_v37  ;;  %v801_v48 = vpop.f32.mrb[49].mxu0  ;;  %v929_v49 = vpop.f32.mrb[49].mxu1  ;;  %v1112_v54 = vld [vmem:[#allocation2 + $0xb0] sm:$0xff] }
 0x15b   :  { %v1342_v45 = vmax.f32 %v1214_v33, %v1278_v39  ;;  %v1868_v52 = vpack.c.bf16 %v1309_v40, %v1309_v40  ;;  %v1144_v55 = vld [vmem:[#allocation2 + $0x1b0] sm:$0xff]  ;;  %v802_v56 = vpop.f32.mrb[50].mxu0  ;;  %v930_v57 = vpop.f32.mrb[50].mxu1  ;;  %v1183_v60 = vadd.f32 %v2450_v29, %v1112_v54  ;;  %v113_v49 = vld [vmem:[#allocation2 + $0xe8] sm:$0xff] }
 0x15c   :  { %v1900_v53 = vpack.c.bf16 %v1341_v41, %v1341_v41  ;;  %v1869_v58 = vpack.c.bf16 %v1310_v44, %v1310_v44  ;;  %v1215_v61 = vadd.f32 %v2450_v29, %v1144_v55  ;;  %1047 = vst.msk [vmem:[#allocation2 + $0xc0] sm:$0xff] %vm19_vm1, %v982_v46  ;;  %1079 = vst.msk [vmem:[#allocation2 + $0x1c0] sm:$0xff] %vm19_vm1, %v1014_v47  ;;  %v804_v62 = vpop.f32.mrb[51].mxu0  ;;  %v932_v63 = vpop.f32.mrb[51].mxu1  ;;  %v144_v46 = vld [vmem:[#allocation2 + $0x1e0] sm:$0xff] }
 0x15d   :  { %v1901_v59 = vpack.c.bf16 %v1342_v45, %v1342_v45  ;;  %1630 = vst.msk [vmem:[%s2840_s3 + $0x50] sm:$0xf] %vm1609_vm2, %v1868_v52  ;;  %v983_v2 = vadd.f32 %v802_v56, %v109_v50  ;;  %v1015_v3 = vadd.f32 %v930_v57, %v141_v51  ;;  %v1247_v4 = vmul.f32 0.2, %v1183_v60  ;;  %v112_v45 = vld [vmem:[#allocation2 + $0xe0] sm:$0xff]  ;;  %v145_v50 = vld [vmem:[#allocation2 + $0x1e8] sm:$0xff] }
 0x15e   :  { %1662 = vst.msk [vmem:[%s2840_s3 + $0xd0] sm:$0xf] %vm1609_vm2, %v1900_v53  ;;  %v1113_v0 = vld [vmem:[#allocation2 + $0xb8] sm:$0xff]  ;;  %1631 = vst.msk [vmem:[%s2840_s3 + $0x54] sm:$0xf] %vm1609_vm2, %v1869_v58 }
 0x15f   :  { %v1145_v1 = vld [vmem:[#allocation2 + $0x1b8] sm:$0xff]  ;;  %1663 = vst.msk [vmem:[%s2840_s3 + $0xd4] sm:$0xf] %vm1609_vm2, %v1901_v59  ;;  %v1279_v5 = vmul.f32 0.2, %v1215_v61  ;;  %v1184_v6 = vadd.f32 %v2450_v29, %v1113_v0  ;;  %v1311_v9 = vmax.f32 %v1183_v60, %v1247_v4 }
 0x160   :  { %v1216_v8 = vadd.f32 %v2724_v7, %v1145_v1  ;;  %1048 = vst.msk [vmem:[#allocation2 + $0xc8] sm:$0xff] %vm19_vm1, %v983_v2  ;;  %1080 = vst.msk [vmem:[#allocation2 + $0x1c8] sm:$0xff] %vm19_vm1, %v1015_v3  ;;  %v807_v15 = vpop.f32.mrb[52].mxu0  ;;  %v935_v16 = vpop.f32.mrb[52].mxu1 }
 0x161   :  { %v1343_v10 = vmax.f32 %v1215_v61, %v1279_v5  ;;  %v1248_v11 = vmul.f32 0.2, %v1184_v6  ;;  %v1870_v29 = vpack.c.bf16 %v1311_v9, %v1311_v9  ;;  %v809_v20 = vpop.f32.mrb[53].mxu0  ;;  %v937_v21 = vpop.f32.mrb[53].mxu1  ;;  %v984_v26 = vadd.f32 %v807_v15, %v110_v13 }
 0x162   :  { %v1280_v12 = vmul.f32 0.2, %v1216_v8  ;;  %v1016_v27 = vadd.f32 %v935_v16, %v142_v14  ;;  %v810_v28 = vpop.f32.mrb[54].mxu0  ;;  %v938_v30 = vpop.f32.mrb[54].mxu1  ;;  %v147_v20 = vld [vmem:[#allocation2 + $0x1f8] sm:$0xff] }
 0x163   :  { %v1902_v17 = vpack.c.bf16 %v1343_v10, %v1343_v10  ;;  %v1312_v18 = vmax.f32 %v1184_v6, %v1248_v11  ;;  %v1114_v24 = vld [vmem:[#allocation2 + $0xc0] sm:$0xff]  ;;  %1632 = vst.msk [vmem:[%s2840_s3 + $0x58] sm:$0xf] %vm1609_vm2, %v1870_v29  ;;  %v812_v35 = vpop.f32.mrb[55].mxu0  ;;  %v940_v36 = vpop.f32.mrb[55].mxu1  ;;  %v985_v37 = vadd.f32 %v810_v28, %v111_v22  ;;  %v1017_v38 = vadd.f32 %v938_v30, %v143_v23 }
 0x164   :  { %v1344_v19 = vmax.f32 %v1216_v8, %v1280_v12  ;;  %v1146_v25 = vld [vmem:[#allocation2 + $0x1c0] sm:$0xff]  ;;  %v1185_v33 = vadd.f32 %v2724_v7, %v1114_v24  ;;  %1049 = vst.msk [vmem:[#allocation2 + $0xd0] sm:$0xff] %vm19_vm1, %v984_v26  ;;  %1081 = vst.msk [vmem:[#allocation2 + $0x1d0] sm:$0xff] %vm19_vm1, %v1016_v27 }
 0x165   :  { %1664 = vst.msk [vmem:[%s2840_s3 + $0xd8] sm:$0xf] %vm1609_vm2, %v1902_v17  ;;  %v1871_v31 = vpack.c.bf16 %v1312_v18, %v1312_v18  ;;  %v1217_v34 = vadd.f32 %v2724_v7, %v1146_v25  ;;  %v114_v17 = vld [vmem:[#allocation2 + $0xf0] sm:$0xff] }
 0x166   :  { %v1903_v32 = vpack.c.bf16 %v1344_v19, %v1344_v19  ;;  %v1249_v39 = vmul.f32 0.2, %v1185_v33  ;;  %1050 = vst.msk [vmem:[#allocation2 + $0xd8] sm:$0xff] %vm19_vm1, %v985_v37  ;;  %1082 = vst.msk [vmem:[#allocation2 + $0x1d8] sm:$0xff] %vm19_vm1, %v1017_v38  ;;  %v146_v18 = vld [vmem:[#allocation2 + $0x1f0] sm:$0xff]  ;;  %v115_v19 = vld [vmem:[#allocation2 + $0xf8] sm:$0xff] }
 0x167   :  { %1633 = vst.msk [vmem:[%s2840_s3 + $0x5c] sm:$0xf] %vm1609_vm2, %v1871_v31  ;;  %v1281_v40 = vmul.f32 0.2, %v1217_v34  ;;  %v1115_v41 = vld [vmem:[#allocation2 + $0xc8] sm:$0xff] }
 0x168   :  { %1665 = vst.msk [vmem:[%s2840_s3 + $0xdc] sm:$0xf] %vm1609_vm2, %v1903_v32  ;;  %v1147_v42 = vld [vmem:[#allocation2 + $0x1c8] sm:$0xff]  ;;  %v1186_v43 = vadd.f32 %v2724_v7, %v1115_v41  ;;  %v1313_v47 = vmax.f32 %v1185_v33, %v1249_v39  ;;  %v815_v53 = vpop.f32.mrb[56].mxu0  ;;  %v943_v54 = vpop.f32.mrb[56].mxu1 }
 0x169   :  { %v1218_v44 = vadd.f32 %v2724_v7, %v1147_v42  ;;  %v1345_v48 = vmax.f32 %v1217_v34, %v1281_v40  ;;  %v986_v57 = vadd.f32 %v815_v53, %v112_v45  ;;  %v1018_v58 = vadd.f32 %v943_v54, %v144_v46  ;;  %v817_v59 = vpop.f32.mrb[57].mxu0  ;;  %v945_v60 = vpop.f32.mrb[57].mxu1 }
 0x16a   :  { %v1250_v51 = vmul.f32 0.2, %v1186_v43  ;;  %v1872_v55 = vpack.c.bf16 %v1313_v47, %v1313_v47  ;;  %v818_v63 = vpop.f32.mrb[58].mxu0  ;;  %v946_v0 = vpop.f32.mrb[58].mxu1 }
 0x16b   :  { %v1282_v52 = vmul.f32 0.2, %v1218_v44  ;;  %v1904_v56 = vpack.c.bf16 %v1345_v48, %v1345_v48  ;;  %v1116_v1 = vld [vmem:[#allocation2 + $0xd0] sm:$0xff]  ;;  %1051 = vst.msk [vmem:[#allocation2 + $0xe0] sm:$0xff] %vm19_vm1, %v986_v57  ;;  %1083 = vst.msk [vmem:[#allocation2 + $0x1e0] sm:$0xff] %vm19_vm1, %v1018_v58  ;;  %v987_v3 = vadd.f32 %v818_v63, %v113_v49  ;;  %v1019_v4 = vadd.f32 %v946_v0, %v145_v50  ;;  %v820_v5 = vpop.f32.mrb[59].mxu0 }
 0x16c   :  { %v1314_v61 = vmax.f32 %v1186_v43, %v1250_v51  ;;  %1634 = vst.msk [vmem:[%s2840_s3 + $0x60] sm:$0xf] %vm1609_vm2, %v1872_v55  ;;  %v1148_v2 = vld [vmem:[#allocation2 + $0x1d0] sm:$0xff]  ;;  %v948_v6 = vpop.f32.mrb[59].mxu1  ;;  %v1187_v10 = vadd.f32 %v2724_v7, %v1116_v1 }
 0x16d   :  { %v1346_v62 = vmax.f32 %v1218_v44, %v1282_v52  ;;  %1666 = vst.msk [vmem:[%s2840_s3 + $0xe0] sm:$0xf] %vm1609_vm2, %v1904_v56  ;;  %v1219_v11 = vadd.f32 %v2724_v7, %v1148_v2  ;;  %v1117_v12 = vld [vmem:[#allocation2 + $0xd8] sm:$0xff] }
 0x16e   :  { %v1873_v8 = vpack.c.bf16 %v1314_v61, %v1314_v61  ;;  %v1149_v13 = vld [vmem:[#allocation2 + $0x1d8] sm:$0xff]  ;;  %1052 = vst.msk [vmem:[#allocation2 + $0xe8] sm:$0xff] %vm19_vm1, %v987_v3  ;;  %1084 = vst.msk [vmem:[#allocation2 + $0x1e8] sm:$0xff] %vm19_vm1, %v1019_v4  ;;  %v1251_v14 = vmul.f32 0.2, %v1187_v10  ;;  %v1188_v16 = vadd.f32 %v2724_v7, %v1117_v12 }
 0x16f   :  { %v1905_v9 = vpack.c.bf16 %v1346_v62, %v1346_v62  ;;  %v1283_v15 = vmul.f32 0.2, %v1219_v11  ;;  %v1220_v29 = vadd.f32 %v2724_v7, %v1149_v13 }
 0x170   :  { %1635 = vst.msk [vmem:[%s2840_s3 + $0x64] sm:$0xf] %vm1609_vm2, %v1873_v8  ;;  %v1315_v21 = vmax.f32 %v1187_v10, %v1251_v14  ;;  %v1252_v23 = vmul.f32 0.2, %v1188_v16  ;;  %v823_v25 = vpop.f32.mrb[60].mxu0  ;;  %v951_v26 = vpop.f32.mrb[60].mxu1 }
 0x171   :  { %1667 = vst.msk [vmem:[%s2840_s3 + $0xe4] sm:$0xf] %vm1609_vm2, %v1905_v9  ;;  %v1347_v22 = vmax.f32 %v1219_v11, %v1283_v15  ;;  %v1284_v24 = vmul.f32 0.2, %v1220_v29  ;;  %v988_v27 = vadd.f32 %v823_v25, %v114_v17  ;;  %v1020_v28 = vadd.f32 %v951_v26, %v146_v18  ;;  %v825_v30 = vpop.f32.mrb[61].mxu0  ;;  %v953_v31 = vpop.f32.mrb[61].mxu1 }
 0x172   :  { %v1874_v32 = vpack.c.bf16 %v1315_v21, %v1315_v21  ;;  %v1316_v34 = vmax.f32 %v1188_v16, %v1252_v23  ;;  %v1118_v36 = vld [vmem:[#allocation2 + $0xe0] sm:$0xff]  ;;  %v826_v38 = vpop.f32.mrb[62].mxu0  ;;  %v954_v39 = vpop.f32.mrb[62].mxu1 }
 0x173   :  { %v1906_v33 = vpack.c.bf16 %v1347_v22, %v1347_v22  ;;  %v1348_v35 = vmax.f32 %v1220_v29, %v1284_v24  ;;  %v1150_v37 = vld [vmem:[#allocation2 + $0x1e0] sm:$0xff]  ;;  %v1189_v40 = vadd.f32 %v2724_v7, %v1118_v36  ;;  %1053 = vst.msk [vmem:[#allocation2 + $0xf0] sm:$0xff] %vm19_vm1, %v988_v27  ;;  %1085 = vst.msk [vmem:[#allocation2 + $0x1f0] sm:$0xff] %vm19_vm1, %v1020_v28  ;;  %v828_v44 = vpop.f32.mrb[63].mxu0  ;;  %v956_v45 = vpop.f32.mrb[63].mxu1 }
 0x174   :  { %v1221_v41 = vadd.f32 %v2724_v7, %v1150_v37  ;;  %v989_v42 = vadd.f32 %v826_v38, %v115_v19  ;;  %v1021_v43 = vadd.f32 %v954_v39, %v147_v20  ;;  %1636 = vst.msk [vmem:[%s2840_s3 + $0x68] sm:$0xf] %vm1609_vm2, %v1874_v32  ;;  %v1875_v46 = vpack.c.bf16 %v1316_v34, %v1316_v34 }
 0x175   :  { %1668 = vst.msk [vmem:[%s2840_s3 + $0xe8] sm:$0xf] %vm1609_vm2, %v1906_v33  ;;  %v1907_v47 = vpack.c.bf16 %v1348_v35, %v1348_v35  ;;  %v1119_v48 = vld [vmem:[#allocation2 + $0xe8] sm:$0xff]  ;;  %v1253_v50 = vmul.f32 0.2, %v1189_v40 }
 0x176   :  { %v1151_v49 = vld [vmem:[#allocation2 + $0x1e8] sm:$0xff]  ;;  %v1285_v51 = vmul.f32 0.2, %v1221_v41  ;;  %v1190_v52 = vadd.f32 %v2724_v7, %v1119_v48  ;;  %1054 = vst.msk [vmem:[#allocation2 + $0xf8] sm:$0xff] %vm19_vm1, %v989_v42  ;;  %1086 = vst.msk [vmem:[#allocation2 + $0x1f8] sm:$0xff] %vm19_vm1, %v1021_v43 }
 0x177   :  { %v1222_v53 = vadd.f32 %v2724_v7, %v1151_v49  ;;  %1637 = vst.msk [vmem:[%s2840_s3 + $0x6c] sm:$0xf] %vm1609_vm2, %v1875_v46  ;;  %1669 = vst.msk [vmem:[%s2840_s3 + $0xec] sm:$0xf] %vm1609_vm2, %v1907_v47  ;;  %v1317_v54 = vmax.f32 %v1189_v40, %v1253_v50 }
 0x178   :  { %v1349_v55 = vmax.f32 %v1221_v41, %v1285_v51  ;;  %v1254_v56 = vmul.f32 0.2, %v1190_v52 }
 0x179   :  { %v1286_v57 = vmul.f32 0.2, %v1222_v53  ;;  %v1876_v58 = vpack.c.bf16 %v1317_v54, %v1317_v54 }
 0x17a   :  { %v1908_v59 = vpack.c.bf16 %v1349_v55, %v1349_v55  ;;  %v1318_v60 = vmax.f32 %v1190_v52, %v1254_v56  ;;  %v1120_v62 = vld [vmem:[#allocation2 + $0xf0] sm:$0xff] }
 0x17b   :  { %v1350_v61 = vmax.f32 %v1222_v53, %v1286_v57  ;;  %v1152_v63 = vld [vmem:[#allocation2 + $0x1f0] sm:$0xff]  ;;  %1638 = vst.msk [vmem:[%s2840_s3 + $0x70] sm:$0xf] %vm1609_vm2, %v1876_v58  ;;  %v1191_v2 = vadd.f32 %v2724_v7, %v1120_v62 }
 0x17c   :  { %1670 = vst.msk [vmem:[%s2840_s3 + $0xf0] sm:$0xf] %vm1609_vm2, %v1908_v59  ;;  %v1877_v0 = vpack.c.bf16 %v1318_v60, %v1318_v60  ;;  %v1223_v3 = vadd.f32 %v2724_v7, %v1152_v63 }
 0x17d   :  { %v1909_v1 = vpack.c.bf16 %v1350_v61, %v1350_v61  ;;  %v1121_v4 = vld [vmem:[#allocation2 + $0xf8] sm:$0xff]  ;;  %v1255_v6 = vmul.f32 0.2, %v1191_v2 }
 0x17e   :  { %v1153_v5 = vld [vmem:[#allocation2 + $0x1f8] sm:$0xff]  ;;  %1639 = vst.msk [vmem:[%s2840_s3 + $0x74] sm:$0xf] %vm1609_vm2, %v1877_v0  ;;  %v1287_v8 = vmul.f32 0.2, %v1223_v3  ;;  %v1192_v9 = vadd.f32 %v2724_v7, %v1121_v4 }
 0x17f   :  { %1671 = vst.msk [vmem:[%s2840_s3 + $0xf4] sm:$0xf] %vm1609_vm2, %v1909_v1  ;;  %v1224_v10 = vadd.f32 %v2724_v7, %v1153_v5  ;;  %v1319_v11 = vmax.f32 %v1191_v2, %v1255_v6 }
 0x180   :  { %v1351_v12 = vmax.f32 %v1223_v3, %v1287_v8  ;;  %v1256_v13 = vmul.f32 0.2, %v1192_v9 }
 0x181   :  { %v1288_v14 = vmul.f32 0.2, %v1224_v10  ;;  %v1878_v15 = vpack.c.bf16 %v1319_v11, %v1319_v11 }
 0x182   :  { %v1910_v16 = vpack.c.bf16 %v1351_v12, %v1351_v12  ;;  %v1320_v29 = vmax.f32 %v1192_v9, %v1256_v13 }
 0x183   :  { %v1352_v17 = vmax.f32 %v1224_v10, %v1288_v14  ;;  %1640 = vst.msk [vmem:[%s2840_s3 + $0x78] sm:$0xf] %vm1609_vm2, %v1878_v15 }
 0x184   :  { %1672 = vst.msk [vmem:[%s2840_s3 + $0xf8] sm:$0xf] %vm1609_vm2, %v1910_v16  ;;  %v1879_v18 = vpack.c.bf16 %v1320_v29, %v1320_v29 }
 0x185   :  { %v1911_v7 = vpack.c.bf16 %v1352_v17, %v1352_v17 }
 0x186   :  { %1641 = vst.msk [vmem:[%s2840_s3 + $0x7c] sm:$0xf] %vm1609_vm2, %v1879_v18 }
 0x187   :  { %1673 = vst.msk [vmem:[%s2840_s3 + $0xfc] sm:$0xf] %vm1609_vm2, %v1911_v7 }

// kernel: multi_image_field_mlp_forward.23
= control target key start
LH: loop header
LB: loop body
LE: loop exit
PB: predicated region body
PF: predicated region fallthrough
CT: control target
= control target key end

     0   :  { %vm348_vm0 = vcmask 261120   ;;  %vm19_vm1 = vcmask 523264   ;;  %v1003_v42 = vmov 0.0   ;;  %vm738_vm2 = vcmask 519168   ;;  %s1293_s1 = inlined_call_operand.vmem [shape: bf16[288,64], index: 1, kind: input, shape index: {}]   ;;  %s1294_s0 = inlined_call_operand.vmem [shape: bf16[128,288], index: 0, kind: input, shape index: {}]   ;;  %s1295_s2 = inlined_call_operand.vmem [shape: f32[1,64], index: 2, kind: input, shape index: {}]   ;;  %s1296_s3 = inlined_call_operand.vmem [shape: bf16[128,64], index: 3, kind: output, shape index: {}]  }
   0x1   :  { %v953_v0 = vld [vmem:[%s1293_s1 + $0x40] sm:$0xff]   ;;  %v955_v2 = vld [vmem:[%s1293_s1 + $0x48] sm:$0xff]   ;;  %v957_v4 = vld [vmem:[%s1293_s1 + $0x50] sm:$0xff]   ;;  %22 = vst.msk [vmem:[#allocation2 + $0x10] sm:$0xff] %vm19_vm1, %v1003_v42 }
   0x2   :  { %v954_v1 = vld [vmem:[%s1293_s1] sm:$0xff]   ;;  %842 = vmatprep.subr.bf16.mxu0 %v953_v0  ;;  %936 = vmatprep.subr.bf16.mxu1 %v953_v0  ;;  %v956_v3 = vld [vmem:[%s1293_s1 + $0x8] sm:$0xff]   ;;  %v958_v5 = vld [vmem:[%s1293_s1 + $0x10] sm:$0xff]   ;;  %20 = vst.msk [vmem:[#allocation2] sm:$0xff] %vm19_vm1, %v1003_v42 }
   0x3   :  { %843 = vmatpush3.bf16.msra.mxu0 %v954_v1  ;;  %944 = vmatpush3.bf16.msra.mxu1 %v954_v1  ;;  %v959_v6 = vld [vmem:[%s1293_s1 + $0x58] sm:$0xff]   ;;  %v961_v8 = vld [vmem:[%s1293_s1 + $0x60] sm:$0xff]   ;;  %v963_v10 = vld [vmem:[%s1293_s1 + $0x68] sm:$0xff]   ;;  %21 = vst.msk [vmem:[#allocation2 + $0x8] sm:$0xff] %vm19_vm1, %v1003_v42 }
   0x4   :  { %844 = vmatprep.subr.bf16.mxu0 %v955_v2  ;;  %937 = vmatprep.subr.bf16.mxu1 %v955_v2  ;;  %v960_v7 = vld [vmem:[%s1293_s1 + $0x18] sm:$0xff]   ;;  %v962_v9 = vld [vmem:[%s1293_s1 + $0x20] sm:$0xff]   ;;  %v964_v13 = vld [vmem:[%s1293_s1 + $0x28] sm:$0xff]   ;;  %23 = vst.msk [vmem:[#allocation2 + $0x18] sm:$0xff] %vm19_vm1, %v1003_v42 }
   0x5   :  { %v971_v11 = vld [vmem:[%s1294_s0 + $0x4] ss:$12 sps:$4 sm:$0xff]   ;;  %v974_v12 = vld [vmem:[%s1294_s0 + $0x94] ss:$12 sps:$4 sm:$0xff]   ;;  %v967_v16 = vld [vmem:[%s1293_s1 + $0x78] sm:$0xff]   ;;  %24 = vst.msk [vmem:[#allocation2 + $0x20] sm:$0xff] %vm19_vm1, %v1003_v42 }
   0x6   :  { %v965_v14 = vld [vmem:[%s1293_s1 + $0x70] sm:$0xff]   ;;  %405 = vmatprep.mubr.bf16.mxu0 %v971_v11  ;;  %453 = vmatprep.mubr.bf16.mxu1 %v974_v12  ;;  %v968_v17 = vld [vmem:[%s1293_s1 + $0x38] sm:$0xff]   ;;  %v969_v18 = vld [vmem:[%s1294_s0] ss:$12 sps:$4 sm:$0xff]   ;;  %25 = vst.msk [vmem:[#allocation2 + $0x28] sm:$0xff] %vm19_vm1, %v1003_v42 }
   0x7   :  { %845 = vmatpush3.bf16.msra.mxu0 %v956_v3  ;;  %945 = vmatpush3.bf16.msra.mxu1 %v956_v3  ;;  %v966_v15 = vld [vmem:[%s1293_s1 + $0x30] sm:$0xff]   ;;  %v975_v19 = vld [vmem:[%s1293_s1 + $0x80] sm:$0xff]   ;;  %v976_v21 = vld [vmem:[%s1294_s0 + $0x1c] ss:$12 sps:$4 sm:$0xff]   ;;  %26 = vst.msk [vmem:[#allocation2 + $0x30] sm:$0xff] %vm19_vm1, %v1003_v42 }
   0x8   :  { %846 = vmatprep.subr.bf16.mxu0 %v957_v4  ;;  %938 = vmatprep.subr.bf16.mxu1 %v957_v4  ;;  %v972_v20 = vld [vmem:[%s1294_s0 + $0x90] ss:$12 sps:$4 sm:$0xff]   ;;  %v978_v22 = vld [vmem:[%s1294_s0 + $0xac] ss:$12 sps:$4 sm:$0xff]   ;;  %v981_v25 = vld [vmem:[%s1294_s0 + $0xa8] ss:$12 sps:$4 sm:$0xff]  }
   0x9   :  { %v982_v23 = vld [vmem:[%s1293_s1 + $0x88] sm:$0xff]   ;;  %v980_v24 = vld [vmem:[%s1294_s0 + $0x18] ss:$12 sps:$4 sm:$0xff]   ;;  %v983_v26 = vld [vmem:[%s1294_s0 + $0x34] ss:$12 sps:$4 sm:$0xff]   ;;  %27 = vst.msk [vmem:[#allocation2 + $0x38] sm:$0xff] %vm19_vm1, %v1003_v42 }
   0xa   :  { %v985_v27 = vld [vmem:[%s1294_s0 + $0x8] ss:$12 sps:$4 sm:$0xff]   ;;  %v986_v28 = vld [vmem:[%s1294_s0 + $0x30] ss:$12 sps:$4 sm:$0xff]   ;;  %v987_v29 = vld [vmem:[%s1294_s0 + $0x20] ss:$12 sps:$4 sm:$0xff]  }
   0xb   :  { %847 = vmatpush3.bf16.msra.mxu0 %v958_v5  ;;  %946 = vmatpush3.bf16.msra.mxu1 %v958_v5  ;;  %v988_v30 = vld [vmem:[%s1294_s0 + $0x4c] ss:$12 sps:$4 sm:$0xff]   ;;  %v991_v32 = vld [vmem:[%s1294_s0 + $0x48] ss:$12 sps:$4 sm:$0xff]   ;;  %v992_v33 = vld [vmem:[%s1294_s0 + $0x50] ss:$12 sps:$4 sm:$0xff]  }
   0xc   :  { %848 = vmatprep.subr.bf16.mxu0 %v959_v6  ;;  %939 = vmatprep.subr.bf16.mxu1 %v959_v6  ;;  %v990_v31 = vld [vmem:[%s1294_s0 + $0x38] ss:$12 sps:$4 sm:$0xff]   ;;  %v995_v35 = vld [vmem:[%s1294_s0 + $0x68] ss:$12 sps:$4 sm:$0xff]   ;;  %v996_v36 = vld [vmem:[%s1294_s0 + $0x60] ss:$12 sps:$4 sm:$0xff]  }
   0xd   :  { %v993_v34 = vld [vmem:[%s1294_s0 + $0x64] ss:$12 sps:$4 sm:$0xff]   ;;  %v997_v37 = vld [vmem:[%s1294_s0 + $0x80] ss:$12 sps:$4 sm:$0xff]   ;;  %v998_v38 = vld [vmem:[%s1294_s0 + $0x7c] ss:$12 sps:$4 sm:$0xff]  }
   0xe   :  { %v1000_v39 = vld [vmem:[%s1294_s0 + $0x98] ss:$12 sps:$4 sm:$0xff]   ;;  %v1002_v41 = vld [vmem:[%s1294_s0 + $0xb0] ss:$12 sps:$4 sm:$0xff]   ;;  %28 = vst.msk [vmem:[#allocation2 + $0x40] sm:$0xff] %vm19_vm1, %v1003_v42  ;;  %29 = vst.msk [vmem:[#allocation2 + $0x48] sm:$0xff] %vm19_vm1, %v1003_v42 }
   0xf   :  { %849 = vmatpush3.bf16.msra.mxu0 %v960_v7  ;;  %947 = vmatpush3.bf16.msra.mxu1 %v960_v7  ;;  %v1001_v40 = vld [vmem:[%s1294_s0 + $0x78] ss:$12 sps:$4 sm:$0xff]   ;;  %30 = vst.msk [vmem:[#allocation2 + $0x50] sm:$0xff] %vm19_vm1, %v1003_v42  ;;  %31 = vst.msk [vmem:[#allocation2 + $0x58] sm:$0xff] %vm19_vm1, %v1003_v42  ;;  %v38_v4 = vld [vmem:[#allocation2 + $0x10] sm:$0xff] }
  0x10   :  { %850 = vmatprep.subr.bf16.mxu0 %v961_v8  ;;  %940 = vmatprep.subr.bf16.mxu1 %v961_v8  ;;  %32 = vst.msk [vmem:[#allocation2 + $0x60] sm:$0xff] %vm19_vm1, %v1003_v42  ;;  %33 = vst.msk [vmem:[#allocation2 + $0x68] sm:$0xff] %vm19_vm1, %v1003_v42  ;;  %v36_v8 = vld [vmem:[#allocation2] sm:$0xff] }
  0x11   :  { %34 = vst.msk [vmem:[#allocation2 + $0x70] sm:$0xff] %vm19_vm1, %v1003_v42  ;;  %35 = vst.msk [vmem:[#allocation2 + $0x78] sm:$0xff] %vm19_vm1, %v1003_v42 }
  0x13   :  { %851 = vmatpush3.bf16.msra.mxu0 %v962_v9  ;;  %948 = vmatpush3.bf16.msra.mxu1 %v962_v9 }
  0x14   :  { %852 = vmatprep.subr.bf16.mxu0 %v963_v10  ;;  %941 = vmatprep.subr.bf16.mxu1 %v963_v10 }
  0x17   :  { %853 = vmatpush3.bf16.msra.mxu0 %v964_v13  ;;  %949 = vmatpush3.bf16.msra.mxu1 %v964_v13  ;;  %v39_v13 = vld [vmem:[#allocation2 + $0x18] sm:$0xff] }
  0x18   :  { %854 = vmatprep.subr.bf16.mxu0 %v965_v14  ;;  %942 = vmatprep.subr.bf16.mxu1 %v965_v14 }
  0x1b   :  { %855 = vmatpush3.bf16.msra.mxu0 %v966_v15  ;;  %950 = vmatpush3.bf16.msra.mxu1 %v966_v15 }
  0x1c   :  { %856 = vmatprep.subr.bf16.mxu0 %v967_v16  ;;  %943 = vmatprep.subr.bf16.mxu1 %v967_v16 }
  0x1f   :  { %857 = vmatpush3.bf16.msra.mxu0 %v968_v17  ;;  %951 = vmatpush3.bf16.msra.mxu1 %v968_v17 }
  0x20   :  { %916 = vmatprep.subr.bf16.mxu1 %v975_v19 }
  0x22   :  { %406 = vmatmul.mubr.bf16.vlgmr.msra.gmra.mrb[0].mxu0 %v969_v18  ;;  %454 = vmatmul.mubr.bf16.vlgmr.msra.gmra.mrb[0].mxu1 %v972_v20  ;;  %v37_v18 = vld [vmem:[#allocation2 + $0x8] sm:$0xff] }
  0x23   :  { %917 = vmatpush3.bf16.msra.mxu1 %v975_v19  ;;  %413 = vmatprep.mubr.bf16.mxu0 %v976_v21 }
  0x24   :  { %461 = vmatprep.mubr.bf16.mxu1 %v978_v22  ;;  %918 = vmatprep.subr.bf16.mxu1 %v982_v23 }
  0x27   :  { %919 = vmatpush3.bf16.msra.mxu1 %v982_v23 }
  0x2a   :  { %414 = vmatmul.mubr.bf16.gmra.mrb[4].mxu0 %v980_v24  ;;  %462 = vmatmul.mubr.bf16.gmra.mrb[4].mxu1 %v981_v25 }
  0x2b   :  { %421 = vmatprep.mubr.bf16.mxu0 %v983_v26  ;;  %920 = vmatprep.mubr.msk.bf16.mxu1 %vm348_vm0, %v985_v27 }
  0x32   :  { %422 = vmatmul.mubr.bf16.gmra.mrb[8].mxu0 %v986_v28  ;;  %921 = vmatmul.mubr.msk.bf16.vlgmr.msra.gmra.mrb[8].mxu1 %vm348_vm0, %v987_v29  ;;  %v40_v28 = vld [vmem:[#allocation2 + $0x20] sm:$0xff] }
  0x33   :  { %429 = vmatprep.mubr.bf16.mxu0 %v988_v30  ;;  %924 = vmatprep.mubr.msk.bf16.mxu1 %vm348_vm0, %v990_v31  ;;  %v1189_v30 = vld [vmem:[%s1295_s2] ss:$0 sm:$0xff] }
  0x3a   :  { %430 = vmatmul.mubr.bf16.gmra.mrb[12].mxu0 %v991_v32  ;;  %925 = vmatmul.mubr.msk.bf16.gmra.mrb[12].mxu1 %vm348_vm0, %v992_v33 }
  0x3b   :  { %437 = vmatprep.mubr.bf16.mxu0 %v993_v34  ;;  %928 = vmatprep.mubr.msk.bf16.mxu1 %vm348_vm0, %v995_v35  ;;  %v42_v35 = vld [vmem:[#allocation2 + $0x30] sm:$0xff] }
  0x42   :  { %438 = vmatmul.mubr.bf16.gmra.mrb[16].mxu0 %v996_v36  ;;  %929 = vmatmul.mubr.msk.bf16.gmra.mrb[16].mxu1 %vm348_vm0, %v997_v37  ;;  %v41_v37 = vld [vmem:[#allocation2 + $0x28] sm:$0xff] }
  0x43   :  { %445 = vmatprep.mubr.bf16.mxu0 %v998_v38  ;;  %932 = vmatprep.mubr.msk.bf16.mxu1 %vm348_vm0, %v1000_v39 }
  0x4a   :  { %446 = vmatmul.mubr.bf16.gmra.mrb[20].mxu0 %v1001_v40  ;;  %933 = vmatmul.mubr.msk.bf16.gmra.mrb[20].mxu1 %vm348_vm0, %v1002_v41 }
  0xf5   :  { %v858_v43 = vpop.f32.mrb[0].mxu0  ;;  %v894_v44 = vpop.f32.mrb[0].mxu1 }
  0xf6   :  { %v859_v45 = vpop.f32.mrb[1].mxu0  ;;  %v895_v46 = vpop.f32.mrb[1].mxu1 }
  0xf7   :  { %v860_v47 = vadd.f32 %v859_v45, %v858_v43  ;;  %v1174_v48 = vadd.f32 %v895_v46, %v894_v44  ;;  %v861_v49 = vpop.f32.mrb[2].mxu0  ;;  %v897_v50 = vpop.f32.mrb[2].mxu1  ;;  %v43_v46 = vld [vmem:[#allocation2 + $0x38] sm:$0xff] }
  0xf8   :  { %v862_v51 = vpop.f32.mrb[3].mxu0  ;;  %v898_v52 = vpop.f32.mrb[3].mxu1 }
  0xf9   :  { %v863_v53 = vadd.f32 %v862_v51, %v861_v49  ;;  %v1176_v54 = vadd.f32 %v898_v52, %v897_v50 }
  0xfd   :  { %v864_v55 = vpop.f32.mrb[4].mxu0  ;;  %v900_v56 = vpop.f32.mrb[4].mxu1 }
  0xfe   :  { %v865_v57 = vpop.f32.mrb[5].mxu0  ;;  %v901_v58 = vpop.f32.mrb[5].mxu1 }
  0xff   :  { %v866_v59 = vadd.f32 %v865_v57, %v864_v55  ;;  %v1178_v60 = vadd.f32 %v901_v58, %v900_v56  ;;  %v867_v61 = vpop.f32.mrb[6].mxu0  ;;  %v903_v62 = vpop.f32.mrb[6].mxu1 }
 0x100   :  { %v868_v63 = vpop.f32.mrb[7].mxu0  ;;  %v904_v0 = vpop.f32.mrb[7].mxu1 }
 0x101   :  { %v869_v1 = vadd.f32 %v868_v63, %v867_v61  ;;  %v1180_v2 = vadd.f32 %v904_v0, %v903_v62 }
 0x105   :  { %v870_v3 = vpop.f32.mrb[8].mxu0  ;;  %v922_v5 = vpop.f32.mrb[8].mxu1 }
 0x106   :  { %v513_v6 = vadd.f32 %v922_v5, %v866_v59  ;;  %v871_v7 = vpop.f32.mrb[9].mxu0  ;;  %v504_v9 = vpop.f32.mrb[9].mxu1 }
 0x107   :  { %v872_v10 = vadd.f32 %v871_v7, %v870_v3  ;;  %v505_v11 = vadd.f32 %v860_v47, %v504_v9  ;;  %v873_v12 = vpop.f32.mrb[10].mxu0  ;;  %v923_v14 = vpop.f32.mrb[10].mxu1 }
 0x108   :  { %v569_v15 = vadd.f32 %v513_v6, %v38_v4  ;;  %v516_v16 = vadd.f32 %v923_v14, %v869_v1  ;;  %v874_v17 = vpop.f32.mrb[11].mxu0  ;;  %v507_v19 = vpop.f32.mrb[11].mxu1 }
 0x109   :  { %v567_v20 = vadd.f32 %v505_v11, %v36_v8  ;;  %v875_v21 = vadd.f32 %v874_v17, %v873_v12  ;;  %v508_v22 = vadd.f32 %v863_v53, %v507_v19  ;;  %v44_v11 = vld [vmem:[#allocation2 + $0x40] sm:$0xff] }
 0x10a   :  { %586 = vst.msk [vmem:[#allocation2 + $0x10] sm:$0xff] %vm19_vm1, %v569_v15  ;;  %v570_v23 = vadd.f32 %v516_v16, %v39_v13 }
 0x10b   :  { %584 = vst.msk [vmem:[#allocation2] sm:$0xff] %vm19_vm1, %v567_v20  ;;  %v568_v24 = vadd.f32 %v508_v22, %v37_v18  ;;  %v45_v20 = vld [vmem:[#allocation2 + $0x48] sm:$0xff] }
 0x10c   :  { %587 = vst.msk [vmem:[#allocation2 + $0x18] sm:$0xff] %vm19_vm1, %v570_v23 }
 0x10d   :  { %585 = vst.msk [vmem:[#allocation2 + $0x8] sm:$0xff] %vm19_vm1, %v568_v24  ;;  %v876_v25 = vpop.f32.mrb[12].mxu0  ;;  %v926_v26 = vpop.f32.mrb[12].mxu1 }
 0x10e   :  { %v877_v27 = vpop.f32.mrb[13].mxu0  ;;  %v520_v29 = vpop.f32.mrb[13].mxu1 }
 0x10f   :  { %v878_v31 = vadd.f32 %v877_v27, %v876_v25  ;;  %v521_v32 = vadd.f32 %v872_v10, %v520_v29  ;;  %v879_v33 = vpop.f32.mrb[14].mxu0  ;;  %v927_v34 = vpop.f32.mrb[14].mxu1 }
 0x110   :  { %v880_v36 = vpop.f32.mrb[15].mxu0  ;;  %v523_v38 = vpop.f32.mrb[15].mxu1 }
 0x111   :  { %v605_v39 = vld [vmem:[#allocation2 + $0x10] sm:$0xff]  ;;  %v529_v40 = vadd.f32 %v926_v26, %v878_v31  ;;  %v571_v41 = vadd.f32 %v521_v32, %v40_v28  ;;  %v881_v42 = vadd.f32 %v880_v36, %v879_v33  ;;  %v524_v43 = vadd.f32 %v875_v21, %v523_v38  ;;  %v48_v38 = vld [vmem:[#allocation2 + $0x60] sm:$0xff] }
 0x112   :  { %v628_v44 = vadd.f32 %v1189_v30, %v605_v39  ;;  %v603_v45 = vld [vmem:[#allocation2] sm:$0xff]  ;;  %v50_v33 = vld [vmem:[#allocation2 + $0x70] sm:$0xff] }
 0x113   :  { %v626_v47 = vadd.f32 %v1189_v30, %v603_v45  ;;  %v606_v49 = vld [vmem:[#allocation2 + $0x18] sm:$0xff]  ;;  %v573_v50 = vadd.f32 %v529_v40, %v42_v35  ;;  %588 = vst.msk [vmem:[#allocation2 + $0x20] sm:$0xff] %vm19_vm1, %v571_v41  ;;  %v532_v51 = vadd.f32 %v927_v34, %v881_v42  ;;  %v572_v52 = vadd.f32 %v524_v43, %v41_v37 }
 0x114   :  { %v644_v53 = vmul.f32 0.2, %v628_v44  ;;  %v629_v55 = vadd.f32 %v1189_v30, %v606_v49  ;;  %v604_v56 = vld [vmem:[#allocation2 + $0x8] sm:$0xff]  ;;  %v51_v40 = vld [vmem:[#allocation2 + $0x78] sm:$0xff] }
 0x115   :  { %v642_v57 = vmul.f32 0.2, %v626_v47  ;;  %v627_v58 = vadd.f32 %v1189_v30, %v604_v56  ;;  %590 = vst.msk [vmem:[#allocation2 + $0x30] sm:$0xff] %vm19_vm1, %v573_v50  ;;  %v574_v59 = vadd.f32 %v532_v51, %v43_v46  ;;  %589 = vst.msk [vmem:[#allocation2 + $0x28] sm:$0xff] %vm19_vm1, %v572_v52  ;;  %v882_v61 = vpop.f32.mrb[16].mxu0  ;;  %v1198_v62 = vpop.f32.mrb[16].mxu1 }
 0x116   :  { %v660_v63 = vmax.f32 %v628_v44, %v644_v53  ;;  %v645_v0 = vmul.f32 0.2, %v629_v55  ;;  %v883_v1 = vpop.f32.mrb[17].mxu0  ;;  %v536_v3 = vpop.f32.mrb[17].mxu1 }
 0x117   :  { %v658_v4 = vmax.f32 %v626_v47, %v642_v57  ;;  %v643_v5 = vmul.f32 0.2, %v627_v58  ;;  %591 = vst.msk [vmem:[#allocation2 + $0x38] sm:$0xff] %vm19_vm1, %v574_v59  ;;  %v884_v6 = vadd.f32 %v883_v1, %v882_v61  ;;  %v885_v7 = vpop.f32.mrb[18].mxu0  ;;  %v1201_v8 = vpop.f32.mrb[18].mxu1  ;;  %v49_v1 = vld [vmem:[#allocation2 + $0x68] sm:$0xff] }
 0x118   :  { %v828_v9 = vpack.c.bf16 %v660_v63, %v660_v63  ;;  %v661_v10 = vmax.f32 %v629_v55, %v645_v0  ;;  %v886_v12 = vpop.f32.mrb[19].mxu0  ;;  %v539_v13 = vpop.f32.mrb[19].mxu1 }
 0x119   :  { %v826_v14 = vpack.c.bf16 %v658_v4, %v658_v4  ;;  %v659_v15 = vmax.f32 %v627_v58, %v643_v5  ;;  %v537_v16 = vadd.f32 %v884_v6, %v536_v3  ;;  %v887_v17 = vadd.f32 %v886_v12, %v885_v7  ;;  %v46_v58 = vld [vmem:[#allocation2 + $0x50] sm:$0xff]  ;;  %v47_v4 = vld [vmem:[#allocation2 + $0x58] sm:$0xff] }
 0x11a   :  { %741 = vst.msk [vmem:[%s1296_s3 + $0x8] sm:$0xf] %vm738_vm2, %v828_v9  ;;  %v829_v18 = vpack.c.bf16 %v661_v10, %v661_v10  ;;  %v607_v19 = vld [vmem:[#allocation2 + $0x20] sm:$0xff] }
 0x11b   :  { %739 = vst.msk [vmem:[%s1296_s3] sm:$0xf] %vm738_vm2, %v826_v14  ;;  %v827_v21 = vpack.c.bf16 %v659_v15, %v659_v15  ;;  %v630_v22 = vadd.f32 %v1189_v30, %v607_v19  ;;  %v575_v23 = vadd.f32 %v537_v16, %v44_v11  ;;  %v540_v24 = vadd.f32 %v887_v17, %v539_v13 }
 0x11c   :  { %742 = vst.msk [vmem:[%s1296_s3 + $0xc] sm:$0xf] %vm738_vm2, %v829_v18  ;;  %v609_v25 = vld [vmem:[#allocation2 + $0x30] sm:$0xff]  ;;  %v608_v26 = vld [vmem:[#allocation2 + $0x28] sm:$0xff] }
 0x11d   :  { %740 = vst.msk [vmem:[%s1296_s3 + $0x4] sm:$0xf] %vm738_vm2, %v827_v21  ;;  %v632_v27 = vadd.f32 %v1189_v30, %v609_v25  ;;  %v646_v28 = vmul.f32 0.2, %v630_v22  ;;  %v631_v29 = vadd.f32 %v1189_v30, %v608_v26  ;;  %v576_v31 = vadd.f32 %v540_v24, %v45_v20  ;;  %v888_v32 = vpop.f32.mrb[20].mxu0  ;;  %v934_v34 = vpop.f32.mrb[20].mxu1 }
 0x11e   :  { %592 = vst.msk [vmem:[#allocation2 + $0x40] sm:$0xff] %vm19_vm1, %v575_v23  ;;  %v610_v35 = vld [vmem:[#allocation2 + $0x38] sm:$0xff]  ;;  %v561_v36 = vadd.f32 %v934_v34, %v1178_v60  ;;  %v889_v37 = vpop.f32.mrb[21].mxu0  ;;  %v552_v39 = vpop.f32.mrb[21].mxu1 }
 0x11f   :  { %v648_v41 = vmul.f32 0.2, %v632_v27  ;;  %v662_v42 = vmax.f32 %v630_v22, %v646_v28  ;;  %v633_v43 = vadd.f32 %v1189_v30, %v610_v35  ;;  %v647_v44 = vmul.f32 0.2, %v631_v29  ;;  %593 = vst.msk [vmem:[#allocation2 + $0x48] sm:$0xff] %vm19_vm1, %v576_v31  ;;  %v891_v45 = vpop.f32.mrb[22].mxu0 }
 0x120   :  { %v935_v46 = vpop.f32.mrb[22].mxu1  ;;  %v581_v47 = vadd.f32 %v561_v36, %v50_v33  ;;  %v890_v49 = vadd.f32 %v889_v37, %v888_v32  ;;  %v553_v50 = vadd.f32 %v1174_v48, %v552_v39  ;;  %v892_v60 = vpop.f32.mrb[23].mxu0 }
 0x121   :  { %v564_v51 = vadd.f32 %v935_v46, %v1180_v2  ;;  %v555_v52 = vpop.f32.mrb[23].mxu1  ;;  %v664_v53 = vmax.f32 %v632_v27, %v648_v41  ;;  %v830_v55 = vpack.c.bf16 %v662_v42, %v662_v42  ;;  %v649_v56 = vmul.f32 0.2, %v633_v43 }
 0x122   :  { %v663_v57 = vmax.f32 %v631_v29, %v647_v44  ;;  %598 = vst.msk [vmem:[#allocation2 + $0x70] sm:$0xff] %vm19_vm1, %v581_v47  ;;  %v545_v59 = vadd.f32 %v1198_v62, %v890_v49  ;;  %v579_v61 = vadd.f32 %v553_v50, %v48_v38  ;;  %v893_v0 = vadd.f32 %v892_v60, %v891_v45 }
 0x123   :  { %v582_v63 = vadd.f32 %v564_v51, %v51_v40  ;;  %v832_v3 = vpack.c.bf16 %v664_v53, %v664_v53  ;;  %743 = vst.msk [vmem:[%s1296_s3 + $0x10] sm:$0xf] %vm738_vm2, %v830_v55  ;;  %v665_v48 = vmax.f32 %v633_v43, %v649_v56  ;;  %v556_v5 = vadd.f32 %v1176_v54, %v555_v52 }
 0x124   :  { %v831_v2 = vpack.c.bf16 %v663_v57, %v663_v57  ;;  %v577_v7 = vadd.f32 %v545_v59, %v46_v58  ;;  %596 = vst.msk [vmem:[#allocation2 + $0x60] sm:$0xff] %vm19_vm1, %v579_v61  ;;  %v548_v62 = vadd.f32 %v1201_v8, %v893_v0 }
 0x125   :  { %v611_v6 = vld [vmem:[#allocation2 + $0x40] sm:$0xff]  ;;  %599 = vst.msk [vmem:[#allocation2 + $0x78] sm:$0xff] %vm19_vm1, %v582_v63  ;;  %v833_v9 = vpack.c.bf16 %v665_v48, %v665_v48  ;;  %v580_v10 = vadd.f32 %v556_v5, %v49_v1 }
 0x126   :  { %745 = vst.msk [vmem:[%s1296_s3 + $0x18] sm:$0xf] %vm738_vm2, %v832_v3  ;;  %744 = vst.msk [vmem:[%s1296_s3 + $0x14] sm:$0xf] %vm738_vm2, %v831_v2  ;;  %v634_v54 = vadd.f32 %v1189_v30, %v611_v6  ;;  %v612_v11 = vld [vmem:[#allocation2 + $0x48] sm:$0xff]  ;;  %v578_v12 = vadd.f32 %v548_v62, %v47_v4 }
 0x127   :  { %594 = vst.msk [vmem:[#allocation2 + $0x50] sm:$0xff] %vm19_vm1, %v577_v7  ;;  %v635_v13 = vadd.f32 %v1189_v30, %v612_v11  ;;  %597 = vst.msk [vmem:[#allocation2 + $0x68] sm:$0xff] %vm19_vm1, %v580_v10 }
 0x128   :  { %746 = vst.msk [vmem:[%s1296_s3 + $0x1c] sm:$0xf] %vm738_vm2, %v833_v9  ;;  %v650_v8 = vmul.f32 0.2, %v634_v54 }
 0x129   :  { %595 = vst.msk [vmem:[#allocation2 + $0x58] sm:$0xff] %vm19_vm1, %v578_v12  ;;  %v651_v15 = vmul.f32 0.2, %v635_v13  ;;  %v617_v16 = vld [vmem:[#allocation2 + $0x70] sm:$0xff] }
 0x12a   :  { %v666_v14 = vmax.f32 %v634_v54, %v650_v8  ;;  %v640_v17 = vadd.f32 %v1189_v30, %v617_v16 }
 0x12b   :  { %v667_v19 = vmax.f32 %v635_v13, %v651_v15  ;;  %v615_v20 = vld [vmem:[#allocation2 + $0x60] sm:$0xff] }
 0x12c   :  { %v834_v18 = vpack.c.bf16 %v666_v14, %v666_v14  ;;  %v618_v21 = vld [vmem:[#allocation2 + $0x78] sm:$0xff]  ;;  %v656_v22 = vmul.f32 0.2, %v640_v17  ;;  %v638_v23 = vadd.f32 %v1189_v30, %v615_v20 }
 0x12d   :  { %v641_v24 = vadd.f32 %v1189_v30, %v618_v21  ;;  %v835_v25 = vpack.c.bf16 %v667_v19, %v667_v19 }
 0x12e   :  { %747 = vst.msk [vmem:[%s1296_s3 + $0x20] sm:$0xf] %vm738_vm2, %v834_v18  ;;  %v613_v26 = vld [vmem:[#allocation2 + $0x50] sm:$0xff]  ;;  %v672_v27 = vmax.f32 %v640_v17, %v656_v22  ;;  %v654_v29 = vmul.f32 0.2, %v638_v23  ;;  %v616_v32 = vld [vmem:[#allocation2 + $0x68] sm:$0xff] }
 0x12f   :  { %v636_v28 = vadd.f32 %v1189_v30, %v613_v26  ;;  %v657_v31 = vmul.f32 0.2, %v641_v24  ;;  %748 = vst.msk [vmem:[%s1296_s3 + $0x24] sm:$0xf] %vm738_vm2, %v835_v25  ;;  %v639_v34 = vadd.f32 %v1189_v30, %v616_v32 }
 0x130   :  { %v614_v33 = vld [vmem:[#allocation2 + $0x58] sm:$0xff]  ;;  %v840_v35 = vpack.c.bf16 %v672_v27, %v672_v27  ;;  %v670_v37 = vmax.f32 %v638_v23, %v654_v29 }
 0x131   :  { %v652_v36 = vmul.f32 0.2, %v636_v28  ;;  %v673_v38 = vmax.f32 %v641_v24, %v657_v31  ;;  %v637_v39 = vadd.f32 %v1189_v30, %v614_v33  ;;  %v655_v40 = vmul.f32 0.2, %v639_v34 }
 0x132   :  { %753 = vst.msk [vmem:[%s1296_s3 + $0x38] sm:$0xf] %vm738_vm2, %v840_v35  ;;  %v838_v42 = vpack.c.bf16 %v670_v37, %v670_v37 }
 0x133   :  { %v668_v41 = vmax.f32 %v636_v28, %v652_v36  ;;  %v841_v43 = vpack.c.bf16 %v673_v38, %v673_v38  ;;  %v653_v44 = vmul.f32 0.2, %v637_v39  ;;  %v671_v45 = vmax.f32 %v639_v34, %v655_v40 }
 0x134   :  { %751 = vst.msk [vmem:[%s1296_s3 + $0x30] sm:$0xf] %vm738_vm2, %v838_v42 }
 0x135   :  { %v836_v46 = vpack.c.bf16 %v668_v41, %v668_v41  ;;  %754 = vst.msk [vmem:[%s1296_s3 + $0x3c] sm:$0xf] %vm738_vm2, %v841_v43  ;;  %v669_v30 = vmax.f32 %v637_v39, %v653_v44  ;;  %v839_v47 = vpack.c.bf16 %v671_v45, %v671_v45 }
 0x137   :  { %749 = vst.msk [vmem:[%s1296_s3 + $0x28] sm:$0xf] %vm738_vm2, %v836_v46  ;;  %v837_v49 = vpack.c.bf16 %v669_v30, %v669_v30  ;;  %752 = vst.msk [vmem:[%s1296_s3 + $0x34] sm:$0xf] %vm738_vm2, %v839_v47 }
 0x139   :  { %750 = vst.msk [vmem:[%s1296_s3 + $0x2c] sm:$0xf] %vm738_vm2, %v837_v49 }

// kernel: multi_image_field_mlp_forward.24
= control target key start
LH: loop header
LB: loop body
LE: loop exit
PB: predicated region body
PF: predicated region fallthrough
CT: control target
= control target key end

     0   :  { %vm377_vm0 = vcmask 523264   ;;  %s948_s1 = inlined_call_operand.vmem [shape: bf16[576,128], index: 1, kind: input, shape index: {}]   ;;  %s949_s0 = inlined_call_operand.vmem [shape: bf16[32,576], index: 0, kind: input, shape index: {}]   ;;  %s950_s2 = inlined_call_operand.vmem [shape: f32[1,128], index: 2, kind: input, shape index: {}]   ;;  %s951_s3 = inlined_call_operand.vmem [shape: bf16[32,128], index: 3, kind: output, shape index: {}]  }
   0x1   :  { %v731_v0 = vld [vmem:[%s948_s1 + $0x40] sm:$0xff]   ;;  %v735_v4 = vld [vmem:[%s948_s1 + $0x48] sm:$0xff]   ;;  %v739_v8 = vld [vmem:[%s948_s1 + $0x50] sm:$0xff]  }
   0x2   :  { %v732_v1 = vld [vmem:[%s948_s1 + $0xc0] sm:$0xff]   ;;  %657 = vmatprep.subr.bf16.mxu0 %v731_v0  ;;  %v736_v5 = vld [vmem:[%s948_s1 + $0xc8] sm:$0xff]   ;;  %v740_v9 = vld [vmem:[%s948_s1 + $0xd0] sm:$0xff]  }
   0x3   :  { %v733_v2 = vld [vmem:[%s948_s1] sm:$0xff]   ;;  %685 = vmatprep.subr.bf16.mxu1 %v732_v1  ;;  %v737_v6 = vld [vmem:[%s948_s1 + $0x8] sm:$0xff]   ;;  %v741_v10 = vld [vmem:[%s948_s1 + $0x10] sm:$0xff]  }
   0x4   :  { %v734_v3 = vld [vmem:[%s948_s1 + $0x80] sm:$0xff]   ;;  %658 = vmatpush3.bf16.msra.mxu0 %v733_v2  ;;  %v738_v7 = vld [vmem:[%s948_s1 + $0x88] sm:$0xff]   ;;  %v742_v11 = vld [vmem:[%s948_s1 + $0x90] sm:$0xff]  }
   0x5   :  { %686 = vmatpush3.bf16.msra.mxu1 %v734_v3  ;;  %659 = vmatprep.subr.bf16.mxu0 %v735_v4  ;;  %v743_v12 = vld [vmem:[%s948_s1 + $0x58] sm:$0xff]   ;;  %v747_v16 = vld [vmem:[%s948_s1 + $0x60] sm:$0xff]   ;;  %v751_v20 = vld [vmem:[%s948_s1 + $0x68] sm:$0xff]  }
   0x6   :  { %687 = vmatprep.subr.bf16.mxu1 %v736_v5  ;;  %v744_v13 = vld [vmem:[%s948_s1 + $0xd8] sm:$0xff]   ;;  %v748_v17 = vld [vmem:[%s948_s1 + $0xe0] sm:$0xff]   ;;  %v752_v21 = vld [vmem:[%s948_s1 + $0xe8] sm:$0xff]  }
   0x7   :  { %v745_v14 = vld [vmem:[%s948_s1 + $0x18] sm:$0xff]   ;;  %v749_v18 = vld [vmem:[%s948_s1 + $0x20] sm:$0xff]   ;;  %v753_v22 = vld [vmem:[%s948_s1 + $0x28] sm:$0xff]  }
   0x8   :  { %660 = vmatpush3.bf16.msra.mxu0 %v737_v6  ;;  %v746_v15 = vld [vmem:[%s948_s1 + $0x98] sm:$0xff]   ;;  %v750_v19 = vld [vmem:[%s948_s1 + $0xa0] sm:$0xff]   ;;  %v754_v23 = vld [vmem:[%s948_s1 + $0xa8] sm:$0xff]  }
   0x9   :  { %688 = vmatpush3.bf16.msra.mxu1 %v738_v7  ;;  %661 = vmatprep.subr.bf16.mxu0 %v739_v8  ;;  %v755_v24 = vld [vmem:[%s948_s1 + $0x70] sm:$0xff]   ;;  %v759_v28 = vld [vmem:[%s948_s1 + $0x78] sm:$0xff]   ;;  %v768_v35 = vld [vmem:[%s949_s0 + $0xc] ss:$20 sps:$4 sm:$0xff]  }
   0xa   :  { %689 = vmatprep.subr.bf16.mxu1 %v740_v9  ;;  %v756_v25 = vld [vmem:[%s948_s1 + $0xf0] sm:$0xff]   ;;  %v760_v29 = vld [vmem:[%s948_s1 + $0xf8] sm:$0xff]   ;;  %v769_v36 = vld [vmem:[%s948_s1 + $0x100] sm:$0xff]   ;;  %465 = vmatprep.mubr.bf16.mxu1 %v768_v35 }
   0xb   :  { %v757_v26 = vld [vmem:[%s948_s1 + $0x30] sm:$0xff]   ;;  %v761_v30 = vld [vmem:[%s948_s1 + $0x38] sm:$0xff]   ;;  %v770_v37 = vld [vmem:[%s948_s1 + $0x108] sm:$0xff]  }
   0xc   :  { %662 = vmatpush3.bf16.msra.mxu0 %v741_v10  ;;  %v758_v27 = vld [vmem:[%s948_s1 + $0xb0] sm:$0xff]   ;;  %v762_v31 = vld [vmem:[%s948_s1 + $0xb8] sm:$0xff]   ;;  %v771_v38 = vld [vmem:[%s949_s0 + $0x2c] ss:$20 sps:$4 sm:$0xff]  }
   0xd   :  { %690 = vmatpush3.bf16.msra.mxu1 %v742_v11  ;;  %663 = vmatprep.subr.bf16.mxu0 %v743_v12  ;;  %v763_v32 = vld [vmem:[%s949_s0] ss:$20 sps:$4 sm:$0xff]   ;;  %v765_v33 = vld [vmem:[%s949_s0 + $0x4] ss:$20 sps:$4 sm:$0xff]   ;;  %v766_v34 = vld [vmem:[%s949_s0 + $0x8] ss:$20 sps:$4 sm:$0xff]  }
   0xe   :  { %691 = vmatprep.subr.bf16.mxu1 %v744_v13  ;;  %416 = vmatprep.mubr.bf16.mxu0 %v765_v33  ;;  %v773_v39 = vld [vmem:[%s949_s0 + $0x34] ss:$20 sps:$4 sm:$0xff]   ;;  %v776_v42 = vld [vmem:[%s949_s0 + $0x30] ss:$20 sps:$4 sm:$0xff]   ;;  %v778_v44 = vld [vmem:[%s948_s1 + $0x118] sm:$0xff]  }
   0xf   :  { %v775_v40 = vld [vmem:[%s949_s0 + $0x28] ss:$20 sps:$4 sm:$0xff]   ;;  %v777_v41 = vld [vmem:[%s948_s1 + $0x110] sm:$0xff]   ;;  %v780_v45 = vld [vmem:[%s949_s0 + $0x38] ss:$20 sps:$4 sm:$0xff]  }
  0x10   :  { %664 = vmatpush3.bf16.msra.mxu0 %v745_v14  ;;  %v779_v43 = vld [vmem:[%s949_s0 + $0x10] ss:$20 sps:$4 sm:$0xff]   ;;  %v637_v11 = vld [vmem:[%s950_s2] ss:$0 sm:$0xff] }
  0x11   :  { %692 = vmatpush3.bf16.msra.mxu1 %v746_v15  ;;  %665 = vmatprep.subr.bf16.mxu0 %v747_v16 }
  0x12   :  { %693 = vmatprep.subr.bf16.mxu1 %v748_v17 }
  0x14   :  { %666 = vmatpush3.bf16.msra.mxu0 %v749_v18 }
  0x15   :  { %694 = vmatpush3.bf16.msra.mxu1 %v750_v19  ;;  %667 = vmatprep.subr.bf16.mxu0 %v751_v20 }
  0x16   :  { %695 = vmatprep.subr.bf16.mxu1 %v752_v21 }
  0x18   :  { %668 = vmatpush3.bf16.msra.mxu0 %v753_v22 }
  0x19   :  { %696 = vmatpush3.bf16.msra.mxu1 %v754_v23  ;;  %669 = vmatprep.subr.bf16.mxu0 %v755_v24 }
  0x1a   :  { %697 = vmatprep.subr.bf16.mxu1 %v756_v25 }
  0x1c   :  { %670 = vmatpush3.bf16.msra.mxu0 %v757_v26 }
  0x1d   :  { %698 = vmatpush3.bf16.msra.mxu1 %v758_v27  ;;  %671 = vmatprep.subr.bf16.mxu0 %v759_v28 }
  0x1e   :  { %699 = vmatprep.subr.bf16.mxu1 %v760_v29 }
  0x20   :  { %672 = vmatpush3.bf16.msra.mxu0 %v761_v30 }
  0x21   :  { %700 = vmatpush3.bf16.msra.mxu1 %v762_v31  ;;  %719 = vmatprep.subr.bf16.mxu0 %v769_v36 }
  0x23   :  { %417 = vmatmul.mubr.bf16.vlgmr.msra.gmra.mrb[0].mxu0 %v763_v32 }
  0x24   :  { %466 = vmatmul.mubr.bf16.vlgmr.msra.gmra.mrb[0].mxu1 %v766_v34  ;;  %720 = vmatpush3.bf16.msra.mxu0 %v769_v36 }
  0x25   :  { %721 = vmatprep.subr.bf16.mxu0 %v770_v37  ;;  %424 = vmatprep.mubr.bf16.mxu0 %v771_v38 }
  0x26   :  { %473 = vmatprep.mubr.bf16.mxu1 %v773_v39 }
  0x28   :  { %722 = vmatpush3.bf16.msra.mxu0 %v770_v37 }
  0x29   :  { %723 = vmatprep.subr.bf16.mxu0 %v777_v41 }
  0x2b   :  { %425 = vmatmul.mubr.bf16.gmra.mrb[4].mxu0 %v775_v40 }
  0x2c   :  { %474 = vmatmul.mubr.bf16.gmra.mrb[4].mxu1 %v776_v42  ;;  %727 = vmatprep.mubr.msk.bf16.mxu0 %vm377_vm0, %v779_v43 }
  0x2d   :  { %724 = vmatpush3.bf16.msra.mxu0 %v777_v41 }
  0x2e   :  { %725 = vmatprep.subr.bf16.mxu0 %v778_v44 }
  0x31   :  { %726 = vmatpush3.bf16.msra.mxu0 %v778_v44 }
  0x34   :  { %728 = vmatmul.mubr.msk.bf16.vlgmr.msra.gmra.mrb[8].mxu0 %vm377_vm0, %v780_v45 }
  0xf6   :  { %v673_v46 = vpop.f32.mrb[0].mxu0 }
  0xf7   :  { %v701_v47 = vpop.f32.mrb[0].mxu1  ;;  %v674_v48 = vpop.f32.mrb[1].mxu0 }
  0xf8   :  { %v675_v49 = vadd.f32 %v674_v48, %v673_v46  ;;  %v702_v50 = vpop.f32.mrb[1].mxu1  ;;  %v676_v51 = vpop.f32.mrb[2].mxu0 }
  0xf9   :  { %v703_v52 = vadd.f32 %v702_v50, %v701_v47  ;;  %v704_v53 = vpop.f32.mrb[2].mxu1  ;;  %v677_v54 = vpop.f32.mrb[3].mxu0 }
  0xfa   :  { %v678_v55 = vadd.f32 %v677_v54, %v676_v51  ;;  %v705_v56 = vpop.f32.mrb[3].mxu1 }
  0xfb   :  { %v706_v57 = vadd.f32 %v705_v56, %v704_v53  ;;  %v468_v58 = vadd.f32 %v703_v52, %v675_v49 }
  0xfd   :  { %v471_v59 = vadd.f32 %v706_v57, %v678_v55 }
  0xfe   :  { %v679_v60 = vpop.f32.mrb[4].mxu0 }
  0xff   :  { %v707_v61 = vpop.f32.mrb[4].mxu1  ;;  %v680_v62 = vpop.f32.mrb[5].mxu0 }
 0x100   :  { %v681_v63 = vadd.f32 %v680_v62, %v679_v60  ;;  %v708_v0 = vpop.f32.mrb[5].mxu1  ;;  %v682_v1 = vpop.f32.mrb[6].mxu0 }
 0x101   :  { %v709_v2 = vadd.f32 %v708_v0, %v707_v61  ;;  %v710_v3 = vpop.f32.mrb[6].mxu1  ;;  %v683_v4 = vpop.f32.mrb[7].mxu0 }
 0x102   :  { %v684_v5 = vadd.f32 %v683_v4, %v682_v1  ;;  %v711_v6 = vpop.f32.mrb[7].mxu1 }
 0x103   :  { %v712_v7 = vadd.f32 %v711_v6, %v710_v3  ;;  %v476_v8 = vadd.f32 %v709_v2, %v681_v63 }
 0x105   :  { %v479_v9 = vadd.f32 %v712_v7, %v684_v5 }
 0x107   :  { %v729_v10 = vpop.f32.mrb[8].mxu0 }
 0x108   :  { %v525_v12 = vadd.f32 %v729_v10, %v476_v8  ;;  %v516_v13 = vpop.f32.mrb[9].mxu0 }
 0x109   :  { %v517_v14 = vadd.f32 %v516_v13, %v468_v58  ;;  %v730_v15 = vpop.f32.mrb[10].mxu0 }
 0x10a   :  { %v555_v16 = vadd.f32 %v637_v11, %v525_v12  ;;  %v528_v17 = vadd.f32 %v730_v15, %v479_v9  ;;  %v519_v18 = vpop.f32.mrb[11].mxu0 }
 0x10b   :  { %v553_v19 = vadd.f32 %v637_v11, %v517_v14  ;;  %v520_v20 = vadd.f32 %v519_v18, %v471_v59 }
 0x10c   :  { %v559_v21 = vmul.f32 0.2, %v555_v16  ;;  %v556_v22 = vadd.f32 %v637_v11, %v528_v17 }
 0x10d   :  { %v557_v23 = vmul.f32 0.2, %v553_v19  ;;  %v554_v24 = vadd.f32 %v637_v11, %v520_v20 }
 0x10e   :  { %v560_v25 = vmul.f32 0.2, %v556_v22  ;;  %v563_v27 = vmax.f32 %v555_v16, %v559_v21 }
 0x10f   :  { %v558_v26 = vmul.f32 0.2, %v554_v24  ;;  %v561_v29 = vmax.f32 %v553_v19, %v557_v23 }
 0x110   :  { %v564_v28 = vmax.f32 %v556_v22, %v560_v25 }
 0x111   :  { %v562_v30 = vmax.f32 %v554_v24, %v558_v26 }
 0x112   :  { %v654_v31 = vpack.c.bf16 %v564_v28, %v563_v27 }
 0x113   :  { %v649_v32 = vpack.c.bf16 %v562_v30, %v561_v29 }
 0x114   :  { %656 = vst [vmem:[%s951_s3 + $0x8] sm:$0xff] %v654_v31  }
 0x115   :  { %650 = vst [vmem:[%s951_s3] sm:$0xff] %v649_v32  }

// kernel: multi_image_field_mlp_forward.25
= control target key start
LH: loop header
LB: loop body
LE: loop exit
PB: predicated region body
PF: predicated region fallthrough
CT: control target
= control target key end

     0   :  { %s2036_s1 = inlined_call_operand.vmem [shape: bf16[1152,256], index: 1, kind: input, shape index: {}]   ;;  %s2037_s0 = inlined_call_operand.vmem [shape: bf16[8,1152], index: 0, kind: input, shape index: {}]   ;;  %s2038_s2 = inlined_call_operand.vmem [shape: f32[1,256], index: 2, kind: input, shape index: {}]   ;;  %s2039_s3 = inlined_call_operand.vmem [shape: bf16[8,256], index: 3, kind: output, shape index: {}]  }
   0x1   :  { %v1325_v0 = vld [vmem:[%s2036_s1 + $0x4] ss:$8 sps:$4 sm:$0xff]   ;;  %v1329_v2 = vld [vmem:[%s2036_s1] ss:$8 sps:$4 sm:$0xff]   ;;  %v1331_v4 = vld [vmem:[%s2036_s1 + $0x14] ss:$8 sps:$4 sm:$0xff]  }
   0x2   :  { %v1327_v1 = vld [vmem:[%s2036_s1 + $0x104] ss:$8 sps:$4 sm:$0xff]   ;;  %924 = vmatprep.subr.bf16.mxu0 %v1325_v0  ;;  %v1330_v3 = vld [vmem:[%s2036_s1 + $0x100] ss:$8 sps:$4 sm:$0xff]   ;;  %v1333_v5 = vld [vmem:[%s2036_s1 + $0x114] ss:$8 sps:$4 sm:$0xff]  }
   0x3   :  { %965 = vmatprep.subr.bf16.mxu1 %v1327_v1  ;;  %925 = vmatpush1.bf16.msra.mxu0 %v1329_v2  ;;  %v1335_v6 = vld [vmem:[%s2036_s1 + $0x10] ss:$8 sps:$4 sm:$0xff]   ;;  %v1337_v8 = vld [vmem:[%s2036_s1 + $0x24] ss:$8 sps:$4 sm:$0xff]   ;;  %v1341_v10 = vld [vmem:[%s2036_s1 + $0x20] ss:$8 sps:$4 sm:$0xff]  }
   0x4   :  { %966 = vmatpush1.bf16.msra.mxu1 %v1330_v3  ;;  %926 = vmatprep.subr.bf16.mxu0 %v1331_v4  ;;  %v1336_v7 = vld [vmem:[%s2036_s1 + $0x110] ss:$8 sps:$4 sm:$0xff]   ;;  %v1339_v9 = vld [vmem:[%s2036_s1 + $0x124] ss:$8 sps:$4 sm:$0xff]   ;;  %v1342_v11 = vld [vmem:[%s2036_s1 + $0x120] ss:$8 sps:$4 sm:$0xff]  }
   0x5   :  { %967 = vmatprep.subr.bf16.mxu1 %v1333_v5  ;;  %v1343_v12 = vld [vmem:[%s2036_s1 + $0x34] ss:$8 sps:$4 sm:$0xff]   ;;  %v1347_v14 = vld [vmem:[%s2036_s1 + $0x30] ss:$8 sps:$4 sm:$0xff]   ;;  %v1349_v16 = vld [vmem:[%s2036_s1 + $0x44] ss:$8 sps:$4 sm:$0xff]  }
   0x6   :  { %v1345_v13 = vld [vmem:[%s2036_s1 + $0x134] ss:$8 sps:$4 sm:$0xff]   ;;  %v1348_v15 = vld [vmem:[%s2036_s1 + $0x130] ss:$8 sps:$4 sm:$0xff]   ;;  %v1351_v17 = vld [vmem:[%s2036_s1 + $0x144] ss:$8 sps:$4 sm:$0xff]  }
   0x7   :  { %927 = vmatpush1.bf16.msra.mxu0 %v1335_v6  ;;  %v1353_v18 = vld [vmem:[%s2036_s1 + $0x40] ss:$8 sps:$4 sm:$0xff]   ;;  %v1355_v20 = vld [vmem:[%s2036_s1 + $0x54] ss:$8 sps:$4 sm:$0xff]   ;;  %v1359_v22 = vld [vmem:[%s2036_s1 + $0x50] ss:$8 sps:$4 sm:$0xff]  }
   0x8   :  { %968 = vmatpush1.bf16.msra.mxu1 %v1336_v7  ;;  %928 = vmatprep.subr.bf16.mxu0 %v1337_v8  ;;  %v1354_v19 = vld [vmem:[%s2036_s1 + $0x140] ss:$8 sps:$4 sm:$0xff]   ;;  %v1357_v21 = vld [vmem:[%s2036_s1 + $0x154] ss:$8 sps:$4 sm:$0xff]   ;;  %v1360_v23 = vld [vmem:[%s2036_s1 + $0x150] ss:$8 sps:$4 sm:$0xff]  }
   0x9   :  { %969 = vmatprep.subr.bf16.mxu1 %v1339_v9  ;;  %v1361_v24 = vld [vmem:[%s2036_s1 + $0x64] ss:$8 sps:$4 sm:$0xff]   ;;  %v1365_v26 = vld [vmem:[%s2036_s1 + $0x60] ss:$8 sps:$4 sm:$0xff]   ;;  %v1367_v28 = vld [vmem:[%s2036_s1 + $0x74] ss:$8 sps:$4 sm:$0xff]  }
   0xa   :  { %v1363_v25 = vld [vmem:[%s2036_s1 + $0x164] ss:$8 sps:$4 sm:$0xff]   ;;  %v1366_v27 = vld [vmem:[%s2036_s1 + $0x160] ss:$8 sps:$4 sm:$0xff]   ;;  %v1369_v29 = vld [vmem:[%s2036_s1 + $0x174] ss:$8 sps:$4 sm:$0xff]  }
   0xb   :  { %929 = vmatpush1.bf16.msra.mxu0 %v1341_v10  ;;  %v1371_v30 = vld [vmem:[%s2036_s1 + $0x70] ss:$8 sps:$4 sm:$0xff]   ;;  %v1373_v32 = vld [vmem:[%s2036_s1 + $0x84] ss:$8 sps:$4 sm:$0xff]   ;;  %v1377_v34 = vld [vmem:[%s2036_s1 + $0x80] ss:$8 sps:$4 sm:$0xff]  }
   0xc   :  { %970 = vmatpush1.bf16.msra.mxu1 %v1342_v11  ;;  %930 = vmatprep.subr.bf16.mxu0 %v1343_v12  ;;  %v1372_v31 = vld [vmem:[%s2036_s1 + $0x170] ss:$8 sps:$4 sm:$0xff]   ;;  %v1375_v33 = vld [vmem:[%s2036_s1 + $0x184] ss:$8 sps:$4 sm:$0xff]   ;;  %v1378_v35 = vld [vmem:[%s2036_s1 + $0x180] ss:$8 sps:$4 sm:$0xff]  }
   0xd   :  { %971 = vmatprep.subr.bf16.mxu1 %v1345_v13  ;;  %v1379_v36 = vld [vmem:[%s2036_s1 + $0x94] ss:$8 sps:$4 sm:$0xff]   ;;  %v1383_v38 = vld [vmem:[%s2036_s1 + $0x90] ss:$8 sps:$4 sm:$0xff]   ;;  %v1385_v40 = vld [vmem:[%s2036_s1 + $0xa4] ss:$8 sps:$4 sm:$0xff]  }
   0xe   :  { %v1381_v37 = vld [vmem:[%s2036_s1 + $0x194] ss:$8 sps:$4 sm:$0xff]   ;;  %v1384_v39 = vld [vmem:[%s2036_s1 + $0x190] ss:$8 sps:$4 sm:$0xff]   ;;  %v1387_v41 = vld [vmem:[%s2036_s1 + $0x1a4] ss:$8 sps:$4 sm:$0xff]  }
   0xf   :  { %931 = vmatpush1.bf16.msra.mxu0 %v1347_v14  ;;  %v1389_v42 = vld [vmem:[%s2036_s1 + $0xa0] ss:$8 sps:$4 sm:$0xff]   ;;  %v1391_v44 = vld [vmem:[%s2036_s1 + $0xb4] ss:$8 sps:$4 sm:$0xff]   ;;  %v1395_v49 = vld [vmem:[%s2036_s1 + $0xb0] ss:$8 sps:$4 sm:$0xff]  }
  0x10   :  { %972 = vmatpush1.bf16.msra.mxu1 %v1348_v15  ;;  %932 = vmatprep.subr.bf16.mxu0 %v1349_v16  ;;  %v1390_v43 = vld [vmem:[%s2036_s1 + $0x1a0] ss:$8 sps:$4 sm:$0xff]   ;;  %v1393_v45 = vld [vmem:[%s2036_s1 + $0x1b4] ss:$8 sps:$4 sm:$0xff]   ;;  %v1396_v50 = vld [vmem:[%s2036_s1 + $0x1b0] ss:$8 sps:$4 sm:$0xff]  }
  0x11   :  { %973 = vmatprep.subr.bf16.mxu1 %v1351_v17  ;;  %v23_v46 = vld [vmem:[%s2037_s0] sm:$0xff]  ;;  %v24_v48 = vld [vmem:[%s2037_s0 + $0x8] sm:$0xff]  ;;  %v1403_v56 = vld [vmem:[%s2036_s1 + $0xd4] ss:$8 sps:$4 sm:$0xff]  }
  0x12   :  { %v1170_v47 = vcombine.high %v23_v46, %v23_v46  ;;  %v1172_v51 = vcombine.high %v24_v48, %v24_v48  ;;  %v1397_v52 = vld [vmem:[%s2036_s1 + $0xc4] ss:$8 sps:$4 sm:$0xff]   ;;  %v1401_v54 = vld [vmem:[%s2036_s1 + $0xc0] ss:$8 sps:$4 sm:$0xff]   ;;  %v1405_v57 = vld [vmem:[%s2036_s1 + $0x1d4] ss:$8 sps:$4 sm:$0xff]   ;;  %v1169_v6 = vcombine.low %v23_v46, %v23_v46  ;;  %v1171_v7 = vcombine.low %v24_v48, %v24_v48 }
  0x13   :  { %933 = vmatpush1.bf16.msra.mxu0 %v1353_v18  ;;  %v1399_v53 = vld [vmem:[%s2036_s1 + $0x1c4] ss:$8 sps:$4 sm:$0xff]   ;;  %v1402_v55 = vld [vmem:[%s2036_s1 + $0x1c0] ss:$8 sps:$4 sm:$0xff]   ;;  %v1407_v58 = vld [vmem:[%s2036_s1 + $0xd0] ss:$8 sps:$4 sm:$0xff]  }
  0x14   :  { %974 = vmatpush1.bf16.msra.mxu1 %v1354_v19  ;;  %934 = vmatprep.subr.bf16.mxu0 %v1355_v20  ;;  %v1408_v59 = vld [vmem:[%s2036_s1 + $0x1d0] ss:$8 sps:$4 sm:$0xff]   ;;  %v1409_v60 = vld [vmem:[%s2036_s1 + $0xe4] ss:$8 sps:$4 sm:$0xff]   ;;  %v1413_v62 = vld [vmem:[%s2036_s1 + $0xe0] ss:$8 sps:$4 sm:$0xff]  }
  0x15   :  { %975 = vmatprep.subr.bf16.mxu1 %v1357_v21  ;;  %956 = vmatprep.mubr.bf16.mxu0 %v1170_v47  ;;  %v1411_v61 = vld [vmem:[%s2036_s1 + $0x1e4] ss:$8 sps:$4 sm:$0xff]   ;;  %v1414_v63 = vld [vmem:[%s2036_s1 + $0x1e0] ss:$8 sps:$4 sm:$0xff]   ;;  %v1415_v0 = vld [vmem:[%s2036_s1 + $0xf4] ss:$8 sps:$4 sm:$0xff]  }
  0x16   :  { %997 = vmatprep.mubr.bf16.mxu1 %v1172_v51  ;;  %v1417_v1 = vld [vmem:[%s2036_s1 + $0x1f4] ss:$8 sps:$4 sm:$0xff]   ;;  %v1419_v2 = vld [vmem:[%s2036_s1 + $0xf0] ss:$8 sps:$4 sm:$0xff]   ;;  %v1427_v4 = vld [vmem:[%s2036_s1 + $0x204] ss:$8 sps:$4 sm:$0xff]  }
  0x17   :  { %935 = vmatpush1.bf16.msra.mxu0 %v1359_v22  ;;  %v1420_v3 = vld [vmem:[%s2036_s1 + $0x1f0] ss:$8 sps:$4 sm:$0xff]   ;;  %v1430_v5 = vld [vmem:[%s2036_s1 + $0x304] ss:$8 sps:$4 sm:$0xff]   ;;  %v1425_v8 = vld [vmem:[%s2036_s1 + $0x200] ss:$8 sps:$4 sm:$0xff]  }
  0x18   :  { %976 = vmatpush1.bf16.msra.mxu1 %v1360_v23  ;;  %936 = vmatprep.subr.bf16.mxu0 %v1361_v24  ;;  %v1428_v9 = vld [vmem:[%s2036_s1 + $0x300] ss:$8 sps:$4 sm:$0xff]   ;;  %v1433_v10 = vld [vmem:[%s2036_s1 + $0x214] ss:$8 sps:$4 sm:$0xff]   ;;  %v1431_v12 = vld [vmem:[%s2036_s1 + $0x210] ss:$8 sps:$4 sm:$0xff]  }
  0x19   :  { %977 = vmatprep.subr.bf16.mxu1 %v1363_v25  ;;  %v1436_v11 = vld [vmem:[%s2036_s1 + $0x314] ss:$8 sps:$4 sm:$0xff]   ;;  %v1434_v13 = vld [vmem:[%s2036_s1 + $0x310] ss:$8 sps:$4 sm:$0xff]   ;;  %v1439_v14 = vld [vmem:[%s2036_s1 + $0x224] ss:$8 sps:$4 sm:$0xff]  }
  0x1a   :  { %v1442_v15 = vld [vmem:[%s2036_s1 + $0x324] ss:$8 sps:$4 sm:$0xff]   ;;  %v1437_v16 = vld [vmem:[%s2036_s1 + $0x220] ss:$8 sps:$4 sm:$0xff]   ;;  %v1445_v18 = vld [vmem:[%s2036_s1 + $0x234] ss:$8 sps:$4 sm:$0xff]  }
  0x1b   :  { %937 = vmatpush1.bf16.msra.mxu0 %v1365_v26  ;;  %v1440_v17 = vld [vmem:[%s2036_s1 + $0x320] ss:$8 sps:$4 sm:$0xff]   ;;  %v1448_v19 = vld [vmem:[%s2036_s1 + $0x334] ss:$8 sps:$4 sm:$0xff]   ;;  %v1443_v20 = vld [vmem:[%s2036_s1 + $0x230] ss:$8 sps:$4 sm:$0xff]  }
  0x1c   :  { %978 = vmatpush1.bf16.msra.mxu1 %v1366_v27  ;;  %938 = vmatprep.subr.bf16.mxu0 %v1367_v28  ;;  %v1446_v21 = vld [vmem:[%s2036_s1 + $0x330] ss:$8 sps:$4 sm:$0xff]   ;;  %v1451_v22 = vld [vmem:[%s2036_s1 + $0x244] ss:$8 sps:$4 sm:$0xff]   ;;  %v1449_v24 = vld [vmem:[%s2036_s1 + $0x240] ss:$8 sps:$4 sm:$0xff]  }
  0x1d   :  { %979 = vmatprep.subr.bf16.mxu1 %v1369_v29  ;;  %v1454_v23 = vld [vmem:[%s2036_s1 + $0x344] ss:$8 sps:$4 sm:$0xff]   ;;  %v1452_v25 = vld [vmem:[%s2036_s1 + $0x340] ss:$8 sps:$4 sm:$0xff]   ;;  %v1457_v26 = vld [vmem:[%s2036_s1 + $0x254] ss:$8 sps:$4 sm:$0xff]  }
  0x1e   :  { %v1460_v27 = vld [vmem:[%s2036_s1 + $0x354] ss:$8 sps:$4 sm:$0xff]   ;;  %v1455_v28 = vld [vmem:[%s2036_s1 + $0x250] ss:$8 sps:$4 sm:$0xff]   ;;  %v1490_v51 = vld [vmem:[%s2036_s1 + $0x3a4] ss:$8 sps:$4 sm:$0xff]  }
  0x1f   :  { %939 = vmatpush1.bf16.msra.mxu0 %v1371_v30  ;;  %v1458_v29 = vld [vmem:[%s2036_s1 + $0x350] ss:$8 sps:$4 sm:$0xff]   ;;  %v1463_v30 = vld [vmem:[%s2036_s1 + $0x264] ss:$8 sps:$4 sm:$0xff]   ;;  %v1481_v46 = vld [vmem:[%s2036_s1 + $0x294] ss:$8 sps:$4 sm:$0xff]  }
  0x20   :  { %980 = vmatpush1.bf16.msra.mxu1 %v1372_v31  ;;  %940 = vmatprep.subr.bf16.mxu0 %v1373_v32  ;;  %v1466_v31 = vld [vmem:[%s2036_s1 + $0x364] ss:$8 sps:$4 sm:$0xff]   ;;  %v1850_v32 = vld [vmem:[%s2037_s0 + $0x10] sm:$0xff] }
  0x21   :  { %981 = vmatprep.subr.bf16.mxu1 %v1375_v33  ;;  %v1461_v33 = vld [vmem:[%s2036_s1 + $0x260] ss:$8 sps:$4 sm:$0xff]   ;;  %v1484_v47 = vld [vmem:[%s2036_s1 + $0x394] ss:$8 sps:$4 sm:$0xff]   ;;  %v1479_v48 = vld [vmem:[%s2036_s1 + $0x290] ss:$8 sps:$4 sm:$0xff]  }
  0x23   :  { %941 = vmatpush1.bf16.msra.mxu0 %v1377_v34  ;;  %v1464_v34 = vld [vmem:[%s2036_s1 + $0x360] ss:$8 sps:$4 sm:$0xff]  }
  0x24   :  { %982 = vmatpush1.bf16.msra.mxu1 %v1378_v35  ;;  %942 = vmatprep.subr.bf16.mxu0 %v1379_v36  ;;  %v1174_v35 = vcombine.high %v1850_v32, %v1850_v32  ;;  %v1863_v36 = vld [vmem:[%s2037_s0 + $0x18] sm:$0xff] }
  0x25   :  { %983 = vmatprep.subr.bf16.mxu1 %v1381_v37  ;;  %v1469_v37 = vld [vmem:[%s2036_s1 + $0x274] ss:$8 sps:$4 sm:$0xff]  }
  0x27   :  { %943 = vmatpush1.bf16.msra.mxu0 %v1383_v38  ;;  %v1176_v38 = vcombine.high %v1863_v36, %v1863_v36 }
  0x28   :  { %984 = vmatpush1.bf16.msra.mxu1 %v1384_v39  ;;  %944 = vmatprep.subr.bf16.mxu0 %v1385_v40  ;;  %v1472_v39 = vld [vmem:[%s2036_s1 + $0x374] ss:$8 sps:$4 sm:$0xff]   ;;  %v1467_v40 = vld [vmem:[%s2036_s1 + $0x270] ss:$8 sps:$4 sm:$0xff]  }
  0x29   :  { %985 = vmatprep.subr.bf16.mxu1 %v1387_v41  ;;  %v1470_v41 = vld [vmem:[%s2036_s1 + $0x370] ss:$8 sps:$4 sm:$0xff]  }
  0x2b   :  { %945 = vmatpush1.bf16.msra.mxu0 %v1389_v42  ;;  %v1475_v42 = vld [vmem:[%s2036_s1 + $0x284] ss:$8 sps:$4 sm:$0xff]  }
  0x2c   :  { %986 = vmatpush1.bf16.msra.mxu1 %v1390_v43  ;;  %946 = vmatprep.subr.bf16.mxu0 %v1391_v44  ;;  %v1478_v43 = vld [vmem:[%s2036_s1 + $0x384] ss:$8 sps:$4 sm:$0xff]   ;;  %v1473_v44 = vld [vmem:[%s2036_s1 + $0x280] ss:$8 sps:$4 sm:$0xff]  }
  0x2d   :  { %987 = vmatprep.subr.bf16.mxu1 %v1393_v45  ;;  %v1476_v45 = vld [vmem:[%s2036_s1 + $0x380] ss:$8 sps:$4 sm:$0xff]  }
  0x2f   :  { %947 = vmatpush1.bf16.msra.mxu0 %v1395_v49  ;;  %v1482_v49 = vld [vmem:[%s2036_s1 + $0x390] ss:$8 sps:$4 sm:$0xff]  }
  0x30   :  { %988 = vmatpush1.bf16.msra.mxu1 %v1396_v50  ;;  %948 = vmatprep.subr.bf16.mxu0 %v1397_v52  ;;  %v1487_v50 = vld [vmem:[%s2036_s1 + $0x2a4] ss:$8 sps:$4 sm:$0xff]   ;;  %v1485_v52 = vld [vmem:[%s2036_s1 + $0x2a0] ss:$8 sps:$4 sm:$0xff]  }
  0x31   :  { %989 = vmatprep.subr.bf16.mxu1 %v1399_v53  ;;  %v1488_v53 = vld [vmem:[%s2036_s1 + $0x3a0] ss:$8 sps:$4 sm:$0xff]  }
  0x33   :  { %949 = vmatpush1.bf16.msra.mxu0 %v1401_v54  ;;  %v1493_v54 = vld [vmem:[%s2036_s1 + $0x2b4] ss:$8 sps:$4 sm:$0xff]  }
  0x34   :  { %990 = vmatpush1.bf16.msra.mxu1 %v1402_v55  ;;  %950 = vmatprep.subr.bf16.mxu0 %v1403_v56  ;;  %v1496_v55 = vld [vmem:[%s2036_s1 + $0x3b4] ss:$8 sps:$4 sm:$0xff]   ;;  %v1491_v56 = vld [vmem:[%s2036_s1 + $0x2b0] ss:$8 sps:$4 sm:$0xff]  }
  0x35   :  { %991 = vmatprep.subr.bf16.mxu1 %v1405_v57  ;;  %v1494_v57 = vld [vmem:[%s2036_s1 + $0x3b0] ss:$8 sps:$4 sm:$0xff]  }
  0x37   :  { %951 = vmatpush1.bf16.msra.mxu0 %v1407_v58  ;;  %v1499_v58 = vld [vmem:[%s2036_s1 + $0x2c4] ss:$8 sps:$4 sm:$0xff]  }
  0x38   :  { %992 = vmatpush1.bf16.msra.mxu1 %v1408_v59  ;;  %952 = vmatprep.subr.bf16.mxu0 %v1409_v60  ;;  %v1502_v59 = vld [vmem:[%s2036_s1 + $0x3c4] ss:$8 sps:$4 sm:$0xff]   ;;  %v1497_v60 = vld [vmem:[%s2036_s1 + $0x2c0] ss:$8 sps:$4 sm:$0xff]  }
  0x39   :  { %993 = vmatprep.subr.bf16.mxu1 %v1411_v61  ;;  %v1500_v61 = vld [vmem:[%s2036_s1 + $0x3c0] ss:$8 sps:$4 sm:$0xff]  }
  0x3b   :  { %953 = vmatpush1.bf16.msra.mxu0 %v1413_v62  ;;  %v1505_v62 = vld [vmem:[%s2036_s1 + $0x2d4] ss:$8 sps:$4 sm:$0xff]  }
  0x3c   :  { %994 = vmatpush1.bf16.msra.mxu1 %v1414_v63  ;;  %954 = vmatprep.subr.bf16.mxu0 %v1415_v0  ;;  %v1508_v63 = vld [vmem:[%s2036_s1 + $0x3d4] ss:$8 sps:$4 sm:$0xff]   ;;  %v1503_v0 = vld [vmem:[%s2036_s1 + $0x2d0] ss:$8 sps:$4 sm:$0xff]  }
  0x3d   :  { %995 = vmatprep.subr.bf16.mxu1 %v1417_v1  ;;  %v1506_v1 = vld [vmem:[%s2036_s1 + $0x3d0] ss:$8 sps:$4 sm:$0xff]  }
  0x3f   :  { %955 = vmatpush1.bf16.msra.mxu0 %v1419_v2  ;;  %v1511_v2 = vld [vmem:[%s2036_s1 + $0x2e4] ss:$8 sps:$4 sm:$0xff]  }
  0x40   :  { %996 = vmatpush1.bf16.msra.mxu1 %v1420_v3  ;;  %1006 = vmatprep.subr.bf16.mxu0 %v1427_v4  ;;  %v1514_v3 = vld [vmem:[%s2036_s1 + $0x3e4] ss:$8 sps:$4 sm:$0xff]   ;;  %v1509_v4 = vld [vmem:[%s2036_s1 + $0x2e0] ss:$8 sps:$4 sm:$0xff]  }
  0x41   :  { %1047 = vmatprep.subr.bf16.mxu1 %v1430_v5  ;;  %v1512_v5 = vld [vmem:[%s2036_s1 + $0x3e0] ss:$8 sps:$4 sm:$0xff]  }
  0x42   :  { %957 = vmatmul.mubr.bf16.vlgmr.msra.gmra.mrb[0].mxu0 %v1169_v6  ;;  %v1517_v6 = vld [vmem:[%s2036_s1 + $0x2f4] ss:$8 sps:$4 sm:$0xff]  }
  0x43   :  { %998 = vmatmul.mubr.bf16.vlgmr.msra.gmra.mrb[0].mxu1 %v1171_v7  ;;  %1007 = vmatpush1.bf16.msra.mxu0 %v1425_v8  ;;  %v1520_v7 = vld [vmem:[%s2036_s1 + $0x3f4] ss:$8 sps:$4 sm:$0xff]   ;;  %v1515_v8 = vld [vmem:[%s2036_s1 + $0x2f0] ss:$8 sps:$4 sm:$0xff]  }
  0x44   :  { %1048 = vmatpush1.bf16.msra.mxu1 %v1428_v9  ;;  %1008 = vmatprep.subr.bf16.mxu0 %v1433_v10  ;;  %v1518_v9 = vld [vmem:[%s2036_s1 + $0x3f0] ss:$8 sps:$4 sm:$0xff]   ;;  %v1525_v10 = vld [vmem:[%s2036_s1 + $0x404] ss:$8 sps:$4 sm:$0xff]  }
  0x45   :  { %1049 = vmatprep.subr.bf16.mxu1 %v1436_v11  ;;  %1038 = vmatprep.mubr.bf16.mxu0 %v1174_v35  ;;  %v1173_v11 = vcombine.low %v1850_v32, %v1850_v32 }
  0x46   :  { %1079 = vmatprep.mubr.bf16.mxu1 %v1176_v38 }
  0x47   :  { %1009 = vmatpush1.bf16.msra.mxu0 %v1431_v12  ;;  %v1175_v12 = vcombine.low %v1863_v36, %v1863_v36 }
  0x48   :  { %1050 = vmatpush1.bf16.msra.mxu1 %v1434_v13  ;;  %1010 = vmatprep.subr.bf16.mxu0 %v1439_v14  ;;  %v1523_v13 = vld [vmem:[%s2036_s1 + $0x400] ss:$8 sps:$4 sm:$0xff]   ;;  %v1530_v14 = vld [vmem:[%s2036_s1 + $0x414] ss:$8 sps:$4 sm:$0xff]  }
  0x49   :  { %1051 = vmatprep.subr.bf16.mxu1 %v1442_v15  ;;  %v1528_v15 = vld [vmem:[%s2036_s1 + $0x410] ss:$8 sps:$4 sm:$0xff]  }
  0x4b   :  { %1011 = vmatpush1.bf16.msra.mxu0 %v1437_v16  ;;  %v1550_v16 = vmov 0  }
  0x4c   :  { %1052 = vmatpush1.bf16.msra.mxu1 %v1440_v17  ;;  %1012 = vmatprep.subr.bf16.mxu0 %v1445_v18  ;;  %v1533_v17 = vld [vmem:[%s2036_s1 + $0x424] ss:$8 sps:$4 sm:$0xff]   ;;  %v1531_v18 = vld [vmem:[%s2036_s1 + $0x420] ss:$8 sps:$4 sm:$0xff]  }
  0x4d   :  { %1053 = vmatprep.subr.bf16.mxu1 %v1448_v19  ;;  %v1536_v19 = vld [vmem:[%s2036_s1 + $0x434] ss:$8 sps:$4 sm:$0xff]  }
  0x4f   :  { %1013 = vmatpush1.bf16.msra.mxu0 %v1443_v20  ;;  %v1534_v20 = vld [vmem:[%s2036_s1 + $0x430] ss:$8 sps:$4 sm:$0xff]  }
  0x50   :  { %1054 = vmatpush1.bf16.msra.mxu1 %v1446_v21  ;;  %1014 = vmatprep.subr.bf16.mxu0 %v1451_v22  ;;  %v1539_v21 = vld [vmem:[%s2036_s1 + $0x444] ss:$8 sps:$4 sm:$0xff]   ;;  %v1537_v22 = vld [vmem:[%s2036_s1 + $0x440] ss:$8 sps:$4 sm:$0xff]  }
  0x51   :  { %1055 = vmatprep.subr.bf16.mxu1 %v1454_v23  ;;  %v1542_v23 = vld [vmem:[%s2036_s1 + $0x454] ss:$8 sps:$4 sm:$0xff]  }
  0x53   :  { %1015 = vmatpush1.bf16.msra.mxu0 %v1449_v24  ;;  %v1540_v24 = vld [vmem:[%s2036_s1 + $0x450] ss:$8 sps:$4 sm:$0xff]  }
  0x54   :  { %1056 = vmatpush1.bf16.msra.mxu1 %v1452_v25  ;;  %1016 = vmatprep.subr.bf16.mxu0 %v1457_v26  ;;  %v1545_v25 = vld [vmem:[%s2036_s1 + $0x464] ss:$8 sps:$4 sm:$0xff]   ;;  %v1543_v26 = vld [vmem:[%s2036_s1 + $0x460] ss:$8 sps:$4 sm:$0xff]  }
  0x55   :  { %1057 = vmatprep.subr.bf16.mxu1 %v1460_v27  ;;  %v1548_v27 = vld [vmem:[%s2036_s1 + $0x474] ss:$8 sps:$4 sm:$0xff]  }
  0x57   :  { %1017 = vmatpush1.bf16.msra.mxu0 %v1455_v28  ;;  %v1546_v28 = vld [vmem:[%s2036_s1 + $0x470] ss:$8 sps:$4 sm:$0xff]  }
  0x58   :  { %1058 = vmatpush1.bf16.msra.mxu1 %v1458_v29  ;;  %1018 = vmatprep.subr.bf16.mxu0 %v1463_v30  ;;  %v1549_v29 = vld [vmem:[%s2037_s0 + $0x20] ss:$0 sps:$4 sm:$0xff]  }
  0x59   :  { %1059 = vmatprep.subr.bf16.mxu1 %v1466_v31 }
  0x5b   :  { %1019 = vmatpush1.bf16.msra.mxu0 %v1461_v33 }
  0x5c   :  { %1060 = vmatpush1.bf16.msra.mxu1 %v1464_v34  ;;  %1020 = vmatprep.subr.bf16.mxu0 %v1469_v37 }
  0x5d   :  { %1061 = vmatprep.subr.bf16.mxu1 %v1472_v39 }
  0x5f   :  { %1021 = vmatpush1.bf16.msra.mxu0 %v1467_v40 }
  0x60   :  { %1062 = vmatpush1.bf16.msra.mxu1 %v1470_v41  ;;  %1022 = vmatprep.subr.bf16.mxu0 %v1475_v42 }
  0x61   :  { %1063 = vmatprep.subr.bf16.mxu1 %v1478_v43 }
  0x63   :  { %1023 = vmatpush1.bf16.msra.mxu0 %v1473_v44 }
  0x64   :  { %1064 = vmatpush1.bf16.msra.mxu1 %v1476_v45  ;;  %1024 = vmatprep.subr.bf16.mxu0 %v1481_v46 }
  0x65   :  { %1065 = vmatprep.subr.bf16.mxu1 %v1484_v47 }
  0x67   :  { %1025 = vmatpush1.bf16.msra.mxu0 %v1479_v48 }
  0x68   :  { %1066 = vmatpush1.bf16.msra.mxu1 %v1482_v49  ;;  %1026 = vmatprep.subr.bf16.mxu0 %v1487_v50 }
  0x69   :  { %1067 = vmatprep.subr.bf16.mxu1 %v1490_v51 }
  0x6b   :  { %1027 = vmatpush1.bf16.msra.mxu0 %v1485_v52  ;;  %v1140_v52 = vlaneseq }
  0x6c   :  { %1068 = vmatpush1.bf16.msra.mxu1 %v1488_v53  ;;  %1028 = vmatprep.subr.bf16.mxu0 %v1493_v54 }
  0x6d   :  { %1069 = vmatprep.subr.bf16.mxu1 %v1496_v55  ;;  %v1141_v53 = vshrl.u32 %v1140_v52, 7  ;;  %v1138_v55 = vld [vmem:[%s2038_s2] sm:$0x3] }
  0x6f   :  { %1029 = vmatpush1.bf16.msra.mxu0 %v1491_v56  ;;  %v1142_v54 = vsub.s32 0, %v1141_v53  ;;  %v1146_v56 = vsub.s32 1, %v1141_v53 }
  0x70   :  { %1070 = vmatpush1.bf16.msra.mxu1 %v1494_v57  ;;  %1030 = vmatprep.subr.bf16.mxu0 %v1499_v58 }
  0x71   :  { %1071 = vmatprep.subr.bf16.mxu1 %v1502_v59  ;;  %v1143_v57 = vrot.slane %v1138_v55, %v1142_v54  ;;  %v1147_v59 = vrot.slane %v1138_v55, %v1146_v56 }
  0x73   :  { %1031 = vmatpush1.bf16.msra.mxu0 %v1497_v60 }
  0x74   :  { %1072 = vmatpush1.bf16.msra.mxu1 %v1500_v61  ;;  %1032 = vmatprep.subr.bf16.mxu0 %v1505_v62 }
  0x75   :  { %1073 = vmatprep.subr.bf16.mxu1 %v1508_v63 }
  0x77   :  { %1033 = vmatpush1.bf16.msra.mxu0 %v1503_v0 }
  0x78   :  { %1074 = vmatpush1.bf16.msra.mxu1 %v1506_v1  ;;  %1034 = vmatprep.subr.bf16.mxu0 %v1511_v2 }
  0x79   :  { %1075 = vmatprep.subr.bf16.mxu1 %v1514_v3 }
  0x7b   :  { %1035 = vmatpush1.bf16.msra.mxu0 %v1509_v4 }
  0x7c   :  { %1076 = vmatpush1.bf16.msra.mxu1 %v1512_v5  ;;  %1036 = vmatprep.subr.bf16.mxu0 %v1517_v6 }
  0x7d   :  { %1077 = vmatprep.subr.bf16.mxu1 %v1520_v7 }
  0x7f   :  { %1037 = vmatpush1.bf16.msra.mxu0 %v1515_v8 }
  0x80   :  { %1078 = vmatpush1.bf16.msra.mxu1 %v1518_v9  ;;  %1088 = vmatprep.subr.bf16.mxu0 %v1525_v10 }
  0x82   :  { %1039 = vmatmul.mubr.bf16.vlgmr.msra.gmra.mrb[4].mxu0 %v1173_v11 }
  0x83   :  { %1080 = vmatmul.mubr.bf16.vlgmr.msra.gmra.mrb[4].mxu1 %v1175_v12  ;;  %1089 = vmatpush1.bf16.msra.mxu0 %v1523_v13 }
  0x84   :  { %1120 = vmatprep.mubr.bf16.mxu0 %v1550_v16  ;;  %1090 = vmatprep.subr.bf16.mxu0 %v1530_v14 }
  0x87   :  { %1091 = vmatpush1.bf16.msra.mxu0 %v1528_v15 }
  0x88   :  { %1092 = vmatprep.subr.bf16.mxu0 %v1533_v17 }
  0x8b   :  { %1093 = vmatpush1.bf16.msra.mxu0 %v1531_v18 }
  0x8c   :  { %1094 = vmatprep.subr.bf16.mxu0 %v1536_v19 }
  0x8f   :  { %1095 = vmatpush1.bf16.msra.mxu0 %v1534_v20 }
  0x90   :  { %1096 = vmatprep.subr.bf16.mxu0 %v1539_v21 }
  0x93   :  { %1097 = vmatpush1.bf16.msra.mxu0 %v1537_v22 }
  0x94   :  { %1098 = vmatprep.subr.bf16.mxu0 %v1542_v23 }
  0x97   :  { %1099 = vmatpush1.bf16.msra.mxu0 %v1540_v24 }
  0x98   :  { %1100 = vmatprep.subr.bf16.mxu0 %v1545_v25 }
  0x9b   :  { %1101 = vmatpush1.bf16.msra.mxu0 %v1543_v26 }
  0x9c   :  { %1102 = vmatprep.subr.bf16.mxu0 %v1548_v27 }
  0x9f   :  { %1103 = vmatpush1.bf16.msra.mxu0 %v1546_v28 }
  0xa2   :  { %1121 = vmatmul.mubr.bf16.vlgmr.msra.gmra.mrb[8].mxu0 %v1549_v29 }
 0x115   :  { %v958_v30 = vpop.f32.mrb[0].mxu0 }
 0x116   :  { %v999_v31 = vpop.f32.mrb[0].mxu1  ;;  %v960_v33 = vpop.f32.mrb[1].mxu0 }
 0x117   :  { %v1000_v32 = vadd.f32 %v999_v31, %v958_v30  ;;  %v1001_v34 = vpop.f32.mrb[1].mxu1  ;;  %v962_v36 = vpop.f32.mrb[2].mxu0 }
 0x118   :  { %v1002_v35 = vadd.f32 %v1001_v34, %v960_v33  ;;  %v1003_v37 = vpop.f32.mrb[2].mxu1  ;;  %v963_v38 = vpop.f32.mrb[3].mxu0 }
 0x119   :  { %v1004_v39 = vpop.f32.mrb[3].mxu1 }
 0x155   :  { %v1040_v40 = vpop.f32.mrb[4].mxu0 }
 0x156   :  { %v1081_v41 = vpop.f32.mrb[4].mxu1  ;;  %v1041_v42 = vadd.f32 %v1040_v40, %v1000_v32  ;;  %v1042_v43 = vpop.f32.mrb[5].mxu0 }
 0x157   :  { %v1083_v44 = vpop.f32.mrb[5].mxu1  ;;  %v1043_v45 = vadd.f32 %v1042_v43, %v1002_v35  ;;  %v1044_v46 = vpop.f32.mrb[6].mxu0 }
 0x158   :  { %v1085_v47 = vpop.f32.mrb[6].mxu1  ;;  %v1082_v48 = vadd.f32 %v1081_v41, %v1041_v42  ;;  %v1045_v49 = vpop.f32.mrb[7].mxu0 }
 0x159   :  { %v1086_v50 = vpop.f32.mrb[7].mxu1  ;;  %v1084_v51 = vadd.f32 %v1083_v44, %v1043_v45 }
 0x175   :  { %v1122_v58 = vpop.f32.mrb[8].mxu0 }
 0x176   :  { %v1123_v60 = vadd.f32 %v1122_v58, %v1082_v48  ;;  %v1124_v61 = vpop.f32.mrb[9].mxu0 }
 0x177   :  { %v1125_v62 = vadd.f32 %v1124_v61, %v1084_v51  ;;  %v1126_v63 = vpop.f32.mrb[10].mxu0 }
 0x178   :  { %v1150_v0 = vadd.f32 %v1143_v57, %v1123_v60  ;;  %v1127_v1 = vpop.f32.mrb[11].mxu0 }
 0x179   :  { %v1151_v2 = vadd.f32 %v1147_v59, %v1125_v62 }
 0x17a   :  { %v1152_v3 = vmul.f32 0.2, %v1150_v0 }
 0x17b   :  { %v1153_v4 = vmul.f32 0.2, %v1151_v2 }
 0x17c   :  { %v1154_v5 = vmax.f32 %v1150_v0, %v1152_v3 }
 0x17d   :  { %v1155_v6 = vmax.f32 %v1151_v2, %v1153_v4 }
 0x17f   :  { %v1323_v7 = vpack.c.bf16 %v1155_v6, %v1154_v5 }
 0x181   :  { %1164 = vst [vmem:[%s2039_s3] sm:$0xff] %v1323_v7 }

// kernel: multi_image_field_mlp_forward.26
= control target key start
LH: loop header
LB: loop body
LE: loop exit
PB: predicated region body
PF: predicated region fallthrough
CT: control target
= control target key end

     0   :  { %v995_v22 = vmov 1966171168   ;;  %v156_v24 = vlaneseq  ;;  %vm19_vm0 = vcmask 254976   ;;  %s1234_s1 = inlined_call_operand.vmem [shape: bf16[1024,32], index: 1, kind: input, shape index: {}]   ;;  %s1235_s0 = inlined_call_operand.vmem [shape: bf16[2,1024], index: 0, kind: input, shape index: {}]   ;;  %s1236_s2 = inlined_call_operand.vmem [shape: f32[1,32], index: 2, kind: input, shape index: {}]   ;;  %s1237_s3 = inlined_call_operand.vmem [shape: f32[2,32], index: 3, kind: output, shape index: {}]  }
   0x1   :  { %v930_v0 = vld [vmem:[%s1234_s1 + $0x40] sm:$0xff]   ;;  %v934_v4 = vld [vmem:[%s1234_s1 + $0x48] sm:$0xff]   ;;  %v938_v8 = vld [vmem:[%s1234_s1 + $0x50] sm:$0xff]   ;;  %v154_v23 = vunpack.c.l.s4 %v995_v22 }
   0x2   :  { %v931_v1 = vld [vmem:[%s1234_s1 + $0xc0] sm:$0xff]   ;;  %840 = vmatprep.subr.bf16.mxu0 %v930_v0  ;;  %v935_v5 = vld [vmem:[%s1234_s1 + $0xc8] sm:$0xff]   ;;  %v939_v9 = vld [vmem:[%s1234_s1 + $0xd0] sm:$0xff]   ;;  %v157_v30 = vshrl.u32 %v156_v24, 7 }
   0x3   :  { %v932_v2 = vld [vmem:[%s1234_s1] sm:$0xff]   ;;  %862 = vmatprep.subr.bf16.mxu1 %v931_v1  ;;  %v936_v6 = vld [vmem:[%s1234_s1 + $0x8] sm:$0xff]   ;;  %v940_v10 = vld [vmem:[%s1234_s1 + $0x10] sm:$0xff]   ;;  %v155_v29 = vunpack.c.0.s8 %v154_v23 }
   0x4   :  { %v933_v3 = vld [vmem:[%s1234_s1 + $0x80] sm:$0xff]   ;;  %841 = vmatpush3.bf16.msra.mxu0 %v932_v2  ;;  %v937_v7 = vld [vmem:[%s1234_s1 + $0x88] sm:$0xff]   ;;  %v941_v11 = vld [vmem:[%s1234_s1 + $0x90] sm:$0xff]  }
   0x5   :  { %863 = vmatpush3.bf16.msra.mxu1 %v933_v3  ;;  %842 = vmatprep.subr.bf16.mxu0 %v934_v4  ;;  %v942_v12 = vld [vmem:[%s1234_s1 + $0x58] sm:$0xff]   ;;  %v946_v16 = vld [vmem:[%s1234_s1 + $0x60] sm:$0xff]   ;;  %v950_v20 = vld [vmem:[%s1234_s1 + $0x68] sm:$0xff]   ;;  %v1107_v35 = vsub.s32 %v155_v29, %v157_v30 }
   0x6   :  { %864 = vmatprep.subr.bf16.mxu1 %v935_v5  ;;  %v943_v13 = vld [vmem:[%s1234_s1 + $0xd8] sm:$0xff]   ;;  %v947_v17 = vld [vmem:[%s1234_s1 + $0xe0] sm:$0xff]   ;;  %v951_v21 = vld [vmem:[%s1234_s1 + $0xe8] sm:$0xff]  }
   0x7   :  { %v944_v14 = vld [vmem:[%s1234_s1 + $0x18] sm:$0xff]   ;;  %v948_v18 = vld [vmem:[%s1234_s1 + $0x20] sm:$0xff]   ;;  %v952_v25 = vld [vmem:[%s1234_s1 + $0x28] sm:$0xff]  }
   0x8   :  { %843 = vmatpush3.bf16.msra.mxu0 %v936_v6  ;;  %v945_v15 = vld [vmem:[%s1234_s1 + $0x98] sm:$0xff]   ;;  %v949_v19 = vld [vmem:[%s1234_s1 + $0xa0] sm:$0xff]   ;;  %v953_v26 = vld [vmem:[%s1234_s1 + $0xa8] sm:$0xff]  }
   0x9   :  { %865 = vmatpush3.bf16.msra.mxu1 %v937_v7  ;;  %844 = vmatprep.subr.bf16.mxu0 %v938_v8  ;;  %v954_v27 = vld [vmem:[%s1234_s1 + $0x70] sm:$0xff]   ;;  %v958_v33 = vld [vmem:[%s1234_s1 + $0x78] sm:$0xff]   ;;  %v22_v38 = vld [vmem:[%s1235_s0] sm:$0xff] }
   0xa   :  { %866 = vmatprep.subr.bf16.mxu1 %v939_v9  ;;  %v955_v28 = vld [vmem:[%s1234_s1 + $0xf0] sm:$0xff]   ;;  %v959_v34 = vld [vmem:[%s1234_s1 + $0xf8] sm:$0xff]   ;;  %v152_v39 = vcombine.high %v22_v38, %v22_v38  ;;  %v159_v40 = vrot.slane %v22_v38, %v1107_v35  ;;  %v963_v41 = vld [vmem:[%s1234_s1 + $0x140] sm:$0xff]  }
   0xb   :  { %v956_v31 = vld [vmem:[%s1234_s1 + $0x30] sm:$0xff]   ;;  %v960_v36 = vld [vmem:[%s1234_s1 + $0x38] sm:$0xff]   ;;  %v964_v42 = vld [vmem:[%s1234_s1 + $0x1c0] sm:$0xff]  }
   0xc   :  { %845 = vmatpush3.bf16.msra.mxu0 %v940_v10  ;;  %v957_v32 = vld [vmem:[%s1234_s1 + $0xb0] sm:$0xff]   ;;  %v961_v37 = vld [vmem:[%s1234_s1 + $0xb8] sm:$0xff]   ;;  %v167_v43 = vcombine.high %v159_v40, %v159_v40  ;;  %v175_v44 = vrot.slane %v159_v40, %v1107_v35  ;;  %v1127_v45 = vrot.slane %v152_v39, %v1107_v35  ;;  %v965_v47 = vld [vmem:[%s1234_s1 + $0x100] sm:$0xff]  }
   0xd   :  { %867 = vmatpush3.bf16.msra.mxu1 %v941_v11  ;;  %846 = vmatprep.subr.bf16.mxu0 %v942_v12  ;;  %v967_v50 = vld [vmem:[%s1234_s1 + $0x148] sm:$0xff]   ;;  %v966_v52 = vld [vmem:[%s1234_s1 + $0x180] sm:$0xff]   ;;  %v971_v57 = vld [vmem:[%s1234_s1 + $0x150] sm:$0xff]  }
   0xe   :  { %868 = vmatprep.subr.bf16.mxu1 %v943_v13  ;;  %v189_v46 = vrot.slane %v167_v43, %v1107_v35  ;;  %v168_v48 = vcombine.high %v1127_v45, %v1127_v45  ;;  %v197_v49 = vcombine.high %v175_v44, %v175_v44  ;;  %v968_v54 = vld [vmem:[%s1234_s1 + $0x1c8] sm:$0xff]   ;;  %v972_v59 = vld [vmem:[%s1234_s1 + $0x1d0] sm:$0xff]   ;;  %v975_v61 = vld [vmem:[%s1234_s1 + $0x158] sm:$0xff]  }
   0xf   :  { %v969_v55 = vld [vmem:[%s1234_s1 + $0x108] sm:$0xff]   ;;  %v973_v60 = vld [vmem:[%s1234_s1 + $0x110] sm:$0xff]   ;;  %v976_v63 = vld [vmem:[%s1234_s1 + $0x1d8] sm:$0xff]  }
  0x10   :  { %847 = vmatpush3.bf16.msra.mxu0 %v944_v14  ;;  %625 = vmatprep.mubr.bf16.mxu0 %v189_v46  ;;  %v199_v51 = vcombine.high %v189_v46, %v189_v46  ;;  %v196_v53 = vrot.slane %v168_v48, %v1107_v35  ;;  %v970_v58 = vld [vmem:[%s1234_s1 + $0x188] sm:$0xff]   ;;  %v974_v62 = vld [vmem:[%s1234_s1 + $0x190] sm:$0xff]   ;;  %v977_v0 = vld [vmem:[%s1234_s1 + $0x118] sm:$0xff]  }
  0x11   :  { %869 = vmatpush3.bf16.msra.mxu1 %v945_v15  ;;  %848 = vmatprep.subr.bf16.mxu0 %v946_v16  ;;  %v979_v1 = vld [vmem:[%s1234_s1 + $0x160] sm:$0xff]   ;;  %v978_v2 = vld [vmem:[%s1234_s1 + $0x198] sm:$0xff]   ;;  %v983_v5 = vld [vmem:[%s1234_s1 + $0x168] sm:$0xff]  }
  0x12   :  { %870 = vmatprep.subr.bf16.mxu1 %v947_v17  ;;  %665 = vmatprep.mubr.bf16.mxu1 %v199_v51  ;;  %v200_v56 = vcombine.high %v196_v53, %v196_v53  ;;  %v980_v3 = vld [vmem:[%s1234_s1 + $0x1e0] sm:$0xff]   ;;  %v984_v7 = vld [vmem:[%s1234_s1 + $0x1e8] sm:$0xff]   ;;  %v987_v9 = vld [vmem:[%s1234_s1 + $0x170] sm:$0xff]   ;;  %v182_v17 = vrot.slane %v1127_v45, %v1107_v35 }
  0x13   :  { %v981_v4 = vld [vmem:[%s1234_s1 + $0x120] sm:$0xff]   ;;  %v985_v8 = vld [vmem:[%s1234_s1 + $0x128] sm:$0xff]   ;;  %v988_v11 = vld [vmem:[%s1234_s1 + $0x1f0] sm:$0xff]  }
  0x14   :  { %849 = vmatpush3.bf16.msra.mxu0 %v948_v18  ;;  %v982_v6 = vld [vmem:[%s1234_s1 + $0x1a0] sm:$0xff]   ;;  %v986_v10 = vld [vmem:[%s1234_s1 + $0x1a8] sm:$0xff]   ;;  %v989_v12 = vld [vmem:[%s1234_s1 + $0x130] sm:$0xff]  }
  0x15   :  { %871 = vmatpush3.bf16.msra.mxu1 %v949_v19  ;;  %850 = vmatprep.subr.bf16.mxu0 %v950_v20  ;;  %v991_v13 = vld [vmem:[%s1234_s1 + $0x178] sm:$0xff]   ;;  %v990_v14 = vld [vmem:[%s1234_s1 + $0x1b0] sm:$0xff]   ;;  %v198_v19 = vcombine.high %v182_v17, %v182_v17  ;;  %v996_v20 = vmov 0.0   ;;  %v839_v46 = vld [vmem:[%s1236_s2] ss:$0 sm:$0xff] }
  0x16   :  { %872 = vmatprep.subr.bf16.mxu1 %v951_v21  ;;  %v992_v15 = vld [vmem:[%s1234_s1 + $0x1f8] sm:$0xff]   ;;  %20 = vst.msk [vmem:[#allocation2] sm:$0x3] %vm19_vm0, %v996_v20 }
  0x17   :  { %v993_v16 = vld [vmem:[%s1234_s1 + $0x138] sm:$0xff]  }
  0x18   :  { %851 = vmatpush3.bf16.msra.mxu0 %v952_v25  ;;  %v994_v18 = vld [vmem:[%s1234_s1 + $0x1b8] sm:$0xff]  }
  0x19   :  { %873 = vmatpush3.bf16.msra.mxu1 %v953_v26  ;;  %852 = vmatprep.subr.bf16.mxu0 %v954_v27 }
  0x1a   :  { %874 = vmatprep.subr.bf16.mxu1 %v955_v28 }
  0x1c   :  { %853 = vmatpush3.bf16.msra.mxu0 %v956_v31 }
  0x1d   :  { %875 = vmatpush3.bf16.msra.mxu1 %v957_v32  ;;  %854 = vmatprep.subr.bf16.mxu0 %v958_v33 }
  0x1e   :  { %876 = vmatprep.subr.bf16.mxu1 %v959_v34 }
  0x20   :  { %855 = vmatpush3.bf16.msra.mxu0 %v960_v36 }
  0x21   :  { %877 = vmatpush3.bf16.msra.mxu1 %v961_v37  ;;  %884 = vmatprep.subr.bf16.mxu0 %v963_v41 }
  0x22   :  { %906 = vmatprep.subr.bf16.mxu1 %v964_v42  ;;  %v21_v42 = vld [vmem:[#allocation2] sm:$0x3] }
  0x23   :  { %626 = vmatmul.mubr.bf16.vlgmr.msra.gmra.mrb[0].mxu0 %v175_v44 }
  0x24   :  { %885 = vmatpush3.bf16.msra.mxu0 %v965_v47  ;;  %666 = vmatmul.mubr.bf16.vlgmr.msra.gmra.mrb[0].mxu1 %v197_v49 }
  0x25   :  { %886 = vmatprep.subr.bf16.mxu0 %v967_v50  ;;  %907 = vmatpush3.bf16.msra.mxu1 %v966_v52 }
  0x26   :  { %705 = vmatprep.mubr.bf16.mxu0 %v196_v53  ;;  %908 = vmatprep.subr.bf16.mxu1 %v968_v54 }
  0x27   :  { %745 = vmatprep.mubr.bf16.mxu1 %v200_v56 }
  0x28   :  { %887 = vmatpush3.bf16.msra.mxu0 %v969_v55 }
  0x29   :  { %888 = vmatprep.subr.bf16.mxu0 %v971_v57  ;;  %909 = vmatpush3.bf16.msra.mxu1 %v970_v58 }
  0x2a   :  { %910 = vmatprep.subr.bf16.mxu1 %v972_v59 }
  0x2c   :  { %889 = vmatpush3.bf16.msra.mxu0 %v973_v60 }
  0x2d   :  { %890 = vmatprep.subr.bf16.mxu0 %v975_v61  ;;  %911 = vmatpush3.bf16.msra.mxu1 %v974_v62 }
  0x2e   :  { %912 = vmatprep.subr.bf16.mxu1 %v976_v63 }
  0x30   :  { %891 = vmatpush3.bf16.msra.mxu0 %v977_v0 }
  0x31   :  { %892 = vmatprep.subr.bf16.mxu0 %v979_v1  ;;  %913 = vmatpush3.bf16.msra.mxu1 %v978_v2 }
  0x32   :  { %914 = vmatprep.subr.bf16.mxu1 %v980_v3 }
  0x34   :  { %893 = vmatpush3.bf16.msra.mxu0 %v981_v4 }
  0x35   :  { %894 = vmatprep.subr.bf16.mxu0 %v983_v5  ;;  %915 = vmatpush3.bf16.msra.mxu1 %v982_v6 }
  0x36   :  { %916 = vmatprep.subr.bf16.mxu1 %v984_v7 }
  0x38   :  { %895 = vmatpush3.bf16.msra.mxu0 %v985_v8 }
  0x39   :  { %896 = vmatprep.subr.bf16.mxu0 %v987_v9  ;;  %917 = vmatpush3.bf16.msra.mxu1 %v986_v10 }
  0x3a   :  { %918 = vmatprep.subr.bf16.mxu1 %v988_v11 }
  0x3c   :  { %897 = vmatpush3.bf16.msra.mxu0 %v989_v12 }
  0x3d   :  { %898 = vmatprep.subr.bf16.mxu0 %v991_v13  ;;  %919 = vmatpush3.bf16.msra.mxu1 %v990_v14 }
  0x3e   :  { %920 = vmatprep.subr.bf16.mxu1 %v992_v15 }
  0x40   :  { %899 = vmatpush3.bf16.msra.mxu0 %v993_v16 }
  0x41   :  { %921 = vmatpush3.bf16.msra.mxu1 %v994_v18 }
  0x43   :  { %706 = vmatmul.mubr.bf16.vlgmr.msra.gmra.mrb[4].mxu0 %v182_v17 }
  0x44   :  { %746 = vmatmul.mubr.bf16.vlgmr.msra.gmra.mrb[4].mxu1 %v198_v19 }
  0xf6   :  { %v856_v21 = vpop.f32.mrb[0].mxu0 }
  0xf7   :  { %v857_v22 = vpop.f32.mrb[1].mxu0  ;;  %v878_v23 = vpop.f32.mrb[0].mxu1 }
  0xf8   :  { %v858_v24 = vadd.f32 %v857_v22, %v856_v21  ;;  %v859_v25 = vpop.f32.mrb[2].mxu0  ;;  %v879_v26 = vpop.f32.mrb[1].mxu1 }
  0xf9   :  { %v860_v27 = vpop.f32.mrb[3].mxu0  ;;  %v880_v28 = vadd.f32 %v879_v26, %v878_v23  ;;  %v881_v29 = vpop.f32.mrb[2].mxu1 }
  0xfa   :  { %v882_v30 = vpop.f32.mrb[3].mxu1 }
  0xfb   :  { %v668_v31 = vadd.f32 %v880_v28, %v858_v24 }
 0x116   :  { %v900_v32 = vpop.f32.mrb[4].mxu0 }
 0x117   :  { %v901_v33 = vpop.f32.mrb[5].mxu0  ;;  %v922_v34 = vpop.f32.mrb[4].mxu1 }
 0x118   :  { %v902_v35 = vadd.f32 %v901_v33, %v900_v32  ;;  %v903_v36 = vpop.f32.mrb[6].mxu0  ;;  %v923_v37 = vpop.f32.mrb[5].mxu1 }
 0x119   :  { %v904_v38 = vpop.f32.mrb[7].mxu0  ;;  %v924_v40 = vadd.f32 %v923_v37, %v922_v34  ;;  %v925_v41 = vpop.f32.mrb[6].mxu1 }
 0x11a   :  { %v708_v39 = vadd.f32 %v902_v35, %v668_v31  ;;  %v926_v43 = vpop.f32.mrb[7].mxu1 }
 0x11c   :  { %v748_v44 = vadd.f32 %v924_v40, %v708_v39 }
 0x11e   :  { %v753_v45 = vadd.f32 %v748_v44, %v21_v42 }
 0x120   :  { %755 = vst.msk [vmem:[#allocation2] sm:$0x3] %vm19_vm0, %v753_v45 }
 0x127   :  { %v759_v47 = vld [vmem:[#allocation2] sm:$0x3] }
 0x128   :  { %v767_v48 = vadd.f32 %v839_v46, %v759_v47 }
 0x12a   :  { %v768_v49 = vmul.f32 0.2, %v767_v48 }
 0x12c   :  { %v769_v50 = vmax.f32 %v767_v48, %v768_v49 }
 0x12e   :  { %770 = vst.msk [vmem:[%s1237_s3] sm:$0x3] %vm19_vm0, %v769_v50 }

// kernel: multi_image_field_mlp_forward.27
= control target key start
LH: loop header
LB: loop body
LE: loop exit
PB: predicated region body
PF: predicated region fallthrough
CT: control target
= control target key end

     0   :  { %s2189_s12 = smov 0   ;;  %s2191_s13 = smov 0   ;;  %s2806_s0 = inlined_call_operand.vmem [shape: bf16[2048,9], index: 0, kind: input, shape index: {}]   ;;  %s2807_s1 = inlined_call_operand.vmem [shape: bf16[9,16], index: 1, kind: input, shape index: {}]   ;;  %s2808_s2 = inlined_call_operand.vmem [shape: f32[1,16], index: 2, kind: input, shape index: {}]   ;;  %s2809_s3 = inlined_call_operand.vmem [shape: bf16[2048,16], index: 3, kind: output, shape index: {}]  }
   0x1   :  { %s2193_s14 = smov 0  }
   0x2 LB: > { %s25_s15 = sadd.s32 1, %s2161_s13  ;;  %p1781_p0 = scmp.ge.s32.totalorder %s2165_s14, 1  ;;  %s2165_s14 = sphi %s2193_s14, %s13_s14   ;;  %s2161_s13 = sphi %s2191_s13, %s2812_s13   ;;  %s2157_s12 = sphi %s2189_s12, %s2811_s12  }
   0x3   : > { %p27_p1 = scmp.ge.s32.totalorder %s25_s15, 4  ;;  %p166_p2 = scmp.lt.s32.totalorder %s2165_s14, 5 }
   0x5   : > { %s2814_s15 = smov (%p27_p1, %s25_s15), 0  ;;  %p167_p3 = pnand %p1781_p0, %p166_p2 }
   0x6   : > { %v2212_v0 = vld [vmem:[%s2807_s1] sm:$0x1f] (!%p167_p3)   ;;  %vm681_vm0 = vcmask (!%p167_p3), 1043456   ;;  %vm682_vm1 = vcmask (!%p167_p3), 1044480   ;;  %s1782_s18 = sshll.u32 (!%p167_p3), %s2157_s12, 6  ;;  %v2167_v1 = vmov (!%p167_p3), 65535  }
   0x7   : > { %170 = sbr.rel (%p167_p3) target bundleno = 338 (0x152), region = 32  ;;  %v683_v2 = vsel (!%p167_p3), %vm681_vm0, 4294967295, %v2167_v1  ;;  %p2217_p4 = scmp.lt.s32.totalorder (!%p167_p3), %s1782_s18, 255  ;;  %vm224_vm2 = vcmask (!%p167_p3), 130048   ;;  %v2168_v4 = vmov (!%p167_p3), 0.0   ;;  %vm584_vm3 = vcmask (!%p167_p3), 72704  }
   0x8   : > { %v2221_v3 = vsel (!%p167_p3), %vm682_vm1, %v683_v2, 0  ;;  %227 = vst.msk [vmem:[#allocation2 + $0x10] sm:$0xff] (!%p167_p3), %vm224_vm2, %v2168_v4  ;;  %225 = vst.msk [vmem:[#allocation2] sm:$0xff] (!%p167_p3), %vm224_vm2, %v2168_v4  ;;  %v2442_v1 = vld [vmem:[%s2808_s2] ss:$0 sm:$0xff] (!%p167_p3)  ;;  %vm1628_vm4 = vcmask (!%p167_p3), 125952  }
   0x9   : > { %226 = vst.msk [vmem:[#allocation2 + $0x8] sm:$0xff] (!%p167_p3), %vm224_vm2, %v2168_v4  ;;  %228 = vst.msk [vmem:[#allocation2 + $0x18] sm:$0xff] (!%p167_p3), %vm224_vm2, %v2168_v4  ;;  %v686_v5 = vand.u32 (!%p167_p3), %v2212_v0, %v2221_v3 }
   0xa   : > { %229 = vst.msk [vmem:[#allocation2 + $0x20] sm:$0xff] (!%p167_p3), %vm224_vm2, %v2168_v4  ;;  %230 = vst.msk [vmem:[#allocation2 + $0x28] sm:$0xff] (!%p167_p3), %vm224_vm2, %v2168_v4 }
   0xb   : > { %231 = vst.msk [vmem:[#allocation2 + $0x30] sm:$0xff] (!%p167_p3), %vm224_vm2, %v2168_v4  ;;  %232 = vst.msk [vmem:[#allocation2 + $0x38] sm:$0xff] (!%p167_p3), %vm224_vm2, %v2168_v4  ;;  %2015 = vmatprep.subr.bf16.mxu0 (!%p167_p3), %v686_v5  ;;  %2081 = vmatprep.subr.bf16.mxu1 (!%p167_p3), %v686_v5 }
   0xc   : > { %233 = vst.msk [vmem:[#allocation2 + $0x40] sm:$0xff] (!%p167_p3), %vm224_vm2, %v2168_v4  ;;  %234 = vst.msk [vmem:[#allocation2 + $0x48] sm:$0xff] (!%p167_p3), %vm224_vm2, %v2168_v4  ;;  %2016 = vmatpush3.bf16.msra.mxu0 (!%p167_p3), %v686_v5  ;;  %2082 = vmatpush3.bf16.msra.mxu1 (!%p167_p3), %v686_v5 }
   0xd   : > { %235 = vst.msk [vmem:[#allocation2 + $0x50] sm:$0xff] (!%p167_p3), %vm224_vm2, %v2168_v4  ;;  %236 = vst.msk [vmem:[#allocation2 + $0x58] sm:$0xff] (!%p167_p3), %vm224_vm2, %v2168_v4 }
   0xe   : > { %237 = vst.msk [vmem:[#allocation2 + $0x60] sm:$0xff] %vm224_vm2, %v2168_v4  ;;  %238 = vst.msk [vmem:[#allocation2 + $0x68] sm:$0xff] %vm224_vm2, %v2168_v4  ;;  %s2816_s18 = smov (!%p2217_p4, %s1782_s18), 255 }
   0xf   : > { %239 = vst.msk [vmem:[#allocation2 + $0x70] sm:$0xff] %vm224_vm2, %v2168_v4  ;;  %240 = vst.msk [vmem:[#allocation2 + $0x78] sm:$0xff] %vm224_vm2, %v2168_v4  ;;  %s1783_s20 = sshll.u32 %s2816_s18, 2  ;;  %v291_v38 = vld [vmem:[#allocation2 + $0x10] sm:$0xff]  ;;  %v289_v40 = vld [vmem:[#allocation2] sm:$0xff] }
  0x10   : > { %241 = vst.msk [vmem:[#allocation2 + $0x80] sm:$0xff] %vm224_vm2, %v2168_v4  ;;  %242 = vst.msk [vmem:[#allocation2 + $0x88] sm:$0xff] %vm224_vm2, %v2168_v4  ;;  %s2365_s23 = scalar_lea.vmem %s2806_s0, %s1783_s20  ;;  %v292_v43 = vld [vmem:[#allocation2 + $0x18] sm:$0xff]  ;;  %v290_v48 = vld [vmem:[#allocation2 + $0x8] sm:$0xff]  ;;  %s2465_s28 = scalar_lea.vmem %s2809_s3, %s1783_s20 }
  0x11   : > { %243 = vst.msk [vmem:[#allocation2 + $0x90] sm:$0xff] %vm224_vm2, %v2168_v4  ;;  %244 = vst.msk [vmem:[#allocation2 + $0x98] sm:$0xff] %vm224_vm2, %v2168_v4  ;;  %v2110_v6 = vld [vmem:[%s2365_s23] sm:$0xff]   ;;  %v2112_v8 = vld [vmem:[%s2365_s23 + $0x8] sm:$0xff]  }
  0x12   : > { %245 = vst.msk [vmem:[#allocation2 + $0xa0] sm:$0xff] %vm224_vm2, %v2168_v4  ;;  %246 = vst.msk [vmem:[#allocation2 + $0xa8] sm:$0xff] %vm224_vm2, %v2168_v4  ;;  %v2111_v7 = vld [vmem:[%s2365_s23 + $0x80] sm:$0xff]   ;;  %2017 = vmatprep.mubr.msk.bf16.mxu0 %vm584_vm3, %v2110_v6  ;;  %v2113_v9 = vld [vmem:[%s2365_s23 + $0x88] sm:$0xff]  }
  0x13   : > { %247 = vst.msk [vmem:[#allocation2 + $0xb0] sm:$0xff] %vm224_vm2, %v2168_v4  ;;  %248 = vst.msk [vmem:[#allocation2 + $0xb8] sm:$0xff] %vm224_vm2, %v2168_v4  ;;  %2049 = vmatprep.mubr.msk.bf16.mxu1 %vm584_vm3, %v2111_v7  ;;  %2018 = vmatmul.mubr.msk.bf16.vlgmr.msra.gmra.mrb[0].mxu0 %vm584_vm3, %v2112_v8  ;;  %v2114_v10 = vld [vmem:[%s2365_s23 + $0x10] sm:$0xff]   ;;  %v2116_v12 = vld [vmem:[%s2365_s23 + $0x18] sm:$0xff]  }
  0x14   : > { %249 = vst.msk [vmem:[#allocation2 + $0xc0] sm:$0xff] %vm224_vm2, %v2168_v4  ;;  %250 = vst.msk [vmem:[#allocation2 + $0xc8] sm:$0xff] %vm224_vm2, %v2168_v4  ;;  %2050 = vmatmul.mubr.msk.bf16.vlgmr.msra.gmra.mrb[0].mxu1 %vm584_vm3, %v2113_v9  ;;  %v2115_v11 = vld [vmem:[%s2365_s23 + $0x90] sm:$0xff]   ;;  %2021 = vmatprep.mubr.msk.bf16.mxu0 %vm584_vm3, %v2114_v10  ;;  %v2117_v13 = vld [vmem:[%s2365_s23 + $0x98] sm:$0xff]  }
  0x15   : > { %251 = vst.msk [vmem:[#allocation2 + $0xd0] sm:$0xff] %vm224_vm2, %v2168_v4  ;;  %252 = vst.msk [vmem:[#allocation2 + $0xd8] sm:$0xff] %vm224_vm2, %v2168_v4  ;;  %2053 = vmatprep.mubr.msk.bf16.mxu1 %vm584_vm3, %v2115_v11  ;;  %v2118_v14 = vld [vmem:[%s2365_s23 + $0x20] sm:$0xff]   ;;  %v2120_v16 = vld [vmem:[%s2365_s23 + $0x28] sm:$0xff]  }
  0x16   : > { %253 = vst.msk [vmem:[#allocation2 + $0xe0] sm:$0xff] %vm224_vm2, %v2168_v4  ;;  %254 = vst.msk [vmem:[#allocation2 + $0xe8] sm:$0xff] %vm224_vm2, %v2168_v4  ;;  %v2119_v15 = vld [vmem:[%s2365_s23 + $0xa0] sm:$0xff]   ;;  %v2121_v17 = vld [vmem:[%s2365_s23 + $0xa8] sm:$0xff]  }
  0x17   : > { %255 = vst.msk [vmem:[#allocation2 + $0xf0] sm:$0xff] %vm224_vm2, %v2168_v4  ;;  %256 = vst.msk [vmem:[#allocation2 + $0xf8] sm:$0xff] %vm224_vm2, %v2168_v4  ;;  %v2122_v18 = vld [vmem:[%s2365_s23 + $0x30] sm:$0xff]   ;;  %v2124_v20 = vld [vmem:[%s2365_s23 + $0x38] sm:$0xff]  }
  0x18   : > { %257 = vst.msk [vmem:[#allocation2 + $0x100] sm:$0xff] %vm224_vm2, %v2168_v4  ;;  %258 = vst.msk [vmem:[#allocation2 + $0x108] sm:$0xff] %vm224_vm2, %v2168_v4  ;;  %v2123_v19 = vld [vmem:[%s2365_s23 + $0xb0] sm:$0xff]   ;;  %v2125_v21 = vld [vmem:[%s2365_s23 + $0xb8] sm:$0xff]  }
  0x19   : > { %259 = vst.msk [vmem:[#allocation2 + $0x110] sm:$0xff] %vm224_vm2, %v2168_v4  ;;  %260 = vst.msk [vmem:[#allocation2 + $0x118] sm:$0xff] %vm224_vm2, %v2168_v4  ;;  %v2126_v22 = vld [vmem:[%s2365_s23 + $0x40] sm:$0xff]   ;;  %v2128_v24 = vld [vmem:[%s2365_s23 + $0x48] sm:$0xff]  }
  0x1a   : > { %261 = vst.msk [vmem:[#allocation2 + $0x120] sm:$0xff] %vm224_vm2, %v2168_v4  ;;  %262 = vst.msk [vmem:[#allocation2 + $0x128] sm:$0xff] %vm224_vm2, %v2168_v4  ;;  %v2127_v23 = vld [vmem:[%s2365_s23 + $0xc0] sm:$0xff]   ;;  %v2129_v25 = vld [vmem:[%s2365_s23 + $0xc8] sm:$0xff]  }
  0x1b   : > { %263 = vst.msk [vmem:[#allocation2 + $0x130] sm:$0xff] %vm224_vm2, %v2168_v4  ;;  %264 = vst.msk [vmem:[#allocation2 + $0x138] sm:$0xff] %vm224_vm2, %v2168_v4  ;;  %2022 = vmatmul.mubr.msk.bf16.gmra.mrb[4].mxu0 %vm584_vm3, %v2116_v12  ;;  %v2130_v26 = vld [vmem:[%s2365_s23 + $0x50] sm:$0xff]   ;;  %v2132_v28 = vld [vmem:[%s2365_s23 + $0x58] sm:$0xff]  }
  0x1c   : > { %265 = vst.msk [vmem:[#allocation2 + $0x140] sm:$0xff] %vm224_vm2, %v2168_v4  ;;  %266 = vst.msk [vmem:[#allocation2 + $0x148] sm:$0xff] %vm224_vm2, %v2168_v4  ;;  %2054 = vmatmul.mubr.msk.bf16.gmra.mrb[4].mxu1 %vm584_vm3, %v2117_v13  ;;  %2025 = vmatprep.mubr.msk.bf16.mxu0 %vm584_vm3, %v2118_v14  ;;  %v2131_v27 = vld [vmem:[%s2365_s23 + $0xd0] sm:$0xff]   ;;  %v2133_v29 = vld [vmem:[%s2365_s23 + $0xd8] sm:$0xff]  }
  0x1d   : > { %267 = vst.msk [vmem:[#allocation2 + $0x150] sm:$0xff] %vm224_vm2, %v2168_v4  ;;  %268 = vst.msk [vmem:[#allocation2 + $0x158] sm:$0xff] %vm224_vm2, %v2168_v4  ;;  %2057 = vmatprep.mubr.msk.bf16.mxu1 %vm584_vm3, %v2119_v15  ;;  %v2134_v30 = vld [vmem:[%s2365_s23 + $0x60] sm:$0xff]   ;;  %v2136_v32 = vld [vmem:[%s2365_s23 + $0x68] sm:$0xff]  }
  0x1e   : > { %269 = vst.msk [vmem:[#allocation2 + $0x160] sm:$0xff] %vm224_vm2, %v2168_v4  ;;  %270 = vst.msk [vmem:[#allocation2 + $0x168] sm:$0xff] %vm224_vm2, %v2168_v4  ;;  %v2135_v31 = vld [vmem:[%s2365_s23 + $0xe0] sm:$0xff]   ;;  %v2137_v33 = vld [vmem:[%s2365_s23 + $0xe8] sm:$0xff]  }
  0x1f   : > { %271 = vst.msk [vmem:[#allocation2 + $0x170] sm:$0xff] %vm224_vm2, %v2168_v4  ;;  %272 = vst.msk [vmem:[#allocation2 + $0x178] sm:$0xff] %vm224_vm2, %v2168_v4  ;;  %v2138_v34 = vld [vmem:[%s2365_s23 + $0x70] sm:$0xff]   ;;  %v2140_v36 = vld [vmem:[%s2365_s23 + $0x78] sm:$0xff]  }
  0x20   : > { %273 = vst.msk [vmem:[#allocation2 + $0x180] sm:$0xff] %vm224_vm2, %v2168_v4  ;;  %274 = vst.msk [vmem:[#allocation2 + $0x188] sm:$0xff] %vm224_vm2, %v2168_v4  ;;  %v2139_v35 = vld [vmem:[%s2365_s23 + $0xf0] sm:$0xff]   ;;  %v2141_v37 = vld [vmem:[%s2365_s23 + $0xf8] sm:$0xff]  }
  0x21   : > { %275 = vst.msk [vmem:[#allocation2 + $0x190] sm:$0xff] %vm224_vm2, %v2168_v4  ;;  %276 = vst.msk [vmem:[#allocation2 + $0x198] sm:$0xff] %vm224_vm2, %v2168_v4  ;;  %v323_v39 = vld [vmem:[#allocation2 + $0x110] sm:$0xff]  ;;  %v321_v42 = vld [vmem:[#allocation2 + $0x100] sm:$0xff] }
  0x22   : > { %277 = vst.msk [vmem:[#allocation2 + $0x1a0] sm:$0xff] %vm224_vm2, %v2168_v4  ;;  %278 = vst.msk [vmem:[#allocation2 + $0x1a8] sm:$0xff] %vm224_vm2, %v2168_v4  ;;  %v324_v47 = vld [vmem:[#allocation2 + $0x118] sm:$0xff]  ;;  %v322_v53 = vld [vmem:[#allocation2 + $0x108] sm:$0xff] }
  0x23   : > { %279 = vst.msk [vmem:[#allocation2 + $0x1b0] sm:$0xff] %vm224_vm2, %v2168_v4  ;;  %280 = vst.msk [vmem:[#allocation2 + $0x1b8] sm:$0xff] %vm224_vm2, %v2168_v4  ;;  %2026 = vmatmul.mubr.msk.bf16.gmra.mrb[8].mxu0 %vm584_vm3, %v2120_v16  ;;  %v295_v62 = vld [vmem:[#allocation2 + $0x30] sm:$0xff]  ;;  %v293_v0 = vld [vmem:[#allocation2 + $0x20] sm:$0xff] }
  0x24   : > { %281 = vst.msk [vmem:[#allocation2 + $0x1c0] sm:$0xff] %vm224_vm2, %v2168_v4  ;;  %282 = vst.msk [vmem:[#allocation2 + $0x1c8] sm:$0xff] %vm224_vm2, %v2168_v4  ;;  %2058 = vmatmul.mubr.msk.bf16.gmra.mrb[8].mxu1 %vm584_vm3, %v2121_v17  ;;  %2029 = vmatprep.mubr.msk.bf16.mxu0 %vm584_vm3, %v2122_v18  ;;  %v327_v63 = vld [vmem:[#allocation2 + $0x130] sm:$0xff]  ;;  %v325_v3 = vld [vmem:[#allocation2 + $0x120] sm:$0xff] }
  0x25   : > { %283 = vst.msk [vmem:[#allocation2 + $0x1d0] sm:$0xff] %vm224_vm2, %v2168_v4  ;;  %284 = vst.msk [vmem:[#allocation2 + $0x1d8] sm:$0xff] %vm224_vm2, %v2168_v4  ;;  %2061 = vmatprep.mubr.msk.bf16.mxu1 %vm584_vm3, %v2123_v19  ;;  %v328_v8 = vld [vmem:[#allocation2 + $0x138] sm:$0xff]  ;;  %v294_v9 = vld [vmem:[#allocation2 + $0x28] sm:$0xff] }
  0x26   : > { %285 = vst.msk [vmem:[#allocation2 + $0x1e0] sm:$0xff] %vm224_vm2, %v2168_v4  ;;  %286 = vst.msk [vmem:[#allocation2 + $0x1e8] sm:$0xff] %vm224_vm2, %v2168_v4  ;;  %v326_v15 = vld [vmem:[#allocation2 + $0x128] sm:$0xff] }
  0x27   : > { %287 = vst.msk [vmem:[#allocation2 + $0x1f0] sm:$0xff] %vm224_vm2, %v2168_v4  ;;  %288 = vst.msk [vmem:[#allocation2 + $0x1f8] sm:$0xff] %vm224_vm2, %v2168_v4  ;;  %v296_v4 = vld [vmem:[#allocation2 + $0x38] sm:$0xff] }
  0x2b   : > { %2030 = vmatmul.mubr.msk.bf16.gmra.mrb[12].mxu0 %vm584_vm3, %v2124_v20 }
  0x2c   : > { %2062 = vmatmul.mubr.msk.bf16.gmra.mrb[12].mxu1 %vm584_vm3, %v2125_v21  ;;  %2033 = vmatprep.mubr.msk.bf16.mxu0 %vm584_vm3, %v2126_v22 }
  0x2d   : > { %2065 = vmatprep.mubr.msk.bf16.mxu1 %vm584_vm3, %v2127_v23 }
  0x33   : > { %2034 = vmatmul.mubr.msk.bf16.gmra.mrb[16].mxu0 %vm584_vm3, %v2128_v24 }
  0x34   : > { %2066 = vmatmul.mubr.msk.bf16.gmra.mrb[16].mxu1 %vm584_vm3, %v2129_v25  ;;  %2037 = vmatprep.mubr.msk.bf16.mxu0 %vm584_vm3, %v2130_v26 }
  0x35   : > { %2069 = vmatprep.mubr.msk.bf16.mxu1 %vm584_vm3, %v2131_v27 }
  0x3b   : > { %2038 = vmatmul.mubr.msk.bf16.gmra.mrb[20].mxu0 %vm584_vm3, %v2132_v28 }
  0x3c   : > { %2070 = vmatmul.mubr.msk.bf16.gmra.mrb[20].mxu1 %vm584_vm3, %v2133_v29  ;;  %2041 = vmatprep.mubr.msk.bf16.mxu0 %vm584_vm3, %v2134_v30 }
  0x3d   : > { %2073 = vmatprep.mubr.msk.bf16.mxu1 %vm584_vm3, %v2135_v31 }
  0x43   : > { %2042 = vmatmul.mubr.msk.bf16.gmra.mrb[24].mxu0 %vm584_vm3, %v2136_v32 }
  0x44   : > { %2074 = vmatmul.mubr.msk.bf16.gmra.mrb[24].mxu1 %vm584_vm3, %v2137_v33  ;;  %2045 = vmatprep.mubr.msk.bf16.mxu0 %vm584_vm3, %v2138_v34 }
  0x45   : > { %2077 = vmatprep.mubr.msk.bf16.mxu1 %vm584_vm3, %v2139_v35 }
  0x4b   : > { %2046 = vmatmul.mubr.msk.bf16.gmra.mrb[28].mxu0 %vm584_vm3, %v2140_v36 }
  0x4c   : > { %2078 = vmatmul.mubr.msk.bf16.gmra.mrb[28].mxu1 %vm584_vm3, %v2141_v37 }
  0xe6   : > { %v2019_v41 = vpop.f32.mrb[0].mxu0 }
  0xe7   : > { %v979_v44 = vadd.f32 %v2019_v41, %v291_v38  ;;  %v2051_v45 = vpop.f32.mrb[0].mxu1  ;;  %v722_v46 = vpop.f32.mrb[1].mxu0 }
  0xe8   : > { %v1011_v49 = vadd.f32 %v2051_v45, %v323_v39  ;;  %v977_v50 = vadd.f32 %v722_v46, %v289_v40  ;;  %v850_v51 = vpop.f32.mrb[1].mxu1  ;;  %v2020_v52 = vpop.f32.mrb[2].mxu0 }
  0xe9   : > { %1044 = vst.msk [vmem:[#allocation2 + $0x10] sm:$0xff] %vm224_vm2, %v979_v44  ;;  %v1009_v54 = vadd.f32 %v850_v51, %v321_v42  ;;  %v980_v55 = vadd.f32 %v2020_v52, %v292_v43  ;;  %v2052_v56 = vpop.f32.mrb[2].mxu1  ;;  %v725_v57 = vpop.f32.mrb[3].mxu0 }
  0xea   : > { %1076 = vst.msk [vmem:[#allocation2 + $0x110] sm:$0xff] %vm224_vm2, %v1011_v49  ;;  %1042 = vst.msk [vmem:[#allocation2] sm:$0xff] %vm224_vm2, %v977_v50  ;;  %v1012_v58 = vadd.f32 %v2052_v56, %v324_v47  ;;  %v978_v59 = vadd.f32 %v725_v57, %v290_v48  ;;  %v853_v60 = vpop.f32.mrb[3].mxu1 }
  0xeb   : > { %1074 = vst.msk [vmem:[#allocation2 + $0x100] sm:$0xff] %vm224_vm2, %v1009_v54  ;;  %1045 = vst.msk [vmem:[#allocation2 + $0x18] sm:$0xff] %vm224_vm2, %v980_v55  ;;  %v1010_v61 = vadd.f32 %v853_v60, %v322_v53 }
  0xec   : > { %1077 = vst.msk [vmem:[#allocation2 + $0x118] sm:$0xff] %vm224_vm2, %v1012_v58  ;;  %1043 = vst.msk [vmem:[#allocation2 + $0x8] sm:$0xff] %vm224_vm2, %v978_v59 }
  0xed   : > { %1075 = vst.msk [vmem:[#allocation2 + $0x108] sm:$0xff] %vm224_vm2, %v1010_v61 }
  0xee   : > { %v2023_v2 = vpop.f32.mrb[4].mxu0 }
  0xef   : > { %v983_v5 = vadd.f32 %v2023_v2, %v295_v62  ;;  %v2055_v6 = vpop.f32.mrb[4].mxu1  ;;  %v738_v7 = vpop.f32.mrb[5].mxu0 }
  0xf0   : > { %v1111_v10 = vld [vmem:[#allocation2 + $0x10] sm:$0xff]  ;;  %v1015_v11 = vadd.f32 %v2055_v6, %v327_v63  ;;  %v981_v12 = vadd.f32 %v738_v7, %v293_v0  ;;  %v866_v13 = vpop.f32.mrb[5].mxu1  ;;  %v2024_v14 = vpop.f32.mrb[6].mxu0 }
  0xf1   : > { %v1182_v16 = vadd.f32 %v2442_v1, %v1111_v10  ;;  %v1143_v17 = vld [vmem:[#allocation2 + $0x110] sm:$0xff]  ;;  %v1109_v18 = vld [vmem:[#allocation2] sm:$0xff]  ;;  %1048 = vst.msk [vmem:[#allocation2 + $0x30] sm:$0xff] %vm224_vm2, %v983_v5  ;;  %v1013_v19 = vadd.f32 %v866_v13, %v325_v3  ;;  %v984_v20 = vadd.f32 %v2024_v14, %v296_v4  ;;  %v2056_v21 = vpop.f32.mrb[6].mxu1  ;;  %v741_v22 = vpop.f32.mrb[7].mxu0 }
  0xf2   : > { %v1214_v23 = vadd.f32 %v2442_v1, %v1143_v17  ;;  %v1180_v24 = vadd.f32 %v2442_v1, %v1109_v18  ;;  %v1141_v25 = vld [vmem:[#allocation2 + $0x100] sm:$0xff]  ;;  %v1112_v26 = vld [vmem:[#allocation2 + $0x18] sm:$0xff]  ;;  %1080 = vst.msk [vmem:[#allocation2 + $0x130] sm:$0xff] %vm224_vm2, %v1015_v11  ;;  %1046 = vst.msk [vmem:[#allocation2 + $0x20] sm:$0xff] %vm224_vm2, %v981_v12  ;;  %v1016_v27 = vadd.f32 %v2056_v21, %v328_v8  ;;  %v869_v29 = vpop.f32.mrb[7].mxu1 }
  0xf3   : > { %v982_v28 = vadd.f32 %v741_v22, %v294_v9  ;;  %v1246_v30 = vmul.f32 0.2, %v1182_v16  ;;  %v1212_v31 = vadd.f32 %v2442_v1, %v1141_v25  ;;  %v1183_v32 = vadd.f32 %v2442_v1, %v1112_v26  ;;  %v1144_v33 = vld [vmem:[#allocation2 + $0x118] sm:$0xff]  ;;  %v1110_v34 = vld [vmem:[#allocation2 + $0x8] sm:$0xff]  ;;  %1078 = vst.msk [vmem:[#allocation2 + $0x120] sm:$0xff] %vm224_vm2, %v1013_v19  ;;  %1049 = vst.msk [vmem:[#allocation2 + $0x38] sm:$0xff] %vm224_vm2, %v984_v20 }
  0xf4   : > { %v1014_v35 = vadd.f32 %v869_v29, %v326_v15  ;;  %v1278_v36 = vmul.f32 0.2, %v1214_v23  ;;  %v1244_v37 = vmul.f32 0.2, %v1180_v24  ;;  %v1215_v38 = vadd.f32 %v2442_v1, %v1144_v33  ;;  %v1142_v40 = vld [vmem:[#allocation2 + $0x108] sm:$0xff]  ;;  %1081 = vst.msk [vmem:[#allocation2 + $0x138] sm:$0xff] %vm224_vm2, %v1016_v27 }
  0xf5   : > { %v1181_v39 = vadd.f32 %v2442_v1, %v1110_v34  ;;  %1047 = vst.msk [vmem:[#allocation2 + $0x28] sm:$0xff] %vm224_vm2, %v982_v28  ;;  %v1310_v41 = vmax.f32 %v1182_v16, %v1246_v30  ;;  %v1276_v42 = vmul.f32 0.2, %v1212_v31  ;;  %v1247_v43 = vmul.f32 0.2, %v1183_v32  ;;  %v299_v30 = vld [vmem:[#allocation2 + $0x50] sm:$0xff] }
  0xf6   : > { %v1213_v44 = vadd.f32 %v2442_v1, %v1142_v40  ;;  %1079 = vst.msk [vmem:[#allocation2 + $0x128] sm:$0xff] %vm224_vm2, %v1014_v35  ;;  %v1342_v45 = vmax.f32 %v1214_v23, %v1278_v36  ;;  %v1308_v46 = vmax.f32 %v1180_v24, %v1244_v37  ;;  %v1279_v47 = vmul.f32 0.2, %v1215_v38  ;;  %v2467_v49 = vpop.f32.mrb[8].mxu0  ;;  %v297_v36 = vld [vmem:[#allocation2 + $0x40] sm:$0xff] }
  0xf7   : > { %v1245_v48 = vmul.f32 0.2, %v1181_v39  ;;  %v1920_v50 = vpack.c.bf16 %v1310_v41, %v1310_v41  ;;  %v1340_v51 = vmax.f32 %v1212_v31, %v1276_v42  ;;  %v1311_v52 = vmax.f32 %v1183_v32, %v1247_v43  ;;  %v2469_v54 = vpop.f32.mrb[8].mxu1  ;;  %v2471_v55 = vpop.f32.mrb[9].mxu0  ;;  %v331_v31 = vld [vmem:[#allocation2 + $0x150] sm:$0xff]  ;;  %v329_v42 = vld [vmem:[#allocation2 + $0x140] sm:$0xff] }
  0xf8   : > { %v1277_v53 = vmul.f32 0.2, %v1213_v44  ;;  %v1952_v56 = vpack.c.bf16 %v1342_v45, %v1342_v45  ;;  %v1918_v57 = vpack.c.bf16 %v1308_v46, %v1308_v46  ;;  %v1343_v58 = vmax.f32 %v1215_v38, %v1279_v47  ;;  %v1115_v60 = vld [vmem:[#allocation2 + $0x30] sm:$0xff]  ;;  %v2473_v61 = vpop.f32.mrb[9].mxu1  ;;  %v2475_v62 = vpop.f32.mrb[10].mxu0  ;;  %v300_v43 = vld [vmem:[#allocation2 + $0x58] sm:$0xff] }
  0xf9   : > { %v1309_v59 = vmax.f32 %v1181_v39, %v1245_v48  ;;  %1631 = vst.msk [vmem:[%s2465_s28 + $0x8] sm:$0xf] %vm1628_vm4, %v1920_v50  ;;  %v1950_v63 = vpack.c.bf16 %v1340_v51, %v1340_v51  ;;  %v1921_v0 = vpack.c.bf16 %v1311_v52, %v1311_v52  ;;  %v1186_v3 = vadd.f32 %v2442_v1, %v1115_v60  ;;  %v1147_v4 = vld [vmem:[#allocation2 + $0x130] sm:$0xff]  ;;  %v1113_v5 = vld [vmem:[#allocation2 + $0x20] sm:$0xff]  ;;  %v2480_v6 = vpop.f32.mrb[10].mxu1  ;;  %v2482_v7 = vpop.f32.mrb[11].mxu0 }
  0xfa   : > { %v1341_v2 = vmax.f32 %v1213_v44, %v1277_v53  ;;  %1663 = vst.msk [vmem:[%s2465_s28 + $0x88] sm:$0xf] %vm1628_vm4, %v1952_v56  ;;  %1629 = vst.msk [vmem:[%s2465_s28] sm:$0xf] %vm1628_vm4, %v1918_v57  ;;  %v1953_v8 = vpack.c.bf16 %v1343_v58, %v1343_v58  ;;  %v1218_v10 = vadd.f32 %v2442_v1, %v1147_v4  ;;  %v1145_v12 = vld [vmem:[#allocation2 + $0x120] sm:$0xff]  ;;  %v1116_v13 = vld [vmem:[#allocation2 + $0x38] sm:$0xff] }
  0xfb   : > { %v1919_v9 = vpack.c.bf16 %v1309_v59, %v1309_v59  ;;  %v1184_v11 = vadd.f32 %v2442_v1, %v1113_v5  ;;  %v2490_v14 = vpop.f32.mrb[11].mxu1  ;;  %1661 = vst.msk [vmem:[%s2465_s28 + $0x80] sm:$0xf] %vm1628_vm4, %v1950_v63  ;;  %1632 = vst.msk [vmem:[%s2465_s28 + $0xc] sm:$0xf] %vm1628_vm4, %v1921_v0  ;;  %v1216_v17 = vadd.f32 %v2442_v1, %v1145_v12  ;;  %v1148_v19 = vld [vmem:[#allocation2 + $0x138] sm:$0xff] }
  0xfc   : > { %v1951_v15 = vpack.c.bf16 %v1341_v2, %v1341_v2  ;;  %v1250_v16 = vmul.f32 0.2, %v1186_v3  ;;  %v1187_v18 = vadd.f32 %v2442_v1, %v1116_v13  ;;  %v1114_v20 = vld [vmem:[#allocation2 + $0x28] sm:$0xff]  ;;  %1664 = vst.msk [vmem:[%s2465_s28 + $0x8c] sm:$0xf] %vm1628_vm4, %v1953_v8  ;;  %v1219_v23 = vadd.f32 %v2442_v1, %v1148_v19  ;;  %v332_v51 = vld [vmem:[#allocation2 + $0x158] sm:$0xff] }
  0xfd   : > { %1630 = vst.msk [vmem:[%s2465_s28 + $0x4] sm:$0xf] %vm1628_vm4, %v1919_v9  ;;  %v1282_v21 = vmul.f32 0.2, %v1218_v10  ;;  %v1248_v22 = vmul.f32 0.2, %v1184_v11  ;;  %v1185_v24 = vadd.f32 %v2442_v1, %v1114_v20  ;;  %v987_v63 = vadd.f32 %v2467_v49, %v299_v30 }
  0xfe   : > { %v1146_v25 = vld [vmem:[#allocation2 + $0x128] sm:$0xff]  ;;  %1662 = vst.msk [vmem:[%s2465_s28 + $0x84] sm:$0xf] %vm1628_vm4, %v1951_v15  ;;  %v1314_v26 = vmax.f32 %v1186_v3, %v1250_v16  ;;  %v1280_v27 = vmul.f32 0.2, %v1216_v17  ;;  %v2031_v37 = vpop.f32.mrb[12].mxu0 }
  0xff   : > { %v1251_v28 = vmul.f32 0.2, %v1187_v18  ;;  %v1217_v29 = vadd.f32 %v2442_v1, %v1146_v25  ;;  %v1346_v32 = vmax.f32 %v1218_v10, %v1282_v21  ;;  %v1312_v33 = vmax.f32 %v1184_v11, %v1248_v22  ;;  %v2063_v44 = vpop.f32.mrb[12].mxu1  ;;  %v770_v45 = vpop.f32.mrb[13].mxu0  ;;  %v298_v52 = vld [vmem:[#allocation2 + $0x48] sm:$0xff]  ;;  %v303_v0 = vld [vmem:[#allocation2 + $0x70] sm:$0xff] }
 0x100   : > { %v1283_v34 = vmul.f32 0.2, %v1219_v23  ;;  %v1249_v35 = vmul.f32 0.2, %v1185_v24  ;;  %v1924_v38 = vpack.c.bf16 %v1314_v26, %v1314_v26  ;;  %v1344_v39 = vmax.f32 %v1216_v17, %v1280_v27  ;;  %v330_v53 = vld [vmem:[#allocation2 + $0x148] sm:$0xff]  ;;  %v898_v56 = vpop.f32.mrb[13].mxu1 }
 0x101   : > { %v1315_v40 = vmax.f32 %v1187_v18, %v1251_v28  ;;  %v1281_v41 = vmul.f32 0.2, %v1217_v29  ;;  %v1956_v46 = vpack.c.bf16 %v1346_v32, %v1346_v32  ;;  %v1922_v47 = vpack.c.bf16 %v1312_v33, %v1312_v33  ;;  %v2032_v57 = vpop.f32.mrb[14].mxu0  ;;  %v335_v2 = vld [vmem:[#allocation2 + $0x170] sm:$0xff]  ;;  %v301_v3 = vld [vmem:[#allocation2 + $0x60] sm:$0xff]  ;;  %v2064_v4 = vpop.f32.mrb[14].mxu1 }
 0x102   : > { %v1347_v48 = vmax.f32 %v1219_v23, %v1283_v34  ;;  %v1313_v50 = vmax.f32 %v1185_v24, %v1249_v35  ;;  %1635 = vst.msk [vmem:[%s2465_s28 + $0x18] sm:$0xf] %vm1628_vm4, %v1924_v38  ;;  %v1954_v58 = vpack.c.bf16 %v1344_v39, %v1344_v39  ;;  %v773_v5 = vpop.f32.mrb[15].mxu0  ;;  %v1019_v10 = vadd.f32 %v2469_v54, %v331_v31  ;;  %v333_v49 = vld [vmem:[#allocation2 + $0x160] sm:$0xff]  ;;  %v304_v12 = vld [vmem:[#allocation2 + $0x78] sm:$0xff]  ;;  %v901_v15 = vpop.f32.mrb[15].mxu1 }
 0x103   : > { %v1925_v59 = vpack.c.bf16 %v1315_v40, %v1315_v40  ;;  %v1345_v60 = vmax.f32 %v1217_v29, %v1281_v41  ;;  %1667 = vst.msk [vmem:[%s2465_s28 + $0x98] sm:$0xf] %vm1628_vm4, %v1956_v46  ;;  %1633 = vst.msk [vmem:[%s2465_s28 + $0x10] sm:$0xf] %vm1628_vm4, %v1922_v47  ;;  %v985_v11 = vadd.f32 %v2471_v55, %v297_v36  ;;  %v336_v13 = vld [vmem:[#allocation2 + $0x178] sm:$0xff]  ;;  %v302_v19 = vld [vmem:[#allocation2 + $0x68] sm:$0xff] }
 0x104   : > { %v1957_v8 = vpack.c.bf16 %v1347_v48, %v1347_v48  ;;  %v1923_v9 = vpack.c.bf16 %v1313_v50, %v1313_v50  ;;  %1665 = vst.msk [vmem:[%s2465_s28 + $0x90] sm:$0xf] %vm1628_vm4, %v1954_v58  ;;  %v1017_v17 = vadd.f32 %v2473_v61, %v329_v42  ;;  %v988_v18 = vadd.f32 %v2475_v62, %v300_v43  ;;  %v334_v55 = vld [vmem:[#allocation2 + $0x168] sm:$0xff]  ;;  %v307_v23 = vld [vmem:[#allocation2 + $0x90] sm:$0xff]  ;;  %v305_v27 = vld [vmem:[#allocation2 + $0x80] sm:$0xff] }
 0x105   : > { %1636 = vst.msk [vmem:[%s2465_s28 + $0x1c] sm:$0xf] %vm1628_vm4, %v1925_v59  ;;  %v1955_v16 = vpack.c.bf16 %v1345_v60, %v1345_v60  ;;  %v1020_v54 = vadd.f32 %v2480_v6, %v332_v51  ;;  %v986_v20 = vadd.f32 %v2482_v7, %v298_v52  ;;  %v1018_v21 = vadd.f32 %v2490_v14, %v330_v53  ;;  %v339_v26 = vld [vmem:[#allocation2 + $0x190] sm:$0xff]  ;;  %v337_v29 = vld [vmem:[#allocation2 + $0x180] sm:$0xff]  ;;  %v308_v30 = vld [vmem:[#allocation2 + $0x98] sm:$0xff] }
 0x106   : > { %1052 = vst.msk [vmem:[#allocation2 + $0x50] sm:$0xff] %vm224_vm2, %v987_v63  ;;  %1084 = vst.msk [vmem:[#allocation2 + $0x150] sm:$0xff] %vm224_vm2, %v1019_v10  ;;  %v991_v22 = vadd.f32 %v2031_v37, %v303_v0  ;;  %v1023_v61 = vadd.f32 %v2063_v44, %v335_v2  ;;  %v989_v62 = vadd.f32 %v770_v45, %v301_v3  ;;  %v2035_v28 = vpop.f32.mrb[16].mxu0  ;;  %v340_v34 = vld [vmem:[#allocation2 + $0x198] sm:$0xff]  ;;  %v306_v35 = vld [vmem:[#allocation2 + $0x88] sm:$0xff] }
 0x107   : > { %1668 = vst.msk [vmem:[%s2465_s28 + $0x9c] sm:$0xf] %vm1628_vm4, %v1957_v8  ;;  %1634 = vst.msk [vmem:[%s2465_s28 + $0x14] sm:$0xf] %vm1628_vm4, %v1923_v9  ;;  %v1021_v6 = vadd.f32 %v898_v56, %v333_v49  ;;  %v992_v24 = vadd.f32 %v2032_v57, %v304_v12  ;;  %v1024_v25 = vadd.f32 %v2064_v4, %v336_v13  ;;  %v2067_v32 = vpop.f32.mrb[16].mxu1  ;;  %v786_v33 = vpop.f32.mrb[17].mxu0 }
 0x108   : > { %1050 = vst.msk [vmem:[#allocation2 + $0x40] sm:$0xff] %vm224_vm2, %v985_v11  ;;  %1082 = vst.msk [vmem:[#allocation2 + $0x140] sm:$0xff] %vm224_vm2, %v1017_v17  ;;  %v990_v7 = vadd.f32 %v773_v5, %v302_v19  ;;  %v1022_v14 = vadd.f32 %v901_v15, %v334_v55  ;;  %v995_v31 = vadd.f32 %v2035_v28, %v307_v23  ;;  %v914_v38 = vpop.f32.mrb[17].mxu1  ;;  %v2036_v39 = vpop.f32.mrb[18].mxu0  ;;  %v338_v40 = vld [vmem:[#allocation2 + $0x188] sm:$0xff] }
 0x109   : > { %1666 = vst.msk [vmem:[%s2465_s28 + $0x94] sm:$0xf] %vm1628_vm4, %v1955_v16  ;;  %v1027_v36 = vadd.f32 %v2067_v32, %v339_v26  ;;  %v993_v37 = vadd.f32 %v786_v33, %v305_v27  ;;  %v1025_v41 = vadd.f32 %v914_v38, %v337_v29  ;;  %v996_v42 = vadd.f32 %v2036_v39, %v308_v30  ;;  %v2068_v43 = vpop.f32.mrb[18].mxu1  ;;  %v789_v44 = vpop.f32.mrb[19].mxu0 }
 0x10a   : > { %1053 = vst.msk [vmem:[#allocation2 + $0x58] sm:$0xff] %vm224_vm2, %v988_v18  ;;  %1085 = vst.msk [vmem:[#allocation2 + $0x158] sm:$0xff] %vm224_vm2, %v1020_v54  ;;  %v1028_v46 = vadd.f32 %v2068_v43, %v340_v34  ;;  %v994_v47 = vadd.f32 %v789_v44, %v306_v35  ;;  %v917_v48 = vpop.f32.mrb[19].mxu1 }
 0x10b   : > { %1051 = vst.msk [vmem:[#allocation2 + $0x48] sm:$0xff] %vm224_vm2, %v986_v20  ;;  %1083 = vst.msk [vmem:[#allocation2 + $0x148] sm:$0xff] %vm224_vm2, %v1018_v21  ;;  %v1026_v53 = vadd.f32 %v917_v48, %v338_v40 }
 0x10c   : > { %1056 = vst.msk [vmem:[#allocation2 + $0x70] sm:$0xff] %vm224_vm2, %v991_v22  ;;  %1088 = vst.msk [vmem:[#allocation2 + $0x170] sm:$0xff] %vm224_vm2, %v1023_v61 }
 0x10d   : > { %1054 = vst.msk [vmem:[#allocation2 + $0x60] sm:$0xff] %vm224_vm2, %v989_v62  ;;  %1086 = vst.msk [vmem:[#allocation2 + $0x160] sm:$0xff] %vm224_vm2, %v1021_v6  ;;  %v1119_v45 = vld [vmem:[#allocation2 + $0x50] sm:$0xff] }
 0x10e   : > { %1057 = vst.msk [vmem:[#allocation2 + $0x78] sm:$0xff] %vm224_vm2, %v992_v24  ;;  %1089 = vst.msk [vmem:[#allocation2 + $0x178] sm:$0xff] %vm224_vm2, %v1024_v25  ;;  %v1190_v50 = vadd.f32 %v2442_v1, %v1119_v45  ;;  %v1151_v51 = vld [vmem:[#allocation2 + $0x150] sm:$0xff]  ;;  %v2563_v62 = vpop.f32.mrb[20].mxu0 }
 0x10f   : > { %1055 = vst.msk [vmem:[#allocation2 + $0x68] sm:$0xff] %vm224_vm2, %v990_v7  ;;  %1087 = vst.msk [vmem:[#allocation2 + $0x168] sm:$0xff] %vm224_vm2, %v1022_v14  ;;  %v1117_v52 = vld [vmem:[#allocation2 + $0x40] sm:$0xff]  ;;  %v1222_v56 = vadd.f32 %v2442_v1, %v1151_v51  ;;  %v2565_v6 = vpop.f32.mrb[20].mxu1  ;;  %v2567_v29 = vpop.f32.mrb[21].mxu0 }
 0x110   : > { %1060 = vst.msk [vmem:[#allocation2 + $0x90] sm:$0xff] %vm224_vm2, %v995_v31  ;;  %1092 = vst.msk [vmem:[#allocation2 + $0x190] sm:$0xff] %vm224_vm2, %v1027_v36  ;;  %v1188_v57 = vadd.f32 %v2442_v1, %v1117_v52  ;;  %v1149_v58 = vld [vmem:[#allocation2 + $0x140] sm:$0xff]  ;;  %v1254_v63 = vmul.f32 0.2, %v1190_v50  ;;  %v2569_v30 = vpop.f32.mrb[21].mxu1 }
 0x111   : > { %1058 = vst.msk [vmem:[#allocation2 + $0x80] sm:$0xff] %vm224_vm2, %v993_v37  ;;  %1090 = vst.msk [vmem:[#allocation2 + $0x180] sm:$0xff] %vm224_vm2, %v1025_v41  ;;  %v1120_v59 = vld [vmem:[#allocation2 + $0x58] sm:$0xff]  ;;  %v1220_v0 = vadd.f32 %v2442_v1, %v1149_v58  ;;  %v1286_v8 = vmul.f32 0.2, %v1222_v56  ;;  %v2574_v37 = vpop.f32.mrb[22].mxu0 }
 0x112   : > { %1061 = vst.msk [vmem:[#allocation2 + $0x98] sm:$0xff] %vm224_vm2, %v996_v42  ;;  %v1152_v60 = vld [vmem:[#allocation2 + $0x158] sm:$0xff]  ;;  %1093 = vst.msk [vmem:[#allocation2 + $0x198] sm:$0xff] %vm224_vm2, %v1028_v46  ;;  %v1191_v2 = vadd.f32 %v2442_v1, %v1120_v59  ;;  %v1118_v4 = vld [vmem:[#allocation2 + $0x48] sm:$0xff]  ;;  %v1252_v9 = vmul.f32 0.2, %v1188_v57  ;;  %v1318_v49 = vmax.f32 %v1190_v50, %v1254_v63 }
 0x113   : > { %1059 = vst.msk [vmem:[#allocation2 + $0x88] sm:$0xff] %vm224_vm2, %v994_v47  ;;  %v1223_v3 = vadd.f32 %v2442_v1, %v1152_v60  ;;  %v1150_v5 = vld [vmem:[#allocation2 + $0x148] sm:$0xff]  ;;  %1091 = vst.msk [vmem:[#allocation2 + $0x188] sm:$0xff] %vm224_vm2, %v1026_v53  ;;  %v1189_v10 = vadd.f32 %v2442_v1, %v1118_v4  ;;  %v1284_v12 = vmul.f32 0.2, %v1220_v0  ;;  %v1350_v16 = vmax.f32 %v1222_v56, %v1286_v8  ;;  %v1123_v19 = vld [vmem:[#allocation2 + $0x70] sm:$0xff] }
 0x114   : > { %v1221_v11 = vadd.f32 %v2442_v1, %v1150_v5  ;;  %v1255_v13 = vmul.f32 0.2, %v1191_v2  ;;  %v1316_v17 = vmax.f32 %v1188_v57, %v1252_v9  ;;  %v1928_v55 = vpack.c.bf16 %v1318_v49, %v1318_v49  ;;  %v1155_v61 = vld [vmem:[#allocation2 + $0x170] sm:$0xff]  ;;  %v1121_v23 = vld [vmem:[#allocation2 + $0x60] sm:$0xff]  ;;  %v2576_v38 = vpop.f32.mrb[22].mxu1  ;;  %v2584_v43 = vpop.f32.mrb[23].mxu0 }
 0x115   : > { %v1287_v15 = vmul.f32 0.2, %v1223_v3  ;;  %v1253_v18 = vmul.f32 0.2, %v1189_v10  ;;  %v1348_v20 = vmax.f32 %v1220_v0, %v1284_v12  ;;  %v1960_v24 = vpack.c.bf16 %v1350_v16, %v1350_v16  ;;  %v1153_v7 = vld [vmem:[#allocation2 + $0x160] sm:$0xff]  ;;  %v1124_v14 = vld [vmem:[#allocation2 + $0x78] sm:$0xff] }
 0x116   : > { %v1285_v54 = vmul.f32 0.2, %v1221_v11  ;;  %v1319_v21 = vmax.f32 %v1191_v2, %v1255_v13  ;;  %v1926_v25 = vpack.c.bf16 %v1316_v17, %v1316_v17  ;;  %v1156_v28 = vld [vmem:[#allocation2 + $0x178] sm:$0xff]  ;;  %1639 = vst.msk [vmem:[%s2465_s28 + $0x28] sm:$0xf] %vm1628_vm4, %v1928_v55  ;;  %v1194_v34 = vadd.f32 %v2442_v1, %v1123_v19  ;;  %v1122_v35 = vld [vmem:[#allocation2 + $0x68] sm:$0xff] }
 0x117   : > { %v1351_v22 = vmax.f32 %v1223_v3, %v1287_v15  ;;  %v1317_v26 = vmax.f32 %v1189_v10, %v1253_v18  ;;  %v1958_v31 = vpack.c.bf16 %v1348_v20, %v1348_v20  ;;  %v1154_v36 = vld [vmem:[#allocation2 + $0x168] sm:$0xff]  ;;  %1671 = vst.msk [vmem:[%s2465_s28 + $0xa8] sm:$0xf] %vm1628_vm4, %v1960_v24  ;;  %v1226_v41 = vadd.f32 %v2442_v1, %v1155_v61  ;;  %v2586_v44 = vpop.f32.mrb[23].mxu1  ;;  %v1127_v56 = vld [vmem:[#allocation2 + $0x90] sm:$0xff]  ;;  %v2603_v57 = vpop.f32.mrb[24].mxu0 }
 0x118   : > { %v1349_v27 = vmax.f32 %v1221_v11, %v1285_v54  ;;  %v1929_v32 = vpack.c.bf16 %v1319_v21, %v1319_v21  ;;  %1637 = vst.msk [vmem:[%s2465_s28 + $0x20] sm:$0xf] %vm1628_vm4, %v1926_v25  ;;  %v1192_v42 = vadd.f32 %v2442_v1, %v1121_v23  ;;  %v1258_v45 = vmul.f32 0.2, %v1194_v34  ;;  %v2605_v5 = vpop.f32.mrb[24].mxu1  ;;  %v2607_v8 = vpop.f32.mrb[25].mxu0 }
 0x119   : > { %v1961_v33 = vpack.c.bf16 %v1351_v22, %v1351_v22  ;;  %v1927_v39 = vpack.c.bf16 %v1317_v26, %v1317_v26  ;;  %1669 = vst.msk [vmem:[%s2465_s28 + $0xa0] sm:$0xf] %vm1628_vm4, %v1958_v31  ;;  %v1224_v46 = vadd.f32 %v2442_v1, %v1153_v7  ;;  %v1195_v47 = vadd.f32 %v2442_v1, %v1124_v14  ;;  %v1159_v12 = vld [vmem:[#allocation2 + $0x190] sm:$0xff]  ;;  %v1125_v13 = vld [vmem:[#allocation2 + $0x80] sm:$0xff]  ;;  %v2609_v15 = vpop.f32.mrb[25].mxu1  ;;  %v2611_v16 = vpop.f32.mrb[26].mxu0 }
 0x11a   : > { %v1959_v40 = vpack.c.bf16 %v1349_v27, %v1349_v27  ;;  %1640 = vst.msk [vmem:[%s2465_s28 + $0x2c] sm:$0xf] %vm1628_vm4, %v1929_v32  ;;  %v1227_v48 = vadd.f32 %v2442_v1, %v1156_v28  ;;  %v1290_v50 = vmul.f32 0.2, %v1226_v41  ;;  %v1256_v51 = vmul.f32 0.2, %v1192_v42 }
 0x11b   : > { %1672 = vst.msk [vmem:[%s2465_s28 + $0xac] sm:$0xf] %vm1628_vm4, %v1961_v33  ;;  %1638 = vst.msk [vmem:[%s2465_s28 + $0x24] sm:$0xf] %vm1628_vm4, %v1927_v39  ;;  %v1193_v52 = vadd.f32 %v2442_v1, %v1122_v35  ;;  %v1225_v53 = vadd.f32 %v2442_v1, %v1154_v36  ;;  %v1322_v58 = vmax.f32 %v1194_v34, %v1258_v45  ;;  %v1288_v59 = vmul.f32 0.2, %v1224_v46 }
 0x11c   : > { %1670 = vst.msk [vmem:[%s2465_s28 + $0xa4] sm:$0xf] %vm1628_vm4, %v1959_v40  ;;  %v1259_v60 = vmul.f32 0.2, %v1195_v47  ;;  %v1291_v63 = vmul.f32 0.2, %v1227_v48  ;;  %v1354_v0 = vmax.f32 %v1226_v41, %v1290_v50  ;;  %v1320_v2 = vmax.f32 %v1192_v42, %v1256_v51 }
 0x11d   : > { %v1257_v3 = vmul.f32 0.2, %v1193_v52  ;;  %v1289_v4 = vmul.f32 0.2, %v1225_v53  ;;  %v1932_v9 = vpack.c.bf16 %v1322_v58, %v1322_v58  ;;  %v1352_v10 = vmax.f32 %v1224_v46, %v1288_v59  ;;  %v1157_v55 = vld [vmem:[#allocation2 + $0x180] sm:$0xff]  ;;  %v1128_v20 = vld [vmem:[#allocation2 + $0x98] sm:$0xff] }
 0x11e   : > { %v1323_v11 = vmax.f32 %v1195_v47, %v1259_v60  ;;  %v1355_v49 = vmax.f32 %v1227_v48, %v1291_v63  ;;  %v1964_v17 = vpack.c.bf16 %v1354_v0, %v1354_v0  ;;  %v1930_v18 = vpack.c.bf16 %v1320_v2, %v1320_v2  ;;  %v1160_v21 = vld [vmem:[#allocation2 + $0x198] sm:$0xff]  ;;  %v2613_v22 = vpop.f32.mrb[26].mxu1  ;;  %v2615_v61 = vpop.f32.mrb[27].mxu0  ;;  %v1126_v27 = vld [vmem:[#allocation2 + $0x88] sm:$0xff]  ;;  %v311_v46 = vld [vmem:[#allocation2 + $0xb0] sm:$0xff] }
 0x11f   : > { %v1321_v54 = vmax.f32 %v1193_v52, %v1257_v3  ;;  %v1353_v19 = vmax.f32 %v1225_v53, %v1289_v4  ;;  %1643 = vst.msk [vmem:[%s2465_s28 + $0x38] sm:$0xf] %vm1628_vm4, %v1932_v9  ;;  %v1962_v23 = vpack.c.bf16 %v1352_v10, %v1352_v10  ;;  %v1198_v26 = vadd.f32 %v2442_v1, %v1127_v56  ;;  %v1158_v7 = vld [vmem:[#allocation2 + $0x188] sm:$0xff]  ;;  %v2620_v14 = vpop.f32.mrb[27].mxu1  ;;  %v2643_v47 = vpop.f32.mrb[28].mxu0  ;;  %v343_v53 = vld [vmem:[#allocation2 + $0x1b0] sm:$0xff] }
 0x120   : > { %v1933_v24 = vpack.c.bf16 %v1323_v11, %v1323_v11  ;;  %v1965_v25 = vpack.c.bf16 %v1355_v49, %v1355_v49  ;;  %1675 = vst.msk [vmem:[%s2465_s28 + $0xb8] sm:$0xf] %vm1628_vm4, %v1964_v17  ;;  %1641 = vst.msk [vmem:[%s2465_s28 + $0x30] sm:$0xf] %vm1628_vm4, %v1930_v18  ;;  %v1230_v32 = vadd.f32 %v2442_v1, %v1159_v12  ;;  %v309_v56 = vld [vmem:[#allocation2 + $0xa0] sm:$0xff]  ;;  %v312_v2 = vld [vmem:[#allocation2 + $0xb8] sm:$0xff] }
 0x121   : > { %v1931_v28 = vpack.c.bf16 %v1321_v54, %v1321_v54  ;;  %v1963_v31 = vpack.c.bf16 %v1353_v19, %v1353_v19  ;;  %v1196_v33 = vadd.f32 %v2442_v1, %v1125_v13  ;;  %1673 = vst.msk [vmem:[%s2465_s28 + $0xb0] sm:$0xf] %vm1628_vm4, %v1962_v23  ;;  %v1262_v34 = vmul.f32 0.2, %v1198_v26  ;;  %v341_v0 = vld [vmem:[#allocation2 + $0x1a0] sm:$0xff]  ;;  %v2645_v3 = vpop.f32.mrb[28].mxu1 }
 0x122   : > { %1644 = vst.msk [vmem:[%s2465_s28 + $0x3c] sm:$0xf] %vm1628_vm4, %v1933_v24  ;;  %1676 = vst.msk [vmem:[%s2465_s28 + $0xbc] sm:$0xf] %vm1628_vm4, %v1965_v25  ;;  %v1228_v35 = vadd.f32 %v2442_v1, %v1157_v55  ;;  %v1199_v36 = vadd.f32 %v2442_v1, %v1128_v20  ;;  %v1231_v39 = vadd.f32 %v2442_v1, %v1160_v21  ;;  %v1294_v40 = vmul.f32 0.2, %v1230_v32 }
 0x123   : > { %1642 = vst.msk [vmem:[%s2465_s28 + $0x34] sm:$0xf] %vm1628_vm4, %v1931_v28  ;;  %1674 = vst.msk [vmem:[%s2465_s28 + $0xb4] sm:$0xf] %vm1628_vm4, %v1963_v31  ;;  %v1260_v41 = vmul.f32 0.2, %v1196_v33  ;;  %v1197_v42 = vadd.f32 %v2442_v1, %v1126_v27  ;;  %v1229_v45 = vadd.f32 %v2442_v1, %v1158_v7  ;;  %v1326_v48 = vmax.f32 %v1198_v26, %v1262_v34 }
 0x124   : > { %v1292_v50 = vmul.f32 0.2, %v1228_v35  ;;  %v1263_v51 = vmul.f32 0.2, %v1199_v36  ;;  %v1295_v52 = vmul.f32 0.2, %v1231_v39  ;;  %v1358_v58 = vmax.f32 %v1230_v32, %v1294_v40 }
 0x125   : > { %v1324_v59 = vmax.f32 %v1196_v33, %v1260_v41  ;;  %v1261_v60 = vmul.f32 0.2, %v1197_v42  ;;  %v1293_v63 = vmul.f32 0.2, %v1229_v45  ;;  %v2647_v4 = vpop.f32.mrb[29].mxu0  ;;  %v1936_v9 = vpack.c.bf16 %v1326_v48, %v1326_v48  ;;  %v344_v12 = vld [vmem:[#allocation2 + $0x1b8] sm:$0xff] }
 0x126   : > { %v1356_v10 = vmax.f32 %v1228_v35, %v1292_v50  ;;  %v1327_v11 = vmax.f32 %v1199_v36, %v1263_v51  ;;  %v1359_v49 = vmax.f32 %v1231_v39, %v1295_v52  ;;  %v310_v13 = vld [vmem:[#allocation2 + $0xa8] sm:$0xff]  ;;  %v2649_v18 = vpop.f32.mrb[29].mxu1  ;;  %v2651_v54 = vpop.f32.mrb[30].mxu0  ;;  %v1968_v19 = vpack.c.bf16 %v1358_v58, %v1358_v58  ;;  %v315_v23 = vld [vmem:[#allocation2 + $0xd0] sm:$0xff]  ;;  %v313_v25 = vld [vmem:[#allocation2 + $0xc0] sm:$0xff] }
 0x127   : > { %v342_v17 = vld [vmem:[#allocation2 + $0x1a8] sm:$0xff]  ;;  %v1934_v55 = vpack.c.bf16 %v1324_v59, %v1324_v59  ;;  %v1325_v20 = vmax.f32 %v1197_v42, %v1261_v60  ;;  %v1357_v21 = vmax.f32 %v1229_v45, %v1293_v63  ;;  %v347_v24 = vld [vmem:[#allocation2 + $0x1d0] sm:$0xff]  ;;  %v2653_v26 = vpop.f32.mrb[30].mxu1  ;;  %v2655_v27 = vpop.f32.mrb[31].mxu0  ;;  %1647 = vst.msk [vmem:[%s2465_s28 + $0x48] sm:$0xf] %vm1628_vm4, %v1936_v9  ;;  %v999_v32 = vadd.f32 %v2563_v62, %v311_v46 }
 0x128   : > { %v1966_v7 = vpack.c.bf16 %v1356_v10, %v1356_v10  ;;  %v1937_v28 = vpack.c.bf16 %v1327_v11, %v1327_v11  ;;  %v1969_v31 = vpack.c.bf16 %v1359_v49, %v1359_v49  ;;  %v345_v33 = vld [vmem:[#allocation2 + $0x1c0] sm:$0xff]  ;;  %v316_v34 = vld [vmem:[#allocation2 + $0xd8] sm:$0xff]  ;;  %v965_v36 = vpop.f32.mrb[31].mxu1  ;;  %1679 = vst.msk [vmem:[%s2465_s28 + $0xc8] sm:$0xf] %vm1628_vm4, %v1968_v19  ;;  %v1031_v41 = vadd.f32 %v2565_v6, %v343_v53  ;;  %v314_v45 = vld [vmem:[#allocation2 + $0xc8] sm:$0xff] }
 0x129   : > { %v348_v35 = vld [vmem:[#allocation2 + $0x1d8] sm:$0xff]  ;;  %1645 = vst.msk [vmem:[%s2465_s28 + $0x40] sm:$0xf] %vm1628_vm4, %v1934_v55  ;;  %v1935_v39 = vpack.c.bf16 %v1325_v20, %v1325_v20  ;;  %v1967_v40 = vpack.c.bf16 %v1357_v21, %v1357_v21  ;;  %v997_v42 = vadd.f32 %v2567_v29, %v309_v56  ;;  %v346_v48 = vld [vmem:[#allocation2 + $0x1c8] sm:$0xff]  ;;  %v319_v62 = vld [vmem:[#allocation2 + $0xf0] sm:$0xff]  ;;  %v1029_v46 = vadd.f32 %v2569_v30, %v341_v0 }
 0x12a   : > { %1677 = vst.msk [vmem:[%s2465_s28 + $0xc0] sm:$0xf] %vm1628_vm4, %v1966_v7  ;;  %1648 = vst.msk [vmem:[%s2465_s28 + $0x4c] sm:$0xf] %vm1628_vm4, %v1937_v28  ;;  %v1000_v50 = vadd.f32 %v2574_v37, %v312_v2  ;;  %v1032_v6 = vadd.f32 %v2576_v38, %v344_v12  ;;  %v998_v29 = vadd.f32 %v2584_v43, %v310_v13  ;;  %v351_v51 = vld [vmem:[#allocation2 + $0x1f0] sm:$0xff]  ;;  %v317_v52 = vld [vmem:[#allocation2 + $0xe0] sm:$0xff] }
 0x12b   : > { %1680 = vst.msk [vmem:[%s2465_s28 + $0xcc] sm:$0xf] %vm1628_vm4, %v1969_v31  ;;  %v349_v53 = vld [vmem:[#allocation2 + $0x1e0] sm:$0xff]  ;;  %1646 = vst.msk [vmem:[%s2465_s28 + $0x44] sm:$0xf] %vm1628_vm4, %v1935_v39  ;;  %v1030_v56 = vadd.f32 %v2586_v44, %v342_v17  ;;  %v1003_v30 = vadd.f32 %v2603_v57, %v315_v23  ;;  %v1035_v37 = vadd.f32 %v2605_v5, %v347_v24  ;;  %v320_v43 = vld [vmem:[#allocation2 + $0xf8] sm:$0xff] }
 0x12c   : > { %1064 = vst.msk [vmem:[#allocation2 + $0xb0] sm:$0xff] %vm224_vm2, %v999_v32  ;;  %1096 = vst.msk [vmem:[#allocation2 + $0x1b0] sm:$0xff] %vm224_vm2, %v1031_v41  ;;  %v1001_v38 = vadd.f32 %v2607_v8, %v313_v25  ;;  %v352_v58 = vld [vmem:[#allocation2 + $0x1f8] sm:$0xff]  ;;  %v318_v59 = vld [vmem:[#allocation2 + $0xe8] sm:$0xff]  ;;  %v1033_v60 = vadd.f32 %v2609_v15, %v345_v33  ;;  %v1004_v44 = vadd.f32 %v2611_v16, %v316_v34 }
 0x12d   : > { %1678 = vst.msk [vmem:[%s2465_s28 + $0xc4] sm:$0xf] %vm1628_vm4, %v1967_v40  ;;  %v1036_v57 = vadd.f32 %v2613_v22, %v348_v35  ;;  %v1002_v5 = vadd.f32 %v2615_v61, %v314_v45  ;;  %v350_v8 = vld [vmem:[#allocation2 + $0x1e8] sm:$0xff]  ;;  %v1034_v63 = vadd.f32 %v2620_v14, %v346_v48  ;;  %v1007_v0 = vadd.f32 %v2643_v47, %v319_v62 }
 0x12e   : > { %1062 = vst.msk [vmem:[#allocation2 + $0xa0] sm:$0xff] %vm224_vm2, %v997_v42  ;;  %1094 = vst.msk [vmem:[#allocation2 + $0x1a0] sm:$0xff] %vm224_vm2, %v1029_v46  ;;  %v1039_v15 = vadd.f32 %v2645_v3, %v351_v51  ;;  %v1005_v16 = vadd.f32 %v2647_v4, %v317_v52  ;;  %v1037_v22 = vadd.f32 %v2649_v18, %v349_v53 }
 0x12f   : > { %1065 = vst.msk [vmem:[#allocation2 + $0xb8] sm:$0xff] %vm224_vm2, %v1000_v50  ;;  %1097 = vst.msk [vmem:[#allocation2 + $0x1b8] sm:$0xff] %vm224_vm2, %v1032_v6  ;;  %v1008_v61 = vadd.f32 %v2651_v54, %v320_v43  ;;  %v1040_v14 = vadd.f32 %v2653_v26, %v352_v58  ;;  %v1006_v47 = vadd.f32 %v2655_v27, %v318_v59 }
 0x130   : > { %1063 = vst.msk [vmem:[#allocation2 + $0xa8] sm:$0xff] %vm224_vm2, %v998_v29  ;;  %1095 = vst.msk [vmem:[#allocation2 + $0x1a8] sm:$0xff] %vm224_vm2, %v1030_v56  ;;  %v1038_v2 = vadd.f32 %v965_v36, %v350_v8 }
 0x131   : > { %1068 = vst.msk [vmem:[#allocation2 + $0xd0] sm:$0xff] %vm224_vm2, %v1003_v30  ;;  %1100 = vst.msk [vmem:[#allocation2 + $0x1d0] sm:$0xff] %vm224_vm2, %v1035_v37 }
 0x132   : > { %1066 = vst.msk [vmem:[#allocation2 + $0xc0] sm:$0xff] %vm224_vm2, %v1001_v38  ;;  %1098 = vst.msk [vmem:[#allocation2 + $0x1c0] sm:$0xff] %vm224_vm2, %v1033_v60  ;;  %v2738_v60 = vld [vmem:[%s2808_s2] ss:$0 sm:$0xff] }
 0x133   : > { %1069 = vst.msk [vmem:[#allocation2 + $0xd8] sm:$0xff] %vm224_vm2, %v1004_v44  ;;  %1101 = vst.msk [vmem:[#allocation2 + $0x1d8] sm:$0xff] %vm224_vm2, %v1036_v57  ;;  %v1131_v3 = vld [vmem:[#allocation2 + $0xb0] sm:$0xff] }
 0x134   : > { %1067 = vst.msk [vmem:[#allocation2 + $0xc8] sm:$0xff] %vm224_vm2, %v1002_v5  ;;  %1099 = vst.msk [vmem:[#allocation2 + $0x1c8] sm:$0xff] %vm224_vm2, %v1034_v63  ;;  %v1202_v4 = vadd.f32 %v2442_v1, %v1131_v3  ;;  %v1163_v9 = vld [vmem:[#allocation2 + $0x1b0] sm:$0xff] }
 0x135   : > { %1072 = vst.msk [vmem:[#allocation2 + $0xf0] sm:$0xff] %vm224_vm2, %v1007_v0  ;;  %1104 = vst.msk [vmem:[#allocation2 + $0x1f0] sm:$0xff] %vm224_vm2, %v1039_v15  ;;  %v1129_v10 = vld [vmem:[#allocation2 + $0xa0] sm:$0xff]  ;;  %v1234_v11 = vadd.f32 %v2442_v1, %v1163_v9 }
 0x136   : > { %1070 = vst.msk [vmem:[#allocation2 + $0xe0] sm:$0xff] %vm224_vm2, %v1005_v16  ;;  %1102 = vst.msk [vmem:[#allocation2 + $0x1e0] sm:$0xff] %vm224_vm2, %v1037_v22  ;;  %v1200_v49 = vadd.f32 %v2442_v1, %v1129_v10  ;;  %v1161_v12 = vld [vmem:[#allocation2 + $0x1a0] sm:$0xff]  ;;  %v1132_v13 = vld [vmem:[#allocation2 + $0xb8] sm:$0xff]  ;;  %v1266_v18 = vmul.f32 0.2, %v1202_v4 }
 0x137   : > { %1073 = vst.msk [vmem:[#allocation2 + $0xf8] sm:$0xff] %vm224_vm2, %v1008_v61  ;;  %1105 = vst.msk [vmem:[#allocation2 + $0x1f8] sm:$0xff] %vm224_vm2, %v1040_v14  ;;  %v1164_v17 = vld [vmem:[#allocation2 + $0x1b8] sm:$0xff]  ;;  %v1232_v54 = vadd.f32 %v2442_v1, %v1161_v12  ;;  %v1203_v19 = vadd.f32 %v2442_v1, %v1132_v13  ;;  %v1130_v20 = vld [vmem:[#allocation2 + $0xa8] sm:$0xff]  ;;  %v1298_v23 = vmul.f32 0.2, %v1234_v11 }
 0x138   : > { %1071 = vst.msk [vmem:[#allocation2 + $0xe8] sm:$0xff] %vm224_vm2, %v1006_v47  ;;  %1103 = vst.msk [vmem:[#allocation2 + $0x1e8] sm:$0xff] %vm224_vm2, %v1038_v2  ;;  %v1235_v55 = vadd.f32 %v2442_v1, %v1164_v17  ;;  %v1162_v21 = vld [vmem:[#allocation2 + $0x1a8] sm:$0xff]  ;;  %v1264_v24 = vmul.f32 0.2, %v1200_v49  ;;  %v1201_v25 = vadd.f32 %v2442_v1, %v1130_v20  ;;  %v1330_v27 = vmax.f32 %v1202_v4, %v1266_v18  ;;  %v1135_v36 = vld [vmem:[#allocation2 + $0xd0] sm:$0xff] }
 0x139   : > { %v1233_v26 = vadd.f32 %v2442_v1, %v1162_v21  ;;  %v1296_v7 = vmul.f32 0.2, %v1232_v54  ;;  %v1267_v28 = vmul.f32 0.2, %v1203_v19  ;;  %v1362_v32 = vmax.f32 %v1234_v11, %v1298_v23  ;;  %v1167_v45 = vld [vmem:[#allocation2 + $0x1d0] sm:$0xff]  ;;  %v1133_v48 = vld [vmem:[#allocation2 + $0xc0] sm:$0xff] }
 0x13a   : > { %v1299_v31 = vmul.f32 0.2, %v1235_v55  ;;  %v1328_v33 = vmax.f32 %v1200_v49, %v1264_v24  ;;  %v1265_v34 = vmul.f32 0.2, %v1201_v25  ;;  %v1940_v39 = vpack.c.bf16 %v1330_v27, %v1330_v27  ;;  %v1165_v29 = vld [vmem:[#allocation2 + $0x1c0] sm:$0xff]  ;;  %v1136_v51 = vld [vmem:[#allocation2 + $0xd8] sm:$0xff] }
 0x13b   : > { %v1297_v35 = vmul.f32 0.2, %v1233_v26  ;;  %v1360_v40 = vmax.f32 %v1232_v54, %v1296_v7  ;;  %v1331_v41 = vmax.f32 %v1203_v19, %v1267_v28  ;;  %v1972_v62 = vpack.c.bf16 %v1362_v32, %v1362_v32  ;;  %v1168_v52 = vld [vmem:[#allocation2 + $0x1d8] sm:$0xff]  ;;  %v1134_v38 = vld [vmem:[#allocation2 + $0xc8] sm:$0xff] }
 0x13c   : > { %v1363_v42 = vmax.f32 %v1235_v55, %v1299_v31  ;;  %v1938_v46 = vpack.c.bf16 %v1328_v33, %v1328_v33  ;;  %v1329_v50 = vmax.f32 %v1201_v25, %v1265_v34  ;;  %1651 = vst.msk [vmem:[%s2465_s28 + $0x58] sm:$0xf] %vm1628_vm4, %v1940_v39  ;;  %v1206_v37 = vadd.f32 %v2442_v1, %v1135_v36  ;;  %v1166_v43 = vld [vmem:[#allocation2 + $0x1c8] sm:$0xff]  ;;  %v1139_v11 = vld [vmem:[#allocation2 + $0xf0] sm:$0xff] }
 0x13d   : > { %v1361_v6 = vmax.f32 %v1233_v26, %v1297_v35  ;;  %v1970_v53 = vpack.c.bf16 %v1360_v40, %v1360_v40  ;;  %v1941_v56 = vpack.c.bf16 %v1331_v41, %v1331_v41  ;;  %1683 = vst.msk [vmem:[%s2465_s28 + $0xd8] sm:$0xf] %vm1628_vm4, %v1972_v62  ;;  %v1238_v44 = vadd.f32 %v2738_v60, %v1167_v45  ;;  %v1171_v18 = vld [vmem:[#allocation2 + $0x1f0] sm:$0xff]  ;;  %v1137_v54 = vld [vmem:[#allocation2 + $0xe0] sm:$0xff] }
 0x13e   : > { %v1973_v30 = vpack.c.bf16 %v1363_v42, %v1363_v42  ;;  %1649 = vst.msk [vmem:[%s2465_s28 + $0x50] sm:$0xf] %vm1628_vm4, %v1938_v46  ;;  %v1939_v58 = vpack.c.bf16 %v1329_v50, %v1329_v50  ;;  %v1204_v57 = vadd.f32 %v2738_v60, %v1133_v48  ;;  %v1270_v1 = vmul.f32 0.2, %v1206_v37  ;;  %v1169_v23 = vld [vmem:[#allocation2 + $0x1e0] sm:$0xff]  ;;  %v1140_v24 = vld [vmem:[#allocation2 + $0xf8] sm:$0xff] }
 0x13f   : > { %v1971_v59 = vpack.c.bf16 %v1361_v6, %v1361_v6  ;;  %1681 = vst.msk [vmem:[%s2465_s28 + $0xd0] sm:$0xf] %vm1628_vm4, %v1970_v53  ;;  %1652 = vst.msk [vmem:[%s2465_s28 + $0x5c] sm:$0xf] %vm1628_vm4, %v1941_v56  ;;  %v1236_v5 = vadd.f32 %v2738_v60, %v1165_v29  ;;  %v1207_v8 = vadd.f32 %v2738_v60, %v1136_v51  ;;  %v1302_v0 = vmul.f32 0.2, %v1238_v44 }
 0x140   : > { %1684 = vst.msk [vmem:[%s2465_s28 + $0xdc] sm:$0xf] %vm1628_vm4, %v1973_v30  ;;  %v1239_v63 = vadd.f32 %v2738_v60, %v1168_v52  ;;  %1650 = vst.msk [vmem:[%s2465_s28 + $0x54] sm:$0xf] %vm1628_vm4, %v1939_v58  ;;  %v1268_v15 = vmul.f32 0.2, %v1204_v57  ;;  %v1205_v16 = vadd.f32 %v2738_v60, %v1134_v38  ;;  %v1237_v22 = vadd.f32 %v2738_v60, %v1166_v43 }
 0x141   : > { %1682 = vst.msk [vmem:[%s2465_s28 + $0xd4] sm:$0xf] %vm1628_vm4, %v1971_v59  ;;  %v1334_v61 = vmax.f32 %v1206_v37, %v1270_v1  ;;  %v1300_v14 = vmul.f32 0.2, %v1236_v5  ;;  %v1271_v47 = vmul.f32 0.2, %v1207_v8  ;;  %v1366_v3 = vmax.f32 %v1238_v44, %v1302_v0 }
 0x142   : > { %v1303_v2 = vmul.f32 0.2, %v1239_v63  ;;  %v1332_v4 = vmax.f32 %v1204_v57, %v1268_v15  ;;  %v1269_v9 = vmul.f32 0.2, %v1205_v16  ;;  %v1301_v10 = vmul.f32 0.2, %v1237_v22 }
 0x143   : > { %v1944_v49 = vpack.c.bf16 %v1334_v61, %v1334_v61  ;;  %v1364_v12 = vmax.f32 %v1236_v5, %v1300_v14  ;;  %v1335_v13 = vmax.f32 %v1207_v8, %v1271_v47  ;;  %v1976_v19 = vpack.c.bf16 %v1366_v3, %v1366_v3  ;;  %v1172_v25 = vld [vmem:[#allocation2 + $0x1f8] sm:$0xff]  ;;  %v1138_v31 = vld [vmem:[#allocation2 + $0xe8] sm:$0xff] }
 0x144   : > { %v1367_v17 = vmax.f32 %v1239_v63, %v1303_v2  ;;  %v1942_v55 = vpack.c.bf16 %v1332_v4, %v1332_v4  ;;  %v1333_v20 = vmax.f32 %v1205_v16, %v1269_v9  ;;  %v1365_v21 = vmax.f32 %v1237_v22, %v1301_v10  ;;  %v1170_v32 = vld [vmem:[#allocation2 + $0x1e8] sm:$0xff] }
 0x145   : > { %1655 = vst.msk [vmem:[%s2465_s28 + $0x68] sm:$0xf] %vm1628_vm4, %v1944_v49  ;;  %v1974_v26 = vpack.c.bf16 %v1364_v12, %v1364_v12  ;;  %v1945_v27 = vpack.c.bf16 %v1335_v13, %v1335_v13  ;;  %v1210_v28 = vadd.f32 %v2738_v60, %v1139_v11  ;;  %1687 = vst.msk [vmem:[%s2465_s28 + $0xe8] sm:$0xf] %vm1628_vm4, %v1976_v19 }
 0x146   : > { %v1977_v7 = vpack.c.bf16 %v1367_v17, %v1367_v17  ;;  %1653 = vst.msk [vmem:[%s2465_s28 + $0x60] sm:$0xf] %vm1628_vm4, %v1942_v55  ;;  %v1943_v33 = vpack.c.bf16 %v1333_v20, %v1333_v20  ;;  %v1975_v34 = vpack.c.bf16 %v1365_v21, %v1365_v21  ;;  %v1242_v35 = vadd.f32 %v2738_v60, %v1171_v18 }
 0x147   : > { %v1208_v36 = vadd.f32 %v2738_v60, %v1137_v54  ;;  %1685 = vst.msk [vmem:[%s2465_s28 + $0xe0] sm:$0xf] %vm1628_vm4, %v1974_v26  ;;  %1656 = vst.msk [vmem:[%s2465_s28 + $0x6c] sm:$0xf] %vm1628_vm4, %v1945_v27  ;;  %v1274_v39 = vmul.f32 0.2, %v1210_v28  ;;  %v1240_v40 = vadd.f32 %v2738_v60, %v1169_v23  ;;  %v1211_v41 = vadd.f32 %v2738_v60, %v1140_v24 }
 0x148   : > { %1688 = vst.msk [vmem:[%s2465_s28 + $0xec] sm:$0xf] %vm1628_vm4, %v1977_v7  ;;  %v1243_v42 = vadd.f32 %v2738_v60, %v1172_v25  ;;  %1654 = vst.msk [vmem:[%s2465_s28 + $0x64] sm:$0xf] %vm1628_vm4, %v1943_v33  ;;  %v1306_v45 = vmul.f32 0.2, %v1242_v35  ;;  %v1209_v62 = vadd.f32 %v2738_v60, %v1138_v31  ;;  %v1241_v46 = vadd.f32 %v2738_v60, %v1170_v32 }
 0x149   : > { %1686 = vst.msk [vmem:[%s2465_s28 + $0xe4] sm:$0xf] %vm1628_vm4, %v1975_v34  ;;  %v1272_v48 = vmul.f32 0.2, %v1208_v36  ;;  %v1338_v50 = vmax.f32 %v1210_v28, %v1274_v39  ;;  %v1304_v6 = vmul.f32 0.2, %v1240_v40 }
 0x14a   : > { %v1275_v29 = vmul.f32 0.2, %v1211_v41  ;;  %v1307_v51 = vmul.f32 0.2, %v1243_v42  ;;  %v1370_v52 = vmax.f32 %v1242_v35, %v1306_v45  ;;  %v1273_v56 = vmul.f32 0.2, %v1209_v62 }
 0x14b   : > { %v1336_v53 = vmax.f32 %v1208_v36, %v1272_v48  ;;  %v1305_v30 = vmul.f32 0.2, %v1241_v46  ;;  %v1948_v37 = vpack.c.bf16 %v1338_v50, %v1338_v50  ;;  %v1368_v38 = vmax.f32 %v1240_v40, %v1304_v6 }
 0x14c   : > { %v1339_v43 = vmax.f32 %v1211_v41, %v1275_v29  ;;  %v1371_v58 = vmax.f32 %v1243_v42, %v1307_v51  ;;  %v1980_v59 = vpack.c.bf16 %v1370_v52, %v1370_v52  ;;  %v1337_v44 = vmax.f32 %v1209_v62, %v1273_v56 }
 0x14d   : > { %v1946_v60 = vpack.c.bf16 %v1336_v53, %v1336_v53  ;;  %v1369_v57 = vmax.f32 %v1241_v46, %v1305_v30  ;;  %1659 = vst.msk [vmem:[%s2465_s28 + $0x78] sm:$0xf] %vm1628_vm4, %v1948_v37  ;;  %v1978_v1 = vpack.c.bf16 %v1368_v38, %v1368_v38 }
 0x14e   : > { %v1949_v5 = vpack.c.bf16 %v1339_v43, %v1339_v43  ;;  %v1981_v8 = vpack.c.bf16 %v1371_v58, %v1371_v58  ;;  %1691 = vst.msk [vmem:[%s2465_s28 + $0xf8] sm:$0xf] %vm1628_vm4, %v1980_v59  ;;  %v1947_v63 = vpack.c.bf16 %v1337_v44, %v1337_v44 }
 0x14f   : > { %1657 = vst.msk [vmem:[%s2465_s28 + $0x70] sm:$0xf] %vm1628_vm4, %v1946_v60  ;;  %v1979_v0 = vpack.c.bf16 %v1369_v57, %v1369_v57  ;;  %1689 = vst.msk [vmem:[%s2465_s28 + $0xf0] sm:$0xf] %vm1628_vm4, %v1978_v1 }
 0x150   : > { %1660 = vst.msk [vmem:[%s2465_s28 + $0x7c] sm:$0xf] %vm1628_vm4, %v1949_v5  ;;  %1692 = vst.msk [vmem:[%s2465_s28 + $0xfc] sm:$0xf] %vm1628_vm4, %v1981_v8 }
 0x151   : > { %1658 = vst.msk [vmem:[%s2465_s28 + $0x74] sm:$0xf] %vm1628_vm4, %v1947_v63  ;;  %1690 = vst.msk [vmem:[%s2465_s28 + $0xf4] sm:$0xf] %vm1628_vm4, %v1979_v0 }
 0x152 PF: > { %s13_s14 = sadd.s32 1, %s2165_s14   ;;  %s2811_s12 = smov %s2161_s13 }
 0x153   : > { %p10_p5 = scmp.ge.s32.totalorder %s13_s14, 6   ;;  %s2812_s13 = smov %s2814_s15 }
 0x155   :  { %12 = sbr.rel (!%p10_p5) target bundleno = 2 (0x2), region = 73 }

// kernel: multi_image_field_mlp_forward.20
= control target key start
LH: loop header
LB: loop body
LE: loop exit
PB: predicated region body
PF: predicated region fallthrough
CT: control target
= control target key end

     0   :  { %v204_v0 = vmov 0.0   ;;  %vm205_vm0 = vmmov 0   ;;  %vm43_vm1 = vcmask 130048   ;;  %vm116_vm2 = vcmask 261120   ;;  %s263_s1 = inlined_call_operand.vmem [shape: bf16[16,32], index: 1, kind: input, shape index: {}]   ;;  %s264_s0 = inlined_call_operand.vmem [shape: bf16[16,16], index: 0, kind: input, shape index: {}]   ;;  %s265_s3 = inlined_call_operand.vmem [shape: bf16[32,32], index: 3, kind: input, shape index: {}]   ;;  %s266_s2 = inlined_call_operand.vmem [shape: f32[1,32], index: 2, kind: input, shape index: {}]   ;;  %s267_s4 = inlined_call_operand.vmem [shape: f32[1,32], index: 4, kind: input, shape index: {}]   ;;  %s268_s5 = inlined_call_operand.vmem [shape: f32[16,32], index: 5, kind: output, shape index: {}]  }
   0x1   :  { %184 = vmatprep.subr.bf16.mxu0 %v204_v0  ;;  %v200_v1 = vld [vmem:[%s263_s1] sm:$0xff]   ;;  %186 = vmatprep.mubr.msk.bf16.mxu0 %vm205_vm0, %v204_v0  ;;  %v203_v4 = vld [vmem:[%s265_s3 + $0x8] sm:$0xff]  }
   0x2   :  { %v201_v2 = vld [vmem:[%s264_s0] sm:$0xff]   ;;  %190 = vmatprep.subr.bf16.mxu1 %v204_v0  ;;  %194 = vmatprep.mubr.msk.bf16.mxu1 %vm205_vm0, %v204_v0 }
   0x3   :  { %185 = vmatpush3.bf16.msra.mxu0 %v200_v1  ;;  %v202_v3 = vld [vmem:[%s265_s3] sm:$0xff]  }
   0x4   :  { %191 = vmatpush3.bf16.msra.mxu1 %v202_v3  ;;  %v171_v5 = vld [vmem:[%s266_s2] ss:$0 sm:$0xff] }
   0x5   :  { %192 = vmatprep.subr.bf16.mxu1 %v204_v0  ;;  %v175_v17 = vld [vmem:[%s267_s4] ss:$0 sm:$0xff] }
   0x6   :  { %187 = vmatmul.mubr.msk.bf16.vlgmr.msra.gmra.mrb[0].mxu0 %vm43_vm1, %v201_v2 }
   0x8   :  { %193 = vmatpush3.bf16.msra.mxu1 %v203_v4 }
  0xd9   :  { %v81_v6 = vpop.f32.mrb[0].mxu0 }
  0xda   :  { %v82_v7 = vadd.f32 %v171_v5, %v81_v6  ;;  %v188_v8 = vpop.f32.mrb[1].mxu0 }
  0xdb   :  { %v84_v9 = vpop.f32.mrb[2].mxu0 }
  0xdc   :  { %v88_v10 = vmul.f32 0.2, %v82_v7  ;;  %v85_v11 = vadd.f32 %v171_v5, %v84_v9  ;;  %v189_v12 = vpop.f32.mrb[3].mxu0 }
  0xde   :  { %v89_v13 = vmul.f32 0.2, %v85_v11  ;;  %v90_v14 = vmax.f32 %v82_v7, %v88_v10 }
  0xe0   :  { %v91_v15 = vmax.f32 %v85_v11, %v89_v13 }
  0xe2   :  { %v92_v16 = vpack.c.bf16 %v91_v15, %v90_v14 }
  0xe4   :  { %195 = vmatmul.mubr.msk.bf16.vlgmr.msra.gmra.mrb[0].mxu1 %vm116_vm2, %v92_v16 }
 0x1b7   :  { %v154_v18 = vpop.f32.mrb[0].mxu1 }
 0x1b8   :  { %v155_v19 = vadd.f32 %v175_v17, %v154_v18  ;;  %v196_v20 = vpop.f32.mrb[1].mxu1 }
 0x1b9   :  { %v157_v21 = vpop.f32.mrb[2].mxu1 }
 0x1ba   :  { %v161_v22 = vmul.f32 0.2, %v155_v19  ;;  %v158_v23 = vadd.f32 %v175_v17, %v157_v21  ;;  %v197_v24 = vpop.f32.mrb[3].mxu1 }
 0x1bc   :  { %v163_v25 = vmax.f32 %v155_v19, %v161_v22  ;;  %v162_v26 = vmul.f32 0.2, %v158_v23 }
 0x1be   :  { %165 = vst.msk [vmem:[%s268_s5] sm:$0xff] %vm116_vm2, %v163_v25  ;;  %v164_v27 = vmax.f32 %v158_v23, %v162_v26 }
 0x1c0   :  { %166 = vst.msk [vmem:[%s268_s5 + $0x8] sm:$0xff] %vm116_vm2, %v164_v27 }

// kernel: multi_image_field_mlp_forward.39
= control target key start
LH: loop header
LB: loop body
LE: loop exit
PB: predicated region body
PF: predicated region fallthrough
CT: control target
= control target key end

     0   :  { %v507_v0 = vmov 0.0   ;;  %vm508_vm0 = vmmov 0   ;;  %vm199_vm1 = vcmask 523264   ;;  %vm272_vm2 = vcmask 261120   ;;  %s654_s1 = inlined_call_operand.vmem [shape: bf16[128,64], index: 1, kind: input, shape index: {}]   ;;  %s655_s3 = inlined_call_operand.vmem [shape: bf16[64,32], index: 3, kind: input, shape index: {}]   ;;  %s656_s0 = inlined_call_operand.vmem [shape: bf16[16,128], index: 0, kind: input, shape index: {}]   ;;  %s657_s2 = inlined_call_operand.vmem [shape: f32[1,64], index: 2, kind: input, shape index: {}]   ;;  %s658_s5 = inlined_call_operand.vmem [shape: bf16[32,32], index: 5, kind: input, shape index: {}]   ;;  %s659_s4 = inlined_call_operand.vmem [shape: f32[1,32], index: 4, kind: input, shape index: {}]   ;;  %s660_s7 = inlined_call_operand.vmem [shape: bf16[32,1], index: 7, kind: input, shape index: {}]   ;;  %s661_s8 = inlined_call_operand.<no memory space> [shape: f32[1,1], index: 8, kind: input, shape index: {}]   ;;  %s662_s6 = inlined_call_operand.vmem [shape: f32[1,32], index: 6, kind: input, shape index: {}]   ;;  %s663_s9 = inlined_call_operand.vmem [shape: f32[16,1], index: 9, kind: output, shape index: {}]  }
   0x1   :  { %440 = vmatprep.subr.bf16.mxu0 %v507_v0  ;;  %v490_v1 = vld [vmem:[%s654_s1] sm:$0xff]   ;;  %456 = vmatprep.mubr.msk.bf16.mxu0 %vm508_vm0, %v507_v0  ;;  %v491_v2 = vld [vmem:[%s654_s1 + $0x8] sm:$0xff]   ;;  %v492_v3 = vld [vmem:[%s654_s1 + $0x10] sm:$0xff]   ;;  %v14_v42 = vstv %s661_s8  ;;  %vm389_vm3 = vcmask 7168  }
   0x2   :  { %460 = vmatprep.subr.bf16.mxu1 %v507_v0  ;;  %468 = vmatprep.mubr.msk.bf16.mxu1 %vm508_vm0, %v507_v0  ;;  %v499_v4 = vld [vmem:[%s655_s3] sm:$0xff]   ;;  %v493_v5 = vld [vmem:[%s654_s1 + $0x18] sm:$0xff]   ;;  %v495_v7 = vld [vmem:[%s654_s1 + $0x28] sm:$0xff]   ;;  %15 = vst [vmem:[#allocation2] sm:$0x1] %v14_v42 }
   0x3   :  { %441 = vmatpush3.bf16.msra.mxu0 %v490_v1  ;;  %461 = vmatpush3.bf16.msra.mxu1 %v499_v4  ;;  %v494_v6 = vld [vmem:[%s654_s1 + $0x20] sm:$0xff]   ;;  %v496_v8 = vld [vmem:[%s654_s1 + $0x30] sm:$0xff]   ;;  %v497_v9 = vld [vmem:[%s654_s1 + $0x38] sm:$0xff]  }
   0x4   :  { %442 = vmatprep.subr.bf16.mxu0 %v507_v0  ;;  %462 = vmatprep.subr.bf16.mxu1 %v507_v0  ;;  %v498_v10 = vld [vmem:[%s656_s0] sm:$0xff]   ;;  %v500_v11 = vld [vmem:[%s655_s3 + $0x8] sm:$0xff]   ;;  %v501_v12 = vld [vmem:[%s655_s3 + $0x10] sm:$0xff]  }
   0x5   :  { %v502_v13 = vld [vmem:[%s655_s3 + $0x18] sm:$0xff]   ;;  %v396_v14 = vld [vmem:[%s657_s2] ss:$0 sm:$0xff]  ;;  %v504_v27 = vld [vmem:[%s658_s5 + $0x8] sm:$0xff]  }
   0x6   :  { %v503_v26 = vld [vmem:[%s658_s5] sm:$0xff]   ;;  %v506_v41 = vld [vmem:[%s660_s7 + $0x8] sm:$0xff]  }
   0x7   :  { %443 = vmatpush3.bf16.msra.mxu0 %v491_v2  ;;  %463 = vmatpush3.bf16.msra.mxu1 %v500_v11  ;;  %v406_v28 = vld [vmem:[%s659_s4] ss:$0 sm:$0xff] }
   0x8   :  { %444 = vmatprep.subr.bf16.mxu0 %v507_v0  ;;  %464 = vmatprep.subr.bf16.mxu1 %v507_v0  ;;  %v505_v40 = vld [vmem:[%s660_s7] sm:$0xff]  }
   0x9   :  { %v412_v43 = vld [vmem:[%s662_s6] ss:$0 sm:$0xff] }
   0xa   :  { %v416_v55 = vld [vmem:[#allocation2] ss:$0 sm:$0xff] }
   0xb   :  { %445 = vmatpush3.bf16.msra.mxu0 %v492_v3  ;;  %465 = vmatpush3.bf16.msra.mxu1 %v501_v12 }
   0xc   :  { %446 = vmatprep.subr.bf16.mxu0 %v507_v0  ;;  %466 = vmatprep.subr.bf16.mxu1 %v507_v0 }
   0xf   :  { %447 = vmatpush3.bf16.msra.mxu0 %v493_v5  ;;  %467 = vmatpush3.bf16.msra.mxu1 %v502_v13 }
  0x10   :  { %448 = vmatprep.subr.bf16.mxu0 %v507_v0  ;;  %472 = vmatprep.subr.bf16.mxu1 %v507_v0 }
  0x13   :  { %449 = vmatpush3.bf16.msra.mxu0 %v494_v6 }
  0x14   :  { %450 = vmatprep.subr.bf16.mxu0 %v507_v0 }
  0x17   :  { %451 = vmatpush3.bf16.msra.mxu0 %v495_v7 }
  0x18   :  { %452 = vmatprep.subr.bf16.mxu0 %v507_v0 }
  0x1b   :  { %453 = vmatpush3.bf16.msra.mxu0 %v496_v8 }
  0x1c   :  { %454 = vmatprep.subr.bf16.mxu0 %v507_v0 }
  0x1f   :  { %455 = vmatpush3.bf16.msra.mxu0 %v497_v9 }
  0x22   :  { %457 = vmatmul.mubr.bf16.vlgmr.msra.gmra.mrb[0].mxu0 %v498_v10 }
  0xf5   :  { %v148_v15 = vpop.f32.mrb[0].mxu0 }
  0xf6   :  { %v149_v16 = vadd.f32 %v396_v14, %v148_v15  ;;  %v458_v17 = vpop.f32.mrb[1].mxu0 }
  0xf7   :  { %v151_v18 = vpop.f32.mrb[2].mxu0 }
  0xf8   :  { %v155_v19 = vmul.f32 0.2, %v149_v16  ;;  %v152_v20 = vadd.f32 %v396_v14, %v151_v18  ;;  %v459_v21 = vpop.f32.mrb[3].mxu0 }
  0xfa   :  { %v156_v22 = vmul.f32 0.2, %v152_v20  ;;  %v157_v23 = vmax.f32 %v149_v16, %v155_v19 }
  0xfc   :  { %v158_v24 = vmax.f32 %v152_v20, %v156_v22 }
  0xfe   :  { %v159_v25 = vpack.c.bf16 %v158_v24, %v157_v23 }
 0x100   :  { %469 = vmatmul.mubr.msk.bf16.vlgmr.msra.gmra.mrb[0].mxu1 %vm199_vm1, %v159_v25 }
 0x101   :  { %476 = vmatprep.mubr.msk.bf16.mxu1 %vm508_vm0, %v507_v0  ;;  %473 = vmatpush3.bf16.msra.mxu1 %v503_v26 }
 0x102   :  { %474 = vmatprep.subr.bf16.mxu1 %v507_v0 }
 0x105   :  { %475 = vmatpush3.bf16.msra.mxu1 %v504_v27 }
 0x106   :  { %480 = vmatprep.subr.bf16.mxu1 %v507_v0 }
 0x1d3   :  { %v237_v29 = vpop.f32.mrb[0].mxu1 }
 0x1d4   :  { %v238_v30 = vadd.f32 %v406_v28, %v237_v29  ;;  %v470_v31 = vpop.f32.mrb[1].mxu1 }
 0x1d5   :  { %v240_v32 = vpop.f32.mrb[2].mxu1 }
 0x1d6   :  { %v244_v33 = vmul.f32 0.2, %v238_v30  ;;  %v241_v34 = vadd.f32 %v406_v28, %v240_v32  ;;  %v471_v35 = vpop.f32.mrb[3].mxu1 }
 0x1d8   :  { %v245_v36 = vmul.f32 0.2, %v241_v34  ;;  %v246_v37 = vmax.f32 %v238_v30, %v244_v33 }
 0x1da   :  { %v247_v38 = vmax.f32 %v241_v34, %v245_v36 }
 0x1dc   :  { %v248_v39 = vpack.c.bf16 %v247_v38, %v246_v37 }
 0x1de   :  { %477 = vmatmul.mubr.msk.bf16.vlgmr.msra.gmra.mrb[4].mxu1 %vm272_vm2, %v248_v39 }
 0x1df   :  { %484 = vmatprep.mubr.msk.bf16.mxu1 %vm508_vm0, %v507_v0  ;;  %481 = vmatpush3.bf16.msra.mxu1 %v505_v40 }
 0x1e0   :  { %482 = vmatprep.subr.bf16.mxu1 %v507_v0 }
 0x1e3   :  { %483 = vmatpush3.bf16.msra.mxu1 %v506_v41 }
 0x2b1   :  { %v310_v44 = vpop.f32.mrb[4].mxu1 }
 0x2b2   :  { %v311_v45 = vadd.f32 %v412_v43, %v310_v44  ;;  %v478_v46 = vpop.f32.mrb[5].mxu1 }
 0x2b3   :  { %v313_v47 = vpop.f32.mrb[6].mxu1 }
 0x2b4   :  { %v317_v48 = vmul.f32 0.2, %v311_v45  ;;  %v314_v49 = vadd.f32 %v412_v43, %v313_v47  ;;  %v479_v50 = vpop.f32.mrb[7].mxu1 }
 0x2b6   :  { %v318_v51 = vmul.f32 0.2, %v314_v49  ;;  %v319_v52 = vmax.f32 %v311_v45, %v317_v48 }
 0x2b8   :  { %v320_v53 = vmax.f32 %v314_v49, %v318_v51 }
 0x2ba   :  { %v321_v54 = vpack.c.bf16 %v320_v53, %v319_v52 }
 0x2bc   :  { %485 = vmatmul.mubr.msk.bf16.vlgmr.msra.gmra.mrb[8].mxu1 %vm272_vm2, %v321_v54 }
 0x38f   :  { %v382_v56 = vpop.f32.mrb[8].mxu1 }
 0x390   :  { %v383_v57 = vadd.f32 %v416_v55, %v382_v56  ;;  %v486_v58 = vpop.f32.mrb[9].mxu1 }
 0x391   :  { %v385_v59 = vpop.f32.mrb[10].mxu1 }
 0x392   :  { %390 = vst.msk [vmem:[%s663_s9] sm:$0xff] %vm389_vm3, %v383_v57  ;;  %v386_v60 = vadd.f32 %v416_v55, %v385_v59  ;;  %v487_v61 = vpop.f32.mrb[11].mxu1 }
 0x394   :  { %391 = vst.msk [vmem:[%s663_s9 + $0x8] sm:$0xff] %vm389_vm3, %v386_v60 }

</bundles_post_ra>
